<compile_context>
chip_gen: v6e
topology: v6e:2x2x1
jax: 0.10.0
libtpu: 0.0.40
codegen_flags: <defaults>
</compile_context>

<pallas_src>
import functools

import jax
import jax.numpy as jnp
import numpy as np
from jax import lax
from jax.experimental import pallas as pl
from jax.experimental.pallas import tpu as pltpu

LEAKY_SLOPE = 0.01             # nn.LeakyReLU() default
IN_EPS = 1e-5                  # nn.InstanceNorm2d default
MXU_DTYPE = jnp.bfloat16       # matmul operand dtype (accumulation is f32)
SCRATCH_DTYPE = jnp.bfloat16   # padded-concat / mid-activation scratch dtype
PER_TAP_MIN_C = 128            # conv in-channels >= this -> per-tap matmuls
UP_MAX_M = 2048                # max rows per ConvTranspose matmul band


@functools.lru_cache(maxsize=None)
def _vmem_limit_bytes() -> int:
    """Generation-aware VMEM budget: ~3/4 of per-core physical VMEM
    (~96 MiB on v5e/v6e's 128 MiB, ~48 MiB on v7x's 64 MiB)."""
    cap = 64 * 1024 * 1024                        # conservative fallback (v7x)
    try:
        cap = int(getattr(pltpu.get_tpu_info(), "vmem_capacity_bytes", cap))
    except Exception:
        pass
    return (cap // 4) * 3


def _largest_divisor(n: int, cap: int) -> int:
    cap = max(1, min(n, cap))
    for d in range(cap, 0, -1):
        if n % d == 0:
            return d
    return 1


# ---------------------------------------------------------------------------
# Kernel 1: ConvTranspose2d(kernel=2, stride=2) as a banded matmul over the
# fused (N*H1) row axis.  Output is packed as (row, di, col, (dj, co)) so the
# wrapper reshape to NHWC is a free bitcast reshape.
# ---------------------------------------------------------------------------
def _up_kernel(x_ref, w_ref, b_ref, o_ref, *, mb, W1, Cup):
    # x_ref: (mb, W1, Cin) bf16 band of the fused (N*H1) row axis.
    # w_ref: (Cin, 4*Cup) bf16, columns ordered (di, dj, co).
    # o_ref: (mb, 2, W1, 2*Cup) bf16 packed output.
    Cin = x_ref.shape[-1]
    x = x_ref[...].reshape(mb * W1, Cin).astype(MXU_DTYPE)
    y = jnp.dot(x, w_ref[...], preferred_element_type=jnp.float32) + b_ref[...]
    y = y.astype(o_ref.dtype)                              # (mb*W1, 4*Cup)
    # Two full-band stores (one per output-row parity di) -- no per-row
    # unrolled store loop.
    o_ref[:, 0, :, :] = y[:, :2 * Cup].reshape(mb, W1, 2 * Cup)
    o_ref[:, 1, :, :] = y[:, 2 * Cup:].reshape(mb, W1, 2 * Cup)


def conv_transpose_2x2_s2(x1_nhwc, w, b):
    """ConvTranspose2d(Cin, Cup, 2, 2).  x1_nhwc: (N,H1,W1,Cin) bf16.
    w: (Cin, Cup, 2, 2) PyTorch layout, b: (Cup,).  Returns (N,2H1,2W1,Cup) bf16."""
    N, H1, W1, Cin = x1_nhwc.shape
    Cup = w.shape[1]
    # Columns ordered (di, dj, co): per-parity output rows are contiguous lane
    # ranges and the final reshape to NHWC is free.
    w_mat = jnp.transpose(w, (0, 2, 3, 1)).reshape(Cin, 4 * Cup).astype(MXU_DTYPE)
    b_mat = jnp.tile(b, 4).reshape(1, 4 * Cup).astype(jnp.float32)

    # Band of the fused (N*H1) axis: folds small batches / rows together so the
    # matmul M dimension fills the MXU and the per-grid-step overhead amortizes.
    x_rows = x1_nhwc.reshape(N * H1, W1, Cin)              # free reshape
    mb = _largest_divisor(N * H1, max(1, UP_MAX_M // W1))

    kernel = functools.partial(_up_kernel, mb=mb, W1=W1, Cup=Cup)
    packed = pl.pallas_call(
        kernel,
        out_shape=jax.ShapeDtypeStruct((N * H1, 2, W1, 2 * Cup), MXU_DTYPE),
        grid=((N * H1) // mb,),
        in_specs=[
            pl.BlockSpec((mb, W1, Cin), lambda i: (i, 0, 0)),
            pl.BlockSpec((Cin, 4 * Cup), lambda i: (0, 0)),
            pl.BlockSpec((1, 4 * Cup), lambda i: (0, 0)),
        ],
        out_specs=pl.BlockSpec((mb, 2, W1, 2 * Cup), lambda i: (i, 0, 0, 0)),
        compiler_params=pltpu.CompilerParams(
            dimension_semantics=("parallel",),
            vmem_limit_bytes=_vmem_limit_bytes()),
    )(x_rows, w_mat, b_mat)
    # free bitcast reshape: (N*H1, 2, W1, 2*Cup) -> (N, 2*H1, 2*W1, Cup)
    return packed.reshape(N, 2 * H1, 2 * W1, Cup)


# ---------------------------------------------------------------------------
# Kernel 2: fused  F.pad + torch.cat + Dropout2d(eval) + UNetDoubleConv
#   (conv3x3 -> InstanceNorm2d -> LeakyReLU) x 2, one batch sample per step.
# The padded / concatenated conv input lives only in a bf16 VMEM scratch.
# ---------------------------------------------------------------------------
def _double_conv_kernel(x2_ref, up_ref, w1_ref, w2_ref, o_ref, xpad, mpad, *,
                        H, W, Hu, Wu, Cskip, Cup, Cmid, Cout, pt, pb, pL, pr):
    f32 = jnp.float32
    cdt = xpad.dtype
    Ccat = Cskip + Cup

    # Zero only the thin 1-px halo every step (interior is fully overwritten).
    # Not gated on program_id: a "parallel" grid may start each core anywhere.
    for ref_, c in ((xpad, Ccat), (mpad, Cmid)):
        ref_[0:1, :, :] = jnp.zeros((1, W + 2, c), cdt)
        ref_[H + 1:H + 2, :, :] = jnp.zeros((1, W + 2, c), cdt)
        ref_[:, 0:1, :] = jnp.zeros((H + 2, 1, c), cdt)
        ref_[:, W + 1:W + 2, :] = jnp.zeros((H + 2, 1, c), cdt)

    # --- F.pad + torch.cat fused: two channel-range stores (no concat temp) ---
    xpad[1:H + 1, 1:W + 1, 0:Cskip] = x2_ref[0].astype(cdt)
    xpad[1 + pt:1 + pt + Hu, 1 + pL:1 + pL + Wu, Cskip:Ccat] = up_ref[0].astype(cdt)
    if pt:
        xpad[1:1 + pt, 1:W + 1, Cskip:Ccat] = jnp.zeros((pt, W, Cup), cdt)
    if pb:
        xpad[1 + H - pb:1 + H, 1:W + 1, Cskip:Ccat] = jnp.zeros((pb, W, Cup), cdt)
    if pL:
        xpad[1 + pt:1 + pt + Hu, 1:1 + pL, Cskip:Ccat] = jnp.zeros((Hu, pL, Cup), cdt)
    if pr:
        xpad[1 + pt:1 + pt + Hu, 1 + W - pr:1 + W, Cskip:Ccat] = jnp.zeros((Hu, pr, Cup), cdt)

    # TODO(synk): nn.Dropout2d() training-mode channel dropout not implemented
    # (eval-mode identity).

    def conv3x3_in_lrelu(src, c_in, c_out, w_ref):
        # Conv bias intentionally omitted: a per-channel constant shift is
        # exactly cancelled by the following InstanceNorm mean subtraction.
        if c_in >= PER_TAP_MIN_C:
            # Per-tap accumulation: 9 matmuls with K = c_in (MXU-filling at
            # production channel counts); avoids the (H*W, 9*c_in) im2col
            # temporary that exceeds VMEM at production H, W (esp. v7x 64 MiB).
            z = jnp.zeros((H * W, c_out), f32)
            for ky in range(3):
                for kx in range(3):
                    t = (ky * 3 + kx) * c_in
                    tap = src[ky:ky + H, kx:kx + W, :].reshape(H * W, c_in)
                    z = z + jnp.dot(tap, w_ref[t:t + c_in, :],
                                    preferred_element_type=f32)
        else:
            # Small-C path: bf16 im2col (src is already bf16, so the patches
            # temporary is built directly in bf16 -- no f32 staging copy).
            cols = [src[ky:ky + H, kx:kx + W, :].reshape(H * W, c_in)
                    for ky in range(3) for kx in range(3)]
            z = jnp.dot(jnp.concatenate(cols, axis=-1), w_ref[...],
                        preferred_element_type=f32)
        # Single-pass InstanceNorm statistics (sum & sum-of-squares) +
        # LeakyReLU, in f32.
        inv_n = 1.0 / (H * W)
        mean = jnp.sum(z, axis=0, keepdims=True) * inv_n
        var = jnp.maximum(
            jnp.sum(z * z, axis=0, keepdims=True) * inv_n - mean * mean, 0.0)
        zn = (z - mean) * lax.rsqrt(var + IN_EPS)
        return jnp.where(zn > 0, zn, LEAKY_SLOPE * zn)      # (H*W, c_out) f32

    h1 = conv3x3_in_lrelu(xpad, Ccat, Cmid, w1_ref)
    mpad[1:H + 1, 1:W + 1, :] = h1.reshape(H, W, Cmid).astype(cdt)
    h2 = conv3x3_in_lrelu(mpad, Cmid, Cout, w2_ref)
    o_ref[0] = h2.reshape(H, W, Cout).astype(o_ref.dtype)


def fused_pad_concat_double_conv(x2_nhwc, up_nhwc, w1, w2):
    N, H, W, Cskip = x2_nhwc.shape
    _, Hu, Wu, Cup = up_nhwc.shape
    Ccat = Cskip + Cup
    Cmid, Cout = w1.shape[-1], w2.shape[-1]
    assert w1.shape[:3] == (3, 3, Ccat) and w2.shape[:3] == (3, 3, Cmid)
    assert H >= Hu and W >= Wu
    pt = (H - Hu) // 2
    pb = (H - Hu) - pt
    pL = (W - Wu) // 2
    pr = (W - Wu) - pL

    w1_mat = w1.reshape(9 * Ccat, Cmid).astype(MXU_DTYPE)    # row = (ky, kx, ci)
    w2_mat = w2.reshape(9 * Cmid, Cout).astype(MXU_DTYPE)
    # conv biases are not passed in: they cancel under InstanceNorm.

    kernel = functools.partial(
        _double_conv_kernel, H=H, W=W, Hu=Hu, Wu=Wu, Cskip=Cskip, Cup=Cup,
        Cmid=Cmid, Cout=Cout, pt=pt, pb=pb, pL=pL, pr=pr)

    # TODO(synk): for production-size feature maps on v7x (64 MiB/core VMEM),
    # add a row-band grid axis with a 1-row halo and multi-pass InstanceNorm
    # statistics (or split into two pallas_calls with a bf16 HBM intermediate);
    # that also gives enough parallel grid steps to use both v7x cores at N=1.
    # TODO(synk): fusing the 2x2 ConvTranspose in here would also remove the
    # HBM round trip of `up`, at the cost of an in-kernel pixel-shuffle relayout.
    return pl.pallas_call(
        kernel,
        out_shape=jax.ShapeDtypeStruct((N, H, W, Cout), jnp.float32),
        grid=(N,),
        in_specs=[
            pl.BlockSpec((1, H, W, Cskip), lambda n: (n, 0, 0, 0)),
            pl.BlockSpec((1, Hu, Wu, Cup), lambda n: (n, 0, 0, 0)),
            pl.BlockSpec((9 * Ccat, Cmid), lambda n: (0, 0)),
            pl.BlockSpec((9 * Cmid, Cout), lambda n: (0, 0)),
        ],
        out_specs=pl.BlockSpec((1, H, W, Cout), lambda n: (n, 0, 0, 0)),
        scratch_shapes=[
            pltpu.VMEM((H + 2, W + 2, Ccat), SCRATCH_DTYPE),  # padded concat in
            pltpu.VMEM((H + 2, W + 2, Cmid), SCRATCH_DTYPE),  # padded mid act
        ],
        compiler_params=pltpu.CompilerParams(
            dimension_semantics=("parallel",),
            vmem_limit_bytes=_vmem_limit_bytes()),
    )(x2_nhwc, up_nhwc, w1_mat, w2_mat)


# ---------------------------------------------------------------------------
# UNetUp forward (wrapper)
# ---------------------------------------------------------------------------
def unet_up_forward(params, x1_nchw, x2_nchw):
    # NCHW -> NHWC, cast to bf16 at the boundary (matmul operands are bf16
    # anyway) so the HBM reads inside the kernels are half-width.
    x1 = jnp.transpose(x1_nchw, (0, 2, 3, 1)).astype(MXU_DTYPE)
    x2 = jnp.transpose(x2_nchw, (0, 2, 3, 1)).astype(MXU_DTYPE)

    # 1) ConvTranspose2d(in_ch, in_ch//2, 2, 2)
    up = conv_transpose_2x2_s2(x1, params["up_w"], params["up_b"])

    # 2-5) F.pad + torch.cat + Dropout2d(eval) + UNetDoubleConv, fused
    out = fused_pad_concat_double_conv(x2, up, params["w1"], params["w2"])
    return jnp.transpose(out, (0, 3, 1, 2))                  # NCHW


# ---------------------------------------------------------------------------
# Pure-JAX reference (same bf16-operand / f32-accumulate casting points)
# ---------------------------------------------------------------------------
def _ref_forward(params, x1_nchw, x2_nchw):
    f32, bf16 = jnp.float32, jnp.bfloat16
    x1 = jnp.transpose(x1_nchw, (0, 2, 3, 1)).astype(f32)
    x2 = jnp.transpose(x2_nchw, (0, 2, 3, 1)).astype(f32)

    w, b = params["up_w"], params["up_b"]             # (Cin, Cup, 2, 2)
    y = jnp.einsum("nijc,cokl->nijokl", x1.astype(bf16), w.astype(bf16),
                   preferred_element_type=f32)
    y = y + b[None, None, None, :, None, None]
    N, H1, W1, Co = y.shape[:4]
    y = y.transpose(0, 1, 4, 2, 5, 3).reshape(N, 2 * H1, 2 * W1, Co)
    y = y.astype(bf16).astype(f32)                    # kernel stores up in bf16

    dy = x2.shape[1] - y.shape[1]
    dx = x2.shape[2] - y.shape[2]
    y = jnp.pad(y, ((0, 0), (dy // 2, dy - dy // 2),
                    (dx // 2, dx - dx // 2), (0, 0)))
    x = jnp.concatenate([x2, y], axis=-1)

    def conv_in_lrelu(z, wk, bk):
        z = lax.conv_general_dilated(
            z.astype(bf16), wk.astype(bf16), window_strides=(1, 1),
            padding="SAME", dimension_numbers=("NHWC", "HWIO", "NHWC"),
            preferred_element_type=f32) + bk
        mean = jnp.mean(z, axis=(1, 2), keepdims=True)
        var = jnp.mean(jnp.square(z - mean), axis=(1, 2), keepdims=True)
        z = (z - mean) * lax.rsqrt(var + IN_EPS)
        return jnp.where(z > 0, z, LEAKY_SLOPE * z)

    x = conv_in_lrelu(x, params["w1"], params["b1"])
    x = conv_in_lrelu(x, params["w2"], params["b2"])
    return jnp.transpose(x, (0, 3, 1, 2))


# ---------------------------------------------------------------------------
def _make_params(key, in_channels, out_channels):
    k = jax.random.split(key, 6)
    return {
        # ConvTranspose2d(in_ch, in_ch//2, 2, 2): weight (Cin, Cout, 2, 2)
        "up_w": 0.1 * jax.random.normal(
            k[0], (in_channels, in_channels // 2, 2, 2), jnp.float32),
        "up_b": 0.1 * jax.random.normal(k[1], (in_channels // 2,), jnp.float32),
        # Conv2d(in_ch, out_ch, 3, pad=1): weight in HWIO layout
        "w1": 0.1 * jax.random.normal(k[2], (3, 3, in_channels, out_channels), jnp.float32),
        "b1": 0.1 * jax.random.normal(k[3], (out_channels,), jnp.float32),
        "w2": 0.1 * jax.random.normal(k[4], (3, 3, out_channels, out_channels), jnp.float32),
        "b2": 0.1 * jax.random.normal(k[5], (out_channels,), jnp.float32),
    }


def _run_case(key, in_channels, out_channels, N, H1, W1, H2, W2):
    kp, kx1, kx2 = jax.random.split(key, 3)
    params = _make_params(kp, in_channels, out_channels)
    x1 = jax.random.normal(kx1, (N, in_channels, H1, W1), jnp.float32)       # NCHW
    x2 = jax.random.normal(kx2, (N, in_channels // 2, H2, W2), jnp.float32)  # NCHW

    out = jax.block_until_ready(jax.jit(unet_up_forward)(params, x1, x2))
    ref = jax.block_until_ready(_ref_forward(params, x1, x2))

    assert out.shape == (N, out_channels, H2, W2), out.shape
    # tolerance accounts for the bf16-operand / f32-accumulate matmul path
    np.testing.assert_allclose(np.asarray(out), np.asarray(ref),
                               atol=5e-3, rtol=5e-3)


if __name__ == "__main__":
    key = jax.random.PRNGKey(0)
    k1, k2 = jax.random.split(key)
    # Small config: exercises the bf16 im2col path and the no-F.pad fast path.
    _run_case(k1, 8, 4, 2, 8, 8, 16, 16)
    # Production-style channels: exercises the per-tap matmul path (lane-
    # aligned 128/256 channels) and the F.pad branch (skip map larger than up).
    _run_case(k2, 256, 128, 1, 8, 8, 24, 24)
    print("KERNEL_OK")
</pallas_src>

<mosaic_0001>
module attributes {stable_mosaic.version = 11 : i64} {
  func.func @_up_kernel(%arg0: i32, %arg1: memref<16x8x8xbf16, #tpu.memory_space<vmem>>, %arg2: memref<8x16xbf16, #tpu.memory_space<vmem>>, %arg3: memref<1x16xf32, #tpu.memory_space<vmem>>, %arg4: memref<16x2x8x8xbf16, #tpu.memory_space<vmem>>) attributes {dimension_semantics = [#tpu.dimension_semantics<parallel>], iteration_bounds = array<i64: 1>, scalar_prefetch = 0 : i64, scratch_operands = 0 : i64, tpu.core_type = #tpu.core_type<tc>, window_params = [{transform_indices = @transform_0, window_bounds = array<i64: 16, 8, 8>}, {pipeline_mode = #tpu.pipeline_mode<synchronous>, transform_indices = @transform_1, window_bounds = array<i64: 8, 16>}, {pipeline_mode = #tpu.pipeline_mode<synchronous>, transform_indices = @transform_2, window_bounds = array<i64: 1, 16>}, {transform_indices = @transform_3, window_bounds = array<i64: 16, 2, 8, 8>}]} {
    %c0 = arith.constant 0 : index
    %c0_0 = arith.constant 0 : index
    %c0_1 = arith.constant 0 : index
    %0 = vector.load %arg1[%c0, %c0_0, %c0_1] : memref<16x8x8xbf16, #tpu.memory_space<vmem>>, vector<16x8x8xbf16>
    %1 = vector.shape_cast %0 : vector<16x8x8xbf16> to vector<128x8xbf16>
    %c0_2 = arith.constant 0 : index
    %c0_3 = arith.constant 0 : index
    %2 = vector.load %arg2[%c0_2, %c0_3] : memref<8x16xbf16, #tpu.memory_space<vmem>>, vector<8x16xbf16>
    %cst = arith.constant dense<0.000000e+00> : vector<128x16xf32>
    %3 = tpu.matmul %1, %2, %cst {dimension_numbers = #tpu.dot_dimension_numbers<[1], [0], [0], [1], [0, 0, 1, 1], [], []>} : vector<128x8xbf16>, vector<8x16xbf16>, vector<128x16xf32> -> vector<128x16xf32>
    %c0_4 = arith.constant 0 : index
    %c0_5 = arith.constant 0 : index
    %4 = vector.load %arg3[%c0_4, %c0_5] : memref<1x16xf32, #tpu.memory_space<vmem>>, vector<1x16xf32>
    %5 = vector.broadcast %4 : vector<1x16xf32> to vector<128x16xf32>
    %6 = arith.addf %3, %5 : vector<128x16xf32>
    %7 = arith.truncf %6 : vector<128x16xf32> to vector<128x16xbf16>
    %8 = vector.extract_strided_slice %7 {offsets = [0, 0], sizes = [128, 8], strides = [1, 1]} : vector<128x16xbf16> to vector<128x8xbf16>
    %9 = vector.shape_cast %8 : vector<128x8xbf16> to vector<16x8x8xbf16>
    %c0_6 = arith.constant 0 : index
    %c0_7 = arith.constant 0 : index
    %c0_8 = arith.constant 0 : index
    %c0_9 = arith.constant 0 : index
    %10 = vector.load %arg4[%c0_6, %c0_7, %c0_8, %c0_9] : memref<16x2x8x8xbf16, #tpu.memory_space<vmem>>, vector<16x1x8x8xbf16>
    %11 = vector.shape_cast %10 : vector<16x1x8x8xbf16> to vector<16x8x8xbf16>
    %12 = vector.shape_cast %9 : vector<16x8x8xbf16> to vector<16x1x8x8xbf16>
    tpu.vector_store %arg4[%c0_6, %c0_7, %c0_8, %c0_9], %12 {strides = array<i32>} : memref<16x2x8x8xbf16, #tpu.memory_space<vmem>>, vector<16x1x8x8xbf16>,
    %13 = vector.extract_strided_slice %7 {offsets = [0, 8], sizes = [128, 8], strides = [1, 1]} : vector<128x16xbf16> to vector<128x8xbf16>
    %14 = vector.shape_cast %13 : vector<128x8xbf16> to vector<16x8x8xbf16>
    %c0_10 = arith.constant 0 : index
    %c1 = arith.constant 1 : index
    %c0_11 = arith.constant 0 : index
    %c0_12 = arith.constant 0 : index
    %15 = vector.load %arg4[%c0_10, %c1, %c0_11, %c0_12] : memref<16x2x8x8xbf16, #tpu.memory_space<vmem>>, vector<16x1x8x8xbf16>
    %16 = vector.shape_cast %15 : vector<16x1x8x8xbf16> to vector<16x8x8xbf16>
    %17 = vector.shape_cast %14 : vector<16x8x8xbf16> to vector<16x1x8x8xbf16>
    tpu.vector_store %arg4[%c0_10, %c1, %c0_11, %c0_12], %17 {strides = array<i32>} : memref<16x2x8x8xbf16, #tpu.memory_space<vmem>>, vector<16x1x8x8xbf16>,
    return
  }
  func.func @transform_0(%arg0: i32) -> (i32, i32, i32) {
    %c0_i32 = arith.constant 0 : i32
    %c0_i32_0 = arith.constant 0 : i32
    %c0_i32_1 = arith.constant 0 : i32
    return %arg0, %c0_i32, %c0_i32_0 : i32, i32, i32
  }
  func.func @transform_1(%arg0: i32) -> (i32, i32) {
    %c0_i32 = arith.constant 0 : i32
    %c0_i32_0 = arith.constant 0 : i32
    %c0_i32_1 = arith.constant 0 : i32
    return %c0_i32, %c0_i32_0 : i32, i32
  }
  func.func @transform_2(%arg0: i32) -> (i32, i32) {
    %c0_i32 = arith.constant 0 : i32
    %c0_i32_0 = arith.constant 0 : i32
    %c0_i32_1 = arith.constant 0 : i32
    return %c0_i32, %c0_i32_0 : i32, i32
  }
  func.func @transform_3(%arg0: i32) -> (i32, i32, i32, i32) {
    %c0_i32 = arith.constant 0 : i32
    %c0_i32_0 = arith.constant 0 : i32
    %c0_i32_1 = arith.constant 0 : i32
    %c0_i32_2 = arith.constant 0 : i32
    return %arg0, %c0_i32, %c0_i32_0, %c0_i32_1 : i32, i32, i32, i32
  }
}

module attributes {stable_mosaic.version = 11 : i64} {
  func.func @_double_conv_kernel(%arg0: i32, %arg1: memref<1x16x16x4xbf16, #tpu.memory_space<vmem>>, %arg2: memref<1x16x16x4xbf16, #tpu.memory_space<vmem>>, %arg3: memref<72x4xbf16, #tpu.memory_space<vmem>>, %arg4: memref<36x4xbf16, #tpu.memory_space<vmem>>, %arg5: memref<1x16x16x4xf32, #tpu.memory_space<vmem>>, %arg6: memref<18x18x8xbf16, #tpu.memory_space<vmem>>, %arg7: memref<18x18x4xbf16, #tpu.memory_space<vmem>>) attributes {dimension_semantics = [#tpu.dimension_semantics<parallel>], iteration_bounds = array<i64: 2>, scalar_prefetch = 0 : i64, scratch_operands = 2 : i64, tpu.core_type = #tpu.core_type<tc>, window_params = [{transform_indices = @transform_0, window_bounds = array<i64: 1, 16, 16, 4>}, {transform_indices = @transform_1, window_bounds = array<i64: 1, 16, 16, 4>}, {pipeline_mode = #tpu.pipeline_mode<synchronous>, transform_indices = @transform_2, window_bounds = array<i64: 72, 4>}, {pipeline_mode = #tpu.pipeline_mode<synchronous>, transform_indices = @transform_3, window_bounds = array<i64: 36, 4>}, {transform_indices = @transform_4, window_bounds = array<i64: 1, 16, 16, 4>}]} {
    %cst = arith.constant 0.000000e+00 : bf16
    %0 = vector.broadcast %cst : bf16 to vector<1x18x8xbf16>
    %c0 = arith.constant 0 : index
    %c0_0 = arith.constant 0 : index
    %c0_1 = arith.constant 0 : index
    %1 = vector.load %arg6[%c0, %c0_0, %c0_1] : memref<18x18x8xbf16, #tpu.memory_space<vmem>>, vector<1x18x8xbf16>
    tpu.vector_store %arg6[%c0, %c0_0, %c0_1], %0 {strides = array<i32>} : memref<18x18x8xbf16, #tpu.memory_space<vmem>>, vector<1x18x8xbf16>,
    %cst_2 = arith.constant 0.000000e+00 : bf16
    %2 = vector.broadcast %cst_2 : bf16 to vector<1x18x8xbf16>
    %c17 = arith.constant 17 : index
    %c0_3 = arith.constant 0 : index
    %c0_4 = arith.constant 0 : index
    %3 = vector.load %arg6[%c17, %c0_3, %c0_4] : memref<18x18x8xbf16, #tpu.memory_space<vmem>>, vector<1x18x8xbf16>
    tpu.vector_store %arg6[%c17, %c0_3, %c0_4], %2 {strides = array<i32>} : memref<18x18x8xbf16, #tpu.memory_space<vmem>>, vector<1x18x8xbf16>,
    %cst_5 = arith.constant 0.000000e+00 : bf16
    %4 = vector.broadcast %cst_5 : bf16 to vector<18x1x8xbf16>
    %c0_6 = arith.constant 0 : index
    %c0_7 = arith.constant 0 : index
    %c0_8 = arith.constant 0 : index
    %5 = vector.load %arg6[%c0_6, %c0_7, %c0_8] : memref<18x18x8xbf16, #tpu.memory_space<vmem>>, vector<18x1x8xbf16>
    tpu.vector_store %arg6[%c0_6, %c0_7, %c0_8], %4 {strides = array<i32>} : memref<18x18x8xbf16, #tpu.memory_space<vmem>>, vector<18x1x8xbf16>,
    %cst_9 = arith.constant 0.000000e+00 : bf16
    %6 = vector.broadcast %cst_9 : bf16 to vector<18x1x8xbf16>
    %c0_10 = arith.constant 0 : index
    %c17_11 = arith.constant 17 : index
    %c0_12 = arith.constant 0 : index
    %7 = vector.load %arg6[%c0_10, %c17_11, %c0_12] : memref<18x18x8xbf16, #tpu.memory_space<vmem>>, vector<18x1x8xbf16>
    tpu.vector_store %arg6[%c0_10, %c17_11, %c0_12], %6 {strides = array<i32>} : memref<18x18x8xbf16, #tpu.memory_space<vmem>>, vector<18x1x8xbf16>,
    %cst_13 = arith.constant 0.000000e+00 : bf16
    %8 = vector.broadcast %cst_13 : bf16 to vector<1x18x4xbf16>
    %c0_14 = arith.constant 0 : index
    %c0_15 = arith.constant 0 : index
    %c0_16 = arith.constant 0 : index
    %9 = vector.load %arg7[%c0_14, %c0_15, %c0_16] : memref<18x18x4xbf16, #tpu.memory_space<vmem>>, vector<1x18x4xbf16>
    tpu.vector_store %arg7[%c0_14, %c0_15, %c0_16], %8 {strides = array<i32>} : memref<18x18x4xbf16, #tpu.memory_space<vmem>>, vector<1x18x4xbf16>,
    %cst_17 = arith.constant 0.000000e+00 : bf16
    %10 = vector.broadcast %cst_17 : bf16 to vector<1x18x4xbf16>
    %c17_18 = arith.constant 17 : index
    %c0_19 = arith.constant 0 : index
    %c0_20 = arith.constant 0 : index
    %11 = vector.load %arg7[%c17_18, %c0_19, %c0_20] : memref<18x18x4xbf16, #tpu.memory_space<vmem>>, vector<1x18x4xbf16>
    tpu.vector_store %arg7[%c17_18, %c0_19, %c0_20], %10 {strides = array<i32>} : memref<18x18x4xbf16, #tpu.memory_space<vmem>>, vector<1x18x4xbf16>,
    %cst_21 = arith.constant 0.000000e+00 : bf16
    %12 = vector.broadcast %cst_21 : bf16 to vector<18x1x4xbf16>
    %c0_22 = arith.constant 0 : index
    %c0_23 = arith.constant 0 : index
    %c0_24 = arith.constant 0 : index
    %13 = vector.load %arg7[%c0_22, %c0_23, %c0_24] : memref<18x18x4xbf16, #tpu.memory_space<vmem>>, vector<18x1x4xbf16>
    tpu.vector_store %arg7[%c0_22, %c0_23, %c0_24], %12 {strides = array<i32>} : memref<18x18x4xbf16, #tpu.memory_space<vmem>>, vector<18x1x4xbf16>,
    %cst_25 = arith.constant 0.000000e+00 : bf16
    %14 = vector.broadcast %cst_25 : bf16 to vector<18x1x4xbf16>
    %c0_26 = arith.constant 0 : index
    %c17_27 = arith.constant 17 : index
    %c0_28 = arith.constant 0 : index
    %15 = vector.load %arg7[%c0_26, %c17_27, %c0_28] : memref<18x18x4xbf16, #tpu.memory_space<vmem>>, vector<18x1x4xbf16>
    tpu.vector_store %arg7[%c0_26, %c17_27, %c0_28], %14 {strides = array<i32>} : memref<18x18x4xbf16, #tpu.memory_space<vmem>>, vector<18x1x4xbf16>,
    %c0_29 = arith.constant 0 : index
    %c0_30 = arith.constant 0 : index
    %c0_31 = arith.constant 0 : index
    %c0_32 = arith.constant 0 : index
    %16 = vector.load %arg1[%c0_29, %c0_30, %c0_31, %c0_32] : memref<1x16x16x4xbf16, #tpu.memory_space<vmem>>, vector<1x16x16x4xbf16>
    %17 = vector.shape_cast %16 : vector<1x16x16x4xbf16> to vector<16x16x4xbf16>
    %c1 = arith.constant 1 : index
    %c1_33 = arith.constant 1 : index
    %c0_34 = arith.constant 0 : index
    %18 = vector.load %arg6[%c1, %c1_33, %c0_34] : memref<18x18x8xbf16, #tpu.memory_space<vmem>>, vector<16x16x4xbf16>
    tpu.vector_store %arg6[%c1, %c1_33, %c0_34], %17 {strides = array<i32>} : memref<18x18x8xbf16, #tpu.memory_space<vmem>>, vector<16x16x4xbf16>,
    %c0_35 = arith.constant 0 : index
    %c0_36 = arith.constant 0 : index
    %c0_37 = arith.constant 0 : index
    %c0_38 = arith.constant 0 : index
    %19 = vector.load %arg2[%c0_35, %c0_36, %c0_37, %c0_38] : memref<1x16x16x4xbf16, #tpu.memory_space<vmem>>, vector<1x16x16x4xbf16>
    %20 = vector.shape_cast %19 : vector<1x16x16x4xbf16> to vector<16x16x4xbf16>
    %c1_39 = arith.constant 1 : index
    %c1_40 = arith.constant 1 : index
    %c4 = arith.constant 4 : index
    %21 = vector.load %arg6[%c1_39, %c1_40, %c4] : memref<18x18x8xbf16, #tpu.memory_space<vmem>>, vector<16x16x4xbf16>
    tpu.vector_store %arg6[%c1_39, %c1_40, %c4], %20 {strides = array<i32>} : memref<18x18x8xbf16, #tpu.memory_space<vmem>>, vector<16x16x4xbf16>,
    %c0_41 = arith.constant 0 : index
    %c0_42 = arith.constant 0 : index
    %c0_43 = arith.constant 0 : index
    %22 = vector.load %arg6[%c0_41, %c0_42, %c0_43] : memref<18x18x8xbf16, #tpu.memory_space<vmem>>, vector<16x16x8xbf16>
    %23 = vector.shape_cast %22 : vector<16x16x8xbf16> to vector<256x8xbf16>
    %c0_44 = arith.constant 0 : index
    %c1_45 = arith.constant 1 : index
    %c0_46 = arith.constant 0 : index
    %24 = vector.load %arg6[%c0_44, %c1_45, %c0_46] : memref<18x18x8xbf16, #tpu.memory_space<vmem>>, vector<16x16x8xbf16>
    %25 = vector.shape_cast %24 : vector<16x16x8xbf16> to vector<256x8xbf16>
    %c0_47 = arith.constant 0 : index
    %c2 = arith.constant 2 : index
    %c0_48 = arith.constant 0 : index
    %26 = vector.load %arg6[%c0_47, %c2, %c0_48] : memref<18x18x8xbf16, #tpu.memory_space<vmem>>, vector<16x16x8xbf16>
    %27 = vector.shape_cast %26 : vector<16x16x8xbf16> to vector<256x8xbf16>
    %c1_49 = arith.constant 1 : index
    %c0_50 = arith.constant 0 : index
    %c0_51 = arith.constant 0 : index
    %28 = vector.load %arg6[%c1_49, %c0_50, %c0_51] : memref<18x18x8xbf16, #tpu.memory_space<vmem>>, vector<16x16x8xbf16>
    %29 = vector.shape_cast %28 : vector<16x16x8xbf16> to vector<256x8xbf16>
    %c1_52 = arith.constant 1 : index
    %c1_53 = arith.constant 1 : index
    %c0_54 = arith.constant 0 : index
    %30 = vector.load %arg6[%c1_52, %c1_53, %c0_54] : memref<18x18x8xbf16, #tpu.memory_space<vmem>>, vector<16x16x8xbf16>
    %31 = vector.shape_cast %30 : vector<16x16x8xbf16> to vector<256x8xbf16>
    %c1_55 = arith.constant 1 : index
    %c2_56 = arith.constant 2 : index
    %c0_57 = arith.constant 0 : index
    %32 = vector.load %arg6[%c1_55, %c2_56, %c0_57] : memref<18x18x8xbf16, #tpu.memory_space<vmem>>, vector<16x16x8xbf16>
    %33 = vector.shape_cast %32 : vector<16x16x8xbf16> to vector<256x8xbf16>
    %c2_58 = arith.constant 2 : index
    %c0_59 = arith.constant 0 : index
    %c0_60 = arith.constant 0 : index
    %34 = vector.load %arg6[%c2_58, %c0_59, %c0_60] : memref<18x18x8xbf16, #tpu.memory_space<vmem>>, vector<16x16x8xbf16>
    %35 = vector.shape_cast %34 : vector<16x16x8xbf16> to vector<256x8xbf16>
    %c2_61 = arith.constant 2 : index
    %c1_62 = arith.constant 1 : index
    %c0_63 = arith.constant 0 : index
    %36 = vector.load %arg6[%c2_61, %c1_62, %c0_63] : memref<18x18x8xbf16, #tpu.memory_space<vmem>>, vector<16x16x8xbf16>
    %37 = vector.shape_cast %36 : vector<16x16x8xbf16> to vector<256x8xbf16>
    %c2_64 = arith.constant 2 : index
    %c2_65 = arith.constant 2 : index
    %c0_66 = arith.constant 0 : index
    %38 = vector.load %arg6[%c2_64, %c2_65, %c0_66] : memref<18x18x8xbf16, #tpu.memory_space<vmem>>, vector<16x16x8xbf16>
    %39 = vector.shape_cast %38 : vector<16x16x8xbf16> to vector<256x8xbf16>
    %40 = tpu.concatenate %23, %25, %27, %29, %31, %33, %35, %37, %39 in 1 : vector<256x8xbf16>, vector<256x8xbf16>, vector<256x8xbf16>, vector<256x8xbf16>, vector<256x8xbf16>, vector<256x8xbf16>, vector<256x8xbf16>, vector<256x8xbf16>, vector<256x8xbf16> -> vector<256x72xbf16>
    %c0_67 = arith.constant 0 : index
    %c0_68 = arith.constant 0 : index
    %41 = vector.load %arg3[%c0_67, %c0_68] : memref<72x4xbf16, #tpu.memory_space<vmem>>, vector<72x4xbf16>
    %cst_69 = arith.constant dense<0.000000e+00> : vector<256x4xf32>
    %42 = tpu.matmul %40, %41, %cst_69 {dimension_numbers = #tpu.dot_dimension_numbers<[1], [0], [0], [1], [0, 0, 1, 1], [], []>} : vector<256x72xbf16>, vector<72x4xbf16>, vector<256x4xf32> -> vector<256x4xf32>
    %cst_70 = arith.constant dense<0.000000e+00> : vector<4xf32>
    %43 = vector.multi_reduction <add>, %42, %cst_70 [0] : vector<256x4xf32> to vector<4xf32>
    %44 = vector.shape_cast %43 : vector<4xf32> to vector<1x4xf32>
    %cst_71 = arith.constant 3.906250e-03 : f32
    %45 = vector.broadcast %cst_71 : f32 to vector<1x4xf32>
    %46 = arith.mulf %44, %45 : vector<1x4xf32>
    %47 = arith.mulf %42, %42 : vector<256x4xf32>
    %cst_72 = arith.constant dense<0.000000e+00> : vector<4xf32>
    %48 = vector.multi_reduction <add>, %47, %cst_72 [0] : vector<256x4xf32> to vector<4xf32>
    %49 = vector.shape_cast %48 : vector<4xf32> to vector<1x4xf32>
    %cst_73 = arith.constant 3.906250e-03 : f32
    %50 = vector.broadcast %cst_73 : f32 to vector<1x4xf32>
    %51 = arith.mulf %49, %50 : vector<1x4xf32>
    %52 = arith.mulf %46, %46 : vector<1x4xf32>
    %53 = arith.subf %51, %52 : vector<1x4xf32>
    %cst_74 = arith.constant 0.000000e+00 : f32
    %54 = vector.broadcast %cst_74 : f32 to vector<1x4xf32>
    %55 = arith.maximumf %53, %54 : vector<1x4xf32>
    %56 = vector.broadcast %46 : vector<1x4xf32> to vector<256x4xf32>
    %57 = arith.subf %42, %56 : vector<256x4xf32>
    %cst_75 = arith.constant 9.99999974E-6 : f32
    %58 = vector.broadcast %cst_75 : f32 to vector<1x4xf32>
    %59 = arith.addf %55, %58 : vector<1x4xf32>
    %60 = math.rsqrt %59 : vector<1x4xf32>
    %61 = vector.broadcast %60 : vector<1x4xf32> to vector<256x4xf32>
    %62 = arith.mulf %57, %61 : vector<256x4xf32>
    %cst_76 = arith.constant 0.000000e+00 : f32
    %63 = vector.broadcast %cst_76 : f32 to vector<256x4xf32>
    %64 = arith.cmpf ogt, %62, %63 : vector<256x4xf32>
    %cst_77 = arith.constant 0.00999999977 : f32
    %65 = vector.broadcast %cst_77 : f32 to vector<256x4xf32>
    %66 = arith.mulf %65, %62 : vector<256x4xf32>
    %67 = arith.select %64, %62, %66 : vector<256x4xi1>, vector<256x4xf32>
    %68 = vector.shape_cast %67 : vector<256x4xf32> to vector<16x16x4xf32>
    %69 = arith.truncf %68 : vector<16x16x4xf32> to vector<16x16x4xbf16>
    %c1_78 = arith.constant 1 : index
    %c1_79 = arith.constant 1 : index
    %c0_80 = arith.constant 0 : index
    %70 = vector.load %arg7[%c1_78, %c1_79, %c0_80] : memref<18x18x4xbf16, #tpu.memory_space<vmem>>, vector<16x16x4xbf16>
    tpu.vector_store %arg7[%c1_78, %c1_79, %c0_80], %69 {strides = array<i32>} : memref<18x18x4xbf16, #tpu.memory_space<vmem>>, vector<16x16x4xbf16>,
    %c0_81 = arith.constant 0 : index
    %c0_82 = arith.constant 0 : index
    %c0_83 = arith.constant 0 : index
    %71 = vector.load %arg7[%c0_81, %c0_82, %c0_83] : memref<18x18x4xbf16, #tpu.memory_space<vmem>>, vector<16x16x4xbf16>
    %72 = vector.shape_cast %71 : vector<16x16x4xbf16> to vector<256x4xbf16>
    %c0_84 = arith.constant 0 : index
    %c1_85 = arith.constant 1 : index
    %c0_86 = arith.constant 0 : index
    %73 = vector.load %arg7[%c0_84, %c1_85, %c0_86] : memref<18x18x4xbf16, #tpu.memory_space<vmem>>, vector<16x16x4xbf16>
    %74 = vector.shape_cast %73 : vector<16x16x4xbf16> to vector<256x4xbf16>
    %c0_87 = arith.constant 0 : index
    %c2_88 = arith.constant 2 : index
    %c0_89 = arith.constant 0 : index
    %75 = vector.load %arg7[%c0_87, %c2_88, %c0_89] : memref<18x18x4xbf16, #tpu.memory_space<vmem>>, vector<16x16x4xbf16>
    %76 = vector.shape_cast %75 : vector<16x16x4xbf16> to vector<256x4xbf16>
    %c1_90 = arith.constant 1 : index
    %c0_91 = arith.constant 0 : index
    %c0_92 = arith.constant 0 : index
    %77 = vector.load %arg7[%c1_90, %c0_91, %c0_92] : memref<18x18x4xbf16, #tpu.memory_space<vmem>>, vector<16x16x4xbf16>
    %78 = vector.shape_cast %77 : vector<16x16x4xbf16> to vector<256x4xbf16>
    %c1_93 = arith.constant 1 : index
    %c1_94 = arith.constant 1 : index
    %c0_95 = arith.constant 0 : index
    %79 = vector.load %arg7[%c1_93, %c1_94, %c0_95] : memref<18x18x4xbf16, #tpu.memory_space<vmem>>, vector<16x16x4xbf16>
    %80 = vector.shape_cast %79 : vector<16x16x4xbf16> to vector<256x4xbf16>
    %c1_96 = arith.constant 1 : index
    %c2_97 = arith.constant 2 : index
    %c0_98 = arith.constant 0 : index
    %81 = vector.load %arg7[%c1_96, %c2_97, %c0_98] : memref<18x18x4xbf16, #tpu.memory_space<vmem>>, vector<16x16x4xbf16>
    %82 = vector.shape_cast %81 : vector<16x16x4xbf16> to vector<256x4xbf16>
    %c2_99 = arith.constant 2 : index
    %c0_100 = arith.constant 0 : index
    %c0_101 = arith.constant 0 : index
    %83 = vector.load %arg7[%c2_99, %c0_100, %c0_101] : memref<18x18x4xbf16, #tpu.memory_space<vmem>>, vector<16x16x4xbf16>
    %84 = vector.shape_cast %83 : vector<16x16x4xbf16> to vector<256x4xbf16>
    %c2_102 = arith.constant 2 : index
    %c1_103 = arith.constant 1 : index
    %c0_104 = arith.constant 0 : index
    %85 = vector.load %arg7[%c2_102, %c1_103, %c0_104] : memref<18x18x4xbf16, #tpu.memory_space<vmem>>, vector<16x16x4xbf16>
    %86 = vector.shape_cast %85 : vector<16x16x4xbf16> to vector<256x4xbf16>
    %c2_105 = arith.constant 2 : index
    %c2_106 = arith.constant 2 : index
    %c0_107 = arith.constant 0 : index
    %87 = vector.load %arg7[%c2_105, %c2_106, %c0_107] : memref<18x18x4xbf16, #tpu.memory_space<vmem>>, vector<16x16x4xbf16>
    %88 = vector.shape_cast %87 : vector<16x16x4xbf16> to vector<256x4xbf16>
    %89 = tpu.concatenate %72, %74, %76, %78, %80, %82, %84, %86, %88 in 1 : vector<256x4xbf16>, vector<256x4xbf16>, vector<256x4xbf16>, vector<256x4xbf16>, vector<256x4xbf16>, vector<256x4xbf16>, vector<256x4xbf16>, vector<256x4xbf16>, vector<256x4xbf16> -> vector<256x36xbf16>
    %c0_108 = arith.constant 0 : index
    %c0_109 = arith.constant 0 : index
    %90 = vector.load %arg4[%c0_108, %c0_109] : memref<36x4xbf16, #tpu.memory_space<vmem>>, vector<36x4xbf16>
    %cst_110 = arith.constant dense<0.000000e+00> : vector<256x4xf32>
    %91 = tpu.matmul %89, %90, %cst_110 {dimension_numbers = #tpu.dot_dimension_numbers<[1], [0], [0], [1], [0, 0, 1, 1], [], []>} : vector<256x36xbf16>, vector<36x4xbf16>, vector<256x4xf32> -> vector<256x4xf32>
    %cst_111 = arith.constant dense<0.000000e+00> : vector<4xf32>
    %92 = vector.multi_reduction <add>, %91, %cst_111 [0] : vector<256x4xf32> to vector<4xf32>
    %93 = vector.shape_cast %92 : vector<4xf32> to vector<1x4xf32>
    %cst_112 = arith.constant 3.906250e-03 : f32
    %94 = vector.broadcast %cst_112 : f32 to vector<1x4xf32>
    %95 = arith.mulf %93, %94 : vector<1x4xf32>
    %96 = arith.mulf %91, %91 : vector<256x4xf32>
    %cst_113 = arith.constant dense<0.000000e+00> : vector<4xf32>
    %97 = vector.multi_reduction <add>, %96, %cst_113 [0] : vector<256x4xf32> to vector<4xf32>
    %98 = vector.shape_cast %97 : vector<4xf32> to vector<1x4xf32>
    %cst_114 = arith.constant 3.906250e-03 : f32
    %99 = vector.broadcast %cst_114 : f32 to vector<1x4xf32>
    %100 = arith.mulf %98, %99 : vector<1x4xf32>
    %101 = arith.mulf %95, %95 : vector<1x4xf32>
    %102 = arith.subf %100, %101 : vector<1x4xf32>
    %cst_115 = arith.constant 0.000000e+00 : f32
    %103 = vector.broadcast %cst_115 : f32 to vector<1x4xf32>
    %104 = arith.maximumf %102, %103 : vector<1x4xf32>
    %105 = vector.broadcast %95 : vector<1x4xf32> to vector<256x4xf32>
    %106 = arith.subf %91, %105 : vector<256x4xf32>
    %cst_116 = arith.constant 9.99999974E-6 : f32
    %107 = vector.broadcast %cst_116 : f32 to vector<1x4xf32>
    %108 = arith.addf %104, %107 : vector<1x4xf32>
    %109 = math.rsqrt %108 : vector<1x4xf32>
    %110 = vector.broadcast %109 : vector<1x4xf32> to vector<256x4xf32>
    %111 = arith.mulf %106, %110 : vector<256x4xf32>
    %cst_117 = arith.constant 0.000000e+00 : f32
    %112 = vector.broadcast %cst_117 : f32 to vector<256x4xf32>
    %113 = arith.cmpf ogt, %111, %112 : vector<256x4xf32>
    %cst_118 = arith.constant 0.00999999977 : f32
    %114 = vector.broadcast %cst_118 : f32 to vector<256x4xf32>
    %115 = arith.mulf %114, %111 : vector<256x4xf32>
    %116 = arith.select %113, %111, %115 : vector<256x4xi1>, vector<256x4xf32>
    %117 = vector.shape_cast %116 : vector<256x4xf32> to vector<16x16x4xf32>
    %c0_119 = arith.constant 0 : index
    %c0_120 = arith.constant 0 : index
    %c0_121 = arith.constant 0 : index
    %c0_122 = arith.constant 0 : index
    %118 = vector.load %arg5[%c0_119, %c0_120, %c0_121, %c0_122] : memref<1x16x16x4xf32, #tpu.memory_space<vmem>>, vector<1x16x16x4xf32>
    %119 = vector.shape_cast %118 : vector<1x16x16x4xf32> to vector<16x16x4xf32>
    %120 = vector.shape_cast %117 : vector<16x16x4xf32> to vector<1x16x16x4xf32>
    tpu.vector_store %arg5[%c0_119, %c0_120, %c0_121, %c0_122], %120 {strides = array<i32>} : memref<1x16x16x4xf32, #tpu.memory_space<vmem>>, vector<1x16x16x4xf32>,
    return
  }
  func.func @transform_0(%arg0: i32) -> (i32, i32, i32, i32) {
    %c0_i32 = arith.constant 0 : i32
    %c0_i32_0 = arith.constant 0 : i32
    %c0_i32_1 = arith.constant 0 : i32
    %c0_i32_2 = arith.constant 0 : i32
    return %arg0, %c0_i32, %c0_i32_0, %c0_i32_1 : i32, i32, i32, i32
  }
  func.func @transform_1(%arg0: i32) -> (i32, i32, i32, i32) {
    %c0_i32 = arith.constant 0 : i32
    %c0_i32_0 = arith.constant 0 : i32
    %c0_i32_1 = arith.constant 0 : i32
    %c0_i32_2 = arith.constant 0 : i32
    return %arg0, %c0_i32, %c0_i32_0, %c0_i32_1 : i32, i32, i32, i32
  }
  func.func @transform_2(%arg0: i32) -> (i32, i32) {
    %c0_i32 = arith.constant 0 : i32
    %c0_i32_0 = arith.constant 0 : i32
    %c0_i32_1 = arith.constant 0 : i32
    return %c0_i32, %c0_i32_0 : i32, i32
  }
  func.func @transform_3(%arg0: i32) -> (i32, i32) {
    %c0_i32 = arith.constant 0 : i32
    %c0_i32_0 = arith.constant 0 : i32
    %c0_i32_1 = arith.constant 0 : i32
    return %c0_i32, %c0_i32_0 : i32, i32
  }
  func.func @transform_4(%arg0: i32) -> (i32, i32, i32, i32) {
    %c0_i32 = arith.constant 0 : i32
    %c0_i32_0 = arith.constant 0 : i32
    %c0_i32_1 = arith.constant 0 : i32
    %c0_i32_2 = arith.constant 0 : i32
    return %arg0, %c0_i32, %c0_i32_0, %c0_i32_1 : i32, i32, i32, i32
  }
}

</mosaic_0001>

<bundles_post_ra>
// kernel: tile.9
= control target key start
LH: loop header
LB: loop body
LE: loop exit
PB: predicated region body
PF: predicated region fallthrough
CT: control target
= control target key end

     0   :  { %vm8_vm0 = vcmask 31744   ;;  %s40_s8 = smov 4   ;;  %s41_s9 = smov 8   ;;  %vm14_vm1 = vcmask 130144   ;;  %vm20_vm2 = vcmask 97344   ;;  %vm26_vm3 = vcmask 64544   ;;  %s58_s0 = inlined_call_operand.vmem [shape: f32[4,4], index: 0, kind: input, shape index: {}]   ;;  %s59_s1 = inlined_call_operand.vmem [shape: f32[1,16], index: 1, kind: output, shape index: {}]  }
   0x1   :  { %v5_v0 = vld [vmem:[%s58_s0] sm:$0xf]  ;;  %s39_s0 = smov 12  }
   0x2   :  { %6 = vst [vmem:[#allocation1] sm:$0xf] %v5_v0 }
   0x9   :  { %v11_v1 = vld [vmem:[#allocation1 + $0x3] sm:$0x1]   ;;  %v23_v2 = vld [vmem:[#allocation1 + $0x1] sm:$0x1]   ;;  %v7_v3 = vld [vmem:[#allocation1] sm:$0x1]  }
   0xa   :  { %12 = vrot.lane.b32.xlu0 %v11_v1, %s39_s0  ;;  %24 = vrot.lane.b32.xlu1 %v23_v2, %s40_s8  ;;  %v17_v4 = vld [vmem:[#allocation1 + $0x2] sm:$0x1]   ;;  %9 = vst.msk [vmem:[#allocation0] sm:$0x1] %vm8_vm0, %v7_v3  }
   0xe   :  { %18 = vrot.lane.b32.xlu0 %v17_v4, %s41_s9 }
  0x7c   :  { %v13_v5 = vpop.permute.xlu0 %12   ;;  %v25_v6 = vpop.permute.xlu1 %24  }
  0x7d   :  { %15 = vst.msk [vmem:[#allocation0] sm:$0x1] %vm14_vm1, %v13_v5  }
  0x80   :  { %v19_v7 = vpop.permute.xlu0 %18  }
  0x81   :  { %21 = vst.msk [vmem:[#allocation0] sm:$0x1] %vm20_vm2, %v19_v7  }
  0x82   :  { %27 = vst.msk [vmem:[#allocation0] sm:$0x1] %vm26_vm3, %v25_v6  }
  0x89   :  { %v32_v8 = vld [vmem:[#allocation0] sm:$0x1] }
  0x8a   :  { %35 = vst [vmem:[%s59_s1] sm:$0x1] %v32_v8 }

// kernel: tile.8
= control target key start
LH: loop header
LB: loop body
LE: loop exit
PB: predicated region body
PF: predicated region fallthrough
CT: control target
= control target key end

     0   :  { %2 = vsyncpa [#allocation1], 0  ;;  %s42_s6 = smov [#allocation0]   ;;  %s59_s0 = inlined_call_operand.hbm [shape: f32[4], index: 0, kind: input, shape index: {}]   ;;  %s60_s1 = inlined_call_operand.vmem [shape: f32[4,4], index: 1, kind: output, shape index: {}]  }
   0x1   :  { %s9_s7 = sshll.u32 %s42_s6, 4  ;;  %s10_s7 = int_to_ptr.vmem [resolvable:$true] %s9_s7 }
   0x2   :  { %s28_s8 = scalar_lea.vmem %s10_s7, 16  ;;  %s32_s9 = scalar_lea.vmem %s10_s7, 32 }
   0x3   :  { %p29_p0 = scmp.ne.s32.totalorder %s10_s7, %s28_s8  ;;  %p33_p1 = scmp.lt.s32.totalorder %s10_s7, %s10_s7 }
   0x4   :  { %p34_p2 = scmp.lt.s32.totalorder %s32_s9, %s28_s8 }
   0x6   :  { %p35_p3 = por %p34_p2, %p33_p1 }
   0x8   :  { %p36_p4 = pnand %p35_p3, %p29_p0 }
   0xa   :  { %39 = shalt.err (!%p36_p4)
}
   0xb   :  { %12 = dma.hbm_to_vmem [thread:$0]  %s59_s0, 16, %s10_s7, [#allocation1]  }
   0xc   :  { %40 = dma.done.wait [#allocation1], 16  }
   0xd   :  { %41 = vsyncadd [#allocation1], 4294967280  ;;  %v16_v0 = vld [vmem:[#allocation0] ss:$0 sm:$0xff] }
   0xe   :  { %17 = vst [vmem:[%s60_s1] sm:$0xf] %v16_v0 }
   0xf   :  { %18 = vsyncpa [#allocation1], 1 }

// kernel: unet_up_forward.2
= control target key start
LH: loop header
LB: loop body
LE: loop exit
PB: predicated region body
PF: predicated region fallthrough
CT: control target
= control target key end

     0   :  { %vm104_vm0 = vcmask 1043456   ;;  %vm79_vm1 = vcmask 64512   ;;  %vm269_vm2 = vcmask 60416   ;;  %s460_s4 = smov 120   ;;  %s681_s1 = inlined_call_operand.vmem [shape: bf16[8,16], index: 1, kind: input, shape index: {}]   ;;  %s682_s0 = inlined_call_operand.vmem [shape: bf16[16,8,8], index: 0, kind: input, shape index: {}]   ;;  %s683_s2 = inlined_call_operand.vmem [shape: f32[1,16], index: 2, kind: input, shape index: {}]   ;;  %s684_s3 = inlined_call_operand.vmem [shape: bf16[16,2,8,8], index: 3, kind: output, shape index: {}]  }
   0x1   :  { %v31_v0 = vld [vmem:[%s681_s1] sm:$0xf]  ;;  %v454_v4 = vld [vmem:[%s682_s0 + $0x8] sm:$0xff]   ;;  %v456_v6 = vld [vmem:[%s682_s0 + $0x10] sm:$0xff]  }
   0x2   :  { %449 = vmatprep.subr.msk.bf16.mxu0 %vm104_vm0, %v31_v0  ;;  %450 = vmatprep.subr.msk.bf16.mxu1 %vm104_vm0, %v31_v0  ;;  %v106_v1 = vsel %vm104_vm0, %v31_v0, 0  ;;  %v452_v2 = vld [vmem:[%s682_s0] sm:$0xff]   ;;  %v455_v5 = vld [vmem:[%s682_s0 + $0x28] sm:$0xff]   ;;  %v458_v7 = vld [vmem:[%s682_s0 + $0x30] sm:$0xff]  }
   0x3   :  { %430 = vmatpush3.bf16.msra.mxu0 %v106_v1  ;;  %448 = vmatpush3.bf16.msra.mxu1 %v106_v1  ;;  %v453_v3 = vld [vmem:[%s682_s0 + $0x20] sm:$0xff]   ;;  %v457_v8 = vld [vmem:[%s682_s0 + $0x18] sm:$0xff]  }
   0x4   :  { %431 = vmatprep.mubr.msk.bf16.mxu0 %vm79_vm1, %v452_v2  ;;  %439 = vmatprep.mubr.msk.bf16.mxu1 %vm79_vm1, %v453_v3  ;;  %v459_v9 = vld [vmem:[%s682_s0 + $0x38] sm:$0xff]   ;;  %v519_v10 = vld [vmem:[%s683_s2] ss:$0 sm:$0xff] }
   0x6   :  { %432 = vmatmul.mubr.msk.bf16.vlgmr.msra.gmra.mxu0 %vm79_vm1, %v454_v4  ;;  %440 = vmatmul.mubr.msk.bf16.vlgmr.msra.gmra.mxu1 %vm79_vm1, %v455_v5 }
   0x7   :  { %435 = vmatprep.mubr.msk.bf16.mxu0 %vm79_vm1, %v456_v6  ;;  %443 = vmatprep.mubr.msk.bf16.mxu1 %vm79_vm1, %v458_v7 }
   0xe   :  { %436 = vmatmul.mubr.msk.bf16.gmra.mxu0 %vm79_vm1, %v457_v8  ;;  %444 = vmatmul.mubr.msk.bf16.gmra.mxu1 %vm79_vm1, %v459_v9 }
  0xc6   :  { %v433_v11 = vpop.f32.mrf.mxu0  ;;  %v441_v13 = vpop.f32.mrf.mxu1 }
  0xc7   :  { %v151_v12 = vadd.f32 %v433_v11, %v519_v10  ;;  %v183_v14 = vadd.f32 %v441_v13, %v519_v10 }
  0xc8   :  { %v142_v15 = vpop.f32.mrf.mxu0  ;;  %v174_v18 = vpop.f32.mrf.mxu1 }
  0xc9   :  { %v406_v16 = vpack.c.bf16 %v151_v12, %v151_v12  ;;  %v143_v17 = vadd.f32 %v519_v10, %v142_v15  ;;  %v414_v19 = vpack.c.bf16 %v183_v14, %v183_v14  ;;  %v175_v20 = vadd.f32 %v519_v10, %v174_v18 }
  0xca   :  { %v434_v21 = vpop.f32.mrf.mxu0  ;;  %v442_v24 = vpop.f32.mrf.mxu1 }
  0xcb   :  { %272 = vst.msk [vmem:[%s684_s3 + $0x10] sm:$0xf] %vm269_vm2, %v406_v16  ;;  %v404_v22 = vpack.c.bf16 %v143_v17, %v143_v17  ;;  %v154_v23 = vadd.f32 %v434_v21, %v519_v10  ;;  %290 = vrot.lane.b32.xlu1 %v406_v16, %s460_s4  ;;  %280 = vst.msk [vmem:[%s684_s3 + $0x50] sm:$0xf] %vm269_vm2, %v414_v19  ;;  %v412_v25 = vpack.c.bf16 %v175_v20, %v175_v20 }
  0xcc   :  { %v186_v26 = vadd.f32 %v442_v24, %v519_v10  ;;  %306 = vrot.lane.b32.xlu0 %v414_v19, %s460_s4  ;;  %v145_v27 = vpop.f32.mrf.mxu0  ;;  %v177_v30 = vpop.f32.mrf.mxu1 }
  0xcd   :  { %270 = vst.msk [vmem:[%s684_s3] sm:$0xf] %vm269_vm2, %v404_v22  ;;  %v407_v28 = vpack.c.bf16 %v154_v23, %v154_v23  ;;  %v146_v29 = vadd.f32 %v519_v10, %v145_v27  ;;  %278 = vst.msk [vmem:[%s684_s3 + $0x40] sm:$0xf] %vm269_vm2, %v412_v25  ;;  %v178_v32 = vadd.f32 %v519_v10, %v177_v30 }
  0xce   :  { %v415_v31 = vpack.c.bf16 %v186_v26, %v186_v26  ;;  %v437_v33 = vpop.f32.mrf.mxu0  ;;  %v445_v36 = vpop.f32.mrf.mxu1 }
  0xcf   :  { %273 = vst.msk [vmem:[%s684_s3 + $0x18] sm:$0xf] %vm269_vm2, %v407_v28  ;;  %v405_v34 = vpack.c.bf16 %v146_v29, %v146_v29  ;;  %v167_v35 = vadd.f32 %v437_v33, %v519_v10  ;;  %292 = vrot.lane.b32.xlu1 %v407_v28, %s460_s4  ;;  %v413_v37 = vpack.c.bf16 %v178_v32, %v178_v32 }
  0xd0   :  { %281 = vst.msk [vmem:[%s684_s3 + $0x58] sm:$0xf] %vm269_vm2, %v415_v31  ;;  %286 = vrot.lane.b32.xlu0 %v404_v22, %s460_s4  ;;  %v158_v38 = vpop.f32.mrf.mxu0  ;;  %v199_v39 = vadd.f32 %v445_v36, %v519_v10  ;;  %v190_v42 = vpop.f32.mrf.mxu1 }
  0xd1   :  { %271 = vst.msk [vmem:[%s684_s3 + $0x8] sm:$0xf] %vm269_vm2, %v405_v34  ;;  %v410_v40 = vpack.c.bf16 %v167_v35, %v167_v35  ;;  %v159_v41 = vadd.f32 %v519_v10, %v158_v38  ;;  %279 = vst.msk [vmem:[%s684_s3 + $0x48] sm:$0xf] %vm269_vm2, %v413_v37  ;;  %v191_v45 = vadd.f32 %v519_v10, %v190_v42 }
  0xd2   :  { %v438_v43 = vpop.f32.mrf.mxu0  ;;  %v418_v44 = vpack.c.bf16 %v199_v39, %v199_v39  ;;  %v446_v48 = vpop.f32.mrf.mxu1 }
  0xd3   :  { %276 = vst.msk [vmem:[%s684_s3 + $0x30] sm:$0xf] %vm269_vm2, %v410_v40  ;;  %v408_v46 = vpack.c.bf16 %v159_v41, %v159_v41  ;;  %v170_v47 = vadd.f32 %v438_v43, %v519_v10  ;;  %308 = vrot.lane.b32.xlu1 %v415_v31, %s460_s4  ;;  %v416_v50 = vpack.c.bf16 %v191_v45, %v191_v45 }
  0xd4   :  { %284 = vst.msk [vmem:[%s684_s3 + $0x70] sm:$0xf] %vm269_vm2, %v418_v44  ;;  %302 = vrot.lane.b32.xlu0 %v412_v25, %s460_s4  ;;  %v161_v49 = vpop.f32.mrf.mxu0  ;;  %v202_v51 = vadd.f32 %v446_v48, %v519_v10  ;;  %v193_v54 = vpop.f32.mrf.mxu1 }
  0xd5   :  { %274 = vst.msk [vmem:[%s684_s3 + $0x20] sm:$0xf] %vm269_vm2, %v408_v46  ;;  %v411_v52 = vpack.c.bf16 %v170_v47, %v170_v47  ;;  %v162_v53 = vadd.f32 %v519_v10, %v161_v49  ;;  %282 = vst.msk [vmem:[%s684_s3 + $0x60] sm:$0xf] %vm269_vm2, %v416_v50  ;;  %v194_v56 = vadd.f32 %v519_v10, %v193_v54 }
  0xd6   :  { %v419_v55 = vpack.c.bf16 %v202_v51, %v202_v51 }
  0xd7   :  { %277 = vst.msk [vmem:[%s684_s3 + $0x38] sm:$0xf] %vm269_vm2, %v411_v52  ;;  %v409_v57 = vpack.c.bf16 %v162_v53, %v162_v53  ;;  %304 = vrot.lane.b32.xlu1 %v413_v37, %s460_s4  ;;  %v417_v58 = vpack.c.bf16 %v194_v56, %v194_v56 }
  0xd8   :  { %285 = vst.msk [vmem:[%s684_s3 + $0x78] sm:$0xf] %vm269_vm2, %v419_v55  ;;  %288 = vrot.lane.b32.xlu0 %v405_v34, %s460_s4 }
  0xd9   :  { %275 = vst.msk [vmem:[%s684_s3 + $0x28] sm:$0xf] %vm269_vm2, %v409_v57  ;;  %283 = vst.msk [vmem:[%s684_s3 + $0x68] sm:$0xf] %vm269_vm2, %v417_v58 }
  0xdb   :  { %300 = vrot.lane.b32.xlu1 %v411_v52, %s460_s4 }
  0xdc   :  { %298 = vrot.lane.b32.xlu0 %v410_v40, %s460_s4 }
  0xdf   :  { %296 = vrot.lane.b32.xlu1 %v409_v57, %s460_s4 }
  0xe0   :  { %294 = vrot.lane.b32.xlu0 %v408_v46, %s460_s4 }
  0xe3   :  { %312 = vrot.lane.b32.xlu1 %v417_v58, %s460_s4 }
  0xe4   :  { %310 = vrot.lane.b32.xlu0 %v416_v50, %s460_s4 }
  0xe7   :  { %316 = vrot.lane.b32.xlu1 %v419_v55, %s460_s4 }
  0xe8   :  { %314 = vrot.lane.b32.xlu0 %v418_v44, %s460_s4 }
 0x13d   :  { %v291_v59 = vpop.permute.xlu1 %290 }
 0x13e   :  { %v307_v60 = vpop.permute.xlu0 %306  ;;  %390 = vst.msk [vmem:[%s684_s3 + $0x14] sm:$0xf] %vm269_vm2, %v291_v59 }
 0x13f   :  { %398 = vst.msk [vmem:[%s684_s3 + $0x54] sm:$0xf] %vm269_vm2, %v307_v60 }
 0x141   :  { %v293_v61 = vpop.permute.xlu1 %292 }
 0x142   :  { %391 = vst.msk [vmem:[%s684_s3 + $0x1c] sm:$0xf] %vm269_vm2, %v293_v61  ;;  %v287_v62 = vpop.permute.xlu0 %286 }
 0x143   :  { %388 = vst.msk [vmem:[%s684_s3 + $0x4] sm:$0xf] %vm269_vm2, %v287_v62 }
 0x145   :  { %v309_v63 = vpop.permute.xlu1 %308 }
 0x146   :  { %399 = vst.msk [vmem:[%s684_s3 + $0x5c] sm:$0xf] %vm269_vm2, %v309_v63  ;;  %v303_v0 = vpop.permute.xlu0 %302 }
 0x147   :  { %396 = vst.msk [vmem:[%s684_s3 + $0x44] sm:$0xf] %vm269_vm2, %v303_v0 }
 0x149   :  { %v305_v1 = vpop.permute.xlu1 %304 }
 0x14a   :  { %397 = vst.msk [vmem:[%s684_s3 + $0x4c] sm:$0xf] %vm269_vm2, %v305_v1  ;;  %v289_v2 = vpop.permute.xlu0 %288 }
 0x14b   :  { %389 = vst.msk [vmem:[%s684_s3 + $0xc] sm:$0xf] %vm269_vm2, %v289_v2 }
 0x14d   :  { %v301_v3 = vpop.permute.xlu1 %300 }
 0x14e   :  { %395 = vst.msk [vmem:[%s684_s3 + $0x3c] sm:$0xf] %vm269_vm2, %v301_v3  ;;  %v299_v4 = vpop.permute.xlu0 %298 }
 0x14f   :  { %394 = vst.msk [vmem:[%s684_s3 + $0x34] sm:$0xf] %vm269_vm2, %v299_v4 }
 0x151   :  { %v297_v5 = vpop.permute.xlu1 %296 }
 0x152   :  { %393 = vst.msk [vmem:[%s684_s3 + $0x2c] sm:$0xf] %vm269_vm2, %v297_v5  ;;  %v295_v6 = vpop.permute.xlu0 %294 }
 0x153   :  { %392 = vst.msk [vmem:[%s684_s3 + $0x24] sm:$0xf] %vm269_vm2, %v295_v6 }
 0x155   :  { %v313_v7 = vpop.permute.xlu1 %312 }
 0x156   :  { %401 = vst.msk [vmem:[%s684_s3 + $0x6c] sm:$0xf] %vm269_vm2, %v313_v7  ;;  %v311_v8 = vpop.permute.xlu0 %310 }
 0x157   :  { %400 = vst.msk [vmem:[%s684_s3 + $0x64] sm:$0xf] %vm269_vm2, %v311_v8 }
 0x159   :  { %v317_v9 = vpop.permute.xlu1 %316 }
 0x15a   :  { %403 = vst.msk [vmem:[%s684_s3 + $0x7c] sm:$0xf] %vm269_vm2, %v317_v9  ;;  %v315_v10 = vpop.permute.xlu0 %314 }
 0x15b   :  { %402 = vst.msk [vmem:[%s684_s3 + $0x74] sm:$0xf] %vm269_vm2, %v315_v10 }

// kernel: unet_up_forward.3
= control target key start
LH: loop header
LB: loop body
LE: loop exit
PB: predicated region body
PF: predicated region fallthrough
CT: control target
= control target key end

     0   :  { %s9844_s15 = smov 0   ;;  %s15943_s0 = inlined_call_operand.vmem [shape: bf16[2,16,16,4], index: 0, kind: input, shape index: {}]   ;;  %s15944_s1 = inlined_call_operand.vmem [shape: bf16[2,16,16,4], index: 1, kind: input, shape index: {}]   ;;  %s15945_s2 = inlined_call_operand.vmem [shape: bf16[72,4], index: 2, kind: input, shape index: {}]   ;;  %s15946_s3 = inlined_call_operand.vmem [shape: bf16[36,4], index: 3, kind: input, shape index: {}]   ;;  %s15947_s4 = inlined_call_operand.vmem [shape: f32[2,16,16,4], index: 4, kind: output, shape index: {}]  }
   0x1 LB: > { %s8933_s16 = sadd.s32 4294967295, %s9804_s15   ;;  %p8937_p0 = scmp.ge.s32.totalorder %s9804_s15, 1  ;;  %s9804_s15 = sphi %s9844_s15, %s14_s15  }
   0x2   : > { %p172_p1 = scmp.lt.s32.totalorder %s9804_s15, 3 }
   0x4   : > { %p173_p2 = pnand %p8937_p0, %p172_p1 }
   0x6   : > { %176 = sbr.rel (%p173_p2) target bundleno = 1683 (0x693), region = 36 }
   0xb   : > { %p203_p3 = scmp.lt.s32.totalorder %s8933_s16, 1  ;;  %vm222_vm0 = vcmask 57344   ;;  %v237_v0 = vld [vmem:[#allocation2 + $0x18] sm:$0x1]  ;;  %vm229_vm1 = vsmask.f32 256 }
   0xc   : > { %vm344_vm2 = vcmask 24576   ;;  %v234_v1 = vld [vmem:[#allocation2 + $0xc] sm:$0x1]  ;;  %vm9856_vm3 = vmand %vm222_vm0, %vm229_vm1  ;;  %v16025_v2 = vmov 0  ;;  %vm285_vm4 = vsmask.f32 7938 }
   0xd   : > { %s16784_s16 = smov (!%p203_p3, %s8933_s16), 1  ;;  %v16026_v2 = vsel %vm9856_vm3, 4294967295, %v16025_v2  ;;  %vm15962_vm5 = vcmask 27648   ;;  %vm219_vm6 = vcmask 60416   ;;  %v238_v3 = vsel %vm9856_vm3, 0, %v237_v0  ;;  %vm9865_vm7 = vmand %vm344_vm2, %vm285_vm4  ;;  %s9807_s21 = smov 4  }
   0xe   : > { %16027 = vst [vmem:[#allocation4_spill] sm:$0xff] %v16026_v2  ;;  %s9402_s17 = sshll.u32 %s16784_s16, 7  ;;  %v16028_v4 = vmov 0  ;;  %v235_v5 = vsel %vm9856_vm3, 0, %v234_v1  ;;  %v240_v6 = vld [vmem:[#allocation2 + $0x24] sm:$0x1]  ;;  %vm10012_vm10 = vmand %vm222_vm0, %vm285_vm4 }
   0xf   : > { %v16029_v4 = vsel %vm9865_vm7, 4294967295, %v16028_v4  ;;  %v9806_v7 = vmov 0   ;;  %s9884_s20 = scalar_lea.vmem %s15944_s1, %s9402_s17  ;;  %239 = vst [vmem:[#allocation2 + $0x18] sm:$0x1] %v238_v3  ;;  %236 = vst [vmem:[#allocation2 + $0xc] sm:$0x1] %v235_v5  ;;  %s9957_s24 = scalar_lea.vmem %s15943_s0, %s9402_s17 }
  0x10   : > { %16030 = vst [vmem:[#allocation5_spill] sm:$0xff] %v16029_v4  ;;  %220 = vst.msk [vmem:[#allocation2] sm:$0xf] %vm219_vm6, %v9806_v7  ;;  %v241_v8 = vsel %vm9856_vm3, 0, %v240_v6  ;;  %v932_v9 = vld [vmem:[%s9884_s20 + $0x8] sm:$0xf] }
  0x11   : > { %221 = vst.msk [vmem:[#allocation2 + $0x4] sm:$0xf] %vm219_vm6, %v9806_v7  ;;  %225 = vst.msk [vmem:[#allocation2 + $0xcc] sm:$0xf] %vm219_vm6, %v9806_v7  ;;  %v930_v10 = vld [vmem:[%s9884_s20] sm:$0xf] }
  0x12   : > { %223 = vst.msk [vmem:[#allocation2 + $0x8] sm:$0x1] %vm222_vm0, %v9806_v7  ;;  %227 = vst.msk [vmem:[#allocation2 + $0xd4] sm:$0x1] %vm222_vm0, %v9806_v7  ;;  %v931_v11 = vld [vmem:[%s9884_s20 + $0x4] sm:$0xf] }
  0x13   : > { %226 = vst.msk [vmem:[#allocation2 + $0xd0] sm:$0xf] %vm219_vm6, %v9806_v7  ;;  %242 = vst [vmem:[#allocation2 + $0x24] sm:$0x1] %v241_v8  ;;  %v980_v12 = vshrl.u32 %v932_v9, 16  ;;  %v983_v13 = vshll.u32 %v932_v9, 16 }
  0x14   : > { %342 = vst.msk [vmem:[#allocation3] sm:$0xf] %vm15962_vm5, %v9806_v7  ;;  %343 = vst.msk [vmem:[#allocation3 + $0x4] sm:$0xf] %vm15962_vm5, %v9806_v7  ;;  %v963_v14 = vshrl.u32 %v930_v10, 16  ;;  %v966_v15 = vshll.u32 %v930_v10, 16 }
  0x15   : > { %345 = vst.msk [vmem:[#allocation3 + $0x8] sm:$0x1] %vm344_vm2, %v9806_v7  ;;  %349 = vst.msk [vmem:[#allocation3 + $0xd4] sm:$0x1] %vm344_vm2, %v9806_v7  ;;  %v933_v16 = vld [vmem:[%s9884_s20 + $0xc] sm:$0xf] }
  0x16   : > { %347 = vst.msk [vmem:[#allocation3 + $0xcc] sm:$0xf] %vm15962_vm5, %v9806_v7  ;;  %348 = vst.msk [vmem:[#allocation3 + $0xd0] sm:$0xf] %vm15962_vm5, %v9806_v7  ;;  %v971_v17 = vshrl.u32 %v931_v11, 16  ;;  %v988_v18 = vshrl.u32 %v933_v16, 16 }
  0x17   : > { %v934_v19 = vld [vmem:[%s9884_s20 + $0x10] sm:$0xf]  ;;  %v982_v20 = vrot.slane %v980_v12, 7  ;;  %v965_v21 = vrot.slane %v963_v14, 7  ;;  %v935_v23 = vld [vmem:[%s9884_s20 + $0x14] sm:$0xf]  ;;  %vm10041_vm11 = vmand %vm15962_vm5, %vm285_vm4 }
  0x18   : > { %v997_v22 = vshrl.u32 %v934_v19, 16  ;;  %v973_v24 = vrot.slane %v971_v17, 7  ;;  %v990_v25 = vrot.slane %v988_v18, 7  ;;  %v974_v26 = vshll.u32 %v931_v11, 16  ;;  %v936_v39 = vld [vmem:[%s9884_s20 + $0x18] sm:$0xf]  ;;  %vm10093_vm12 = vmand %vm344_vm2, %vm229_vm1 }
  0x19   : > { %v1005_v27 = vshrl.u32 %v935_v23, 16  ;;  %v985_v28 = vor.u32 %v983_v13, %v982_v20  ;;  %v968_v29 = vor.u32 %v966_v15, %v965_v21  ;;  %vm493_vm8 = vsmask.f32 4368  ;;  %v937_v41 = vld [vmem:[%s9884_s20 + $0x1c] sm:$0xf]  ;;  %s9808_s25 = smov 8  }
  0x1a   : > { %v991_v30 = vshll.u32 %v933_v16, 16  ;;  %v978_v31 = vrot.slane %v973_v24, 4  ;;  %v995_v32 = vrot.slane %v990_v25, 4  ;;  %v999_v33 = vrot.slane %v997_v22, 7  ;;  %vm9898_vm9 = vmor %vm229_vm1, %vm493_vm8  ;;  %v938_v49 = vld [vmem:[%s9884_s20 + $0x20] sm:$0xf] }
  0x1b   : > { %1240 = vrot.lane.b32.xlu1 %v985_v28, %s9807_s21  ;;  %1234 = vrot.lane.b32.xlu0 %v968_v29, %s9807_s21  ;;  %v1000_v34 = vshll.u32 %v934_v19, 16  ;;  %v969_v35 = vrot.slane %v965_v21, 4  ;;  %v976_v36 = vor.u32 %v974_v26, %v973_v24  ;;  %v1007_v37 = vrot.slane %v1005_v27, 7  ;;  %v939_v51 = vld [vmem:[%s9884_s20 + $0x24] sm:$0xf]  ;;  %s9809_s26 = smov 16  }
  0x1c   : > { %v1008_v38 = vshll.u32 %v935_v23, 16  ;;  %v16031_v40 = vmov 0  ;;  %v986_v42 = vrot.slane %v982_v20, 4  ;;  %v993_v44 = vor.u32 %v991_v30, %v990_v25  ;;  %v940_v60 = vld [vmem:[%s9884_s20 + $0x28] sm:$0xf]  ;;  %s9810_s27 = smov 24  }
  0x1d   : > { %v16032_v40 = vsel %vm9898_vm9, 4294967295, %v16031_v40  ;;  %v1002_v43 = vor.u32 %v1000_v34, %v999_v33  ;;  %v1014_v45 = vshrl.u32 %v936_v39, 16  ;;  %v977_v46 = vsel %vm9898_vm9, %v969_v35, %v976_v36  ;;  %v941_v61 = vld [vmem:[%s9884_s20 + $0x2c] sm:$0xf]  ;;  %v942_v8 = vld [vmem:[%s9884_s20 + $0x30] sm:$0xf] }
  0x1e   : > { %16033 = vst [vmem:[#allocation6_spill] sm:$0xff] %v16032_v40  ;;  %v1003_v47 = vrot.slane %v999_v33, 4  ;;  %v1010_v48 = vor.u32 %v1008_v38, %v1007_v37  ;;  %v1022_v50 = vshrl.u32 %v937_v41, 16  ;;  %v994_v52 = vsel %vm9898_vm9, %v986_v42, %v993_v44  ;;  %v943_v11 = vld [vmem:[%s9884_s20 + $0x34] sm:$0xf]  ;;  %s9811_s28 = smov 48  }
  0x1f   : > { %1238 = vrot.lane.b32.xlu1 %v978_v31, %s9807_s21  ;;  %1244 = vrot.lane.b32.xlu0 %v995_v32, %s9807_s21  ;;  %v1016_v53 = vrot.slane %v1014_v45, 7  ;;  %v1017_v54 = vshll.u32 %v936_v39, 16  ;;  %v1031_v55 = vshrl.u32 %v938_v49, 16  ;;  %v1025_v58 = vshll.u32 %v937_v41, 16  ;;  %v944_v14 = vld [vmem:[%s9884_s20 + $0x38] sm:$0xf] }
  0x20   : > { %v1011_v56 = vsel %vm9898_vm9, %v1003_v47, %v1010_v48  ;;  %v1024_v57 = vrot.slane %v1022_v50, 7  ;;  %v1039_v59 = vshrl.u32 %v939_v51, 16  ;;  %v1012_v63 = vrot.slane %v1007_v37, 4  ;;  %v945_v15 = vld [vmem:[%s9884_s20 + $0x3c] sm:$0xf]  ;;  %s9812_s29 = smov 40  }
  0x21   : > { %v1019_v62 = vor.u32 %v1017_v54, %v1016_v53  ;;  %v1033_v0 = vrot.slane %v1031_v55, 7  ;;  %v1034_v1 = vshll.u32 %v938_v49, 16  ;;  %v1020_v3 = vrot.slane %v1016_v53, 4  ;;  %v946_v20 = vld [vmem:[%s9884_s20 + $0x40] sm:$0xf]  ;;  %s9813_s30 = smov 64  }
  0x22   : > { %v1027_v5 = vor.u32 %v1025_v58, %v1024_v57  ;;  %v9919_v6 = vrot.slane %v1039_v59, 7  ;;  %v1042_v7 = vshll.u32 %v939_v51, 16  ;;  %v1048_v9 = vshrl.u32 %v940_v60, 16  ;;  %v947_v24 = vld [vmem:[%s9884_s20 + $0x44] sm:$0xf]  ;;  %s9814_s5 = smov 32  }
  0x23   : > { %1246 = vrot.lane.b32.xlu1 %v1002_v43, %s9807_s21  ;;  %1236 = vrot.lane.b32.xlu0 %v977_v46, %s9807_s21  ;;  %v1056_v10 = vshrl.u32 %v941_v61, 16  ;;  %v1036_v12 = vor.u32 %v1034_v1, %v1033_v0  ;;  %v1065_v13 = vshrl.u32 %v942_v8, 16  ;;  %v1037_v17 = vrot.slane %v1033_v0, 4  ;;  %v9941_v35 = vld [vmem:[%s9884_s20 + $0x48] sm:$0xf]  ;;  %s9815_s6 = smov 56  }
  0x24   : > { %v1028_v16 = vsel %vm9898_vm9, %v1020_v3, %v1027_v5  ;;  %v1044_v18 = vor.u32 %v1042_v7, %v9919_v6  ;;  %v1073_v19 = vshrl.u32 %v943_v11, 16  ;;  %v1050_v21 = vrot.slane %v1048_v9, 7  ;;  %v9950_v45 = vld [vmem:[%s9884_s20 + $0x4c] sm:$0xf]  ;;  %v9969_v54 = vld [vmem:[%s9884_s20 + $0x50] sm:$0xf] }
  0x25   : > { %v9931_v22 = vrot.slane %v1056_v10, 7  ;;  %v1059_v23 = vshll.u32 %v941_v61, 16  ;;  %v1076_v25 = vshll.u32 %v943_v11, 16  ;;  %v1082_v26 = vshrl.u32 %v944_v14, 16  ;;  %v463_v0 = vld [vmem:[%s9957_s24 + $0x8] sm:$0xf] }
  0x26   : > { %v1090_v27 = vshrl.u32 %v945_v15, 16  ;;  %v1029_v28 = vrot.slane %v1024_v57, 4  ;;  %v1051_v29 = vshll.u32 %v940_v60, 16  ;;  %v1067_v30 = vrot.slane %v1065_v13, 7  ;;  %v461_v7 = vld [vmem:[%s9957_s24] sm:$0xf] }
  0x27   : > { %1248 = vrot.lane.b32.xlu1 %v1011_v56, %s9807_s21  ;;  %1242 = vrot.lane.b32.xlu0 %v994_v52, %s9807_s21  ;;  %v1045_v31 = vsel %vm9898_vm9, %v1037_v17, %v1044_v18  ;;  %v9938_v32 = vrot.slane %v1073_v19, 7  ;;  %v1099_v33 = vshrl.u32 %v946_v20, 16  ;;  %v1107_v34 = vshrl.u32 %v947_v24, 16  ;;  %v10005_v17 = vld [vmem:[%s9884_s20 + $0x58] sm:$0xf]  ;;  %s9816_s19 = smov 28  }
  0x28   : > { %v1054_v36 = vrot.slane %v1050_v21, 4  ;;  %v1061_v37 = vor.u32 %v1059_v23, %v9931_v22  ;;  %v1068_v38 = vshll.u32 %v942_v8, 16  ;;  %v1071_v39 = vrot.slane %v1067_v30, 4  ;;  %v10008_v18 = vld [vmem:[%s9884_s20 + $0x5c] sm:$0xf]  ;;  %s9818_s22 = smov 20  }
  0x29   : > { %v1078_v41 = vor.u32 %v1076_v25, %v9938_v32  ;;  %v9945_v42 = vrot.slane %v1082_v26, 7  ;;  %v9947_v43 = vrot.slane %v1090_v27, 7  ;;  %v1093_v44 = vshll.u32 %v945_v15, 16  ;;  %v293_v25 = vld [vmem:[#allocation2 + $0x20] sm:$0x1] }
  0x2a   : > { %v1046_v46 = vrot.slane %v9919_v6, 4  ;;  %v1053_v47 = vor.u32 %v1051_v29, %v1050_v21  ;;  %v1085_v48 = vshll.u32 %v944_v14, 16  ;;  %v1116_v49 = vshrl.u32 %v9941_v35, 16 }
  0x2b   : > { %1252 = vrot.lane.b32.xlu1 %v1019_v62, %s9807_s21  ;;  %1250 = vrot.lane.b32.xlu0 %v1012_v63, %s9807_s21  ;;  %v1063_v50 = vrot.slane %v9931_v22, 4  ;;  %v9964_v51 = vrot.slane %v1099_v33, 7  ;;  %v1102_v52 = vshll.u32 %v946_v20, 16  ;;  %v9966_v53 = vrot.slane %v1107_v34, 7  ;;  %v9980_v63 = vld [vmem:[%s9884_s20 + $0x54] sm:$0xf] }
  0x2c   : > { %v1062_v55 = vsel %vm9898_vm9, %v1054_v36, %v1061_v37  ;;  %v1070_v56 = vor.u32 %v1068_v38, %v1067_v30  ;;  %v1110_v57 = vshll.u32 %v947_v24, 16  ;;  %v1124_v58 = vshrl.u32 %v9950_v45, 16  ;;  %v825_v30 = vld [vmem:[#allocation2 + $0x18] sm:$0xf]  ;;  %v10024_v33 = vld [vmem:[%s9957_s24 + $0x4] sm:$0xf] }
  0x2d   : > { %v1080_v59 = vrot.slane %v9938_v32, 4  ;;  %v1079_v60 = vsel %vm9898_vm9, %v1071_v39, %v1078_v41  ;;  %v1088_v61 = vrot.slane %v9945_v42, 4  ;;  %v1095_v62 = vor.u32 %v1093_v44, %v9947_v43  ;;  %v10033_v38 = vld [vmem:[%s9957_s24 + $0xc] sm:$0xf] }
  0x2e   : > { %v9986_v1 = vor.u32 %v1085_v48, %v9945_v42  ;;  %v1097_v3 = vrot.slane %v9947_v43, 4  ;;  %v9989_v5 = vrot.slane %v1116_v49, 7  ;;  %v1133_v6 = vshrl.u32 %v9969_v54, 16 }
  0x2f   : > { %1258 = vrot.lane.b32.xlu1 %v1036_v12, %s9807_s21  ;;  %1254 = vrot.lane.b32.xlu0 %v1028_v16, %s9807_s21  ;;  %v9994_v8 = vor.u32 %v1102_v52, %v9964_v51  ;;  %v1114_v9 = vrot.slane %v9966_v53, 4  ;;  %v1105_v10 = vrot.slane %v9964_v51, 4  ;;  %v1127_v11 = vshll.u32 %v9950_v45, 16  ;;  %v290_v12 = vld [vmem:[#allocation2 + $0x14] sm:$0x1] }
  0x30   : > { %v1112_v13 = vor.u32 %v1110_v57, %v9966_v53  ;;  %v10000_v14 = vrot.slane %v1124_v58, 7  ;;  %v1119_v15 = vshll.u32 %v9941_v35, 16  ;;  %v1141_v16 = vshrl.u32 %v9980_v63, 16  ;;  %v465_v58 = vld [vmem:[%s9957_s24 + $0x10] sm:$0xf] }
  0x31   : > { %v513_v19 = vshrl.u32 %v463_v0, 16  ;;  %v516_v20 = vshll.u32 %v463_v0, 16  ;;  %v496_v21 = vshrl.u32 %v461_v7, 16  ;;  %v499_v23 = vshll.u32 %v461_v7, 16  ;;  %v10071_v0 = vld [vmem:[%s9884_s20 + $0x64] sm:$0xf] }
  0x32   : > { %v16034_v24 = vmov 0  ;;  %v1122_v26 = vrot.slane %v9989_v5, 4  ;;  %v10019_v27 = vrot.slane %v1133_v6, 7  ;;  %v1144_v29 = vshll.u32 %v9980_v63, 16 }
  0x33   : > { %1260 = vrot.lane.b32.xlu1 %v1045_v31, %s9807_s21  ;;  %1256 = vrot.lane.b32.xlu0 %v1029_v28, %s9807_s21  ;;  %v16035_v24 = vsel %vm10012_vm10, 4294967295, %v16034_v24  ;;  %v1136_v28 = vshll.u32 %v9969_v54, 16  ;;  %v818_v31 = vld [vmem:[#allocation2 + $0xc] sm:$0xf]  ;;  %v1131_v34 = vrot.slane %v10000_v14, 4  ;;  %v1150_v35 = vshrl.u32 %v10005_v17, 16 }
  0x34   : > { %16036 = vst [vmem:[#allocation7_spill] sm:$0xff] %v16035_v24  ;;  %v10028_v36 = vrot.slane %v513_v19, 7  ;;  %v10030_v37 = vrot.slane %v496_v21, 7  ;;  %v10035_v39 = vrot.slane %v1141_v16, 7  ;;  %v1139_v41 = vrot.slane %v10019_v27, 4 }
  0x35   : > { %v1158_v42 = vshrl.u32 %v10008_v18, 16  ;;  %v16037_v44 = vmov 0  ;;  %v291_v45 = vsel %vm10012_vm10, 0, %v290_v12  ;;  %v504_v51 = vshrl.u32 %v10024_v33, 16  ;;  %v287_v12 = vld [vmem:[#allocation2 + $0x8] sm:$0x1] }
  0x36   : > { %v16038_v44 = vsel %vm10041_vm11, 4294967295, %v16037_v44  ;;  %v518_v48 = vor.u32 %v516_v20, %v10028_v36  ;;  %v501_v49 = vor.u32 %v499_v23, %v10030_v37  ;;  %292 = vst [vmem:[#allocation2 + $0x14] sm:$0x1] %v291_v45  ;;  %v1096_v52 = vsel %vm9898_vm9, %v1088_v61, %v1095_v62  ;;  %v231_v61 = vld [vmem:[#allocation2] sm:$0x1] }
  0x37   : > { %1262 = vrot.lane.b32.xlu0 %v1046_v46, %s9807_s21  ;;  %1264 = vrot.lane.b32.xlu1 %v1053_v47, %s9807_s21  ;;  %16039 = vst [vmem:[#allocation8_spill] sm:$0xff] %v16038_v44  ;;  %v1161_v46 = vshll.u32 %v10008_v18, 16  ;;  %v10049_v47 = vld [vmem:[%s9884_s20 + $0x60] sm:$0xf]  ;;  %v521_v57 = vshrl.u32 %v10033_v38, 16  ;;  %v10068_v63 = vrot.slane %v1150_v35, 7  ;;  %v1129_v62 = vor.u32 %v1127_v11, %v10000_v14 }
  0x38   : > { %v826_v22 = vsel %vm10041_vm11, %v518_v48, %v825_v30  ;;  %v10079_v6 = vor.u32 %v1119_v15, %v9989_v5  ;;  %v1148_v7 = vrot.slane %v10035_v39, 4  ;;  %v10085_v16 = vrot.slane %v1158_v42, 7  ;;  %v10089_v20 = vld [vmem:[%s9884_s20 + $0x68] sm:$0xf]  ;;  %v10106_v30 = vld [vmem:[%s9884_s20 + $0x6c] sm:$0xf] }
  0x39   : > { %827 = vst [vmem:[#allocation2 + $0x18] sm:$0xf] %v826_v22  ;;  %v1153_v19 = vshll.u32 %v10005_v17, 16  ;;  %v16040_v15 = vmov 0  ;;  %v1167_v21 = vshrl.u32 %v10049_v47, 16  ;;  %v1170_v17 = vshll.u32 %v10049_v47, 16 }
  0x3a   : > { %v16041_v15 = vsel %vm10093_vm12, 4294967295, %v16040_v15  ;;  %v530_v23 = vshrl.u32 %v465_v58, 16  ;;  %v832_v35 = vld [vmem:[#allocation2 + $0x24] sm:$0xf]  ;;  %v502_v32 = vrot.slane %v10030_v37, 4  ;;  %v232_v48 = vsel %vm9856_vm3, 0, %v231_v61 }
  0x3b   : > { %1266 = vrot.lane.b32.xlu0 %v1062_v55, %s9807_s21  ;;  %1270 = vrot.lane.b32.xlu1 %v1070_v56, %s9807_s21  ;;  %v10062_v55 = vsel %vm9898_vm9, %v1105_v10, %v1112_v13  ;;  %v294_v56 = vsel %vm10012_vm10, 0, %v293_v25  ;;  %v10082_v10 = vrot.slane %v521_v57, 7  ;;  %v1146_v13 = vor.u32 %v1144_v29, %v10035_v39  ;;  %16042 = vst [vmem:[#allocation9_spill] sm:$0xff] %v16041_v15  ;;  %v466_v57 = vld [vmem:[%s9957_s24 + $0x14] sm:$0xf] }
  0x3c   : > { %295 = vst [vmem:[#allocation2 + $0x20] sm:$0x1] %v294_v56  ;;  %v533_v25 = vshll.u32 %v465_v58, 16  ;;  %v1156_v29 = vrot.slane %v10068_v63, 4  ;;  %v10112_v45 = vrot.slane %v530_v23, 7  ;;  %v1178_v5 = vshll.u32 %v10071_v0, 16 }
  0x3d   : > { %v822_v42 = vld [vmem:[#allocation2 + $0x14] sm:$0x1]  ;;  %233 = vst [vmem:[#allocation2] sm:$0x1] %v232_v48  ;;  %v10139_v54 = vsel %vm9898_vm9, %v1139_v41, %v1146_v13  ;;  %v1192_v61 = vshrl.u32 %v10106_v30, 16  ;;  %v519_v13 = vrot.slane %v10028_v36, 4 }
  0x3e   : > { %v535_v58 = vor.u32 %v533_v25, %v10112_v45  ;;  %v10154_v22 = vld [vmem:[%s9884_s20 + $0x74] sm:$0xf]  ;;  %v536_v23 = vrot.slane %v10112_v45, 4  ;;  %v1187_v45 = vshll.u32 %v10089_v20, 16  ;;  %vm1543_vm13 = vsmask.f32 3328 }
  0x3f   : > { %1268 = vrot.lane.b32.xlu0 %v1063_v50, %s9807_s21  ;;  %1272 = vrot.lane.b32.xlu1 %v1079_v60, %s9807_s21  ;;  %v819_v50 = vsel %vm10041_vm11, %v501_v49, %v818_v31  ;;  %v506_v60 = vrot.slane %v504_v51, 7  ;;  %v528_v31 = vrot.slane %v10082_v10, 4  ;;  %v288_v49 = vsel %vm10012_vm10, 0, %v287_v12 }
  0x40   : > { %820 = vst [vmem:[#allocation2 + $0xc] sm:$0xf] %v819_v50  ;;  %v10122_v51 = vsel %vm9898_vm9, %v1122_v26, %v1129_v62  ;;  %289 = vst [vmem:[#allocation2 + $0x8] sm:$0x1] %v288_v49  ;;  %v1184_v26 = vshrl.u32 %v10089_v20, 16  ;;  %v833_v18 = vsel %vm10041_vm11, %v535_v58, %v832_v35  ;;  %v10165_v62 = vrot.slane %v1167_v21, 7 }
  0x41   : > { %v511_v11 = vrot.slane %v506_v60, 4  ;;  %834 = vst [vmem:[#allocation2 + $0x24] sm:$0xf] %v833_v18  ;;  %v541_v12 = vshll.u32 %v466_v57, 16  ;;  %v1195_v35 = vshll.u32 %v10106_v30, 16  ;;  %vm1994_vm15 = vcmask 1042432  }
  0x42   : > { %v10176_v21 = vrot.slane %v1184_v26, 7  ;;  %v296_v49 = vld [vmem:[#allocation2 + $0x2c] sm:$0x1]  ;;  %v469_v26 = vld [vmem:[%s9957_s24 + $0x20] sm:$0xf]  ;;  %vm1995_vm0 = vcmask 1046532  }
  0x43   : > { %1274 = vrot.lane.b32.xlu0 %v1080_v59, %s9807_s21  ;;  %1276 = vrot.lane.b32.xlu1 %v9986_v1, %s9807_s21  ;;  %v507_v59 = vshll.u32 %v10024_v33, 16  ;;  %v1175_v1 = vshrl.u32 %v10071_v0, 16  ;;  %v10127_v33 = vor.u32 %v1136_v28, %v10019_v27  ;;  %v823_v37 = vsel %vm10093_vm12, %v511_v11, %v822_v42  ;;  %v829_v28 = vld [vmem:[#allocation2 + $0x20] sm:$0x1]  ;;  %v10151_v27 = vld [vmem:[%s9884_s20 + $0x70] sm:$0xf]  ;;  %vm10431_vm6 = vmor %vm1994_vm15, %vm1995_vm0 }
  0x44   : > { %824 = vst [vmem:[#allocation2 + $0x14] sm:$0x1] %v823_v37  ;;  %v830_v41 = vsel %vm10093_vm12, %v528_v31, %v829_v28  ;;  %v1201_v36 = vshrl.u32 %v10151_v27, 16  ;;  %v10204_v42 = vor.u32 %v1170_v17, %v10165_v62  ;;  %v246_v37 = vld [vmem:[#allocation2 + $0x3c] sm:$0x1]  ;;  %v1190_v17 = vrot.slane %v10176_v21, 4 }
  0x45   : > { %v509_v56 = vor.u32 %v507_v59, %v506_v60  ;;  %v1165_v60 = vrot.slane %v10085_v16, 4  ;;  %831 = vst [vmem:[#allocation2 + $0x20] sm:$0x1] %v830_v41  ;;  %v10174_v11 = vrot.slane %v1175_v1, 7  ;;  %v10197_v59 = vld [vmem:[%s9884_s20 + $0x7c] sm:$0xf] }
  0x46   : > { %v10222_v28 = vrot.slane %v1201_v36, 7  ;;  %v1204_v53 = vshll.u32 %v10151_v27, 16  ;;  %v468_v58 = vld [vmem:[%s9957_s24 + $0x1c] sm:$0xf]  ;;  %v470_v18 = vld [vmem:[%s9957_s24 + $0x24] sm:$0xf] }
  0x47   : > { %1278 = vrot.lane.b32.xlu0 %v1096_v52, %s9807_s21  ;;  %1282 = vrot.lane.b32.xlu1 %v9994_v8, %s9807_s21  ;;  %v1163_v52 = vor.u32 %v1161_v46, %v10085_v16  ;;  %v10148_v8 = vor.u32 %v1153_v19, %v10068_v63  ;;  %v510_v50 = vsel %vm9898_vm9, %v502_v32, %v509_v56  ;;  %v538_v46 = vshrl.u32 %v466_v57, 16  ;;  %v243_v63 = vld [vmem:[#allocation2 + $0x30] sm:$0x1]  ;;  %v10194_v32 = vld [vmem:[%s9884_s20 + $0x78] sm:$0xf]  ;;  %s9817_s20 = smov 12  }
  0x48   : > { %821 = vst.msk [vmem:[#allocation2 + $0x10] sm:$0xf] %vm15962_vm5, %v510_v50  ;;  %v524_v19 = vshll.u32 %v10033_v38, 16  ;;  %v1209_v38 = vshrl.u32 %v10154_v22, 16  ;;  %v244_v43 = vsel %vm9856_vm3, 0, %v243_v63  ;;  %v1182_v47 = vrot.slane %v10174_v11, 4 }
  0x49   : > { %v10179_v25 = vrot.slane %v538_v46, 7  ;;  %245 = vst [vmem:[#allocation2 + $0x30] sm:$0x1] %v244_v43  ;;  %v297_v50 = vsel %vm10012_vm10, 0, %v296_v49  ;;  %v1207_v46 = vrot.slane %v10222_v28, 4  ;;  %v1218_v63 = vshrl.u32 %v10194_v32, 16 }
  0x4a   : > { %v526_v31 = vor.u32 %v524_v19, %v10082_v10  ;;  %v467_v10 = vld [vmem:[%s9957_s24 + $0x18] sm:$0xf]  ;;  %298 = vst [vmem:[#allocation2 + $0x2c] sm:$0x1] %v297_v50  ;;  %v567_v36 = vshll.u32 %v469_v26, 16  ;;  %v1206_v16 = vor.u32 %v1204_v53, %v10222_v28  ;;  %vm1378_vm8 = vcmask 60448  }
  0x4b   : > { %1280 = vrot.lane.b32.xlu0 %v1097_v3, %s9807_s21  ;;  %1284 = vrot.lane.b32.xlu1 %v10062_v55, %s9807_s21  ;;  %v10188_v3 = vsel %vm9898_vm9, %v1156_v29, %v1163_v52  ;;  %v10190_v55 = vrot.slane %v1192_v61, 7  ;;  %v543_v1 = vor.u32 %v541_v12, %v10179_v25  ;;  %v1173_v29 = vrot.slane %v10165_v62, 4  ;;  %v299_v19 = vld [vmem:[#allocation2 + $0x38] sm:$0x1]  ;;  %v302_v43 = vld [vmem:[#allocation2 + $0x44] sm:$0x1] }
  0x4c   : > { %v527_v48 = vsel %vm9898_vm9, %v519_v13, %v526_v31  ;;  %v1212_v52 = vshll.u32 %v10154_v22, 16  ;;  %v550_v41 = vshll.u32 %v467_v10, 16  ;;  %v247_v61 = vsel %vm9856_vm3, 0, %v246_v37 }
  0x4d   : > { %v1199_v56 = vrot.slane %v10190_v55, 4  ;;  %v544_v57 = vsel %vm9898_vm9, %v536_v23, %v543_v1  ;;  %828 = vst.msk [vmem:[#allocation2 + $0x1c] sm:$0xf] %vm15962_vm5, %v527_v48  ;;  %v1226_v12 = vshrl.u32 %v10197_v59, 16  ;;  %248 = vst [vmem:[#allocation2 + $0x3c] sm:$0x1] %v247_v61 }
  0x4e   : > { %835 = vst.msk [vmem:[#allocation2 + $0x28] sm:$0xf] %vm15962_vm5, %v544_v57  ;;  %v564_v23 = vshrl.u32 %v469_v26, 16  ;;  %v558_v31 = vshll.u32 %v468_v58, 16  ;;  %v1229_v1 = vshll.u32 %v10197_v59, 16  ;;  %v572_v37 = vshrl.u32 %v470_v18, 16 }
  0x4f   : > { %1286 = vrot.lane.b32.xlu0 %v1114_v9, %s9807_s21  ;;  %1288 = vrot.lane.b32.xlu1 %v10079_v6, %s9807_s21  ;;  %v10225_v9 = vrot.slane %v1209_v38, 7  ;;  %v547_v6 = vshrl.u32 %v467_v10, 16  ;;  %v555_v38 = vshrl.u32 %v468_v58, 16  ;;  %v300_v50 = vsel %vm10012_vm10, 0, %v299_v19 }
  0x50   : > { %v839_v10 = vld [vmem:[#allocation2 + $0x30] sm:$0xf]  ;;  %v566_v57 = vrot.slane %v564_v23, 7  ;;  %v545_v26 = vrot.slane %v10179_v25, 4  ;;  %v10253_v61 = vrot.slane %v572_v37, 7  ;;  %v10299_v39 = vrot.slane %v1226_v12, 7 }
  0x51   : > { %v549_v13 = vrot.slane %v547_v6, 7  ;;  %v10243_v6 = vrot.slane %v555_v38, 7  ;;  %301 = vst [vmem:[#allocation2 + $0x38] sm:$0x1] %v300_v50  ;;  %v249_v38 = vld [vmem:[#allocation2 + $0x48] sm:$0x1] }
  0x52   : > { %v569_v25 = vor.u32 %v567_v36, %v566_v57  ;;  %v1180_v36 = vor.u32 %v1178_v5, %v10174_v11  ;;  %vm1544_vm14 = vsmask.f32 7440  ;;  %vm15966_vm15 = vcmask 130048  }
  0x53   : > { %1290 = vrot.lane.b32.xlu0 %v10122_v51, %s9807_s21  ;;  %1294 = vrot.lane.b32.xlu1 %v10127_v33, %s9807_s21  ;;  %v552_v48 = vor.u32 %v550_v41, %v549_v13  ;;  %v553_v49 = vrot.slane %v549_v13, 4  ;;  %v575_v51 = vshll.u32 %v470_v18, 16  ;;  %v10248_v33 = vld [vmem:[%s9957_s24 + $0x28] sm:$0xf]  ;;  %v303_v41 = vsel %vm10012_vm10, 0, %v302_v43  ;;  %vm10418_vm2 = vmor %vm1543_vm13, %vm1544_vm14 }
  0x54   : > { %v472_v13 = vld [vmem:[%s9957_s24 + $0x2c] sm:$0xf]  ;;  %v10263_v18 = vrot.slane %v1218_v63, 7  ;;  %v560_v19 = vor.u32 %v558_v31, %v10243_v6  ;;  %v562_v23 = vrot.slane %v10243_v6, 4  ;;  %304 = vst [vmem:[#allocation2 + $0x44] sm:$0x1] %v303_v41  ;;  %v1181_v12 = vsel %vm9898_vm9, %v1173_v29, %v1180_v36  ;;  %vm10495_vm14 = vmand %vm1378_vm8, %vm285_vm4 }
  0x55   : > { %v840_v58 = vsel %vm10041_vm11, %v552_v48, %v839_v10  ;;  %v305_v10 = vld [vmem:[#allocation2 + $0x50] sm:$0x1]  ;;  %v10267_v43 = vld [vmem:[#allocation2 + $0x4] sm:$0xf]  ;;  %v570_v48 = vrot.slane %v566_v57, 4  ;;  %v577_v14 = vor.u32 %v575_v51, %v10253_v61  ;;  %v584_v50 = vshll.u32 %v10248_v33, 16 }
  0x56   : > { %841 = vst [vmem:[#allocation2 + $0x30] sm:$0xf] %v840_v58  ;;  %v252_v63 = vld [vmem:[#allocation2 + $0x54] sm:$0x1]  ;;  %v836_v31 = vld [vmem:[#allocation2 + $0x2c] sm:$0x1]  ;;  %v561_v6 = vsel %vm9898_vm9, %v553_v49, %v560_v19 }
  0x57   : > { %1292 = vrot.lane.b32.xlu0 %v1131_v34, %s9807_s21  ;;  %1296 = vrot.lane.b32.xlu1 %v10139_v54, %s9807_s21  ;;  %v579_v34 = vrot.slane %v10253_v61, 4  ;;  %v581_v54 = vshrl.u32 %v10248_v33, 16  ;;  %v846_v37 = vld [vmem:[#allocation2 + $0x3c] sm:$0xf]  ;;  %v589_v57 = vshrl.u32 %v472_v13, 16  ;;  %v837_v51 = vsel %vm10093_vm12, %v545_v26, %v836_v31 }
  0x58   : > { %v847_v58 = vsel %vm10041_vm11, %v569_v25, %v846_v37  ;;  %842 = vst.msk [vmem:[#allocation2 + $0x34] sm:$0xf] %vm15962_vm5, %v561_v6  ;;  %v578_v0 = vsel %vm9898_vm9, %v570_v48, %v577_v14  ;;  %v473_v61 = vld [vmem:[%s9957_s24 + $0x30] sm:$0xf]  ;;  %v308_v41 = vld [vmem:[#allocation2 + $0x5c] sm:$0x1] }
  0x59   : > { %v583_v5 = vrot.slane %v581_v54, 7  ;;  %838 = vst [vmem:[#allocation2 + $0x2c] sm:$0x1] %v837_v51  ;;  %848 = vst [vmem:[#allocation2 + $0x3c] sm:$0xf] %v847_v58  ;;  %v591_v49 = vrot.slane %v589_v57, 7 }
  0x5a   : > { %849 = vst.msk [vmem:[#allocation2 + $0x40] sm:$0xf] %vm15962_vm5, %v578_v0  ;;  %v592_v33 = vshll.u32 %v472_v13, 16  ;;  %v250_v26 = vsel %vm9856_vm3, 0, %v249_v38  ;;  %v306_v25 = vsel %vm10012_vm10, 0, %v305_v10  ;;  %v598_v48 = vshrl.u32 %v473_v61, 16 }
  0x5b   : > { %1298 = vrot.lane.b32.xlu0 %v1148_v7, %s9807_s21  ;;  %1300 = vrot.lane.b32.xlu1 %v10148_v8, %s9807_s21  ;;  %v474_v19 = vld [vmem:[%s9957_s24 + $0x34] sm:$0xf]  ;;  %v587_v7 = vrot.slane %v583_v5, 4  ;;  %251 = vst [vmem:[#allocation2 + $0x48] sm:$0x1] %v250_v26  ;;  %v253_v8 = vsel %vm9856_vm3, 0, %v252_v63  ;;  %v586_v29 = vor.u32 %v584_v50, %v583_v5 }
  0x5c   : > { %307 = vst [vmem:[#allocation2 + $0x50] sm:$0x1] %v306_v25  ;;  %v1556_v13 = vshll.u32 %v10267_v43, 16  ;;  %v843_v14 = vld [vmem:[#allocation2 + $0x38] sm:$0x1]  ;;  %v594_v54 = vor.u32 %v592_v33, %v591_v49  ;;  %v601_v38 = vshll.u32 %v473_v61, 16 }
  0x5d   : > { %254 = vst [vmem:[#allocation2 + $0x54] sm:$0x1] %v253_v8  ;;  %v309_v10 = vsel %vm10012_vm10, 0, %v308_v41  ;;  %v10310_v31 = vld [vmem:[#allocation2] sm:$0xf]  ;;  %v844_v63 = vsel %vm10093_vm12, %v562_v23, %v843_v14  ;;  %v600_v6 = vrot.slane %v598_v48, 7 }
  0x5e   : > { %v850_v37 = vld [vmem:[#allocation2 + $0x44] sm:$0x1]  ;;  %310 = vst [vmem:[#allocation2 + $0x5c] sm:$0x1] %v309_v10  ;;  %v606_v57 = vshrl.u32 %v474_v19, 16  ;;  %v595_v36 = vsel %vm9898_vm9, %v587_v7, %v594_v54  ;;  %v609_v51 = vshll.u32 %v474_v19, 16  ;;  %v1189_v7 = vor.u32 %v1187_v45, %v10176_v21 }
  0x5f   : > { %1302 = vrot.lane.b32.xlu0 %v10188_v3, %s9807_s21  ;;  %1306 = vrot.lane.b32.xlu1 %v10204_v42, %s9807_s21  ;;  %845 = vst [vmem:[#allocation2 + $0x38] sm:$0x1] %v844_v63  ;;  %v851_v62 = vsel %vm10093_vm12, %v579_v34, %v850_v37  ;;  %v10323_v23 = vld [vmem:[%s9957_s24 + $0x38] sm:$0xf]  ;;  %v476_v58 = vld [vmem:[%s9957_s24 + $0x3c] sm:$0xf]  ;;  %v603_v33 = vor.u32 %v601_v38, %v600_v6 }
  0x60   : > { %852 = vst [vmem:[#allocation2 + $0x44] sm:$0x1] %v851_v62  ;;  %v596_v0 = vrot.slane %v591_v49, 4  ;;  %856 = vst.msk [vmem:[#allocation2 + $0x4c] sm:$0xf] %vm15962_vm5, %v595_v36  ;;  %v608_v3 = vrot.slane %v606_v57, 7  ;;  %v1197_v49 = vor.u32 %v1195_v35, %v10190_v55 }
  0x61   : > { %v604_v61 = vrot.slane %v600_v6, 4  ;;  %v615_v42 = vshrl.u32 %v10323_v23, 16  ;;  %v1560_v41 = vshrl.u32 %v10267_v43, 16  ;;  %v623_v34 = vshrl.u32 %v476_v58, 16  ;;  %v255_v45 = vld [vmem:[#allocation2 + $0x60] sm:$0x1] }
  0x62   : > { %v626_v50 = vshll.u32 %v476_v58, 16  ;;  %v1547_v5 = vshrl.u32 %v10310_v31, 16  ;;  %v1550_v26 = vshll.u32 %v10310_v31, 16  ;;  %v613_v25 = vrot.slane %v608_v3, 4  ;;  %v853_v8 = vld [vmem:[#allocation2 + $0x48] sm:$0xf] }
  0x63   : > { %v611_v19 = vor.u32 %v609_v51, %v608_v3  ;;  %1304 = vrot.lane.b32.xlu0 %v1165_v60, %s9807_s21  ;;  %1308 = vrot.lane.b32.xlu1 %v1181_v12, %s9807_s21  ;;  %v857_v48 = vld [vmem:[#allocation2 + $0x50] sm:$0x1]  ;;  %v617_v14 = vrot.slane %v615_v42, 7  ;;  %v10341_v54 = vrot.slane %v623_v34, 7  ;;  %v854_v60 = vsel %vm10041_vm11, %v586_v29, %v853_v8  ;;  %v311_v38 = vld [vmem:[#allocation2 + $0x68] sm:$0x1] }
  0x64   : > { %v858_v30 = vsel %vm10093_vm12, %v596_v0, %v857_v48  ;;  %v860_v35 = vld [vmem:[#allocation2 + $0x54] sm:$0xf]  ;;  %v10352_v10 = vrot.slane %v1556_v13, 5  ;;  %855 = vst [vmem:[#allocation2 + $0x48] sm:$0xf] %v854_v60  ;;  %v1562_v63 = vrot.slane %v1560_v41, 4  ;;  %v1198_v11 = vsel %vm9898_vm9, %v1190_v17, %v1197_v49 }
  0x65   : > { %v612_v20 = vsel %vm9898_vm9, %v604_v61, %v611_v19  ;;  %859 = vst [vmem:[#allocation2 + $0x50] sm:$0x1] %v858_v30  ;;  %v861_v27 = vsel %vm10041_vm11, %v603_v33, %v860_v35  ;;  %v864_v53 = vld [vmem:[#allocation2 + $0x5c] sm:$0x1]  ;;  %v621_v12 = vrot.slane %v617_v14, 4  ;;  %v628_v31 = vor.u32 %v626_v50, %v10341_v54 }
  0x66   : > { %863 = vst.msk [vmem:[#allocation2 + $0x58] sm:$0xf] %vm15962_vm5, %v612_v20  ;;  %862 = vst [vmem:[#allocation2 + $0x54] sm:$0xf] %v861_v27  ;;  %v865_v37 = vsel %vm10093_vm12, %v613_v25, %v864_v53  ;;  %v256_v13 = vsel %vm9856_vm3, 0, %v255_v45  ;;  %v312_v6 = vsel %vm10012_vm10, 0, %v311_v38  ;;  %v1563_v17 = vor.u32 %v1562_v63, %v10352_v10 }
  0x67   : > { %1310 = vrot.lane.b32.xlu0 %v1182_v47, %s9807_s21  ;;  %1312 = vrot.lane.b32.xlu1 %v1189_v7, %s9807_s21  ;;  %v10368_v57 = vld [vmem:[#allocation2 + $0x8] sm:$0x1]  ;;  %v1549_v62 = vrot.slane %v1547_v5, 4  ;;  %v1552_v29 = vrot.slane %v1550_v26, 5  ;;  %866 = vst [vmem:[#allocation2 + $0x5c] sm:$0x1] %v865_v37  ;;  %v629_v51 = vsel %vm9898_vm9, %v621_v12, %v628_v31  ;;  %v1214_v47 = vor.u32 %v1212_v52, %v10225_v9 }
  0x68   : > { %v618_v36 = vshll.u32 %v10323_v23, 16  ;;  %257 = vst [vmem:[#allocation2 + $0x60] sm:$0x1] %v256_v13  ;;  %313 = vst [vmem:[#allocation2 + $0x68] sm:$0x1] %v312_v6  ;;  %v1221_v23 = vshll.u32 %v10194_v32, 16  ;;  %v1231_v7 = vor.u32 %v1229_v1, %v10299_v39 }
  0x69   : > { %870 = vst.msk [vmem:[#allocation2 + $0x64] sm:$0xf] %vm15962_vm5, %v629_v51  ;;  %v258_v58 = vld [vmem:[#allocation2 + $0x6c] sm:$0x1]  ;;  %v477_v0 = vld [vmem:[%s9957_s24 + $0x40] sm:$0xf]  ;;  %v1553_v32 = vor.u32 %v1552_v29, %v1549_v62  ;;  %v1215_v25 = vsel %vm9898_vm9, %v1207_v46, %v1214_v47 }
  0x6a   : > { %v314_v3 = vld [vmem:[#allocation2 + $0x74] sm:$0x1]  ;;  %v259_v61 = vsel %vm9856_vm3, 0, %v258_v58  ;;  %v632_v42 = vshrl.u32 %v477_v0, 16  ;;  %v478_v41 = vld [vmem:[%s9957_s24 + $0x44] sm:$0xf]  ;;  %v620_v34 = vor.u32 %v618_v36, %v617_v14 }
  0x6b   : > { %v315_v21 = vsel %vm10012_vm10, 0, %v314_v3  ;;  %v1566_v22 = vshll.u32 %v10368_v57, 16  ;;  %260 = vst [vmem:[#allocation2 + $0x6c] sm:$0x1] %v259_v61  ;;  %v635_v52 = vshll.u32 %v477_v0, 16  ;;  %v640_v33 = vshrl.u32 %v478_v41, 16  ;;  %1314 = vrot.lane.b32.xlu0 %v1198_v11, %s9807_s21  ;;  %1318 = vrot.lane.b32.xlu1 %v1206_v16, %s9807_s21 }
  0x6c   : > { %316 = vst [vmem:[#allocation2 + $0x74] sm:$0x1] %v315_v21  ;;  %v630_v50 = vrot.slane %v10341_v54, 4  ;;  %v634_v5 = vrot.slane %v632_v42, 7  ;;  %v1216_v26 = vrot.slane %v10225_v9, 4  ;;  %v1224_v19 = vrot.slane %v10263_v18, 4 }
  0x6d   : > { %v642_v49 = vrot.slane %v640_v33, 7  ;;  %v1930_v8 = vld [vmem:[#allocation2] sm:$0xe]  ;;  %v1999_v48 = vrot.slane %v10267_v43, 5  ;;  %v1223_v9 = vor.u32 %v1221_v23, %v10263_v18  ;;  %v1564_v28 = vrot.slane %v1563_v17, 4 }
  0x6e   : > { %v1568_v14 = vrot.slane %v1566_v22, 5  ;;  %v637_v16 = vor.u32 %v635_v52, %v634_v5  ;;  %v1554_v59 = vrot.slane %v1553_v32, 4  ;;  %v479_v18 = vld [vmem:[%s9957_s24 + $0x48] sm:$0xf]  ;;  %v480_v30 = vld [vmem:[%s9957_s24 + $0x4c] sm:$0xf]  ;;  %v1232_v55 = vsel %vm9898_vm9, %v1224_v19, %v1231_v7 }
  0x6f   : > { %v867_v54 = vld [vmem:[#allocation2 + $0x60] sm:$0xf]  ;;  %v871_v46 = vld [vmem:[#allocation2 + $0x68] sm:$0x1]  ;;  %1316 = vrot.lane.b32.xlu0 %v1199_v56, %s9807_s21  ;;  %1320 = vrot.lane.b32.xlu1 %v1215_v25, %s9807_s21  ;;  %v647_v60 = vrot.slane %v642_v49, 4  ;;  %v638_v35 = vrot.slane %v634_v5, 4 }
  0x70   : > { %v868_v1 = vsel %vm10041_vm11, %v620_v34, %v867_v54  ;;  %v872_v43 = vsel %vm10093_vm12, %v630_v50, %v871_v46  ;;  %v643_v20 = vshll.u32 %v478_v41, 16  ;;  %v649_v45 = vshrl.u32 %v479_v18, 16  ;;  %v261_v23 = vld [vmem:[#allocation2 + $0x78] sm:$0x1]  ;;  %v264_v52 = vld [vmem:[#allocation2 + $0x84] sm:$0x1] }
  0x71   : > { %869 = vst [vmem:[#allocation2 + $0x60] sm:$0xf] %v868_v1  ;;  %873 = vst [vmem:[#allocation2 + $0x68] sm:$0x1] %v872_v43  ;;  %v657_v38 = vshrl.u32 %v480_v30, 16  ;;  %v16043_v56 = vmov 0  ;;  %v1559_v47 = vsel %vm10418_vm2, %v1554_v59, %v10352_v10  ;;  %v1569_v58 = vsel %vm10418_vm2, %v1564_v28, %v1568_v14 }
  0x72   : > { %v16044_v56 = vsel %vm10418_vm2, 4294967295, %v16043_v56  ;;  %v8944_v27 = vrot.slane %v1930_v8, 9  ;;  %v874_v53 = vld [vmem:[#allocation2 + $0x6c] sm:$0xf]  ;;  %v660_v31 = vshll.u32 %v480_v30, 16  ;;  %v645_v13 = vor.u32 %v643_v20, %v642_v49 }
  0x73   : > { %16045 = vst [vmem:[#allocation10_spill] sm:$0xff] %v16044_v56  ;;  %v878_v12 = vld [vmem:[#allocation2 + $0x74] sm:$0x1]  ;;  %v875_v63 = vsel %vm10041_vm11, %v637_v16, %v874_v53  ;;  %v651_v6 = vrot.slane %v649_v45, 7  ;;  %1322 = vrot.lane.b32.xlu0 %v1216_v26, %s9807_s21  ;;  %1324 = vrot.lane.b32.xlu1 %v1223_v9, %s9807_s21  ;;  %v1233_v62 = vrot.slane %v10299_v39, 4  ;;  %v16046_v29 = vmov 0 }
  0x74   : > { %v879_v37 = vsel %vm10093_vm12, %v647_v60, %v878_v12  ;;  %v16047_v29 = vsel %vm10431_vm6, 4294967295, %v16046_v29  ;;  %v2001_v36 = vrot.slane %v1999_v48, 4  ;;  %v2002_v51 = vrot.slane %v10368_v57, 5  ;;  %876 = vst [vmem:[#allocation2 + $0x6c] sm:$0xf] %v875_v63 }
  0x75   : > { %16048 = vst [vmem:[#allocation11_spill] sm:$0xff] %v16047_v29  ;;  %880 = vst [vmem:[#allocation2 + $0x74] sm:$0x1] %v879_v37  ;;  %v659_v11 = vrot.slane %v657_v38, 7  ;;  %v646_v39 = vsel %vm9898_vm9, %v638_v35, %v645_v13  ;;  %v655_v0 = vrot.slane %v651_v6, 4  ;;  %v2000_v61 = vsel %vm10431_vm6, %v8944_v27, %v1999_v48 }
  0x76   : > { %877 = vst.msk [vmem:[#allocation2 + $0x70] sm:$0xf] %vm15962_vm5, %v646_v39  ;;  %v317_v57 = vld [vmem:[#allocation2 + $0x80] sm:$0x1]  ;;  %v262_v42 = vsel %vm9856_vm3, 0, %v261_v23  ;;  %v9008_v21 = vcombine.low %v1559_v47, %v1569_v58  ;;  %v2003_v41 = vsel %vm10431_vm6, %v2001_v36, %v2002_v51  ;;  %v652_v17 = vshll.u32 %v479_v18, 16 }
  0x77   : > { %v662_v3 = vor.u32 %v660_v31, %v659_v11  ;;  %v318_v10 = vsel %vm10012_vm10, 0, %v317_v57  ;;  %1326 = vrot.lane.b32.xlu0 %v1232_v55, %s9807_s21  ;;  %1328 = vrot.lane.b32.xlu1 %v1233_v62, %s9807_s21  ;;  %263 = vst [vmem:[#allocation2 + $0x78] sm:$0x1] %v262_v42  ;;  %v481_v33 = vld [vmem:[%s9957_s24 + $0x50] sm:$0xf]  ;;  %v9024_v34 = vcombine.low %v2000_v61, %v2003_v41  ;;  %v265_v50 = vsel %vm9856_vm3, 0, %v264_v52 }
  0x78   : > { %319 = vst [vmem:[#allocation2 + $0x80] sm:$0x1] %v318_v10  ;;  %v320_v32 = vld [vmem:[#allocation2 + $0x8c] sm:$0x1]  ;;  %v666_v5 = vshrl.u32 %v481_v33, 16  ;;  %v654_v26 = vor.u32 %v652_v17, %v651_v6  ;;  %v664_v25 = vrot.slane %v659_v11, 4 }
  0x79   : > { %v663_v22 = vsel %vm9898_vm9, %v655_v0, %v662_v3  ;;  %266 = vst [vmem:[#allocation2 + $0x84] sm:$0x1] %v265_v50  ;;  %v669_v19 = vshll.u32 %v481_v33, 16  ;;  %v321_v49 = vsel %vm10012_vm10, 0, %v320_v32  ;;  %v482_v7 = vld [vmem:[%s9957_s24 + $0x54] sm:$0xf] }
  0x7a   : > { %884 = vst.msk [vmem:[#allocation2 + $0x7c] sm:$0xf] %vm15962_vm5, %v663_v22  ;;  %v668_v8 = vrot.slane %v666_v5, 7  ;;  %322 = vst [vmem:[#allocation2 + $0x8c] sm:$0x1] %v321_v49  ;;  %v674_v48 = vshrl.u32 %v482_v7, 16 }
  0x7b   : > { %3438 = vrot.lane.b32.xlu0 %v9008_v21, %s9808_s25  ;;  %v677_v9 = vshll.u32 %v482_v7, 16  ;;  %v483_v28 = vld [vmem:[%s9957_s24 + $0x58] sm:$0xf]  ;;  %v484_v14 = vld [vmem:[%s9957_s24 + $0x5c] sm:$0xf]  ;;  %vm1385_vm13 = vcmask 57376  }
  0x7c   : > { %v676_v16 = vrot.slane %v674_v48, 7  ;;  %v672_v59 = vrot.slane %v668_v8, 4  ;;  %v671_v60 = vor.u32 %v669_v19, %v668_v8  ;;  %v683_v18 = vshrl.u32 %v483_v28, 16  ;;  %v267_v12 = vld [vmem:[#allocation2 + $0x90] sm:$0x1]  ;;  %vm10509_vm4 = vmand %vm1385_vm13, %vm229_vm1 }
  0x7d   : > { %v691_v20 = vshrl.u32 %v484_v14, 16  ;;  %v694_v45 = vshll.u32 %v484_v14, 16  ;;  %v268_v13 = vsel %vm9856_vm3, 0, %v267_v12  ;;  %v323_v6 = vld [vmem:[#allocation2 + $0x98] sm:$0x1]  ;;  %v686_v36 = vshll.u32 %v483_v28, 16 }
  0x7e   : > { %v881_v54 = vld [vmem:[#allocation2 + $0x78] sm:$0xf]  ;;  %v681_v30 = vrot.slane %v676_v16, 4  ;;  %v679_v35 = vor.u32 %v677_v9, %v676_v16  ;;  %v685_v38 = vrot.slane %v683_v18, 7  ;;  %269 = vst [vmem:[#allocation2 + $0x90] sm:$0x1] %v268_v13 }
  0x7f   : > { %v885_v46 = vld [vmem:[#allocation2 + $0x80] sm:$0x1]  ;;  %3518 = vrot.lane.b32.xlu0 %v9024_v34, %s9809_s26  ;;  %v882_v1 = vsel %vm10041_vm11, %v654_v26, %v881_v54  ;;  %v693_v53 = vrot.slane %v691_v20, 7  ;;  %v324_v11 = vsel %vm10012_vm10, 0, %v323_v6  ;;  %v270_v58 = vld [vmem:[#allocation2 + $0x9c] sm:$0x1] }
  0x80   : > { %v886_v43 = vsel %vm10093_vm12, %v664_v25, %v885_v46  ;;  %883 = vst [vmem:[#allocation2 + $0x78] sm:$0xf] %v882_v1  ;;  %v888_v55 = vld [vmem:[#allocation2 + $0x84] sm:$0xf]  ;;  %v680_v27 = vsel %vm9898_vm9, %v672_v59, %v679_v35  ;;  %v689_v37 = vrot.slane %v685_v38, 4  ;;  %v271_v3 = vsel %vm9856_vm3, 0, %v270_v58 }
  0x81   : > { %887 = vst [vmem:[#allocation2 + $0x80] sm:$0x1] %v886_v43  ;;  %v889_v31 = vsel %vm10041_vm11, %v671_v60, %v888_v55  ;;  %v892_v63 = vld [vmem:[#allocation2 + $0x8c] sm:$0x1]  ;;  %891 = vst.msk [vmem:[#allocation2 + $0x88] sm:$0xf] %vm15962_vm5, %v680_v27  ;;  %v696_v51 = vor.u32 %v694_v45, %v693_v53  ;;  %v688_v57 = vor.u32 %v686_v36, %v685_v38 }
  0x82   : > { %890 = vst [vmem:[#allocation2 + $0x84] sm:$0xf] %v889_v31  ;;  %v893_v62 = vsel %vm10093_vm12, %v681_v30, %v892_v63  ;;  %325 = vst [vmem:[#allocation2 + $0x98] sm:$0x1] %v324_v11  ;;  %v485_v39 = vld [vmem:[%s9957_s24 + $0x60] sm:$0xf] }
  0x83   : > { %894 = vst [vmem:[#allocation2 + $0x8c] sm:$0x1] %v893_v62  ;;  %v697_v47 = vsel %vm9898_vm9, %v689_v37, %v696_v51  ;;  %v326_v0 = vld [vmem:[#allocation2 + $0xa4] sm:$0x1]  ;;  %v700_v23 = vshrl.u32 %v485_v39, 16  ;;  %v703_v61 = vshll.u32 %v485_v39, 16 }
  0x84   : > { %898 = vst.msk [vmem:[#allocation2 + $0x94] sm:$0xf] %vm15962_vm5, %v697_v47  ;;  %272 = vst [vmem:[#allocation2 + $0x9c] sm:$0x1] %v271_v3  ;;  %v327_v42 = vsel %vm10012_vm10, 0, %v326_v0  ;;  %v698_v41 = vrot.slane %v693_v53, 4 }
  0x85   : > { %v486_v10 = vld [vmem:[%s9957_s24 + $0x64] sm:$0xf]  ;;  %v1390_v21 = vld [vmem:[#allocation2 + $0x18] sm:$0xf]  ;;  %v702_v17 = vrot.slane %v700_v23, 7  ;;  %vm15967_vm1 = vcmask 64512  }
  0x86   : > { %328 = vst [vmem:[#allocation2 + $0xa4] sm:$0x1] %v327_v42  ;;  %v708_v22 = vshrl.u32 %v486_v10, 16  ;;  %v711_v52 = vshll.u32 %v486_v10, 16  ;;  %v487_v33 = vld [vmem:[%s9957_s24 + $0x68] sm:$0xf] }
  0x87   : > { %v488_v32 = vld [vmem:[%s9957_s24 + $0x6c] sm:$0xf]  ;;  %v895_v5 = vld [vmem:[#allocation2 + $0x90] sm:$0xf]  ;;  %v706_v25 = vrot.slane %v702_v17, 4  ;;  %v705_v7 = vor.u32 %v703_v61, %v702_v17  ;;  %v717_v8 = vshrl.u32 %v487_v33, 16 }
  0x88   : > { %v1380_v50 = vld [vmem:[#allocation2 + $0xc] sm:$0xf]  ;;  %v710_v26 = vrot.slane %v708_v22, 7  ;;  %v896_v19 = vsel %vm10041_vm11, %v688_v57, %v895_v5  ;;  %v720_v48 = vshll.u32 %v487_v33, 16  ;;  %v725_v16 = vshrl.u32 %v488_v32, 16 }
  0x89   : > { %v899_v49 = vld [vmem:[#allocation2 + $0x98] sm:$0x1]  ;;  %897 = vst [vmem:[#allocation2 + $0x90] sm:$0xf] %v896_v19  ;;  %v1387_v43 = vld [vmem:[#allocation2 + $0x14] sm:$0x1] }
  0x8a   : > { %v900_v14 = vsel %vm10093_vm12, %v698_v41, %v899_v49  ;;  %v715_v54 = vrot.slane %v710_v26, 4  ;;  %v713_v46 = vor.u32 %v711_v52, %v710_v26  ;;  %v719_v60 = vrot.slane %v717_v8, 7  ;;  %v1394_v35 = vld [vmem:[#allocation2 + $0x20] sm:$0x1]  ;;  %v273_v31 = vld [vmem:[#allocation2 + $0xa8] sm:$0x1] }
  0x8b   : > { %901 = vst [vmem:[#allocation2 + $0x98] sm:$0x1] %v900_v14  ;;  %v728_v18 = vshll.u32 %v488_v32, 16  ;;  %v902_v20 = vld [vmem:[#allocation2 + $0x9c] sm:$0xf]  ;;  %v10515_v38 = vrot.slane %v725_v16, 7 }
  0x8c   : > { %v714_v45 = vsel %vm9898_vm9, %v706_v25, %v713_v46  ;;  %v903_v55 = vsel %vm10041_vm11, %v705_v7, %v902_v20  ;;  %v10520_v53 = vor.u32 %v720_v48, %v719_v60  ;;  %v723_v12 = vrot.slane %v719_v60, 4  ;;  %v329_v36 = vld [vmem:[#allocation2 + $0xb0] sm:$0x1]  ;;  %v1397_v58 = vld [vmem:[#allocation2 + $0x24] sm:$0xf] }
  0x8d   : > { %v1241_v9 = vpop.permute.xlu1 %1240  ;;  %v1235_v28 = vpop.permute.xlu0 %1234  ;;  %16053 = vst [vmem:[#allocation12_spill] sm:$0xff] %v10515_v38  ;;  %v906_v27 = vld [vmem:[#allocation2 + $0xa4] sm:$0x1]  ;;  %905 = vst.msk [vmem:[#allocation2 + $0xa0] sm:$0xf] %vm15962_vm5, %v714_v45  ;;  %v730_v6 = vor.u32 %v728_v18, %v10515_v38  ;;  %v274_v62 = vsel %vm9856_vm3, 0, %v273_v31 }
  0x8e   : > { %v1391_v59 = vsel %vm10495_vm14, %v1241_v9, %v1390_v21  ;;  %v1381_v1 = vsel %vm10495_vm14, %v1235_v28, %v1380_v50  ;;  %16054 = vst [vmem:[#allocation13_spill] sm:$0xff] %v10520_v53  ;;  %904 = vst [vmem:[#allocation2 + $0x9c] sm:$0xf] %v903_v55  ;;  %v907_v13 = vsel %vm10093_vm12, %v715_v54, %v906_v27  ;;  %v330_v47 = vsel %vm10012_vm10, 0, %v329_v36  ;;  %v1404_v19 = vld [vmem:[#allocation2 + $0x30] sm:$0xf] }
  0x8f   : > { %1392 = vst [vmem:[#allocation2 + $0x18] sm:$0xf] %v1391_v59  ;;  %1382 = vst [vmem:[#allocation2 + $0xc] sm:$0xf] %v1381_v1  ;;  %v731_v39 = vsel %vm9898_vm9, %v723_v12, %v730_v6  ;;  %v1401_v49 = vld [vmem:[#allocation2 + $0x2c] sm:$0x1] }
  0x90   : > { %908 = vst [vmem:[#allocation2 + $0xa4] sm:$0x1] %v907_v13  ;;  %275 = vst [vmem:[#allocation2 + $0xa8] sm:$0x1] %v274_v62  ;;  %v1408_v5 = vld [vmem:[#allocation2 + $0x38] sm:$0x1] }
  0x91   : > { %v1239_v63 = vpop.permute.xlu1 %1238  ;;  %v1245_v37 = vpop.permute.xlu0 %1244  ;;  %331 = vst [vmem:[#allocation2 + $0xb0] sm:$0x1] %v330_v47  ;;  %912 = vst.msk [vmem:[#allocation2 + $0xac] sm:$0xf] %vm15962_vm5, %v731_v39  ;;  %vm15965_vm0 = vcmask 195584   ;;  %vm15963_vm13 = vcmask 261120  }
  0x92   : > { %v1388_v51 = vsel %vm10509_vm4, %v1239_v63, %v1387_v43  ;;  %v1395_v11 = vsel %vm10509_vm4, %v1245_v37, %v1394_v35  ;;  %v1411_v37 = vld [vmem:[#allocation2 + $0x3c] sm:$0xf] }
  0x93   : > { %1389 = vst [vmem:[#allocation2 + $0x14] sm:$0x1] %v1388_v51  ;;  %1396 = vst [vmem:[#allocation2 + $0x20] sm:$0x1] %v1395_v11 }
  0x95   : > { %v1247_v0 = vpop.permute.xlu1 %1246  ;;  %v1237_v3 = vpop.permute.xlu0 %1236 }
  0x96   : > { %v1398_v23 = vsel %vm10495_vm14, %v1247_v0, %v1397_v58  ;;  %1384 = vst.msk [vmem:[#allocation2 + $0x10] sm:$0xf] %vm1378_vm8, %v1237_v3  ;;  %v2109_v57 = vld [vmem:[#allocation2 + $0xc] sm:$0xf]  ;;  %v10539_v61 = vld [vmem:[#allocation2 + $0x18] sm:$0xf] }
  0x97   : > { %v10541_v42 = vld [vmem:[#allocation2 + $0x18] sm:$0xf]  ;;  %1399 = vst [vmem:[#allocation2 + $0x24] sm:$0xf] %v1398_v23  ;;  %v2158_v10 = vshrl.u32 %v2109_v57, 16  ;;  %v2161_v21 = vshll.u32 %v2109_v57, 16 }
  0x98   : > { %v2182_v41 = vshrl.u32 %v10539_v61, 16  ;;  %v2185_v17 = vshll.u32 %v10539_v61, 16  ;;  %v10545_v22 = vld [vmem:[#allocation2 + $0xc] sm:$0xe]  ;;  %v2767_v52 = vshrl.u32 %v10541_v42, 16  ;;  %v2770_v33 = vshll.u32 %v10541_v42, 16 }
  0x99   : > { %v8960_v32 = vrot.slane %v10545_v22, 9  ;;  %v10550_v50 = vld [vmem:[#allocation2 + $0x18] sm:$0xe]  ;;  %v1249_v26 = vpop.permute.xlu1 %1248  ;;  %v1243_v25 = vpop.permute.xlu0 %1242  ;;  %v2160_v7 = vrot.slane %v2158_v10, 4  ;;  %v2163_v8 = vrot.slane %v2161_v21, 5 }
  0x9a   : > { %v10553_v48 = vrot.slane %v2182_v41, 4  ;;  %v10555_v9 = vrot.slane %v2185_v17, 5  ;;  %v10557_v28 = vld [vmem:[#allocation2 + $0xc] sm:$0xe]  ;;  %1400 = vst.msk [vmem:[#allocation2 + $0x28] sm:$0xf] %vm1378_vm8, %v1249_v26 }
  0x9b   : > { %1393 = vst.msk [vmem:[#allocation2 + $0x1c] sm:$0xf] %vm1378_vm8, %v1243_v25  ;;  %v10561_v14 = vrot.slane %v2767_v52, 4  ;;  %v10563_v54 = vrot.slane %v2770_v33, 5  ;;  %v10565_v46 = vld [vmem:[#allocation2 + $0x14] sm:$0x1]  ;;  %v2164_v55 = vor.u32 %v2163_v8, %v2160_v7 }
  0x9c   : > { %v10567_v16 = vld [vmem:[#allocation2 + $0x20] sm:$0x1]  ;;  %v2610_v59 = vrot.slane %v10565_v46, 5  ;;  %v8976_v1 = vrot.slane %v10550_v50, 9  ;;  %v10572_v60 = vld [vmem:[#allocation2 + $0x14] sm:$0x1] }
  0x9d   : > { %v3219_v43 = vrot.slane %v10567_v16, 5  ;;  %v8945_v18 = vrot.slane %v10557_v28, 9  ;;  %v2009_v35 = vrot.slane %v10572_v60, 5  ;;  %v10576_v20 = vld [vmem:[#allocation2 + $0x20] sm:$0x1]  ;;  %v1253_v12 = vpop.permute.xlu1 %1252  ;;  %v1251_v31 = vpop.permute.xlu0 %1250  ;;  %v10603_v52 = vrot.slane %v2164_v55, 4 }
  0x9e   : > { %v10578_v45 = vld [vmem:[#allocation2 + $0x18] sm:$0xe]  ;;  %v10581_v63 = vld [vmem:[#allocation2 + $0x10] sm:$0xf]  ;;  %v1405_v36 = vsel %vm10495_vm14, %v1253_v12, %v1404_v19  ;;  %v1402_v51 = vsel %vm10509_vm4, %v1251_v31, %v1401_v49  ;;  %v2720_v58 = vld [vmem:[#allocation2 + $0x24] sm:$0xf] }
  0x9f   : > { %v10583_v13 = vld [vmem:[#allocation2 + $0x10] sm:$0xf]  ;;  %v9040_v47 = vcombine.low %v2109_v57, %v10581_v63  ;;  %v10593_v39 = vld [vmem:[#allocation2 + $0x24] sm:$0xf]  ;;  %1406 = vst [vmem:[#allocation2 + $0x30] sm:$0xf] %v1405_v36 }
  0xa0   : > { %1403 = vst [vmem:[#allocation2 + $0x2c] sm:$0x1] %v1402_v51  ;;  %v2791_v0 = vshrl.u32 %v2720_v58, 16  ;;  %v2794_v3 = vshll.u32 %v2720_v58, 16  ;;  %v2206_v23 = vshrl.u32 %v10593_v39, 16  ;;  %v2209_v10 = vshll.u32 %v10593_v39, 16 }
  0xa1   : > { %v10597_v21 = vld [vmem:[#allocation2 + $0x24] sm:$0xe]  ;;  %3614 = vrot.lane.b32.xlu0 %v9040_v47, %s9810_s27  ;;  %v2607_v41 = vrot.slane %v10581_v63, 5  ;;  %v2006_v57 = vrot.slane %v10583_v13, 5  ;;  %v1259_v33 = vpop.permute.xlu1 %1258  ;;  %v1255_v26 = vpop.permute.xlu0 %1254  ;;  %v10609_v49 = vld [vmem:[#allocation2 + $0x28] sm:$0xf] }
  0xa2   : > { %v8977_v17 = vrot.slane %v10597_v21, 9  ;;  %v10605_v25 = vld [vmem:[#allocation2 + $0x1c] sm:$0xf]  ;;  %v1412_v12 = vsel %vm10495_vm14, %v1259_v33, %v1411_v37  ;;  %1407 = vst.msk [vmem:[#allocation2 + $0x34] sm:$0xf] %vm1378_vm8, %v1255_v26  ;;  %v10626_v8 = vrot.slane %v2791_v0, 4  ;;  %v9089_v33 = vcombine.low %v2720_v58, %v10609_v49 }
  0xa3   : > { %v10607_v19 = vld [vmem:[#allocation2 + $0x1c] sm:$0xf]  ;;  %v9041_v31 = vcombine.low %v10539_v61, %v10605_v25  ;;  %v10622_v51 = vld [vmem:[#allocation2 + $0x28] sm:$0xf]  ;;  %1413 = vst [vmem:[#allocation2 + $0x3c] sm:$0xf] %v1412_v12 }
  0xa4   : > { %v9088_v47 = vcombine.low %v10541_v42, %v10607_v19  ;;  %v10628_v7 = vrot.slane %v2794_v3, 5  ;;  %v10633_v61 = vrot.slane %v2206_v23, 4  ;;  %v10635_v26 = vrot.slane %v2209_v10, 5  ;;  %v10697_v11 = vld [vmem:[#allocation2 + $0x1c] sm:$0xf] }
  0xa5   : > { %3616 = vrot.lane.b32.xlu1 %v9041_v31, %s9810_s27  ;;  %v1261_v42 = vpop.permute.xlu1 %1260  ;;  %v1257_v0 = vpop.permute.xlu0 %1256  ;;  %v9042_v3 = vcombine.low %v10593_v39, %v10622_v51  ;;  %v10645_v31 = vsel %vm10431_vm6, %v8960_v32, %v2607_v41  ;;  %v2609_v58 = vrot.slane %v2607_v41, 4  ;;  %v3216_v23 = vrot.slane %v10607_v19, 5  ;;  %v1415_v41 = vld [vmem:[#allocation2 + $0x44] sm:$0x1] }
  0xa6   : > { %3870 = vrot.lane.b32.xlu0 %v9088_v47, %s9811_s28  ;;  %1414 = vst.msk [vmem:[#allocation2 + $0x40] sm:$0xf] %vm1378_vm8, %v1261_v42  ;;  %v1409_v10 = vsel %vm10509_vm4, %v1257_v0, %v1408_v5  ;;  %v2115_v47 = vld [vmem:[#allocation2 + $0x30] sm:$0xf]  ;;  %v10655_v39 = vsel %vm10431_vm6, %v8945_v18, %v2006_v57  ;;  %v2008_v22 = vrot.slane %v2006_v57, 4  ;;  %v3223_v32 = vrot.slane %v10609_v49, 5 }
  0xa7   : > { %v2722_v37 = vld [vmem:[#allocation2 + $0x30] sm:$0xf]  ;;  %1410 = vst [vmem:[#allocation2 + $0x38] sm:$0x1] %v1409_v10  ;;  %v2230_v12 = vshrl.u32 %v2115_v47, 16  ;;  %v2233_v55 = vshll.u32 %v2115_v47, 16  ;;  %v2611_v5 = vsel %vm10431_vm6, %v2609_v58, %v2610_v59  ;;  %v10667_v28 = vsel %vm10431_vm6, %v8976_v1, %v3216_v23 }
  0xa8   : > { %v2815_v36 = vshrl.u32 %v2722_v37, 16  ;;  %v2818_v42 = vshll.u32 %v2722_v37, 16  ;;  %v3218_v18 = vrot.slane %v3216_v23, 4  ;;  %v10673_v57 = vsel %vm10431_vm6, %v2008_v22, %v2009_v35  ;;  %v10695_v27 = vld [vmem:[#allocation2 + $0x2c] sm:$0x1] }
  0xa9   : > { %3872 = vrot.lane.b32.xlu1 %v9089_v33, %s9811_s28  ;;  %v1263_v33 = vpop.permute.xlu0 %1262  ;;  %v10676_v0 = vld [vmem:[#allocation2 + $0x34] sm:$0xf]  ;;  %v10678_v10 = vrot.slane %v2230_v12, 4  ;;  %v10680_v59 = vrot.slane %v2233_v55, 5  ;;  %v9072_v1 = vcombine.low %v10645_v31, %v2611_v5  ;;  %v10687_v23 = vpop.permute.xlu1 %1264  ;;  %v2614_v21 = vrot.slane %v10605_v25, 5 }
  0xaa   : > { %3618 = vrot.lane.b32.xlu0 %v9042_v3, %s9810_s27  ;;  %v10682_v50 = vld [vmem:[#allocation2 + $0x34] sm:$0xf]  ;;  %v1416_v35 = vsel %vm10509_vm4, %v1263_v33, %v1415_v41  ;;  %v9043_v22 = vcombine.low %v2115_v47, %v10676_v0  ;;  %v10693_v12 = vrot.slane %v2815_v36, 4  ;;  %v2724_v55 = vld [vmem:[#allocation2 + $0x3c] sm:$0xf]  ;;  %v10699_v31 = vrot.slane %v2818_v42, 5 }
  0xab   : > { %1417 = vst [vmem:[#allocation2 + $0x44] sm:$0x1] %v1416_v35  ;;  %v9090_v58 = vcombine.low %v2722_v37, %v10682_v50  ;;  %v2839_v62 = vshrl.u32 %v2724_v55, 16  ;;  %v10703_v41 = vld [vmem:[#allocation2 + $0x20] sm:$0x1]  ;;  %v2842_v36 = vshll.u32 %v2724_v55, 16  ;;  %v3220_v47 = vsel %vm10431_vm6, %v3218_v18, %v3219_v43 }
  0xac   : > { %v1932_v33 = vld [vmem:[#allocation2 + $0x18] sm:$0xe]  ;;  %v10714_v42 = vsel %vm10431_vm6, %v8977_v17, %v3223_v32  ;;  %v3225_v35 = vrot.slane %v3223_v32, 4  ;;  %v10716_v37 = vld [vmem:[#allocation2 + $0x28] sm:$0xf]  ;;  %v9120_v6 = vcombine.low %v10667_v28, %v3220_v47  ;;  %v3226_v43 = vrot.slane %v10695_v27, 5 }
  0xad   : > { %3620 = vrot.lane.b32.xlu1 %v9043_v22, %s9810_s27  ;;  %v1933_v3 = vld [vmem:[#allocation2 + $0x24] sm:$0xe]  ;;  %v10719_v5 = vld [vmem:[#allocation2 + $0x40] sm:$0xf]  ;;  %v10721_v22 = vrot.slane %v2839_v62, 4  ;;  %v1267_v18 = vpop.permute.xlu0 %1266  ;;  %v10726_v4 = vpop.permute.xlu1 %1270  ;;  %v10728_v17 = vrot.slane %v2842_v36, 5 }
  0xae   : > { %3874 = vrot.lane.b32.xlu0 %v9090_v58, %s9811_s28  ;;  %v9091_v40 = vcombine.low %v2724_v55, %v10719_v5  ;;  %v8946_v58 = vrot.slane %v1932_v33, 9  ;;  %v10732_v24 = vld [vmem:[#allocation2 + $0x2c] sm:$0x1]  ;;  %1421 = vst.msk [vmem:[#allocation2 + $0x4c] sm:$0xf] %vm1378_vm8, %v1267_v18  ;;  %v3227_v62 = vsel %vm10431_vm6, %v3225_v35, %v3226_v43  ;;  %v16057_v28 = vrot.slane %v10578_v45, 9 }
  0xaf   : > { %16055 = vst [vmem:[#allocation14_spill] sm:$0xff] %v10721_v22  ;;  %16056 = vst [vmem:[#allocation15_spill] sm:$0xff] %v10728_v17  ;;  %v2616_v2 = vrot.slane %v2614_v21, 4  ;;  %v2013_v36 = vrot.slane %v10697_v11, 5  ;;  %v10742_v15 = vld [vmem:[#allocation2 + $0x2c] sm:$0x1]  ;;  %v9121_v55 = vcombine.low %v10714_v42, %v3227_v62  ;;  %v16060_v22 = vcombine.low %v10655_v39, %v10673_v57 }
  0xb0   : > { %v2615_v47 = vsel %vm10431_vm6, %v16057_v28, %v2614_v21  ;;  %v2543_v32 = vld [vmem:[#allocation2 + $0x24] sm:$0xe]  ;;  %v2016_v33 = vrot.slane %v10703_v41, 5  ;;  %v8947_v18 = vrot.slane %v1933_v3, 9  ;;  %v2020_v35 = vrot.slane %v10716_v37, 5 }
  0xb1   : > { %3876 = vrot.lane.b32.xlu1 %v9091_v40, %s9811_s28  ;;  %v2544_v43 = vld [vmem:[#allocation2 + $0x30] sm:$0xe]  ;;  %v16058_v45 = vrot.slane %v10576_v20, 5  ;;  %v10755_v28 = vsel %vm10431_vm6, %v8946_v58, %v2013_v36  ;;  %v2015_v40 = vrot.slane %v2013_v36, 4  ;;  %v2023_v42 = vrot.slane %v10732_v24, 5  ;;  %v10760_v3 = vpop.permute.xlu0 %1268  ;;  %v1273_v38 = vpop.permute.xlu1 %1272 }
  0xb2   : > { %3774 = vrot.lane.b32.xlu0 %v9072_v1, %s9812_s29  ;;  %v10758_v62 = vld [vmem:[#allocation2 + $0x38] sm:$0x1]  ;;  %v2021_v1 = vsel %vm10431_vm6, %v8947_v18, %v2020_v35  ;;  %v2022_v53 = vrot.slane %v2020_v35, 4  ;;  %v8962_v17 = vrot.slane %v2543_v32, 9  ;;  %1428 = vst.msk [vmem:[#allocation2 + $0x58] sm:$0xf] %vm1378_vm8, %v1273_v38 }
  0xb3   : > { %v2618_v21 = vsel %vm10431_vm6, %v2616_v2, %v16058_v45  ;;  %16059 = vst [vmem:[#allocation16_spill] sm:$0xff] %v10758_v62  ;;  %v2017_v2 = vsel %vm10431_vm6, %v2015_v40, %v2016_v33  ;;  %v2621_v58 = vrot.slane %v10622_v51, 5  ;;  %v2624_v36 = vrot.slane %v10742_v15, 5  ;;  %v1497_v33 = vld [vmem:[#allocation2 + $0xc] sm:$0xf] }
  0xb4   : > { %v9073_v44 = vcombine.low %v2615_v47, %v2618_v21  ;;  %v8963_v45 = vrot.slane %v2544_v43, 9  ;;  %v9026_v47 = vcombine.low %v10755_v28, %v2017_v2  ;;  %v2024_v32 = vsel %vm10431_vm6, %v2022_v53, %v2023_v42 }
  0xb5   : > { %3520 = vrot.lane.b32.xlu1 %v16060_v22, %s9809_s26  ;;  %v2628_v38 = vrot.slane %v10676_v0, 5  ;;  %v2631_v18 = vrot.slane %v10758_v62, 5  ;;  %v9027_v35 = vcombine.low %v2021_v1, %v2024_v32  ;;  %v2622_v43 = vsel %vm10431_vm6, %v8962_v17, %v2621_v58  ;;  %v10782_v57 = vpop.permute.xlu0 %1274  ;;  %v10784_v22 = vpop.permute.xlu1 %1276 }
  0xb6   : > { %4030 = vrot.lane.b32.xlu0 %v9120_v6, %s9813_s30  ;;  %v2623_v21 = vrot.slane %v2621_v58, 4  ;;  %v2167_v39 = vshll.u32 %v10581_v63, 16  ;;  %16061 = vst [vmem:[#allocation17_spill] sm:$0xff] %v10784_v22  ;;  %v16062_v40 = vshrl.u32 %v10581_v63, 16  ;;  %v16063_v6 = vshll.u32 %v10565_v46, 16 }
  0xb7   : > { %v2629_v53 = vsel %vm10431_vm6, %v8963_v45, %v2628_v38  ;;  %v2630_v28 = vrot.slane %v2628_v38, 4  ;;  %v1571_v58 = vshrl.u32 %v1497_v33, 16  ;;  %v1574_v32 = vshll.u32 %v1497_v33, 16 }
  0xb8   : > { %v2173_v42 = vrot.slane %v16062_v40, 4  ;;  %v2179_v1 = vrot.slane %v16063_v6, 5  ;;  %v2625_v17 = vsel %vm10431_vm6, %v2623_v21, %v2624_v36  ;;  %v2169_v2 = vrot.slane %v2167_v39, 5 }
  0xb9   : > { %3776 = vrot.lane.b32.xlu1 %v9073_v44, %s9812_s29  ;;  %v9074_v62 = vcombine.low %v2622_v43, %v2625_v17  ;;  %v2632_v22 = vsel %vm10431_vm6, %v2630_v28, %v2631_v18  ;;  %v1580_v45 = vshll.u32 %v10583_v13, 16  ;;  %v1584_v63 = vshrl.u32 %v10583_v13, 16  ;;  %v1279_v33 = vpop.permute.xlu0 %1278  ;;  %v10803_v39 = vpop.permute.xlu1 %1282 }
  0xba   : > { %4032 = vrot.lane.b32.xlu0 %v9121_v55, %s9813_s30  ;;  %v9075_v46 = vcombine.low %v2629_v53, %v2632_v22  ;;  %v2170_v36 = vsel %vm10418_vm2, %v10603_v52, %v2169_v2  ;;  %v2174_v38 = vor.u32 %v2173_v42, %v2169_v2  ;;  %v1573_v21 = vrot.slane %v1571_v58, 4  ;;  %1435 = vst.msk [vmem:[#allocation2 + $0x64] sm:$0xf] %vm1378_vm8, %v1279_v33 }
  0xbb   : > { %v1576_v44 = vrot.slane %v1574_v32, 5  ;;  %v1582_v43 = vrot.slane %v1580_v45, 5  ;;  %v1586_v40 = vrot.slane %v1584_v63, 4  ;;  %v1590_v18 = vshll.u32 %v10572_v60, 16 }
  0xbc   : > { %v2175_v13 = vrot.slane %v2174_v38, 4  ;;  %v16064_v55 = vor.u32 %v10563_v54, %v10561_v14  ;;  %v2776_v53 = vshll.u32 %v10607_v19, 16  ;;  %v16065_v52 = vshrl.u32 %v10607_v19, 16 }
  0xbd   : > { %3524 = vrot.lane.b32.xlu1 %v9027_v35, %s9809_s26  ;;  %v1577_v42 = vor.u32 %v1576_v44, %v1573_v21  ;;  %v1587_v6 = vor.u32 %v1586_v40, %v1582_v43  ;;  %v1592_v17 = vrot.slane %v1590_v18, 5  ;;  %v2786_v2 = vshll.u32 %v10567_v16, 16  ;;  %v10822_v32 = vpop.permute.xlu0 %1280  ;;  %v1285_v35 = vpop.permute.xlu1 %1284 }
  0xbe   : > { %v2774_v22 = vrot.slane %v16064_v55, 4  ;;  %v2782_v28 = vrot.slane %v16065_v52, 4  ;;  %3522 = vrot.lane.b32.xlu0 %v9026_v47, %s9809_s26  ;;  %v2180_v60 = vsel %vm10418_vm2, %v2175_v13, %v2179_v1  ;;  %v2778_v58 = vrot.slane %v2776_v53, 5  ;;  %1442 = vst.msk [vmem:[#allocation2 + $0x70] sm:$0xf] %vm1378_vm8, %v1285_v35 }
  0xbf   : > { %v16066_v14 = vor.u32 %v10555_v9, %v10553_v48  ;;  %v2191_v19 = vshll.u32 %v10605_v25, 16  ;;  %v9056_v45 = vcombine.low %v2170_v36, %v2180_v60  ;;  %v1578_v63 = vrot.slane %v1577_v42, 4 }
  0xc0   : > { %v1588_v38 = vrot.slane %v1587_v6, 4  ;;  %v2788_v21 = vrot.slane %v2786_v2, 5  ;;  %v2779_v16 = vsel %vm10418_vm2, %v2774_v22, %v2778_v58  ;;  %v2783_v47 = vor.u32 %v2782_v28, %v2778_v58  ;;  %v1418_v6 = vld [vmem:[#allocation2 + $0x48] sm:$0xf] }
  0xc1   : > { %v2189_v54 = vrot.slane %v16066_v14, 4  ;;  %v2193_v1 = vrot.slane %v2191_v19, 5  ;;  %v16067_v33 = vshrl.u32 %v10605_v25, 16  ;;  %3780 = vrot.lane.b32.xlu1 %v9075_v46, %s9812_s29  ;;  %v1583_v9 = vsel %vm10418_vm2, %v1578_v63, %v1582_v43  ;;  %v10840_v46 = vpop.permute.xlu0 %1286  ;;  %v10842_v22 = vpop.permute.xlu1 %1288  ;;  %v1422_v14 = vld [vmem:[#allocation2 + $0x50] sm:$0x1] }
  0xc2   : > { %v1593_v36 = vsel %vm10418_vm2, %v1588_v38, %v1592_v17  ;;  %v2201_v44 = vshll.u32 %v10576_v20, 16  ;;  %v2212_v40 = vor.u32 %v10635_v26, %v10633_v61  ;;  %3778 = vrot.lane.b32.xlu0 %v9074_v62, %s9812_s29  ;;  %v2784_v13 = vrot.slane %v2783_v47, 4  ;;  %v1499_v47 = vld [vmem:[#allocation2 + $0x18] sm:$0xf] }
  0xc3   : > { %v2197_v48 = vrot.slane %v16067_v33, 4  ;;  %v9009_v18 = vcombine.low %v1583_v9, %v1593_v36  ;;  %v2194_v25 = vsel %vm10418_vm2, %v2189_v54, %v2193_v1  ;;  %v2215_v52 = vshll.u32 %v10622_v51, 16 }
  0xc4   : > { %v2203_v43 = vrot.slane %v2201_v44, 5  ;;  %v2213_v53 = vrot.slane %v2212_v40, 4  ;;  %v16068_v20 = vshrl.u32 %v10622_v51, 16  ;;  %v2789_v61 = vsel %vm10418_vm2, %v2784_v13, %v2788_v21 }
  0xc5   : > { %v2198_v55 = vor.u32 %v2197_v48, %v2193_v1  ;;  %v2225_v62 = vshll.u32 %v10742_v15, 16  ;;  %v2797_v42 = vor.u32 %v10628_v7, %v10626_v8  ;;  %3440 = vrot.lane.b32.xlu1 %v9009_v18, %s9808_s25  ;;  %v9104_v17 = vcombine.low %v2779_v16, %v2789_v61  ;;  %v1291_v8 = vpop.permute.xlu0 %1290  ;;  %v10860_v35 = vpop.permute.xlu1 %1294  ;;  %v10864_v16 = vld [vmem:[#allocation2 + $0x38] sm:$0x1] }
  0xc6   : > { %v2221_v28 = vrot.slane %v16068_v20, 4  ;;  %v2217_v2 = vrot.slane %v2215_v52, 5  ;;  %v2800_v60 = vshll.u32 %v10609_v49, 16  ;;  %v16069_v58 = vshrl.u32 %v10609_v49, 16  ;;  %3694 = vrot.lane.b32.xlu0 %v9056_v45, %s9814_s5  ;;  %1449 = vst.msk [vmem:[#allocation2 + $0x7c] sm:$0xf] %vm1378_vm8, %v1291_v8 }
  0xc7   : > { %v2199_v26 = vrot.slane %v2198_v55, 4  ;;  %v2227_v54 = vrot.slane %v2225_v62, 5  ;;  %v2798_v19 = vrot.slane %v2797_v42, 4  ;;  %v2810_v7 = vshll.u32 %v10695_v27, 16  ;;  %v1425_v52 = vld [vmem:[#allocation2 + $0x54] sm:$0xf] }
  0xc8   : > { %v2806_v51 = vrot.slane %v16069_v58, 4  ;;  %v2218_v38 = vsel %vm10418_vm2, %v2213_v53, %v2217_v2  ;;  %v2222_v49 = vor.u32 %v2221_v28, %v2217_v2  ;;  %v2802_v21 = vrot.slane %v2800_v60, 5  ;;  %v1429_v62 = vld [vmem:[#allocation2 + $0x5c] sm:$0x1]  ;;  %v3152_v60 = vld [vmem:[#allocation2 + $0x30] sm:$0xe] }
  0xc9   : > { %v2204_v15 = vsel %vm10418_vm2, %v2199_v26, %v2203_v43  ;;  %v2812_v45 = vrot.slane %v2810_v7, 5  ;;  %v1419_v1 = vsel %vm10495_vm14, %v10687_v23, %v1418_v6  ;;  %v1423_v27 = vsel %vm10509_vm4, %v10760_v3, %v1422_v14  ;;  %v10883_v18 = vpop.permute.xlu0 %1292  ;;  %v1297_v13 = vpop.permute.xlu1 %1296 }
  0xca   : > { %v9057_v63 = vcombine.low %v2194_v25, %v2204_v15  ;;  %v2821_v33 = vor.u32 %v10699_v31, %v10693_v12  ;;  %v2223_v48 = vrot.slane %v2222_v49, 4  ;;  %v2803_v9 = vsel %vm10418_vm2, %v2798_v19, %v2802_v21  ;;  %1420 = vst [vmem:[#allocation2 + $0x48] sm:$0xf] %v1419_v1  ;;  %1424 = vst [vmem:[#allocation2 + $0x50] sm:$0x1] %v1423_v27 }
  0xcb   : > { %v2807_v36 = vor.u32 %v2806_v51, %v2802_v21  ;;  %v2824_v44 = vshll.u32 %v10682_v50, 16  ;;  %3950 = vrot.lane.b32.xlu0 %v9104_v17, %s9815_s6  ;;  %v16070_v3 = vshrl.u32 %v10682_v50, 16  ;;  %v2834_v12 = vshll.u32 %v10864_v16, 16  ;;  %1456 = vst.msk [vmem:[#allocation2 + $0x88] sm:$0xf] %vm1378_vm8, %v1297_v13 }
  0xcc   : > { %3696 = vrot.lane.b32.xlu1 %v9057_v63, %s9814_s5  ;;  %v2822_v23 = vrot.slane %v2821_v33, 4  ;;  %v1595_v31 = vshrl.u32 %v1499_v47, 16  ;;  %v2228_v25 = vsel %vm10418_vm2, %v2223_v48, %v2227_v54  ;;  %v1598_v53 = vshll.u32 %v1499_v47, 16  ;;  %v1501_v54 = vld [vmem:[#allocation2 + $0x24] sm:$0xf] }
  0xcd   : > { %v2830_v40 = vrot.slane %v16070_v3, 4  ;;  %v2808_v55 = vrot.slane %v2807_v36, 4  ;;  %v2826_v43 = vrot.slane %v2824_v44, 5  ;;  %v9058_v20 = vcombine.low %v2218_v38, %v2228_v25  ;;  %v10896_v19 = vpop.permute.xlu0 %1298  ;;  %v10898_v7 = vpop.permute.xlu1 %1300  ;;  %v3153_v36 = vld [vmem:[#allocation2 + $0x3c] sm:$0xe] }
  0xce   : > { %v2836_v28 = vrot.slane %v2834_v12, 5  ;;  %v1597_v61 = vrot.slane %v1595_v31, 4  ;;  %v1604_v26 = vshll.u32 %v10697_v11, 16  ;;  %v1600_v2 = vrot.slane %v1598_v53, 5 }
  0xcf   : > { %v2813_v42 = vsel %vm10418_vm2, %v2808_v55, %v2812_v45  ;;  %v2827_v6 = vsel %vm10418_vm2, %v2822_v23, %v2826_v43  ;;  %v2831_v17 = vor.u32 %v2830_v40, %v2826_v43  ;;  %3698 = vrot.lane.b32.xlu0 %v9058_v20, %s9814_s5  ;;  %v1608_v14 = vshrl.u32 %v10697_v11, 16  ;;  %v10924_v55 = vld [vmem:[#allocation2 + $0x44] sm:$0x1] }
  0xd0   : > { %v9105_v58 = vcombine.low %v2803_v9, %v2813_v42  ;;  %v1606_v51 = vrot.slane %v1604_v26, 5  ;;  %v1614_v15 = vshll.u32 %v10703_v41, 16  ;;  %v1601_v63 = vor.u32 %v1600_v2, %v1597_v61 }
  0xd1   : > { %v2832_v8 = vrot.slane %v2831_v17, 4  ;;  %v1426_v38 = vsel %vm10495_vm14, %v10726_v4, %v1425_v52  ;;  %v1430_v49 = vsel %vm10509_vm4, %v10782_v57, %v1429_v62  ;;  %v1610_v11 = vrot.slane %v1608_v14, 4  ;;  %v1303_v44 = vpop.permute.xlu0 %1302  ;;  %v10913_v23 = vpop.permute.xlu1 %1306 }
  0xd2   : > { %3952 = vrot.lane.b32.xlu1 %v9105_v58, %s9815_s6  ;;  %v1616_v21 = vrot.slane %v1614_v15, 5  ;;  %1427 = vst [vmem:[#allocation2 + $0x54] sm:$0xf] %v1426_v38  ;;  %1431 = vst [vmem:[#allocation2 + $0x5c] sm:$0x1] %v1430_v49  ;;  %v8978_v41 = vrot.slane %v3152_v60, 9  ;;  %v2236_v2 = vor.u32 %v10680_v59, %v10678_v10 }
  0xd3   : > { %v3230_v47 = vrot.slane %v10682_v50, 5  ;;  %v2837_v45 = vsel %vm10418_vm2, %v2832_v8, %v2836_v28  ;;  %v1602_v1 = vrot.slane %v1601_v63, 4  ;;  %v3233_v27 = vrot.slane %v10864_v16, 5  ;;  %1463 = vst.msk [vmem:[#allocation2 + $0x94] sm:$0xf] %vm1378_vm8, %v1303_v44  ;;  %v16072_v59 = vld [vmem:[#allocation16_spill] sm:$0xff] }
  0xd4   : > { %v1619_v4 = vshrl.u32 %v1501_v54, 16  ;;  %v9106_v33 = vcombine.low %v2827_v6, %v2837_v45  ;;  %v1611_v48 = vor.u32 %v1610_v11, %v1606_v51  ;;  %v1622_v40 = vshll.u32 %v1501_v54, 16  ;;  %v1432_v60 = vld [vmem:[#allocation2 + $0x60] sm:$0xf]  ;;  %v1436_v54 = vld [vmem:[#allocation2 + $0x68] sm:$0x1] }
  0xd5   : > { %v3231_v57 = vsel %vm10431_vm6, %v8978_v41, %v3230_v47  ;;  %v3232_v9 = vrot.slane %v3230_v47, 4  ;;  %v1607_v50 = vsel %vm10418_vm2, %v1602_v1, %v1606_v51  ;;  %v1628_v12 = vshll.u32 %v10716_v37, 16  ;;  %v10929_v42 = vpop.permute.xlu0 %1304  ;;  %v1309_v6 = vpop.permute.xlu1 %1308  ;;  %v1934_v11 = vld [vmem:[#allocation2 + $0x30] sm:$0xe]  ;;  %v16073_v45 = vld [vmem:[#allocation17_spill] sm:$0xff] }
  0xd6   : > { %v1621_v3 = vrot.slane %v1619_v4, 4  ;;  %3954 = vrot.lane.b32.xlu0 %v9106_v33, %s9815_s6  ;;  %v1612_v16 = vrot.slane %v1611_v48, 4  ;;  %v1632_v13 = vshrl.u32 %v10716_v37, 16  ;;  %v1638_v25 = vshll.u32 %v10732_v24, 16  ;;  %1470 = vst.msk [vmem:[#allocation2 + $0xa0] sm:$0xf] %vm1378_vm8, %v1309_v6 }
  0xd7   : > { %v3234_v31 = vsel %vm10431_vm6, %v3232_v9, %v3233_v27  ;;  %v1624_v53 = vrot.slane %v1622_v40, 5  ;;  %v1630_v52 = vrot.slane %v1628_v12, 5  ;;  %v8979_v20 = vrot.slane %v3153_v36, 9  ;;  %v10948_v27 = vld [vmem:[#allocation2 + $0x34] sm:$0xf] }
  0xd8   : > { %v9122_v43 = vcombine.low %v3231_v57, %v3234_v31  ;;  %v1617_v28 = vsel %vm10418_vm2, %v1612_v16, %v1616_v21  ;;  %v1634_v61 = vrot.slane %v1632_v13, 4  ;;  %v1640_v26 = vrot.slane %v1638_v25, 5  ;;  %v10950_v4 = vld [vmem:[#allocation2 + $0x38] sm:$0x1]  ;;  %v1439_v40 = vld [vmem:[#allocation2 + $0x6c] sm:$0xf] }
  0xd9   : > { %v3237_v62 = vrot.slane %v10719_v5, 5  ;;  %v9010_v17 = vcombine.low %v1607_v50, %v1617_v28  ;;  %v1625_v37 = vor.u32 %v1624_v53, %v1621_v3  ;;  %v3240_v24 = vrot.slane %v10924_v55, 5  ;;  %v10952_v33 = vpop.permute.xlu0 %1310  ;;  %v16074_v13 = vld [vmem:[#allocation14_spill] sm:$0xff]  ;;  %v16075_v25 = vld [vmem:[#allocation15_spill] sm:$0xff] }
  0xda   : > { %4034 = vrot.lane.b32.xlu0 %v9122_v43, %s9813_s30  ;;  %v1635_v58 = vor.u32 %v1634_v61, %v1630_v52  ;;  %v2239_v15 = vshll.u32 %v10676_v0, 16  ;;  %v2237_v63 = vrot.slane %v2236_v2, 4  ;;  %v16071_v38 = vshrl.u32 %v10676_v0, 16  ;;  %v1443_v43 = vld [vmem:[#allocation2 + $0x74] sm:$0x1] }
  0xdb   : > { %v3238_v51 = vsel %vm10431_vm6, %v8979_v20, %v3237_v62  ;;  %v3239_v14 = vrot.slane %v3237_v62, 4  ;;  %3442 = vrot.lane.b32.xlu1 %v9010_v17, %s9808_s25  ;;  %v1626_v8 = vrot.slane %v1625_v37, 4  ;;  %v2249_v49 = vshll.u32 %v16072_v59, 16  ;;  %v10978_v2 = vld [vmem:[#allocation2 + $0x40] sm:$0xf] }
  0xdc   : > { %v2245_v10 = vrot.slane %v16071_v38, 4  ;;  %v1636_v21 = vrot.slane %v1635_v58, 4  ;;  %v2241_v47 = vrot.slane %v2239_v15, 5  ;;  %v1433_v1 = vsel %vm10495_vm14, %v16073_v45, %v1432_v60 }
  0xdd   : > { %v3241_v41 = vsel %vm10431_vm6, %v3239_v14, %v3240_v24  ;;  %v1631_v0 = vsel %vm10418_vm2, %v1626_v8, %v1630_v52  ;;  %v2251_v57 = vrot.slane %v2249_v49, 5  ;;  %1434 = vst [vmem:[#allocation2 + $0x60] sm:$0xf] %v1433_v1  ;;  %v1437_v9 = vsel %vm10509_vm4, %v10822_v32, %v1436_v54  ;;  %v1315_v62 = vpop.permute.xlu0 %1314  ;;  %v10996_v1 = vld [vmem:[#allocation2 + $0x44] sm:$0x1] }
  0xde   : > { %v9123_v48 = vcombine.low %v3238_v51, %v3241_v41  ;;  %v1641_v36 = vsel %vm10418_vm2, %v1636_v21, %v1640_v26  ;;  %v2242_v44 = vsel %vm10418_vm2, %v2237_v63, %v2241_v47  ;;  %v2246_v50 = vor.u32 %v2245_v10, %v2241_v47  ;;  %1438 = vst [vmem:[#allocation2 + $0x68] sm:$0x1] %v1437_v9  ;;  %v2117_v26 = vld [vmem:[#allocation2 + $0x3c] sm:$0xf]  ;;  %v1503_v51 = vld [vmem:[#allocation2 + $0x30] sm:$0xf] }
  0xdf   : > { %v8948_v3 = vrot.slane %v1934_v11, 9  ;;  %v9011_v12 = vcombine.low %v1631_v0, %v1641_v36  ;;  %v2027_v16 = vrot.slane %v10948_v27, 5  ;;  %v2030_v31 = vrot.slane %v10950_v4, 5  ;;  %1477 = vst.msk [vmem:[#allocation2 + $0xac] sm:$0xf] %vm1378_vm8, %v1315_v62 }
  0xe0   : > { %4036 = vrot.lane.b32.xlu0 %v9123_v48, %s9813_s30  ;;  %v2845_v32 = vor.u32 %v16075_v25, %v16074_v13  ;;  %v2247_v53 = vrot.slane %v2246_v50, 4  ;;  %v2848_v52 = vshll.u32 %v10719_v5, 16  ;;  %v16076_v20 = vshrl.u32 %v10719_v5, 16  ;;  %v1505_v36 = vld [vmem:[#allocation2 + $0x3c] sm:$0xf] }
  0xe1   : > { %v2858_v61 = vshll.u32 %v10924_v55, 16  ;;  %3444 = vrot.lane.b32.xlu1 %v9011_v12, %s9808_s25  ;;  %v2028_v6 = vsel %vm10431_vm6, %v8948_v3, %v2027_v16  ;;  %v2029_v17 = vrot.slane %v2027_v16, 4  ;;  %v1440_v24 = vsel %vm10495_vm14, %v10803_v39, %v1439_v40  ;;  %v1506_v12 = vld [vmem:[#allocation2 + $0x40] sm:$0xf] }
  0xe2   : > { %v2854_v28 = vrot.slane %v16076_v20, 4  ;;  %v2846_v37 = vrot.slane %v2845_v32, 4  ;;  %v2252_v5 = vsel %vm10418_vm2, %v2247_v53, %v2251_v57  ;;  %v2850_v55 = vrot.slane %v2848_v52, 5  ;;  %1441 = vst [vmem:[#allocation2 + $0x6c] sm:$0xf] %v1440_v24 }
  0xe3   : > { %v2860_v60 = vrot.slane %v2858_v61, 5  ;;  %v1444_v58 = vsel %vm10509_vm4, %v10840_v46, %v1443_v43  ;;  %v9059_v14 = vcombine.low %v2242_v44, %v2252_v5  ;;  %v2031_v15 = vsel %vm10431_vm6, %v2029_v17, %v2030_v31  ;;  %v1446_v53 = vld [vmem:[#allocation2 + $0x78] sm:$0xf]  ;;  %v11007_v20 = vld [vmem:[#allocation2 + $0x44] sm:$0x1] }
  0xe4   : > { %1445 = vst [vmem:[#allocation2 + $0x74] sm:$0x1] %v1444_v58  ;;  %v2254_v39 = vshrl.u32 %v2117_v26, 16  ;;  %v2257_v54 = vshll.u32 %v2117_v26, 16  ;;  %v9028_v8 = vcombine.low %v2028_v6, %v2031_v15  ;;  %v2851_v63 = vsel %vm10418_vm2, %v2846_v37, %v2850_v55  ;;  %v1450_v24 = vld [vmem:[#allocation2 + $0x80] sm:$0x1] }
  0xe5   : > { %v2855_v38 = vor.u32 %v2854_v28, %v2850_v55  ;;  %v2267_v10 = vshrl.u32 %v10978_v2, 16  ;;  %3700 = vrot.lane.b32.xlu1 %v9059_v14, %s9814_s5  ;;  %v9044_v46 = vcombine.low %v2117_v26, %v10978_v2  ;;  %v1643_v11 = vshrl.u32 %v1503_v51, 16 }
  0xe6   : > { %v2256_v59 = vrot.slane %v2254_v39, 4  ;;  %v2259_v49 = vrot.slane %v2257_v54, 5  ;;  %3526 = vrot.lane.b32.xlu0 %v9028_v8, %s9809_s26  ;;  %v1646_v41 = vshll.u32 %v1503_v51, 16  ;;  %v1652_v47 = vshll.u32 %v10948_v27, 16  ;;  %v2545_v51 = vld [vmem:[#allocation2 + $0x3c] sm:$0xe] }
  0xe7   : > { %v2856_v21 = vrot.slane %v2855_v38, 4  ;;  %v1656_v45 = vshrl.u32 %v10948_v27, 16  ;;  %v1645_v0 = vrot.slane %v1643_v11, 4  ;;  %v1662_v48 = vshll.u32 %v10950_v4, 16 }
  0xe8   : > { %v2260_v57 = vor.u32 %v2259_v49, %v2256_v59  ;;  %v2263_v9 = vshll.u32 %v10978_v2, 16  ;;  %v1648_v50 = vrot.slane %v1646_v41, 5  ;;  %v1654_v3 = vrot.slane %v1652_v47, 5  ;;  %v1935_v59 = vld [vmem:[#allocation2 + $0x3c] sm:$0xe] }
  0xe9   : > { %v2861_v44 = vsel %vm10418_vm2, %v2856_v21, %v2860_v60  ;;  %v1658_v40 = vrot.slane %v1656_v45, 4  ;;  %v1664_v31 = vrot.slane %v1662_v48, 5  ;;  %v2269_v4 = vrot.slane %v2267_v10, 4  ;;  %v1457_v48 = vld [vmem:[#allocation2 + $0x8c] sm:$0x1] }
  0xea   : > { %v9107_v16 = vcombine.low %v2851_v63, %v2861_v44  ;;  %v2261_v13 = vrot.slane %v2260_v57, 4  ;;  %v2265_v27 = vrot.slane %v2263_v9, 5  ;;  %3622 = vrot.lane.b32.xlu0 %v9044_v46, %s9810_s27  ;;  %v1649_v25 = vor.u32 %v1648_v50, %v1645_v0  ;;  %v2726_v50 = vld [vmem:[#allocation2 + $0x48] sm:$0xf] }
  0xeb   : > { %v1659_v32 = vor.u32 %v1658_v40, %v1654_v3  ;;  %v2273_v43 = vshll.u32 %v10996_v1, 16  ;;  %v1667_v28 = vshrl.u32 %v1505_v36, 16  ;;  %v1670_v61 = vshll.u32 %v1505_v36, 16 }
  0xec   : > { %3956 = vrot.lane.b32.xlu1 %v9107_v16, %s9815_s6  ;;  %v2266_v52 = vsel %vm10418_vm2, %v2261_v13, %v2265_v27  ;;  %v1676_v26 = vshll.u32 %v1506_v12, 16  ;;  %v1650_v62 = vrot.slane %v1649_v25, 4  ;;  %v2270_v17 = vor.u32 %v2269_v4, %v2265_v27 }
  0xed   : > { %v1660_v6 = vrot.slane %v1659_v32, 4  ;;  %v2275_v37 = vrot.slane %v2273_v43, 5  ;;  %v1669_v5 = vrot.slane %v1667_v28, 4  ;;  %v1672_v55 = vrot.slane %v1670_v61, 5  ;;  %v2119_v43 = vld [vmem:[#allocation2 + $0x48] sm:$0xf] }
  0xee   : > { %v1678_v60 = vrot.slane %v1676_v26, 5  ;;  %v1680_v58 = vshrl.u32 %v1506_v12, 16  ;;  %v1655_v14 = vsel %vm10418_vm2, %v1650_v62, %v1654_v3  ;;  %v2271_v39 = vrot.slane %v2270_v17, 4  ;;  %v1464_v17 = vld [vmem:[#allocation2 + $0x98] sm:$0x1] }
  0xef   : > { %v1665_v15 = vsel %vm10418_vm2, %v1660_v6, %v1664_v31  ;;  %v1686_v54 = vshll.u32 %v11007_v20, 16  ;;  %v1673_v63 = vor.u32 %v1672_v55, %v1669_v5  ;;  %v1447_v10 = vsel %vm10495_vm14, %v10842_v22, %v1446_v53  ;;  %v1453_v22 = vld [vmem:[#allocation2 + $0x84] sm:$0xf]  ;;  %v11045_v53 = vld [vmem:[#allocation2 + $0x4c] sm:$0xf] }
  0xf0   : > { %v9012_v8 = vcombine.low %v1655_v14, %v1665_v15  ;;  %v1682_v38 = vrot.slane %v1680_v58, 4  ;;  %v2276_v49 = vsel %vm10418_vm2, %v2271_v39, %v2275_v37  ;;  %1448 = vst [vmem:[#allocation2 + $0x78] sm:$0xf] %v1447_v10  ;;  %v1451_v11 = vsel %vm10509_vm4, %v10883_v18, %v1450_v24  ;;  %v1460_v6 = vld [vmem:[#allocation2 + $0x90] sm:$0xf]  ;;  %v11051_v37 = vpop.permute.xlu0 %1316 }
  0xf1   : > { %v1688_v46 = vrot.slane %v1686_v54, 5  ;;  %v8964_v21 = vrot.slane %v2545_v51, 9  ;;  %v9060_v41 = vcombine.low %v2266_v52, %v2276_v49  ;;  %v1674_v47 = vrot.slane %v1673_v63, 4  ;;  %1452 = vst [vmem:[#allocation2 + $0x80] sm:$0x1] %v1451_v11 }
  0xf2   : > { %3446 = vrot.lane.b32.xlu1 %v9012_v8, %s9808_s25  ;;  %v1683_v45 = vor.u32 %v1682_v38, %v1678_v60  ;;  %v2635_v0 = vrot.slane %v10978_v2, 5  ;;  %v2638_v57 = vrot.slane %v10996_v1, 5  ;;  %v8949_v9 = vrot.slane %v1935_v59, 9  ;;  %v11031_v2 = vld [vmem:[#allocation2 + $0x4c] sm:$0xf] }
  0xf3   : > { %v2034_v36 = vrot.slane %v1506_v12, 5  ;;  %v2037_v44 = vrot.slane %v11007_v20, 5  ;;  %3702 = vrot.lane.b32.xlu0 %v9060_v41, %s9814_s5  ;;  %v1679_v18 = vsel %vm10418_vm2, %v1674_v47, %v1678_v60  ;;  %v1454_v12 = vsel %vm10495_vm14, %v10860_v35, %v1453_v22  ;;  %v2754_v58 = vld [vmem:[#allocation2 + $0x50] sm:$0x1]  ;;  %v3154_v59 = vld [vmem:[#allocation2 + $0x48] sm:$0xe] }
  0xf4   : > { %v1684_v3 = vrot.slane %v1683_v45, 4  ;;  %v2636_v40 = vsel %vm10431_vm6, %v8964_v21, %v2635_v0  ;;  %v2637_v16 = vrot.slane %v2635_v0, 4  ;;  %v1458_v13 = vsel %vm10509_vm4, %v10896_v19, %v1457_v48  ;;  %1455 = vst [vmem:[#allocation2 + $0x84] sm:$0xf] %v1454_v12  ;;  %v2146_v54 = vld [vmem:[#allocation2 + $0x50] sm:$0x1] }
  0xf5   : > { %v2035_v1 = vsel %vm10431_vm6, %v8949_v9, %v2034_v36  ;;  %v2036_v31 = vrot.slane %v2034_v36, 4  ;;  %1459 = vst [vmem:[#allocation2 + $0x8c] sm:$0x1] %v1458_v13  ;;  %v2863_v32 = vshrl.u32 %v2726_v50, 16  ;;  %v2866_v4 = vshll.u32 %v2726_v50, 16 }
  0xf6   : > { %v1689_v27 = vsel %vm10418_vm2, %v1684_v3, %v1688_v46  ;;  %v2639_v25 = vsel %vm10431_vm6, %v2637_v16, %v2638_v57  ;;  %v2876_v19 = vshrl.u32 %v11031_v2, 16  ;;  %v9092_v62 = vcombine.low %v2726_v50, %v11031_v2  ;;  %v2546_v22 = vld [vmem:[#allocation2 + $0x48] sm:$0xe]  ;;  %v11071_v50 = vpop.permute.xlu0 %1322  ;;  %v1467_v16 = vld [vmem:[#allocation2 + $0x9c] sm:$0xf] }
  0xf7   : > { %v9013_v52 = vcombine.low %v1679_v18, %v1689_v27  ;;  %v9076_v20 = vcombine.low %v2636_v40, %v2639_v25  ;;  %v2038_v35 = vsel %vm10431_vm6, %v2036_v31, %v2037_v44  ;;  %v2865_v61 = vrot.slane %v2863_v32, 4  ;;  %v11069_v44 = vpop.permute.xlu1 %1312  ;;  %v1471_v13 = vld [vmem:[#allocation2 + $0xa4] sm:$0x1] }
  0xf8   : > { %v9029_v28 = vcombine.low %v2035_v1, %v2038_v35  ;;  %v2868_v26 = vrot.slane %v2866_v4, 5  ;;  %v2278_v24 = vshrl.u32 %v2119_v43, 16  ;;  %v2281_v5 = vshll.u32 %v2119_v43, 16 }
  0xf9   : > { %3448 = vrot.lane.b32.xlu1 %v9013_v52, %s9808_s25  ;;  %3782 = vrot.lane.b32.xlu0 %v9076_v20, %s9812_s29  ;;  %v2291_v55 = vshrl.u32 %v11045_v53, 16  ;;  %v9045_v60 = vcombine.low %v2119_v43, %v11045_v53  ;;  %v2872_v14 = vshll.u32 %v11031_v2, 16  ;;  %v2878_v15 = vrot.slane %v2876_v19, 4  ;;  %v11080_v43 = vld [vmem:[#allocation2 + $0x58] sm:$0xf] }
  0xfa   : > { %v2869_v51 = vor.u32 %v2868_v26, %v2865_v61  ;;  %v2882_v39 = vshll.u32 %v2754_v58, 16  ;;  %v2280_v8 = vrot.slane %v2278_v24, 4  ;;  %v2283_v63 = vrot.slane %v2281_v5, 5  ;;  %v2755_v19 = vld [vmem:[#allocation2 + $0x5c] sm:$0x1] }
  0xfb   : > { %v2287_v38 = vshll.u32 %v11045_v53, 16  ;;  %v2293_v10 = vrot.slane %v2291_v55, 4  ;;  %v2874_v46 = vrot.slane %v2872_v14, 5  ;;  %v2297_v21 = vshll.u32 %v2146_v54, 16  ;;  %v1936_v24 = vld [vmem:[#allocation2 + $0x48] sm:$0xe]  ;;  %v11106_v14 = vpop.permute.xlu0 %1326 }
  0xfc   : > { %v2870_v49 = vrot.slane %v2869_v51, 4  ;;  %v2884_v11 = vrot.slane %v2882_v39, 5  ;;  %v2284_v41 = vor.u32 %v2283_v63, %v2280_v8  ;;  %v1461_v45 = vsel %vm10495_vm14, %v10898_v7, %v1460_v6  ;;  %v11104_v51 = vpop.permute.xlu1 %1318 }
  0xfd   : > { %3528 = vrot.lane.b32.xlu1 %v9029_v28, %s9809_s26  ;;  %3878 = vrot.lane.b32.xlu0 %v9092_v62, %s9811_s28  ;;  %v2289_v47 = vrot.slane %v2287_v38, 5  ;;  %v1465_v0 = vsel %vm10509_vm4, %v10929_v42, %v1464_v17  ;;  %v2879_v57 = vor.u32 %v2878_v15, %v2874_v46  ;;  %v2299_v9 = vrot.slane %v2297_v21, 5  ;;  %1462 = vst [vmem:[#allocation2 + $0x90] sm:$0xf] %v1461_v45  ;;  %v11089_v28 = vld [vmem:[#allocation2 + $0x54] sm:$0xf] }
  0xfe   : > { %v2875_v48 = vsel %vm10418_vm2, %v2870_v49, %v2874_v46  ;;  %1466 = vst [vmem:[#allocation2 + $0x98] sm:$0x1] %v1465_v0  ;;  %v8980_v36 = vrot.slane %v3154_v59, 9  ;;  %v2285_v18 = vrot.slane %v2284_v41, 4  ;;  %v3244_v7 = vrot.slane %v11031_v2, 5 }
  0xff   : > { %v2294_v3 = vor.u32 %v2293_v10, %v2289_v47  ;;  %v3247_v40 = vrot.slane %v2754_v58, 5  ;;  %v2880_v42 = vrot.slane %v2879_v57, 4  ;;  %v8965_v1 = vrot.slane %v2546_v22, 9  ;;  %v3155_v2 = vld [vmem:[#allocation2 + $0x54] sm:$0xe] }
 0x100   : > { %v2642_v31 = vrot.slane %v11045_v53, 5  ;;  %v2645_v12 = vrot.slane %v2146_v54, 5  ;;  %v2290_v27 = vsel %vm10418_vm2, %v2285_v18, %v2289_v47  ;;  %v3245_v32 = vsel %vm10431_vm6, %v8980_v36, %v3244_v7  ;;  %v11098_v17 = vld [vmem:[#allocation2 + $0x4c] sm:$0xf]  ;;  %v11102_v58 = vld [vmem:[#allocation2 + $0x50] sm:$0x1] }
 0x101   : > { %3624 = vrot.lane.b32.xlu1 %v9045_v60, %s9810_s27  ;;  %v2295_v25 = vrot.slane %v2294_v3, 4  ;;  %v3246_v4 = vrot.slane %v3244_v7, 4  ;;  %v2885_v52 = vsel %vm10418_vm2, %v2880_v42, %v2884_v11  ;;  %v1468_v35 = vsel %vm10495_vm14, %v10913_v23, %v1467_v16  ;;  %v909_v59 = vld [vmem:[#allocation2 + $0xa8] sm:$0xf]  ;;  %v913_v22 = vld [vmem:[#allocation2 + $0xb0] sm:$0x1] }
 0x102   : > { %v2643_v53 = vsel %vm10431_vm6, %v8965_v1, %v2642_v31  ;;  %v2644_v20 = vrot.slane %v2642_v31, 4  ;;  %v9108_v61 = vcombine.low %v2875_v48, %v2885_v52  ;;  %1469 = vst [vmem:[#allocation2 + $0x9c] sm:$0xf] %v1468_v35  ;;  %v1472_v6 = vsel %vm10509_vm4, %v10952_v33, %v1471_v13  ;;  %v16077_v36 = vld [vmem:[#allocation13_spill] sm:$0xff]  ;;  %v11129_v7 = vld [vmem:[#allocation2 + $0x54] sm:$0xf]  ;;  %v11136_v13 = vpop.permute.xlu1 %1320 }
 0x103   : > { %v2300_v26 = vsel %vm10418_vm2, %v2295_v25, %v2299_v9  ;;  %v3248_v62 = vsel %vm10431_vm6, %v3246_v4, %v3247_v40  ;;  %1473 = vst [vmem:[#allocation2 + $0xa4] sm:$0x1] %v1472_v6  ;;  %v8981_v60 = vrot.slane %v3155_v2, 9  ;;  %v3251_v33 = vrot.slane %v11080_v43, 5  ;;  %v11131_v40 = vld [vmem:[#allocation2 + $0x58] sm:$0xf] }
 0x104   : > { %v9061_v5 = vcombine.low %v2290_v27, %v2300_v26  ;;  %v9124_v23 = vcombine.low %v3245_v32, %v3248_v62  ;;  %v2646_v55 = vsel %vm10431_vm6, %v2644_v20, %v2645_v12  ;;  %3958 = vrot.lane.b32.xlu0 %v9108_v61, %s9815_s6  ;;  %v3254_v39 = vrot.slane %v2755_v19, 5  ;;  %v1507_v12 = vld [vmem:[#allocation2 + $0x48] sm:$0xf]  ;;  %v11138_v27 = vpop.permute.xlu0 %3438 }
 0x105   : > { %v9077_v15 = vcombine.low %v2643_v53, %v2646_v55  ;;  %v2887_v54 = vshrl.u32 %v11089_v28, 16  ;;  %v2890_v8 = vshll.u32 %v11089_v28, 16  ;;  %v9093_v63 = vcombine.low %v11089_v28, %v11080_v43 }
 0x106   : > { %3704 = vrot.lane.b32.xlu1 %v9061_v5, %s9814_s5  ;;  %v8950_v38 = vrot.slane %v1936_v24, 9  ;;  %v2041_v10 = vrot.slane %v11098_v17, 5  ;;  %v3252_v49 = vsel %vm10431_vm6, %v8981_v60, %v3251_v33  ;;  %v3253_v46 = vrot.slane %v3251_v33, 4  ;;  %v276_v24 = vld [vmem:[#allocation2 + $0xb4] sm:$0x1] }
 0x107   : > { %v2889_v11 = vrot.slane %v2887_v54, 4  ;;  %v2044_v21 = vrot.slane %v11102_v58, 5  ;;  %v2892_v41 = vrot.slane %v2890_v8, 5  ;;  %v2896_v0 = vshll.u32 %v11080_v43, 16  ;;  %v489_v5 = vld [vmem:[%s9957_s24 + $0x70] sm:$0xf] }
 0x108   : > { %v2042_v47 = vsel %vm10431_vm6, %v8950_v38, %v2041_v10  ;;  %v2043_v45 = vrot.slane %v2041_v10, 4  ;;  %4038 = vrot.lane.b32.xlu0 %v9124_v23, %s9813_s30  ;;  %v3255_v48 = vsel %vm10431_vm6, %v3253_v46, %v3254_v39  ;;  %v2900_v57 = vshrl.u32 %v11080_v43, 16  ;;  %v16079_v43 = vld [vmem:[#allocation12_spill] sm:$0xff]  ;;  %v332_v38 = vld [vmem:[#allocation2 + $0xbc] sm:$0x1] }
 0x109   : > { %v2906_v9 = vshll.u32 %v2755_v19, 16  ;;  %v910_v3 = vsel %vm10041_vm11, %v16077_v36, %v909_v59  ;;  %v9125_v16 = vcombine.low %v3252_v49, %v3255_v48  ;;  %v2893_v1 = vor.u32 %v2892_v41, %v2889_v11  ;;  %v11160_v11 = vld [vmem:[%s9957_s24 + $0x74] sm:$0xf]  ;;  %v11164_v41 = vpop.permute.xlu0 %3518 }
 0x10a   : > { %3784 = vrot.lane.b32.xlu1 %v9077_v15, %s9812_s29  ;;  %v2045_v42 = vsel %vm10431_vm6, %v2043_v45, %v2044_v21  ;;  %v2898_v31 = vrot.slane %v2896_v0, 5  ;;  %911 = vst [vmem:[#allocation2 + $0xa8] sm:$0xf] %v910_v3  ;;  %v2902_v32 = vrot.slane %v2900_v57, 4  ;;  %v16080_v2 = vrot.slane %v16079_v43, 4  ;;  %v11162_v21 = vpop.permute.xlu1 %1324 }
 0x10b   : > { %v9030_v25 = vcombine.low %v2042_v47, %v2045_v42  ;;  %v2908_v4 = vrot.slane %v2906_v9, 5  ;;  %v2894_v20 = vrot.slane %v2893_v1, 4  ;;  %v2302_v35 = vshrl.u32 %v11129_v7, 16  ;;  %v1509_v36 = vld [vmem:[#allocation2 + $0x54] sm:$0xf] }
 0x10c   : > { %v914_v53 = vsel %vm10093_vm12, %v16080_v2, %v913_v22  ;;  %v2305_v19 = vshll.u32 %v11129_v7, 16  ;;  %v2315_v28 = vshrl.u32 %v11131_v40, 16  ;;  %4040 = vrot.lane.b32.xlu0 %v9125_v16, %s9813_s30  ;;  %v2903_v61 = vor.u32 %v2902_v32, %v2898_v31 }
 0x10d   : > { %915 = vst [vmem:[#allocation2 + $0xb0] sm:$0x1] %v914_v53  ;;  %v9046_v26 = vcombine.low %v11129_v7, %v11131_v40  ;;  %v1691_v62 = vshrl.u32 %v1507_v12, 16  ;;  %v1694_v6 = vshll.u32 %v1507_v12, 16  ;;  %v2899_v23 = vsel %vm10418_vm2, %v2894_v20, %v2898_v31  ;;  %v11188_v20 = vld [vmem:[#allocation2 + $0x5c] sm:$0x1] }
 0x10e   : > { %3880 = vrot.lane.b32.xlu1 %v9093_v63, %s9811_s28  ;;  %v2304_v55 = vrot.slane %v2302_v35, 4  ;;  %v2307_v60 = vrot.slane %v2305_v19, 5  ;;  %v1700_v15 = vshll.u32 %v11098_v17, 16  ;;  %v2904_v33 = vrot.slane %v2903_v61, 4 }
 0x10f   : > { %v1693_v39 = vrot.slane %v1691_v62, 4  ;;  %v1696_v54 = vrot.slane %v1694_v6, 5  ;;  %v1704_v8 = vshrl.u32 %v11098_v17, 16  ;;  %v1710_v59 = vshll.u32 %v11102_v58, 16  ;;  %v11191_v6 = vpop.permute.xlu1 %1328 }
 0x110   : > { %v1702_v10 = vrot.slane %v1700_v15, 5  ;;  %v277_v46 = vsel %vm9856_vm3, 0, %v276_v24  ;;  %v734_v63 = vshrl.u32 %v489_v5, 16  ;;  %3530 = vrot.lane.b32.xlu0 %v9030_v25, %s9809_s26  ;;  %v2909_v47 = vsel %vm10418_vm2, %v2904_v33, %v2908_v4  ;;  %v11183_v4 = vld [vmem:[#allocation2 + $0x58] sm:$0xf] }
 0x111   : > { %v1474_v17 = vld [vmem:[#allocation2 + $0xa8] sm:$0xf]  ;;  %v1697_v45 = vor.u32 %v1696_v54, %v1693_v39  ;;  %v1706_v0 = vrot.slane %v1704_v8, 4  ;;  %278 = vst [vmem:[#allocation2 + $0xb4] sm:$0x1] %v277_v46  ;;  %v737_v58 = vshll.u32 %v489_v5, 16  ;;  %v9109_v22 = vcombine.low %v2899_v23, %v2909_v47 }
 0x112   : > { %v1475_v48 = vsel %vm10495_vm14, %v11069_v44, %v1474_v17  ;;  %v1712_v57 = vrot.slane %v1710_v59, 5  ;;  %v11172_v9 = vrot.slane %v734_v63, 7  ;;  %v333_v1 = vsel %vm10012_vm10, 0, %v332_v38  ;;  %v11197_v23 = vld [vmem:[#allocation2 + $0x5c] sm:$0x1] }
 0x113   : > { %1476 = vst [vmem:[#allocation2 + $0xa8] sm:$0xf] %v1475_v48  ;;  %v1698_v7 = vrot.slane %v1697_v45, 4  ;;  %v1707_v16 = vor.u32 %v1706_v0, %v1702_v10  ;;  %v742_v31 = vshrl.u32 %v11160_v11, 16  ;;  %3960 = vrot.lane.b32.xlu1 %v9109_v22, %s9815_s6  ;;  %334 = vst [vmem:[#allocation2 + $0xbc] sm:$0x1] %v333_v1  ;;  %v2308_v25 = vor.u32 %v2307_v60, %v2304_v55  ;;  %v11193_v24 = vpop.permute.xlu0 %3614 }
 0x114   : > { %v1478_v3 = vld [vmem:[#allocation2 + $0xb0] sm:$0x1]  ;;  %v739_v44 = vor.u32 %v737_v58, %v11172_v9  ;;  %v2311_v32 = vshll.u32 %v11131_v40, 16  ;;  %3626 = vrot.lane.b32.xlu0 %v9046_v26, %s9810_s27  ;;  %v2317_v35 = vrot.slane %v2315_v28, 4  ;;  %v2321_v61 = vshll.u32 %v11188_v20, 16 }
 0x115   : > { %v1479_v12 = vsel %vm10509_vm4, %v11051_v37, %v1478_v3  ;;  %v1703_v43 = vsel %vm10418_vm2, %v1698_v7, %v1702_v10  ;;  %v1708_v2 = vrot.slane %v1707_v16, 4  ;;  %v744_v53 = vrot.slane %v742_v31, 7  ;;  %v491_v8 = vld [vmem:[%s9957_s24 + $0x78] sm:$0xf]  ;;  %v492_v0 = vld [vmem:[%s9957_s24 + $0x7c] sm:$0xf] }
 0x116   : > { %1480 = vst [vmem:[#allocation2 + $0xb0] sm:$0x1] %v1479_v12  ;;  %v2309_v37 = vrot.slane %v2308_v25, 4  ;;  %v2313_v19 = vrot.slane %v2311_v32, 5  ;;  %v1715_v62 = vshrl.u32 %v1509_v36, 16  ;;  %v1718_v55 = vshll.u32 %v1509_v36, 16 }
 0x117   : > { %v1713_v26 = vsel %vm10418_vm2, %v1708_v2, %v1712_v57  ;;  %v749_v5 = vrot.slane %v744_v53, 4  ;;  %v1724_v60 = vshll.u32 %v11183_v4, 16  ;;  %v2323_v54 = vrot.slane %v2321_v61, 5  ;;  %v11210_v58 = vpop.permute.xlu1 %3616  ;;  %v1937_v61 = vld [vmem:[#allocation2 + $0x54] sm:$0xe] }
 0x118   : > { %v9014_v28 = vcombine.low %v1703_v43, %v1713_v26  ;;  %v916_v15 = vld [vmem:[#allocation2 + $0xb4] sm:$0xf]  ;;  %v2314_v33 = vsel %vm10418_vm2, %v2309_v37, %v2313_v19  ;;  %v2318_v39 = vor.u32 %v2317_v35, %v2313_v19  ;;  %v1717_v10 = vrot.slane %v1715_v62, 4  ;;  %v11214_v7 = vpop.permute.xlu0 %3870 }
 0x119   : > { %v917_v38 = vsel %vm10041_vm11, %v739_v44, %v916_v15  ;;  %v1720_v59 = vrot.slane %v1718_v55, 5  ;;  %v1726_v46 = vrot.slane %v1724_v60, 5  ;;  %v1728_v47 = vshrl.u32 %v11183_v4, 16  ;;  %v2547_v44 = vld [vmem:[#allocation2 + $0x54] sm:$0xe] }
 0x11a   : > { %3450 = vrot.lane.b32.xlu1 %v9014_v28, %s9808_s25  ;;  %918 = vst [vmem:[#allocation2 + $0xb4] sm:$0xf] %v917_v38  ;;  %v2319_v63 = vrot.slane %v2318_v39, 4  ;;  %v1734_v17 = vshll.u32 %v11197_v23, 16  ;;  %v2051_v45 = vrot.slane %v11197_v23, 5  ;;  %v740_v57 = vrot.slane %v11172_v9, 4 }
 0x11b   : > { %v920_v22 = vld [vmem:[#allocation2 + $0xbc] sm:$0x1]  ;;  %v1721_v48 = vor.u32 %v1720_v59, %v1717_v10  ;;  %v745_v36 = vshll.u32 %v11160_v11, 16  ;;  %v751_v3 = vshrl.u32 %v491_v8, 16  ;;  %v1730_v31 = vrot.slane %v1728_v47, 4  ;;  %v11220_v62 = vpop.permute.xlu1 %3872 }
 0x11c   : > { %v921_v16 = vsel %vm10093_vm12, %v749_v5, %v920_v22  ;;  %v2324_v1 = vsel %vm10418_vm2, %v2319_v63, %v2323_v54  ;;  %v1736_v12 = vrot.slane %v1734_v17, 5  ;;  %v279_v9 = vld [vmem:[#allocation2 + $0xc0] sm:$0x1]  ;;  %v754_v11 = vshll.u32 %v491_v8, 16 }
 0x11d   : > { %922 = vst [vmem:[#allocation2 + $0xbc] sm:$0x1] %v921_v16  ;;  %v9062_v25 = vcombine.low %v2314_v33, %v2324_v1  ;;  %v1722_v32 = vrot.slane %v1721_v48, 4  ;;  %v747_v43 = vor.u32 %v745_v36, %v744_v53  ;;  %v753_v2 = vrot.slane %v751_v3, 7  ;;  %v11227_v53 = vpop.permute.xlu0 %3618  ;;  %v11254_v48 = vld [vmem:[#allocation2 + $0x64] sm:$0xf] }
 0x11e   : > { %v1731_v35 = vor.u32 %v1730_v31, %v1726_v46  ;;  %v759_v37 = vshrl.u32 %v492_v0, 16  ;;  %v762_v19 = vshll.u32 %v492_v0, 16  ;;  %v8966_v28 = vrot.slane %v2547_v44, 9  ;;  %v9679_v1 = vld [vmem:[#allocation2 + $0x4] sm:$0xf] }
 0x11f   : > { %3706 = vrot.lane.b32.xlu0 %v9062_v25, %s9814_s5  ;;  %v1727_v26 = vsel %vm10418_vm2, %v1722_v32, %v1726_v46  ;;  %v748_v55 = vsel %vm9898_vm9, %v740_v57, %v747_v43  ;;  %v757_v60 = vrot.slane %v753_v2, 4  ;;  %v11230_v33 = vor.u32 %v754_v11, %v753_v2  ;;  %v9680_v31 = vld [vmem:[#allocation2] sm:$0xf] }
 0x120   : > { %v1732_v15 = vrot.slane %v1731_v35, 4  ;;  %919 = vst.msk [vmem:[#allocation2 + $0xb8] sm:$0xf] %vm15962_vm5, %v748_v55  ;;  %v11232_v39 = vrot.slane %v759_v37, 7  ;;  %v2649_v54 = vrot.slane %v11131_v40, 5  ;;  %v2652_v38 = vrot.slane %v11188_v20, 5  ;;  %v11248_v20 = vpop.permute.xlu1 %3620 }
 0x121   : > { %v1481_v8 = vld [vmem:[#allocation2 + $0xb4] sm:$0xf]  ;;  %1484 = vst.msk [vmem:[#allocation2 + $0xb8] sm:$0xf] %vm1378_vm8, %v11136_v13  ;;  %v8951_v10 = vrot.slane %v1937_v61, 9  ;;  %v2048_v59 = vrot.slane %v11183_v4, 5  ;;  %v11256_v57 = vpop.permute.xlu0 %3874 }
 0x122   : > { %v280_v46 = vsel %vm9856_vm3, 0, %v279_v9  ;;  %v1482_v63 = vsel %vm10495_vm14, %v11104_v51, %v1481_v8  ;;  %v1737_v47 = vsel %vm10418_vm2, %v1732_v15, %v1736_v12  ;;  %v764_v40 = vor.u32 %v762_v19, %v11232_v39  ;;  %v2730_v13 = vld [vmem:[#allocation2 + $0x60] sm:$0xf]  ;;  %v11267_v9 = vld [vmem:[#allocation2 + $0x64] sm:$0xf] }
 0x123   : > { %v766_v17 = vrot.slane %v11232_v39, 4  ;;  %281 = vst [vmem:[#allocation2 + $0xc0] sm:$0x1] %v280_v46  ;;  %1483 = vst [vmem:[#allocation2 + $0xb4] sm:$0xf] %v1482_v63  ;;  %v9015_v4 = vcombine.low %v1727_v26, %v1737_v47  ;;  %v2650_v0 = vsel %vm10431_vm6, %v8966_v28, %v2649_v54  ;;  %v2651_v22 = vrot.slane %v2649_v54, 4 }
 0x124   : > { %v2049_v51 = vsel %vm10431_vm6, %v8951_v10, %v2048_v59  ;;  %v1485_v36 = vld [vmem:[#allocation2 + $0xbc] sm:$0x1]  ;;  %v765_v3 = vsel %vm9898_vm9, %v757_v60, %v764_v40  ;;  %v2050_v16 = vrot.slane %v2048_v59, 4  ;;  %v8992_v12 = vcombine.low %v9680_v31, %v9679_v1  ;;  %v2123_v2 = vld [vmem:[#allocation2 + $0x60] sm:$0xf]  ;;  %v11278_v61 = vpop.permute.xlu1 %3876 }
 0x125   : > { %v1486_v44 = vsel %vm10509_vm4, %v11071_v50, %v1485_v36  ;;  %3452 = vrot.lane.b32.xlu1 %v9015_v4, %s9808_s25  ;;  %926 = vst.msk [vmem:[#allocation2 + $0xc4] sm:$0xf] %vm15962_vm5, %v765_v3  ;;  %v2653_v25 = vsel %vm10431_vm6, %v2651_v22, %v2652_v38  ;;  %v2911_v32 = vshrl.u32 %v2730_v13, 16  ;;  %v2914_v43 = vshll.u32 %v2730_v13, 16  ;;  %v335_v19 = vld [vmem:[#allocation2 + $0xc8] sm:$0x1] }
 0x126   : > { %1487 = vst [vmem:[#allocation2 + $0xbc] sm:$0x1] %v1486_v44  ;;  %1491 = vst.msk [vmem:[#allocation2 + $0xc4] sm:$0xf] %vm1378_vm8, %v11106_v14  ;;  %v9078_v35 = vcombine.low %v2650_v0, %v2653_v25  ;;  %v2052_v50 = vsel %vm10431_vm6, %v2050_v16, %v2051_v45  ;;  %v4065_v11 = vsel %vm15967_vm1, %v8992_v12, %v11138_v27  ;;  %v2924_v37 = vshrl.u32 %v11254_v48, 16  ;;  %v11281_v14 = vpop.permute.xlu0 %3774 }
 0x127   : > { %v9031_v26 = vcombine.low %v2049_v51, %v2052_v50  ;;  %v2913_v55 = vrot.slane %v2911_v32, 4  ;;  %v2916_v60 = vrot.slane %v2914_v43, 5  ;;  %v9094_v28 = vcombine.low %v2730_v13, %v11254_v48  ;;  %v2756_v40 = vld [vmem:[#allocation2 + $0x68] sm:$0x1]  ;;  %v3156_v12 = vld [vmem:[#allocation2 + $0x60] sm:$0xe] }
 0x128   : > { %3786 = vrot.lane.b32.xlu0 %v9078_v35, %s9812_s29  ;;  %v2326_v23 = vshrl.u32 %v2123_v2, 16  ;;  %v2329_v15 = vshll.u32 %v2123_v2, 16  ;;  %v2339_v45 = vshrl.u32 %v11267_v9, 16  ;;  %v9047_v27 = vcombine.low %v2123_v2, %v11267_v9  ;;  %v11295_v13 = vpop.permute.xlu1 %3520  ;;  %v2148_v36 = vld [vmem:[#allocation2 + $0x68] sm:$0x1] }
 0x129   : > { %3532 = vrot.lane.b32.xlu1 %v9031_v26, %s9809_s26  ;;  %v336_v8 = vsel %vm10012_vm10, 0, %v335_v19  ;;  %v2917_v38 = vor.u32 %v2916_v60, %v2913_v55  ;;  %v2920_v10 = vshll.u32 %v11254_v48, 16  ;;  %v4113_v47 = vsel %vm15966_vm15, %v4065_v11, %v11164_v41  ;;  %v2548_v32 = vld [vmem:[#allocation2 + $0x60] sm:$0xe] }
 0x12a   : > { %v923_v54 = vld [vmem:[#allocation2 + $0xc0] sm:$0xf]  ;;  %v2328_v46 = vrot.slane %v2326_v23, 4  ;;  %v2331_v63 = vrot.slane %v2329_v15, 5  ;;  %337 = vst [vmem:[#allocation2 + $0xc8] sm:$0x1] %v336_v8  ;;  %v11297_v3 = vpop.permute.xlu0 %4030  ;;  %v11306_v50 = vsel %vm15965_vm0, %v4113_v47, %v11193_v24 }
 0x12b   : > { %v924_v59 = vsel %vm10041_vm11, %v11230_v33, %v923_v54  ;;  %v2918_v4 = vrot.slane %v2917_v38, 4  ;;  %v2922_v0 = vrot.slane %v2920_v10, 5  ;;  %v2926_v22 = vrot.slane %v2924_v37, 4  ;;  %v3157_v24 = vld [vmem:[#allocation2 + $0x6c] sm:$0xe] }
 0x12c   : > { %925 = vst [vmem:[#allocation2 + $0xc0] sm:$0xf] %v924_v59  ;;  %v2930_v51 = vshll.u32 %v2756_v40, 16  ;;  %3882 = vrot.lane.b32.xlu0 %v9094_v28, %s9811_s28  ;;  %v2332_v33 = vor.u32 %v2331_v63, %v2328_v46  ;;  %v2335_v16 = vshll.u32 %v11267_v9, 16  ;;  %v2341_v1 = vrot.slane %v2339_v45, 4  ;;  %v11308_v11 = vpop.permute.xlu1 %3776 }
 0x12d   : > { %v2345_v31 = vshll.u32 %v2148_v36, 16  ;;  %3628 = vrot.lane.b32.xlu1 %v9047_v27, %s9810_s27  ;;  %v2923_v41 = vsel %vm10418_vm2, %v2918_v4, %v2922_v0  ;;  %v2927_v44 = vor.u32 %v2926_v22, %v2922_v0  ;;  %v8982_v19 = vrot.slane %v3156_v12, 9  ;;  %v11316_v27 = vld [vmem:[#allocation2 + $0x70] sm:$0xf]  ;;  %v11322_v59 = vld [vmem:[#allocation2 + $0x74] sm:$0x1] }
 0x12e   : > { %v2932_v25 = vrot.slane %v2930_v51, 5  ;;  %v2333_v43 = vrot.slane %v2332_v33, 4  ;;  %v2337_v2 = vrot.slane %v2335_v16, 5  ;;  %v3258_v26 = vrot.slane %v11254_v48, 5  ;;  %v11311_v60 = vpop.permute.xlu0 %4032  ;;  %v11330_v4 = vld [vmem:[#allocation2 + $0x6c] sm:$0xf] }
 0x12f   : > { %v2347_v35 = vrot.slane %v2345_v31, 5  ;;  %v2928_v37 = vrot.slane %v2927_v44, 4  ;;  %v3261_v55 = vrot.slane %v2756_v40, 5  ;;  %v8967_v15 = vrot.slane %v2548_v32, 9  ;;  %v1938_v31 = vld [vmem:[#allocation2 + $0x60] sm:$0xe] }
 0x130   : > { %v2338_v28 = vsel %vm10418_vm2, %v2333_v43, %v2337_v2  ;;  %v2342_v23 = vor.u32 %v2341_v1, %v2337_v2  ;;  %v2656_v45 = vrot.slane %v11267_v9, 5  ;;  %v3259_v48 = vsel %vm10431_vm6, %v8982_v19, %v3258_v26  ;;  %v11332_v0 = vpop.permute.xlu1 %3524  ;;  %v11352_v32 = vld [vmem:[#allocation2 + $0x68] sm:$0x1] }
 0x131   : > { %v927_v54 = vld [vmem:[#allocation2 + $0xc8] sm:$0x1]  ;;  %v2933_v8 = vsel %vm10418_vm2, %v2928_v37, %v2932_v25  ;;  %v3260_v38 = vrot.slane %v3258_v26, 4  ;;  %v2659_v10 = vrot.slane %v2148_v36, 5  ;;  %v8983_v36 = vrot.slane %v3157_v24, 9 }
 0x132   : > { %v928_v9 = vsel %vm10093_vm12, %v766_v17, %v927_v54  ;;  %v9110_v63 = vcombine.low %v2923_v41, %v2933_v8  ;;  %v2343_v47 = vrot.slane %v2342_v23, 4  ;;  %v2657_v40 = vsel %vm10431_vm6, %v8967_v15, %v2656_v45  ;;  %v11339_v17 = vpop.permute.xlu0 %3522  ;;  %v11362_v15 = vld [vmem:[#allocation2 + $0x6c] sm:$0xf] }
 0x133   : > { %v1488_v46 = vld [vmem:[#allocation2 + $0xc0] sm:$0xf]  ;;  %929 = vst [vmem:[#allocation2 + $0xc8] sm:$0x1] %v928_v9  ;;  %v3262_v39 = vsel %vm10431_vm6, %v3260_v38, %v3261_v55  ;;  %v2658_v51 = vrot.slane %v2656_v45, 4  ;;  %v3265_v1 = vrot.slane %v11316_v27, 5  ;;  %v9095_v37 = vcombine.low %v11330_v4, %v11316_v27 }
 0x134   : > { %v1489_v22 = vsel %vm10495_vm14, %v11162_v21, %v1488_v46  ;;  %3962 = vrot.lane.b32.xlu0 %v9110_v63, %s9815_s6  ;;  %v2348_v33 = vsel %vm10418_vm2, %v2343_v47, %v2347_v35  ;;  %v9126_v16 = vcombine.low %v3259_v48, %v3262_v39  ;;  %v3268_v34 = vrot.slane %v11322_v59, 5  ;;  %v11346_v21 = vld [vmem:[#allocation2 + $0x64] sm:$0xf]  ;;  %v11358_v19 = vpop.permute.xlu1 %3780  ;;  %v11374_v63 = vld [vmem:[#allocation2 + $0x70] sm:$0xf] }
 0x135   : > { %1490 = vst [vmem:[#allocation2 + $0xc0] sm:$0xf] %v1489_v22  ;;  %v9063_v12 = vcombine.low %v2338_v28, %v2348_v33  ;;  %v2660_v41 = vsel %vm10431_vm6, %v2658_v51, %v2659_v10  ;;  %v2935_v44 = vshrl.u32 %v11330_v4, 16  ;;  %v2938_v25 = vshll.u32 %v11330_v4, 16 }
 0x136   : > { %v9079_v43 = vcombine.low %v2657_v40, %v2660_v41  ;;  %v3266_v2 = vsel %vm10431_vm6, %v8983_v36, %v3265_v1  ;;  %v3267_v35 = vrot.slane %v3265_v1, 4  ;;  %v8952_v28 = vrot.slane %v1938_v31, 9  ;;  %v11364_v45 = vpop.permute.xlu0 %3778 }
 0x137   : > { %3708 = vrot.lane.b32.xlu1 %v9063_v12, %s9814_s5  ;;  %v2937_v26 = vrot.slane %v2935_v44, 4  ;;  %v2940_v55 = vrot.slane %v2938_v25, 5  ;;  %v2055_v23 = vrot.slane %v11346_v21, 5  ;;  %v2058_v54 = vrot.slane %v11352_v32, 5 }
 0x138   : > { %4042 = vrot.lane.b32.xlu0 %v9126_v16, %s9813_s30  ;;  %v3269_v24 = vsel %vm10431_vm6, %v3267_v35, %v3268_v34  ;;  %v2944_v8 = vshll.u32 %v11316_v27, 16  ;;  %v2948_v48 = vshrl.u32 %v11316_v27, 16  ;;  %v2954_v22 = vshll.u32 %v11322_v59, 16  ;;  %v1511_v16 = vld [vmem:[#allocation2 + $0x60] sm:$0xf]  ;;  %v11388_v30 = vpop.permute.xlu1 %3440 }
 0x139   : > { %v9127_v38 = vcombine.low %v3266_v2, %v3269_v24  ;;  %v2056_v10 = vsel %vm10431_vm6, %v8952_v28, %v2055_v23  ;;  %v2057_v46 = vrot.slane %v2055_v23, 4  ;;  %v2941_v9 = vor.u32 %v2940_v55, %v2937_v26 }
 0x13a   : > { %v1492_v47 = vld [vmem:[#allocation2 + $0xc8] sm:$0x1]  ;;  %v2946_v40 = vrot.slane %v2944_v8, 5  ;;  %v2950_v4 = vrot.slane %v2948_v48, 4  ;;  %v2350_v39 = vshrl.u32 %v11362_v15, 16  ;;  %v2353_v33 = vshll.u32 %v11362_v15, 16  ;;  %v11385_v1 = vpop.permute.xlu0 %3694 }
 0x13b   : > { %v1493_v51 = vsel %vm10509_vm4, %v11191_v6, %v1492_v47  ;;  %3788 = vrot.lane.b32.xlu1 %v9079_v43, %s9812_s29  ;;  %v2059_v27 = vsel %vm10431_vm6, %v2057_v46, %v2058_v54  ;;  %v2942_v36 = vrot.slane %v2941_v9, 4  ;;  %v2956_v31 = vrot.slane %v2954_v22, 5  ;;  %v11400_v54 = vld [vmem:[#allocation2 + $0x70] sm:$0xf] }
 0x13c   : > { %1494 = vst [vmem:[#allocation2 + $0xc8] sm:$0x1] %v1493_v51  ;;  %4044 = vrot.lane.b32.xlu0 %v9127_v38, %s9813_s30  ;;  %v9032_v59 = vcombine.low %v2056_v10, %v2059_v27  ;;  %v2951_v34 = vor.u32 %v2950_v4, %v2946_v40  ;;  %v2352_v12 = vrot.slane %v2350_v39, 4  ;;  %v2355_v41 = vrot.slane %v2353_v33, 5 }
 0x13d   : > { %v2947_v6 = vsel %vm10418_vm2, %v2942_v36, %v2946_v40  ;;  %v2363_v44 = vshrl.u32 %v11374_v63, 16  ;;  %v9048_v25 = vcombine.low %v11362_v15, %v11374_v63  ;;  %v1739_v2 = vshrl.u32 %v1511_v16, 16 }
 0x13e   : > { %v2952_v43 = vrot.slane %v2951_v34, 4  ;;  %v1742_v35 = vshll.u32 %v1511_v16, 16  ;;  %v1748_v26 = vshll.u32 %v11346_v21, 16  ;;  %v1752_v55 = vshrl.u32 %v11346_v21, 16  ;;  %v11402_v8 = vpop.permute.xlu0 %3950  ;;  %v11407_v51 = vpop.permute.xlu1 %3696 }
 0x13f   : > { %3884 = vrot.lane.b32.xlu1 %v9095_v37, %s9811_s28  ;;  %v1758_v28 = vshll.u32 %v11352_v32, 16  ;;  %v2356_v23 = vor.u32 %v2355_v41, %v2352_v12  ;;  %v2359_v24 = vshll.u32 %v11374_v63, 16  ;;  %v1741_v48 = vrot.slane %v1739_v2, 4  ;;  %v1513_v37 = vld [vmem:[#allocation2 + $0x6c] sm:$0xf] }
 0x140   : > { %3534 = vrot.lane.b32.xlu0 %v9032_v59, %s9809_s26  ;;  %v2957_v15 = vsel %vm10418_vm2, %v2952_v43, %v2956_v31  ;;  %v1744_v38 = vrot.slane %v1742_v35, 5  ;;  %v1750_v10 = vrot.slane %v1748_v26, 5  ;;  %v1754_v21 = vrot.slane %v1752_v55, 4  ;;  %v2149_v32 = vld [vmem:[#allocation2 + $0x74] sm:$0x1] }
 0x141   : > { %v9111_v46 = vcombine.low %v2947_v6, %v2957_v15  ;;  %v1760_v9 = vrot.slane %v1758_v28, 5  ;;  %v2357_v47 = vrot.slane %v2356_v23, 4  ;;  %v2361_v4 = vrot.slane %v2359_v24, 5  ;;  %v2549_v41 = vld [vmem:[#allocation2 + $0x6c] sm:$0xe] }
 0x142   : > { %v1745_v40 = vor.u32 %v1744_v38, %v1741_v48  ;;  %v2365_v22 = vrot.slane %v2363_v44, 4  ;;  %v2369_v39 = vshll.u32 %v2149_v32, 16  ;;  %v1755_v27 = vor.u32 %v1754_v21, %v1750_v10  ;;  %v11411_v59 = vpop.permute.xlu0 %3698  ;;  %v1536_v43 = vld [vmem:[#allocation2 + $0x74] sm:$0x1] }
 0x143   : > { %3964 = vrot.lane.b32.xlu1 %v9111_v46, %s9815_s6  ;;  %v1763_v36 = vshrl.u32 %v1513_v37, 16  ;;  %v1766_v33 = vshll.u32 %v1513_v37, 16  ;;  %v1772_v16 = vshll.u32 %v11400_v54, 16  ;;  %v2362_v31 = vsel %vm10418_vm2, %v2357_v47, %v2361_v4  ;;  %v1939_v37 = vld [vmem:[#allocation2 + $0x6c] sm:$0xe] }
 0x144   : > { %3630 = vrot.lane.b32.xlu0 %v9048_v25, %s9810_s27  ;;  %v1746_v34 = vrot.slane %v1745_v40, 4  ;;  %v2366_v12 = vor.u32 %v2365_v22, %v2361_v4  ;;  %v2371_v6 = vrot.slane %v2369_v39, 5  ;;  %v1756_v44 = vrot.slane %v1755_v27, 4  ;;  %v2734_v4 = vld [vmem:[#allocation2 + $0x78] sm:$0xf] }
 0x145   : > { %v1765_v2 = vrot.slane %v1763_v36, 4  ;;  %v1768_v35 = vrot.slane %v1766_v33, 5  ;;  %v1774_v26 = vrot.slane %v1772_v16, 5  ;;  %v1776_v23 = vshrl.u32 %v11400_v54, 16 }
 0x146   : > { %v1751_v55 = vsel %vm10418_vm2, %v1746_v34, %v1750_v10  ;;  %v2367_v28 = vrot.slane %v2366_v12, 4  ;;  %v1782_v24 = vshll.u32 %v1536_v43, 16  ;;  %v1761_v25 = vsel %vm10418_vm2, %v1756_v44, %v1760_v9  ;;  %v11424_v10 = vpop.permute.xlu1 %3952  ;;  %v11432_v12 = vld [vmem:[#allocation2 + $0x7c] sm:$0xf] }
 0x147   : > { %v1769_v15 = vor.u32 %v1768_v35, %v1765_v2  ;;  %v8968_v48 = vrot.slane %v2549_v41, 9  ;;  %v2663_v38 = vrot.slane %v11374_v63, 5  ;;  %v9016_v46 = vcombine.low %v1751_v55, %v1761_v25  ;;  %v11437_v2 = vld [vmem:[#allocation2 + $0x78] sm:$0xf] }
 0x148   : > { %v2372_v21 = vsel %vm10418_vm2, %v2367_v28, %v2371_v6  ;;  %v1778_v47 = vrot.slane %v1776_v23, 4  ;;  %v1784_v40 = vrot.slane %v1782_v24, 5  ;;  %v11428_v36 = vpop.permute.xlu0 %3954  ;;  %v2666_v33 = vrot.slane %v2149_v32, 5  ;;  %v11443_v28 = vld [vmem:[#allocation2 + $0x7c] sm:$0xf] }
 0x149   : > { %v9064_v22 = vcombine.low %v2362_v31, %v2372_v21  ;;  %v1770_v39 = vrot.slane %v1769_v15, 4  ;;  %v2664_v27 = vsel %vm10431_vm6, %v8968_v48, %v2663_v38  ;;  %v2665_v9 = vrot.slane %v2663_v38, 4  ;;  %3454 = vrot.lane.b32.xlu1 %v9016_v46, %s9808_s25 }
 0x14a   : > { %v1779_v63 = vor.u32 %v1778_v47, %v1774_v26  ;;  %v8953_v16 = vrot.slane %v1939_v37, 9  ;;  %v2062_v34 = vrot.slane %v11400_v54, 5  ;;  %v2065_v6 = vrot.slane %v1536_v43, 5  ;;  %v9599_v43 = vld [vmem:[%s15945_s2 + $0x20] ss:$0 sps:$4 sm:$0xff]  }
 0x14b   : > { %3710 = vrot.lane.b32.xlu0 %v9064_v22, %s9814_s5  ;;  %v1775_v31 = vsel %vm10418_vm2, %v1770_v39, %v1774_v26  ;;  %v2959_v41 = vshrl.u32 %v2734_v4, 16  ;;  %v2962_v44 = vshll.u32 %v2734_v4, 16  ;;  %v2667_v55 = vsel %vm10431_vm6, %v2665_v9, %v2666_v33  ;;  %v3158_v33 = vld [vmem:[#allocation2 + $0x78] sm:$0xe] }
 0x14c   : > { %v1780_v35 = vrot.slane %v1779_v63, 4  ;;  %v2063_v32 = vsel %vm10431_vm6, %v8953_v16, %v2062_v34  ;;  %v2064_v54 = vrot.slane %v2062_v34, 4  ;;  %v9080_v23 = vcombine.low %v2664_v27, %v2667_v55  ;;  %v11457_v21 = vpop.permute.xlu0 %4034  ;;  %v2150_v55 = vld [vmem:[#allocation2 + $0x80] sm:$0x1] }
 0x14d   : > { %v2961_v24 = vrot.slane %v2959_v41, 4  ;;  %v2964_v25 = vrot.slane %v2962_v44, 5  ;;  %v2972_v26 = vshrl.u32 %v11432_v12, 16  ;;  %v9096_v38 = vcombine.low %v2734_v4, %v11432_v12  ;;  %v11455_v46 = vpop.permute.xlu1 %3442 }
 0x14e   : > { %v1785_v15 = vsel %vm10418_vm2, %v1780_v35, %v1784_v40  ;;  %v2066_v48 = vsel %vm10431_vm6, %v2064_v54, %v2065_v6  ;;  %v2374_v37 = vshrl.u32 %v11437_v2, 16  ;;  %v2377_v39 = vshll.u32 %v11437_v2, 16  ;;  %v9600_v40 = vld [vmem:[%s15945_s2 + $0x18] sm:$0xff]  }
 0x14f   : > { %v9017_v47 = vcombine.low %v1775_v31, %v1785_v15  ;;  %3790 = vrot.lane.b32.xlu0 %v9080_v23, %s9812_s29  ;;  %v9033_v22 = vcombine.low %v2063_v32, %v2066_v48  ;;  %v2387_v27 = vshrl.u32 %v11443_v28, 16  ;;  %v9049_v4 = vcombine.low %v11437_v2, %v11443_v28  ;;  %v2758_v31 = vld [vmem:[#allocation2 + $0x80] sm:$0x1]  ;;  %v2550_v15 = vld [vmem:[#allocation2 + $0x78] sm:$0xe] }
 0x150   : > { %v2376_v9 = vrot.slane %v2374_v37, 4  ;;  %vm4411_vm8 = vcmask 1043456   ;;  %v2965_v63 = vor.u32 %v2964_v25, %v2961_v24  ;;  %v2379_v16 = vrot.slane %v2377_v39, 5 }
 0x151   : > { %3456 = vrot.lane.b32.xlu1 %v9017_v47, %s9808_s25  ;;  %9557 = vmatprep.subr.msk.bf16.mxu0 %vm4411_vm8, %v9599_v43  ;;  %v4413_v34 = vsel %vm4411_vm8, %v9599_v43, 0  ;;  %v2968_v6 = vshll.u32 %v11432_v12, 16  ;;  %v2974_v41 = vrot.slane %v2972_v26, 4  ;;  %v2978_v35 = vshll.u32 %v2758_v31, 16  ;;  %v9601_v43 = vld [vmem:[%s15945_s2 + $0x10] sm:$0xff]  }
 0x152   : > { %9478 = vmatpush3.bf16.msra.mxu0 %v4413_v34  ;;  %v2966_v44 = vrot.slane %v2965_v63, 4  ;;  %v2383_v32 = vshll.u32 %v11443_v28, 16  ;;  %v2389_v54 = vrot.slane %v2387_v27, 4  ;;  %v2380_v23 = vor.u32 %v2379_v16, %v2376_v9  ;;  %v11477_v27 = vpop.permute.xlu0 %4036 }
 0x153   : > { %3886 = vrot.lane.b32.xlu0 %v9096_v38, %s9811_s28  ;;  %v2970_v2 = vrot.slane %v2968_v6, 5  ;;  %v2393_v24 = vshll.u32 %v2150_v55, 16  ;;  %9479 = vmatprep.subr.bf16.mxu0 %v9600_v40  ;;  %v8984_v25 = vrot.slane %v3158_v33, 9  ;;  %v2980_v26 = vrot.slane %v2978_v35, 5  ;;  %v11475_v39 = vpop.permute.xlu1 %3444 }
 0x154   : > { %v2385_v48 = vrot.slane %v2383_v32, 5  ;;  %v3272_v37 = vrot.slane %v11432_v12, 5  ;;  %v3275_v47 = vrot.slane %v2758_v31, 5  ;;  %v2381_v63 = vrot.slane %v2380_v23, 4 }
 0x155   : > { %3536 = vrot.lane.b32.xlu1 %v9033_v22, %s9809_s26  ;;  %v2971_v38 = vsel %vm10418_vm2, %v2966_v44, %v2970_v2  ;;  %v2975_v9 = vor.u32 %v2974_v41, %v2970_v2  ;;  %v2395_v33 = vrot.slane %v2393_v24, 5  ;;  %v8969_v12 = vrot.slane %v2550_v15, 9  ;;  %v9603_v41 = vld [vmem:[%s15945_s2 + $0x8] sm:$0xff]  }
 0x156   : > { %v2390_v16 = vor.u32 %v2389_v54, %v2385_v48  ;;  %9480 = vmatpush3.bf16.msra.mxu0 %v9600_v40  ;;  %v3273_v34 = vsel %vm10431_vm6, %v8984_v25, %v3272_v37  ;;  %v3274_v6 = vrot.slane %v3272_v37, 4  ;;  %v2386_v35 = vsel %vm10418_vm2, %v2381_v63, %v2385_v48  ;;  %v3159_v54 = vld [vmem:[#allocation2 + $0x84] sm:$0xe]  ;;  %v11497_v24 = vld [vmem:[#allocation2 + $0x88] sm:$0xf] }
 0x157   : > { %v2976_v31 = vrot.slane %v2975_v9, 4  ;;  %v2670_v32 = vrot.slane %v11443_v28, 5  ;;  %v2673_v22 = vrot.slane %v2150_v55, 5  ;;  %9481 = vmatprep.subr.bf16.mxu0 %v9601_v43  ;;  %vm4210_vm14 = vcmask 326656   ;;  %v11499_v25 = vld [vmem:[#allocation2 + $0x8c] sm:$0x1]  ;;  %v11501_v15 = vpop.permute.xlu1 %3700 }
 0x158   : > { %v2391_v44 = vrot.slane %v2390_v16, 4  ;;  %v3276_v40 = vsel %vm10431_vm6, %v3274_v6, %v3275_v47  ;;  %v9682_v47 = vld [vmem:[#allocation2 + $0xc] sm:$0xf]  ;;  %v2736_v63 = vld [vmem:[#allocation2 + $0x84] sm:$0xf]  ;;  %v11508_v16 = vpop.permute.xlu0 %3526  ;;  %vm4243_vm4 = vcmask 392192  }
 0x159   : > { %3632 = vrot.lane.b32.xlu1 %v9049_v4, %s9810_s27  ;;  %v2981_v2 = vsel %vm10418_vm2, %v2976_v31, %v2980_v26  ;;  %v9128_v23 = vcombine.low %v3273_v34, %v3276_v40  ;;  %v2671_v28 = vsel %vm10431_vm6, %v8969_v12, %v2670_v32  ;;  %v2672_v55 = vrot.slane %v2670_v32, 4  ;;  %v9681_v26 = vld [vmem:[#allocation2 + $0x10] sm:$0xf]  ;;  %v1940_v40 = vld [vmem:[#allocation2 + $0x78] sm:$0xe] }
 0x15a   : > { %v9112_v48 = vcombine.low %v2971_v38, %v2981_v2  ;;  %v2396_v37 = vsel %vm10418_vm2, %v2391_v44, %v2395_v33  ;;  %9482 = vmatpush3.bf16.msra.mxu0 %v9601_v43  ;;  %v4179_v4 = vsel %vm15963_vm13, %v11306_v50, %v11385_v1  ;;  %v8993_v9 = vcombine.low %v9682_v47, %v9681_v26  ;;  %v9604_v43 = vld [vmem:[%s15945_s2] sm:$0xff]   ;;  %v11526_v44 = vld [vmem:[#allocation2 + $0x7c] sm:$0xf] }
 0x15b   : > { %v9065_v34 = vcombine.low %v2386_v35, %v2396_v37  ;;  %v2674_v6 = vsel %vm10431_vm6, %v2672_v55, %v2673_v22  ;;  %v4212_v38 = vsel %vm4210_vm14, %v4179_v4, %v11281_v14  ;;  %v8985_v12 = vrot.slane %v3159_v54, 9  ;;  %9483 = vmatprep.subr.bf16.mxu0 %v9603_v41  ;;  %v11530_v2 = vld [vmem:[#allocation2 + $0x80] sm:$0x1] }
 0x15c   : > { %3966 = vrot.lane.b32.xlu0 %v9112_v48, %s9815_s6  ;;  %v9081_v50 = vcombine.low %v2671_v28, %v2674_v6  ;;  %v4068_v1 = vsel %vm15967_vm1, %v8993_v9, %v11388_v30  ;;  %v3279_v33 = vrot.slane %v11497_v24, 5  ;;  %v3282_v31 = vrot.slane %v11499_v25, 5  ;;  %v11545_v9 = vpop.permute.xlu0 %3622 }
 0x15d   : > { %3712 = vrot.lane.b32.xlu1 %v9065_v34, %s9814_s5  ;;  %v4115_v14 = vsel %vm15966_vm15, %v4068_v1, %v11295_v13  ;;  %v2983_v35 = vshrl.u32 %v2736_v63, 16  ;;  %v2986_v32 = vshll.u32 %v2736_v63, 16  ;;  %v9097_v22 = vcombine.low %v2736_v63, %v11497_v24 }
 0x15e   : > { %v3280_v54 = vsel %vm10431_vm6, %v8985_v12, %v3279_v33  ;;  %v3281_v30 = vrot.slane %v3279_v33, 4  ;;  %9484 = vmatpush3.bf16.msra.mxu0 %v9603_v41  ;;  %vm4276_vm8 = vcmask 457728   ;;  %v4245_v13 = vsel %vm4243_vm4, %v4212_v38, %v11214_v7  ;;  %v11536_v37 = vpop.permute.xlu1 %3956  ;;  %v2129_v38 = vld [vmem:[#allocation2 + $0x84] sm:$0xf] }
 0x15f   : > { %v2985_v28 = vrot.slane %v2983_v35, 4  ;;  %v2988_v55 = vrot.slane %v2986_v32, 5  ;;  %v4148_v48 = vsel %vm15965_vm0, %v4115_v14, %v11210_v58  ;;  %9485 = vmatprep.subr.bf16.mxu0 %v9604_v43  ;;  %v4278_v4 = vsel %vm4276_vm8, %v4245_v13, %v11402_v8  ;;  %v11558_v14 = vld [vmem:[#allocation2 + $0x88] sm:$0xf]  ;;  %v1515_v32 = vld [vmem:[#allocation2 + $0x78] sm:$0xf] }
 0x160   : > { %4046 = vrot.lane.b32.xlu0 %v9128_v23, %s9813_s30  ;;  %v3283_v41 = vsel %vm10431_vm6, %v3281_v30, %v3282_v31  ;;  %v4181_v26 = vsel %vm15963_vm13, %v4148_v48, %v11407_v51  ;;  %v8954_v47 = vrot.slane %v1940_v40, 9  ;;  %v2069_v23 = vrot.slane %v11526_v44, 5 }
 0x161   : > { %3792 = vrot.lane.b32.xlu1 %v9081_v50, %s9812_s29  ;;  %v9129_v58 = vcombine.low %v3280_v54, %v3283_v41  ;;  %v4214_v7 = vsel %vm4210_vm14, %v4181_v26, %v11308_v11  ;;  %v2072_v63 = vrot.slane %v11530_v2, 5  ;;  %v2989_v34 = vor.u32 %v2988_v55, %v2985_v28 }
 0x162   : > { %v2992_v6 = vshll.u32 %v11497_v24, 16  ;;  %v2996_v8 = vshrl.u32 %v11497_v24, 16  ;;  %v3002_v51 = vshll.u32 %v11499_v25, 16  ;;  %9486 = vmatpush3.bf16.msra.mxu0 %v9604_v43  ;;  %v2070_v12 = vsel %vm10431_vm6, %v8954_v47, %v2069_v23 }
 0x163   : > { %v2071_v50 = vrot.slane %v2069_v23, 4  ;;  %vm4309_vm5 = vcmask 523264   ;;  %vm15964_vm13 = vcmask 588800   ;;  %v2990_v11 = vrot.slane %v2989_v34, 4 }
 0x164   : > { %4048 = vrot.lane.b32.xlu0 %v9129_v58, %s9813_s30  ;;  %v2994_v1 = vrot.slane %v2992_v6, 5  ;;  %v2998_v33 = vrot.slane %v2996_v8, 4  ;;  %v3004_v31 = vrot.slane %v3002_v51, 5  ;;  %v4311_v25 = vsel %vm4309_vm5, %v4278_v4, %v11297_v3  ;;  %v11567_v40 = vpop.permute.xlu1 %3446  ;;  %v1517_v51 = vld [vmem:[#allocation2 + $0x84] sm:$0xf] }
 0x165   : > { %3888 = vrot.lane.b32.xlu1 %v9097_v22, %s9811_s28  ;;  %v2073_v24 = vsel %vm10431_vm6, %v2071_v50, %v2072_v63  ;;  %v4247_v43 = vsel %vm4243_vm4, %v4214_v7, %v11220_v62  ;;  %v2398_v35 = vshrl.u32 %v2129_v38, 16  ;;  %9487 = vmatprep.mubr.msk.bf16.mxu0 %vm15964_vm13, %v4311_v25  ;;  %v11574_v55 = vpop.permute.xlu0 %3702  ;;  %v2401_v13 = vshll.u32 %v2129_v38, 16 }
 0x166   : > { %v9034_v54 = vcombine.low %v2070_v12, %v2073_v24  ;;  %v2995_v30 = vsel %vm10418_vm2, %v2990_v11, %v2994_v1  ;;  %v2999_v28 = vor.u32 %v2998_v33, %v2994_v1  ;;  %v4280_v22 = vsel %vm4276_vm8, %v4247_v43, %v11424_v10  ;;  %v9683_v11 = vld [vmem:[#allocation2 + $0x1c] sm:$0xf]  ;;  %v9684_v1 = vld [vmem:[#allocation2 + $0x18] sm:$0xf] }
 0x167   : > { %v2400_v3 = vrot.slane %v2398_v35, 4  ;;  %v2411_v62 = vshrl.u32 %v11558_v14, 16  ;;  %v9050_v48 = vcombine.low %v2129_v38, %v11558_v14  ;;  %v1787_v4 = vshrl.u32 %v1515_v32, 16 }
 0x168   : > { %3538 = vrot.lane.b32.xlu0 %v9034_v54, %s9809_s26  ;;  %v3000_v41 = vrot.slane %v2999_v28, 4  ;;  %v1790_v26 = vshll.u32 %v1515_v32, 16  ;;  %v1796_v47 = vshll.u32 %v11526_v44, 16  ;;  %v2403_v58 = vrot.slane %v2401_v13, 5 }
 0x169   : > { %v1800_v7 = vshrl.u32 %v11526_v44, 16  ;;  %v1806_v10 = vshll.u32 %v11530_v2, 16  ;;  %v4313_v23 = vsel %vm4309_vm5, %v4280_v22, %v11311_v60  ;;  %v1789_v34 = vrot.slane %v1787_v4, 4 }
 0x16a   : > { %v3005_v63 = vsel %vm10418_vm2, %v3000_v41, %v3004_v31  ;;  %v1792_v6 = vrot.slane %v1790_v26, 5  ;;  %v1798_v8 = vrot.slane %v1796_v47, 5  ;;  %9488 = vmatmul.mubr.msk.bf16.vlgmr.msra.gmra.mxu0 %vm15964_vm13, %v4313_v23  ;;  %v8994_v44 = vcombine.low %v9684_v1, %v9683_v11  ;;  %v11592_v31 = vld [vmem:[#allocation2 + $0x8c] sm:$0x1]  ;;  %v11601_v41 = vld [vmem:[#allocation2 + $0x88] sm:$0xf] }
 0x16b   : > { %v9113_v38 = vcombine.low %v2995_v30, %v3005_v63  ;;  %v1802_v12 = vrot.slane %v1800_v7, 4  ;;  %v1808_v50 = vrot.slane %v1806_v10, 5  ;;  %v11587_v33 = vpop.permute.xlu1 %3448  ;;  %v11589_v2 = vpop.permute.xlu0 %3782  ;;  %v2404_v24 = vor.u32 %v2403_v58, %v2400_v3  ;;  %v1538_v23 = vld [vmem:[#allocation2 + $0x8c] sm:$0x1] }
 0x16c   : > { %3634 = vrot.lane.b32.xlu0 %v9050_v48, %s9810_s27  ;;  %v1793_v60 = vor.u32 %v1792_v6, %v1789_v34  ;;  %v2407_v25 = vshll.u32 %v11558_v14, 16  ;;  %v2413_v43 = vrot.slane %v2411_v62, 4  ;;  %v4071_v32 = vsel %vm15967_vm1, %v8994_v44, %v11455_v46 }
 0x16d   : > { %3968 = vrot.lane.b32.xlu1 %v9113_v38, %s9815_s6  ;;  %v1803_v35 = vor.u32 %v1802_v12, %v1798_v8  ;;  %v2417_v54 = vshll.u32 %v11592_v31, 16  ;;  %v1811_v30 = vshrl.u32 %v1517_v51, 16  ;;  %v4117_v22 = vsel %vm15966_vm15, %v4071_v32, %v11339_v17 }
 0x16e   : > { %v1794_v28 = vrot.slane %v1793_v60, 4  ;;  %v2405_v13 = vrot.slane %v2404_v24, 4  ;;  %v2409_v48 = vrot.slane %v2407_v25, 5  ;;  %v4150_v62 = vsel %vm15965_vm0, %v4117_v22, %v11227_v53  ;;  %v2551_v60 = vld [vmem:[#allocation2 + $0x84] sm:$0xe] }
 0x16f   : > { %v1804_v3 = vrot.slane %v1803_v35, 4  ;;  %v2419_v4 = vrot.slane %v2417_v54, 5  ;;  %v1813_v26 = vrot.slane %v1811_v30, 4  ;;  %v11605_v47 = vpop.permute.xlu1 %3528  ;;  %vm16085_vm13 = vcmask 261120   ;;  %v11617_v6 = vpop.permute.xlu0 %3878  ;;  %v9685_v35 = vld [vmem:[#allocation2 + $0x28] sm:$0xf] }
 0x170   : > { %v1799_v46 = vsel %vm10418_vm2, %v1794_v28, %v1798_v8  ;;  %v4183_v58 = vsel %vm16085_vm13, %v4150_v62, %v11411_v59  ;;  %v2410_v17 = vsel %vm10418_vm2, %v2405_v13, %v2409_v48  ;;  %v2414_v7 = vor.u32 %v2413_v43, %v2409_v48  ;;  %v1941_v54 = vld [vmem:[#allocation2 + $0x84] sm:$0xe] }
 0x171   : > { %v1809_v10 = vsel %vm10418_vm2, %v1804_v3, %v1808_v50  ;;  %v1814_v63 = vshll.u32 %v1517_v51, 16  ;;  %v1820_v53 = vshll.u32 %v11601_v41, 16  ;;  %v1824_v34 = vshrl.u32 %v11601_v41, 16 }
 0x172   : > { %v9018_v38 = vcombine.low %v1799_v46, %v1809_v10  ;;  %v2415_v8 = vrot.slane %v2414_v7, 4  ;;  %v1830_v12 = vshll.u32 %v1538_v23, 16  ;;  %v4216_v59 = vsel %vm4210_vm14, %v4183_v58, %v11364_v45  ;;  %v9686_v45 = vld [vmem:[#allocation2 + $0x24] sm:$0xf] }
 0x173   : > { %v1816_v11 = vrot.slane %v1814_v63, 5  ;;  %v1822_v1 = vrot.slane %v1820_v53, 5  ;;  %v1826_v44 = vrot.slane %v1824_v34, 4  ;;  %v4249_v50 = vsel %vm4243_vm4, %v4216_v59, %v11256_v57  ;;  %v11623_v51 = vpop.permute.xlu1 %3624 }
 0x174   : > { %3458 = vrot.lane.b32.xlu1 %v9018_v38, %s9808_s25  ;;  %v2420_v24 = vsel %vm10418_vm2, %v2415_v8, %v2419_v4  ;;  %v1832_v25 = vrot.slane %v1830_v12, 5  ;;  %v4282_v43 = vsel %vm4276_vm8, %v4249_v50, %v11428_v36  ;;  %v8995_v32 = vcombine.low %v9686_v45, %v9685_v35  ;;  %v2738_v36 = vld [vmem:[#allocation2 + $0x90] sm:$0xf] }
 0x175   : > { %v9066_v30 = vcombine.low %v2410_v17, %v2420_v24  ;;  %v1817_v28 = vor.u32 %v1816_v11, %v1813_v26  ;;  %v1827_v22 = vor.u32 %v1826_v44, %v1822_v1  ;;  %v4315_v57 = vsel %vm4309_vm5, %v4282_v43, %v11457_v21  ;;  %v2131_v12 = vld [vmem:[#allocation2 + $0x90] sm:$0xf]  ;;  %v11661_v44 = vld [vmem:[#allocation2 + $0x94] sm:$0xf] }
 0x176   : > { %v4074_v13 = vsel %vm15967_vm1, %v8995_v32, %v11475_v39  ;;  %v8970_v48 = vrot.slane %v2551_v60, 9  ;;  %v2677_v3 = vrot.slane %v11558_v14, 5  ;;  %v2680_v62 = vrot.slane %v11592_v31, 5  ;;  %v11640_v21 = vpop.permute.xlu0 %3958 }
 0x177   : > { %vm16086_vm13 = vcmask 588800   ;;  %3714 = vrot.lane.b32.xlu0 %v9066_v30, %s9814_s5  ;;  %v1818_v4 = vrot.slane %v1817_v28, 4  ;;  %v1828_v46 = vrot.slane %v1827_v22, 4  ;;  %v4119_v26 = vsel %vm15966_vm15, %v4074_v13, %v11332_v0  ;;  %v11651_v0 = vld [vmem:[#allocation2 + $0x94] sm:$0xf] }
 0x178   : > { %9491 = vmatprep.mubr.msk.bf16.mxu0 %vm16086_vm13, %v4315_v57  ;;  %v8955_v58 = vrot.slane %v1941_v54, 9  ;;  %v2678_v39 = vsel %vm10431_vm6, %v8970_v48, %v2677_v3  ;;  %v2679_v17 = vrot.slane %v2677_v3, 4  ;;  %v2076_v14 = vrot.slane %v11601_v41, 5  ;;  %v11653_v34 = vpop.permute.xlu1 %3704  ;;  %v2760_v48 = vld [vmem:[#allocation2 + $0x98] sm:$0x1] }
 0x179   : > { %v2079_v31 = vrot.slane %v1538_v23, 5  ;;  %v1823_v7 = vsel %vm10418_vm2, %v1818_v4, %v1822_v1  ;;  %v1833_v10 = vsel %vm10418_vm2, %v1828_v46, %v1832_v25  ;;  %v4152_v63 = vsel %vm15965_vm0, %v4119_v26, %v11248_v20  ;;  %v11683_v26 = vld [vmem:[#allocation2 + $0x98] sm:$0x1] }
 0x17a   : > { %v3007_v53 = vshrl.u32 %v2738_v36, 16  ;;  %v9019_v38 = vcombine.low %v1823_v7, %v1833_v10  ;;  %v2681_v8 = vsel %vm10431_vm6, %v2679_v17, %v2680_v62  ;;  %v2077_v41 = vsel %vm10431_vm6, %v8955_v58, %v2076_v14  ;;  %v11670_v43 = vpop.permute.xlu0 %4038 }
 0x17b   : > { %v2078_v23 = vrot.slane %v2076_v14, 4  ;;  %v9082_v59 = vcombine.low %v2678_v39, %v2681_v8  ;;  %vm16087_vm13 = vcmask 261120   ;;  %v3010_v20 = vshll.u32 %v2738_v36, 16  ;;  %v3160_v14 = vld [vmem:[#allocation2 + $0x90] sm:$0xe] }
 0x17c   : > { %v4185_v11 = vsel %vm16087_vm13, %v4152_v63, %v11501_v15  ;;  %v3009_v1 = vrot.slane %v3007_v53, 4  ;;  %3460 = vrot.lane.b32.xlu1 %v9019_v38, %s9808_s25  ;;  %v3020_v24 = vshrl.u32 %v11651_v0, 16  ;;  %v9098_v25 = vcombine.low %v2738_v36, %v11651_v0  ;;  %v11680_v62 = vpop.permute.xlu1 %3784  ;;  %v2552_v53 = vld [vmem:[#allocation2 + $0x90] sm:$0xe] }
 0x17d   : > { %v2080_v50 = vsel %vm10431_vm6, %v2078_v23, %v2079_v31  ;;  %v4218_v60 = vsel %vm4210_vm14, %v4185_v11, %v11358_v19  ;;  %3794 = vrot.lane.b32.xlu0 %v9082_v59, %s9812_s29  ;;  %v3012_v35 = vrot.slane %v3010_v20, 5  ;;  %v2422_v45 = vshrl.u32 %v2131_v12, 16  ;;  %v9688_v59 = vld [vmem:[#allocation2 + $0x30] sm:$0xf] }
 0x17e   : > { %v9035_v15 = vcombine.low %v2077_v41, %v2080_v50  ;;  %v2425_v32 = vshll.u32 %v2131_v12, 16  ;;  %v2435_v54 = vshrl.u32 %v11661_v44, 16  ;;  %v9051_v30 = vcombine.low %v2131_v12, %v11661_v44  ;;  %v11690_v38 = vpop.permute.xlu0 %4040  ;;  %v9687_v12 = vld [vmem:[#allocation2 + $0x34] sm:$0xf] }
 0x17f   : > { %v4251_v28 = vsel %vm4243_vm4, %v4218_v60, %v11278_v61  ;;  %v3016_v19 = vshll.u32 %v11651_v0, 16  ;;  %v2424_v22 = vrot.slane %v2422_v45, 4  ;;  %v3013_v3 = vor.u32 %v3012_v35, %v3009_v1  ;;  %v3161_v35 = vld [vmem:[#allocation2 + $0x9c] sm:$0xe] }
 0x180   : > { %v2427_v57 = vrot.slane %v2425_v32, 5  ;;  %v4284_v13 = vsel %vm4276_vm8, %v4251_v28, %v11536_v37  ;;  %3540 = vrot.lane.b32.xlu1 %v9035_v15, %s9809_s26  ;;  %v3022_v4 = vrot.slane %v3020_v24, 4  ;;  %v3026_v46 = vshll.u32 %v2760_v48, 16  ;;  %v11701_v45 = vpop.permute.xlu1 %3880 }
 0x181   : > { %v3018_v36 = vrot.slane %v3016_v19, 5  ;;  %v2431_v61 = vshll.u32 %v11661_v44, 16  ;;  %3890 = vrot.lane.b32.xlu0 %v9098_v25, %s9811_s28  ;;  %v3014_v58 = vrot.slane %v3013_v3, 4  ;;  %v2437_v17 = vrot.slane %v2435_v54, 4  ;;  %v9689_v3 = vld [vmem:[#allocation2 + $0x3c] sm:$0xf] }
 0x182   : > { %v2428_v39 = vor.u32 %v2427_v57, %v2424_v22  ;;  %v2441_v37 = vshll.u32 %v11683_v26, 16  ;;  %v3028_v7 = vrot.slane %v3026_v46, 5  ;;  %v4317_v63 = vsel %vm4309_vm5, %v4284_v13, %v11477_v27  ;;  %v11711_v57 = vld [vmem:[#allocation2 + $0xa0] sm:$0xf] }
 0x183   : > { %v3023_v31 = vor.u32 %v3022_v4, %v3018_v36  ;;  %v2433_v10 = vrot.slane %v2431_v61, 5  ;;  %v3019_v8 = vsel %vm10418_vm2, %v3014_v58, %v3018_v36  ;;  %vm16088_vm13 = vcmask 588800   ;;  %v9690_v36 = vld [vmem:[#allocation2 + $0x40] sm:$0xf]  ;;  %v2761_v4 = vld [vmem:[#allocation2 + $0xa4] sm:$0x1]  ;;  %v11717_v58 = vpop.permute.xlu0 %3530 }
 0x184   : > { %v2429_v41 = vrot.slane %v2428_v39, 4  ;;  %v2443_v23 = vrot.slane %v2441_v37, 5  ;;  %9492 = vmatmul.mubr.msk.bf16.gmra.mxu0 %vm16088_vm13, %v4317_v63  ;;  %v8996_v11 = vcombine.low %v9688_v59, %v9687_v12  ;;  %3636 = vrot.lane.b32.xlu1 %v9051_v30, %s9810_s27  ;;  %v8986_v50 = vrot.slane %v3160_v14, 9  ;;  %v2740_v61 = vld [vmem:[#allocation2 + $0x9c] sm:$0xf] }
 0x185   : > { %v3024_v1 = vrot.slane %v3023_v31, 4  ;;  %v2438_v20 = vor.u32 %v2437_v17, %v2433_v10  ;;  %v3286_v27 = vrot.slane %v11651_v0, 5  ;;  %v3289_v25 = vrot.slane %v2760_v48, 5  ;;  %v11736_v12 = vpop.permute.xlu1 %3960 }
 0x186   : > { %v2434_v60 = vsel %vm10418_vm2, %v2429_v41, %v2433_v10  ;;  %v4077_v24 = vsel %vm15967_vm1, %v8996_v11, %v11567_v40  ;;  %v8971_v15 = vrot.slane %v2552_v53, 9  ;;  %v2684_v22 = vrot.slane %v11661_v44, 5  ;;  %v11731_v10 = vld [vmem:[#allocation2 + $0x98] sm:$0x1] }
 0x187   : > { %v3029_v32 = vsel %vm10418_vm2, %v3024_v1, %v3028_v7  ;;  %v2439_v54 = vrot.slane %v2438_v20, 4  ;;  %v4121_v30 = vsel %vm15966_vm15, %v4077_v24, %v11508_v16  ;;  %v3287_v0 = vsel %vm10431_vm6, %v8986_v50, %v3286_v27  ;;  %v11729_v7 = vld [vmem:[#allocation2 + $0x94] sm:$0xf] }
 0x188   : > { %v9114_v28 = vcombine.low %v3019_v8, %v3029_v32  ;;  %v3288_v19 = vrot.slane %v3286_v27, 4  ;;  %v2687_v40 = vrot.slane %v11683_v26, 5  ;;  %v4154_v48 = vsel %vm15965_vm0, %v4121_v30, %v11545_v9 }
 0x189   : > { %v2444_v13 = vsel %vm10418_vm2, %v2439_v54, %v2443_v23  ;;  %v8997_v16 = vcombine.low %v9689_v3, %v9690_v36  ;;  %v8987_v46 = vrot.slane %v3161_v35, 9  ;;  %v2685_v39 = vsel %vm10431_vm6, %v8971_v15, %v2684_v22  ;;  %v1942_v23 = vld [vmem:[#allocation2 + $0x90] sm:$0xe]  ;;  %v11750_v35 = vpop.permute.xlu0 %3626 }
 0x18a   : > { %3970 = vrot.lane.b32.xlu0 %v9114_v28, %s9815_s6  ;;  %v9067_v44 = vcombine.low %v2434_v60, %v2444_v13  ;;  %v3290_v26 = vsel %vm10431_vm6, %v3288_v19, %v3289_v25  ;;  %v2686_v17 = vrot.slane %v2684_v22, 4  ;;  %vm16089_vm13 = vcmask 261120  }
 0x18b   : > { %v9130_v37 = vcombine.low %v3287_v0, %v3290_v26  ;;  %v4187_v9 = vsel %vm16089_vm13, %v4154_v48, %v11574_v55  ;;  %v4080_v14 = vsel %vm15967_vm1, %v8997_v16, %v11587_v33  ;;  %v3293_v31 = vrot.slane %v11711_v57, 5  ;;  %v2133_v0 = vld [vmem:[#allocation2 + $0x9c] sm:$0xf] }
 0x18c   : > { %3716 = vrot.lane.b32.xlu1 %v9067_v44, %s9814_s5  ;;  %v2688_v63 = vsel %vm10431_vm6, %v2686_v17, %v2687_v40  ;;  %v3296_v53 = vrot.slane %v2761_v4, 5  ;;  %v3031_v8 = vshrl.u32 %v2740_v61, 16  ;;  %v3034_v41 = vshll.u32 %v2740_v61, 16  ;;  %v11759_v40 = vld [vmem:[#allocation2 + $0xa0] sm:$0xf]  ;;  %v11764_v16 = vpop.permute.xlu1 %3450 }
 0x18d   : > { %v9083_v55 = vcombine.low %v2685_v39, %v2688_v63  ;;  %v3294_v33 = vsel %vm10431_vm6, %v8987_v46, %v3293_v31  ;;  %v3295_v59 = vrot.slane %v3293_v31, 4  ;;  %v9099_v11 = vcombine.low %v2740_v61, %v11711_v57 }
 0x18e   : > { %4050 = vrot.lane.b32.xlu0 %v9130_v37, %s9813_s30  ;;  %v3033_v1 = vrot.slane %v3031_v8, 4  ;;  %v3036_v20 = vrot.slane %v3034_v41, 5  ;;  %v4220_v50 = vsel %vm4210_vm14, %v4187_v9, %v11589_v2  ;;  %v4123_v27 = vsel %vm15966_vm15, %v4080_v14, %v11605_v47 }
 0x18f   : > { %v3297_v60 = vsel %vm10431_vm6, %v3295_v59, %v3296_v53  ;;  %v8956_v24 = vrot.slane %v1942_v23, 9  ;;  %v2083_v25 = vrot.slane %v11729_v7, 5  ;;  %v2086_v15 = vrot.slane %v11731_v10, 5 }
 0x190   : > { %3796 = vrot.lane.b32.xlu1 %v9083_v55, %s9812_s29  ;;  %v9131_v32 = vcombine.low %v3294_v33, %v3297_v60  ;;  %v3037_v54 = vor.u32 %v3036_v20, %v3033_v1  ;;  %v3040_v30 = vshll.u32 %v11711_v57, 16  ;;  %v3044_v2 = vshrl.u32 %v11711_v57, 16  ;;  %v1519_v57 = vld [vmem:[#allocation2 + $0x90] sm:$0xf] }
 0x191   : > { %v2084_v47 = vsel %vm10431_vm6, %v8956_v24, %v2083_v25  ;;  %v2085_v28 = vrot.slane %v2083_v25, 4  ;;  %v3050_v19 = vshll.u32 %v2761_v4, 16  ;;  %v4253_v22 = vsel %vm4243_vm4, %v4220_v50, %v11617_v6  ;;  %v11773_v31 = vpop.permute.xlu0 %3706  ;;  %v11787_v25 = vld [vmem:[#allocation2 + $0xa4] sm:$0x1] }
 0x192   : > { %4052 = vrot.lane.b32.xlu0 %v9131_v32, %s9813_s30  ;;  %v3038_v13 = vrot.slane %v3037_v54, 4  ;;  %v3042_v48 = vrot.slane %v3040_v30, 5  ;;  %v3046_v3 = vrot.slane %v3044_v2, 4  ;;  %v4156_v36 = vsel %vm15965_vm0, %v4123_v27, %v11623_v51  ;;  %v1521_v27 = vld [vmem:[#allocation2 + $0x9c] sm:$0xf] }
 0x193   : > { %v2087_v46 = vsel %vm10431_vm6, %v2085_v28, %v2086_v15  ;;  %v3052_v4 = vrot.slane %v3050_v19, 5  ;;  %v2446_v61 = vshrl.u32 %v2133_v0, 16  ;;  %v2449_v44 = vshll.u32 %v2133_v0, 16 }
 0x194   : > { %3892 = vrot.lane.b32.xlu1 %v9099_v11, %s9811_s28  ;;  %v9036_v6 = vcombine.low %v2084_v47, %v2087_v46  ;;  %v3043_v26 = vsel %vm10418_vm2, %v3038_v13, %v3042_v48  ;;  %v3047_v39 = vor.u32 %v3046_v3, %v3042_v48  ;;  %v2459_v17 = vshrl.u32 %v11759_v40, 16 }
 0x195   : > { %v2448_v37 = vrot.slane %v2446_v61, 4  ;;  %v2451_v51 = vrot.slane %v2449_v44, 5  ;;  %v9052_v9 = vcombine.low %v2133_v0, %v11759_v40  ;;  %v1835_v14 = vshrl.u32 %v1519_v57, 16  ;;  %v2553_v61 = vld [vmem:[#allocation2 + $0x9c] sm:$0xe] }
 0x196   : > { %3542 = vrot.lane.b32.xlu0 %v9036_v6, %s9809_s26  ;;  %v3048_v63 = vrot.slane %v3047_v39, 4  ;;  %v1838_v53 = vshll.u32 %v1519_v57, 16  ;;  %v1844_v8 = vshll.u32 %v11729_v7, 16  ;;  %v1848_v41 = vshrl.u32 %v11729_v7, 16 }
 0x197   : > { %v1837_v23 = vrot.slane %v1835_v14, 4  ;;  %v1854_v55 = vshll.u32 %v11731_v10, 16  ;;  %v4286_v33 = vsel %vm4276_vm8, %v4253_v22, %v11640_v21  ;;  %v4189_v59 = vsel %vm16089_vm13, %v4156_v36, %v11653_v34  ;;  %v11785_v60 = vpop.permute.xlu1 %3452  ;;  %v1522_v21 = vld [vmem:[#allocation2 + $0xa0] sm:$0xf] }
 0x198   : > { %v3053_v11 = vsel %vm10418_vm2, %v3048_v63, %v3052_v4  ;;  %v1840_v1 = vrot.slane %v1838_v53, 5  ;;  %v1846_v20 = vrot.slane %v1844_v8, 5  ;;  %v1850_v50 = vrot.slane %v1848_v41, 4  ;;  %v1943_v53 = vld [vmem:[#allocation2 + $0x9c] sm:$0xe] }
 0x199   : > { %v9115_v24 = vcombine.low %v3043_v26, %v3053_v11  ;;  %v1856_v7 = vrot.slane %v1854_v55, 5  ;;  %v2452_v10 = vor.u32 %v2451_v51, %v2448_v37  ;;  %v2455_v15 = vshll.u32 %v11759_v40, 16  ;;  %v1540_v26 = vld [vmem:[#allocation2 + $0xa4] sm:$0x1] }
 0x19a   : > { %3638 = vrot.lane.b32.xlu0 %v9052_v9, %s9810_s27  ;;  %v1841_v34 = vor.u32 %v1840_v1, %v1837_v23  ;;  %v1851_v32 = vor.u32 %v1850_v50, %v1846_v20  ;;  %v2461_v54 = vrot.slane %v2459_v17, 4  ;;  %v2465_v30 = vshll.u32 %v11787_v25, 16  ;;  %v11793_v19 = vpop.permute.xlu0 %3786 }
 0x19b   : > { %3972 = vrot.lane.b32.xlu1 %v9115_v24, %s9815_s6  ;;  %v2453_v2 = vrot.slane %v2452_v10, 4  ;;  %v2457_v0 = vrot.slane %v2455_v15, 5  ;;  %v1859_v47 = vshrl.u32 %v1521_v27, 16  ;;  %v1862_v28 = vshll.u32 %v1521_v27, 16  ;;  %v11801_v37 = vpop.permute.xlu1 %3532  ;;  %v2742_v27 = vld [vmem:[#allocation2 + $0xa8] sm:$0xf] }
 0x19c   : > { %v1842_v22 = vrot.slane %v1841_v34, 4  ;;  %v1852_v13 = vrot.slane %v1851_v32, 4  ;;  %v2467_v48 = vrot.slane %v2465_v30, 5  ;;  %v1868_v3 = vshll.u32 %v1522_v21, 16  ;;  %v11819_v32 = vld [vmem:[#allocation2 + $0xac] sm:$0xf] }
 0x19d   : > { %v2458_v36 = vsel %vm10418_vm2, %v2453_v2, %v2457_v0  ;;  %v2462_v57 = vor.u32 %v2461_v54, %v2457_v0  ;;  %v1861_v46 = vrot.slane %v1859_v47, 4  ;;  %v1864_v4 = vrot.slane %v1862_v28, 5 }
 0x19e   : > { %v1847_v44 = vsel %vm10418_vm2, %v1842_v22, %v1846_v20  ;;  %v1857_v6 = vsel %vm10418_vm2, %v1852_v13, %v1856_v7  ;;  %v1870_v39 = vrot.slane %v1868_v3, 5  ;;  %v1872_v17 = vshrl.u32 %v1522_v21, 16  ;;  %v11812_v24 = vpop.permute.xlu0 %3882  ;;  %v11830_v22 = vld [vmem:[#allocation2 + $0xa8] sm:$0xf]  ;;  %v11832_v13 = vld [vmem:[#allocation2 + $0xac] sm:$0xf] }
 0x19f   : > { %v9020_v51 = vcombine.low %v1847_v44, %v1857_v6  ;;  %v2463_v9 = vrot.slane %v2462_v57, 4  ;;  %v1865_v14 = vor.u32 %v1864_v4, %v1861_v46  ;;  %v1878_v63 = vshll.u32 %v1540_v26, 16 }
 0x1a0   : > { %v1874_v8 = vrot.slane %v1872_v17, 4  ;;  %v4319_v41 = vsel %vm4309_vm5, %v4286_v33, %v11670_v43  ;;  %v4222_v23 = vsel %vm4210_vm14, %v4189_v59, %v11680_v62  ;;  %v8972_v55 = vrot.slane %v2553_v61, 9 }
 0x1a1   : > { %3462 = vrot.lane.b32.xlu1 %v9020_v51, %s9808_s25  ;;  %v2468_v11 = vsel %vm10418_vm2, %v2463_v9, %v2467_v48  ;;  %v1866_v1 = vrot.slane %v1865_v14, 4  ;;  %v1880_v20 = vrot.slane %v1878_v63, 5  ;;  %v2691_v50 = vrot.slane %v11759_v40, 5  ;;  %v2762_v14 = vld [vmem:[#allocation2 + $0xb0] sm:$0x1] }
 0x1a2   : > { %vm16090_vm13 = vcmask 588800   ;;  %v9068_v7 = vcombine.low %v2458_v36, %v2468_v11  ;;  %v1875_v43 = vor.u32 %v1874_v8, %v1870_v39  ;;  %v2694_v33 = vrot.slane %v11787_v25, 5  ;;  %v11824_v25 = vpop.permute.xlu1 %3628  ;;  %v11852_v11 = vld [vmem:[#allocation2 + $0xb0] sm:$0x1] }
 0x1a3   : > { %9495 = vmatprep.mubr.msk.bf16.mxu0 %vm16090_vm13, %v4319_v41  ;;  %v8957_v62 = vrot.slane %v1943_v53, 9  ;;  %v1871_v59 = vsel %vm10418_vm2, %v1866_v1, %v1870_v39  ;;  %v2692_v10 = vsel %vm10431_vm6, %v8972_v55, %v2691_v50  ;;  %v2693_v15 = vrot.slane %v2691_v50, 4 }
 0x1a4   : > { %v2090_v34 = vrot.slane %v1522_v21, 5  ;;  %3718 = vrot.lane.b32.xlu0 %v9068_v7, %s9814_s5  ;;  %v1876_v40 = vrot.slane %v1875_v43, 4  ;;  %v2093_v54 = vrot.slane %v1540_v26, 5  ;;  %v4255_v30 = vsel %vm4243_vm4, %v4222_v23, %v11701_v45  ;;  %v3162_v43 = vld [vmem:[#allocation2 + $0xa8] sm:$0xe] }
 0x1a5   : > { %v3055_v2 = vshrl.u32 %v2742_v27, 16  ;;  %v2695_v0 = vsel %vm10431_vm6, %v2693_v15, %v2694_v33  ;;  %v3058_v21 = vshll.u32 %v2742_v27, 16  ;;  %v3068_v36 = vshrl.u32 %v11819_v32, 16 }
 0x1a6   : > { %v2091_v47 = vsel %vm10431_vm6, %v8957_v62, %v2090_v34  ;;  %v2092_v28 = vrot.slane %v2090_v34, 4  ;;  %v1881_v48 = vsel %vm10418_vm2, %v1876_v40, %v1880_v20  ;;  %v9084_v3 = vcombine.low %v2692_v10, %v2695_v0  ;;  %v11840_v44 = vpop.permute.xlu0 %3962 }
 0x1a7   : > { %v3057_v45 = vrot.slane %v3055_v2, 4  ;;  %v9021_v57 = vcombine.low %v1871_v59, %v1881_v48  ;;  %v3060_v4 = vrot.slane %v3058_v21, 5  ;;  %v9100_v61 = vcombine.low %v2742_v27, %v11819_v32 }
 0x1a8   : > { %v2094_v46 = vsel %vm10431_vm6, %v2092_v28, %v2093_v54  ;;  %3798 = vrot.lane.b32.xlu0 %v9084_v3, %s9812_s29  ;;  %v2470_v26 = vshrl.u32 %v11830_v22, 16  ;;  %v2473_v39 = vshll.u32 %v11830_v22, 16  ;;  %v2483_v17 = vshrl.u32 %v11832_v13, 16  ;;  %v9691_v54 = vld [vmem:[#allocation2 + $0x4c] sm:$0xf] }
 0x1a9   : > { %v9037_v6 = vcombine.low %v2091_v47, %v2094_v46  ;;  %3464 = vrot.lane.b32.xlu1 %v9021_v57, %s9808_s25  ;;  %v9053_v51 = vcombine.low %v11830_v22, %v11832_v13  ;;  %v4288_v9 = vsel %vm4276_vm8, %v4255_v30, %v11736_v12  ;;  %v3061_v63 = vor.u32 %v3060_v4, %v3057_v45  ;;  %v11854_v1 = vpop.permute.xlu1 %3708  ;;  %v9692_v30 = vld [vmem:[#allocation2 + $0x48] sm:$0xf] }
 0x1aa   : > { %v3064_v53 = vshll.u32 %v11819_v32, 16  ;;  %v2472_v8 = vrot.slane %v2470_v26, 4  ;;  %v2475_v41 = vrot.slane %v2473_v39, 5  ;;  %v3070_v23 = vrot.slane %v3068_v36, 4  ;;  %v11857_v33 = vpop.permute.xlu0 %4042  ;;  %v2554_v22 = vld [vmem:[#allocation2 + $0xa8] sm:$0xe] }
 0x1ab   : > { %v3074_v55 = vshll.u32 %v2762_v14, 16  ;;  %v3062_v20 = vrot.slane %v3061_v63, 4  ;;  %v2479_v27 = vshll.u32 %v11832_v13, 16  ;;  %v2485_v7 = vrot.slane %v2483_v17, 4 }
 0x1ac   : > { %v3066_v50 = vrot.slane %v3064_v53, 5  ;;  %3894 = vrot.lane.b32.xlu0 %v9100_v61, %s9811_s28  ;;  %v2476_v62 = vor.u32 %v2475_v41, %v2472_v8  ;;  %v2489_v59 = vshll.u32 %v11852_v11, 16  ;;  %v4321_v10 = vsel %vm4309_vm5, %v4288_v9, %v11690_v38  ;;  %v3163_v9 = vld [vmem:[#allocation2 + $0xb4] sm:$0xe]  ;;  %v2763_v8 = vld [vmem:[#allocation2 + $0xbc] sm:$0x1] }
 0x1ad   : > { %v3076_v12 = vrot.slane %v3074_v55, 5  ;;  %3544 = vrot.lane.b32.xlu1 %v9037_v6, %s9809_s26  ;;  %v2481_v40 = vrot.slane %v2479_v27, 5  ;;  %9496 = vmatmul.mubr.msk.bf16.gmra.mxu0 %vm16090_vm13, %v4321_v10  ;;  %v8998_v2 = vcombine.low %v9692_v30, %v9691_v54  ;;  %v8988_v28 = vrot.slane %v3162_v43, 9  ;;  %v11868_v48 = vpop.permute.xlu1 %3788  ;;  %v11880_v6 = vld [vmem:[#allocation2 + $0xb8] sm:$0xf] }
 0x1ae   : > { %v3067_v15 = vsel %vm10418_vm2, %v3062_v20, %v3066_v50  ;;  %v3071_v34 = vor.u32 %v3070_v23, %v3066_v50  ;;  %v2477_v0 = vrot.slane %v2476_v62, 4  ;;  %v2491_v47 = vrot.slane %v2489_v59, 5  ;;  %v11872_v57 = vpop.permute.xlu0 %4044  ;;  %v2744_v41 = vld [vmem:[#allocation2 + $0xb4] sm:$0xf]  ;;  %v11902_v62 = vld [vmem:[#allocation2 + $0xac] sm:$0xf] }
 0x1af   : > { %v3300_v21 = vrot.slane %v11819_v32, 5  ;;  %v2486_v3 = vor.u32 %v2485_v7, %v2481_v40  ;;  %v4083_v45 = vsel %vm15967_vm1, %v8998_v2, %v11764_v16  ;;  %v3303_v36 = vrot.slane %v2762_v14, 5  ;;  %v9693_v27 = vld [vmem:[#allocation2 + $0x54] sm:$0xf]  ;;  %v9694_v7 = vld [vmem:[#allocation2 + $0x58] sm:$0xf] }
 0x1b0   : > { %v3072_v38 = vrot.slane %v3071_v34, 4  ;;  %v2482_v46 = vsel %vm10418_vm2, %v2477_v0, %v2481_v40  ;;  %v4125_v4 = vsel %vm15966_vm15, %v4083_v45, %v11717_v58  ;;  %v8973_v39 = vrot.slane %v2554_v22, 9  ;;  %v1944_v40 = vld [vmem:[#allocation2 + $0xa8] sm:$0xe]  ;;  %v1541_v0 = vld [vmem:[#allocation2 + $0xb0] sm:$0x1] }
 0x1b1   : > { %v3301_v32 = vsel %vm10431_vm6, %v8988_v28, %v3300_v21  ;;  %v3302_v61 = vrot.slane %v3300_v21, 4  ;;  %3640 = vrot.lane.b32.xlu1 %v9053_v51, %s9810_s27  ;;  %v2487_v26 = vrot.slane %v2486_v3, 4  ;;  %v2698_v17 = vrot.slane %v11832_v13, 5  ;;  %v11891_v51 = vpop.permute.xlu1 %3884 }
 0x1b2   : > { %v3077_v16 = vsel %vm10418_vm2, %v3072_v38, %v3076_v12  ;;  %v2701_v63 = vrot.slane %v11852_v11, 5  ;;  %v4158_v53 = vsel %vm15965_vm0, %v4125_v4, %v11750_v35  ;;  %v11897_v50 = vpop.permute.xlu0 %3534  ;;  %vm16091_vm13 = vcmask 261120  }
 0x1b3   : > { %v9116_v14 = vcombine.low %v3067_v15, %v3077_v16  ;;  %v3304_v58 = vsel %vm10431_vm6, %v3302_v61, %v3303_v36  ;;  %v2492_v23 = vsel %vm10418_vm2, %v2487_v26, %v2491_v47  ;;  %v2699_v13 = vsel %vm10431_vm6, %v8973_v39, %v2698_v17  ;;  %v2137_v16 = vld [vmem:[#allocation2 + $0xb4] sm:$0xf] }
 0x1b4   : > { %v9132_v55 = vcombine.low %v3301_v32, %v3304_v58  ;;  %v2700_v20 = vrot.slane %v2698_v17, 4  ;;  %v9069_v11 = vcombine.low %v2482_v46, %v2492_v23  ;;  %v4191_v35 = vsel %vm16091_vm13, %v4158_v53, %v11773_v31  ;;  %v11932_v53 = vld [vmem:[#allocation2 + $0xb8] sm:$0xf] }
 0x1b5   : > { %3974 = vrot.lane.b32.xlu0 %v9116_v14, %s9815_s6  ;;  %v8999_v43 = vcombine.low %v9693_v27, %v9694_v7  ;;  %v8989_v12 = vrot.slane %v3163_v9, 9  ;;  %v3307_v10 = vrot.slane %v11880_v6, 5  ;;  %v3310_v15 = vrot.slane %v2763_v8, 5  ;;  %v11919_v36 = vpop.permute.xlu1 %3964 }
 0x1b6   : > { %v2702_v59 = vsel %vm10431_vm6, %v2700_v20, %v2701_v63  ;;  %v3079_v34 = vshrl.u32 %v2744_v41, 16  ;;  %3720 = vrot.lane.b32.xlu1 %v9069_v11, %s9814_s5  ;;  %v3082_v30 = vshll.u32 %v2744_v41, 16  ;;  %v9101_v2 = vcombine.low %v2744_v41, %v11880_v6  ;;  %v11921_v46 = vpop.permute.xlu0 %3630 }
 0x1b7   : > { %v9085_v54 = vcombine.low %v2699_v13, %v2702_v59  ;;  %v4086_v31 = vsel %vm15967_vm1, %v8999_v43, %v11785_v60  ;;  %v3308_v47 = vsel %vm10431_vm6, %v8989_v12, %v3307_v10  ;;  %v3309_v28 = vrot.slane %v3307_v10, 4  ;;  %v11939_v13 = vld [vmem:[#allocation2 + $0xa8] sm:$0xf] }
 0x1b8   : > { %v3081_v21 = vrot.slane %v3079_v34, 4  ;;  %v4224_v22 = vsel %vm4210_vm14, %v4191_v35, %v11793_v19  ;;  %v3084_v38 = vrot.slane %v3082_v30, 5  ;;  %v4127_v3 = vsel %vm15966_vm15, %v4086_v31, %v11801_v37 }
 0x1b9   : > { %4054 = vrot.lane.b32.xlu0 %v9132_v55, %s9813_s30  ;;  %v8958_v45 = vrot.slane %v1944_v40, 9  ;;  %v2097_v60 = vrot.slane %v11902_v62, 5  ;;  %v3311_v4 = vsel %vm10431_vm6, %v3309_v28, %v3310_v15  ;;  %v2100_v32 = vrot.slane %v1541_v0, 5 }
 0x1ba   : > { %v3088_v61 = vshll.u32 %v11880_v6, 16  ;;  %v3092_v19 = vshrl.u32 %v11880_v6, 16  ;;  %3800 = vrot.lane.b32.xlu1 %v9085_v54, %s9812_s29  ;;  %v9133_v26 = vcombine.low %v3308_v47, %v3311_v4  ;;  %v3085_v17 = vor.u32 %v3084_v38, %v3081_v21  ;;  %v11963_v4 = vld [vmem:[#allocation2 + $0xb8] sm:$0xf] }
 0x1bb   : > { %v2098_v37 = vsel %vm10431_vm6, %v8958_v45, %v2097_v60  ;;  %v2099_v39 = vrot.slane %v2097_v60, 4  ;;  %v3098_v58 = vshll.u32 %v2763_v8, 16  ;;  %v4257_v63 = vsel %vm4243_vm4, %v4224_v22, %v11812_v24  ;;  %v11946_v12 = vpop.permute.xlu1 %3454  ;;  %v11961_v22 = vld [vmem:[#allocation2 + $0xb4] sm:$0xf] }
 0x1bc   : > { %v3090_v9 = vrot.slane %v3088_v61, 5  ;;  %v3094_v14 = vrot.slane %v3092_v19, 4  ;;  %v3086_v41 = vrot.slane %v3085_v17, 4  ;;  %v4160_v23 = vsel %vm15965_vm0, %v4127_v3, %v11824_v25 }
 0x1bd   : > { %4056 = vrot.lane.b32.xlu0 %v9133_v26, %s9813_s30  ;;  %v2101_v6 = vsel %vm10431_vm6, %v2099_v39, %v2100_v32  ;;  %v2494_v55 = vshrl.u32 %v2137_v16, 16  ;;  %v3100_v8 = vrot.slane %v3098_v58, 5  ;;  %v2497_v35 = vshll.u32 %v2137_v16, 16  ;;  %v11948_v25 = vpop.permute.xlu0 %3710  ;;  %v11965_v32 = vld [vmem:[#allocation2 + $0xbc] sm:$0x1] }
 0x1be   : > { %v9038_v20 = vcombine.low %v2098_v37, %v2101_v6  ;;  %v3095_v11 = vor.u32 %v3094_v14, %v3090_v9  ;;  %3896 = vrot.lane.b32.xlu1 %v9101_v2, %s9811_s28  ;;  %v3091_v24 = vsel %vm10418_vm2, %v3086_v41, %v3090_v9  ;;  %v2507_v7 = vshrl.u32 %v11932_v53, 16 }
 0x1bf   : > { %v2496_v27 = vrot.slane %v2494_v55, 4  ;;  %v9054_v43 = vcombine.low %v2137_v16, %v11932_v53  ;;  %v2499_v10 = vrot.slane %v2497_v35, 5  ;;  %v1883_v15 = vshrl.u32 %v11939_v13, 16  ;;  %v1542_v35 = vld [vmem:[#allocation2 + $0xbc] sm:$0x1] }
 0x1c0   : > { %v3096_v59 = vrot.slane %v3095_v11, 4  ;;  %v1886_v34 = vshll.u32 %v11939_v13, 16  ;;  %v1892_v40 = vshll.u32 %v11902_v62, 16  ;;  %v1896_v54 = vshrl.u32 %v11902_v62, 16 }
 0x1c1   : > { %3546 = vrot.lane.b32.xlu0 %v9038_v20, %s9809_s26  ;;  %v1902_v31 = vshll.u32 %v1541_v0, 16  ;;  %v4290_v30 = vsel %vm4276_vm8, %v4257_v63, %v11840_v44  ;;  %v1885_v47 = vrot.slane %v1883_v15, 4  ;;  %v4193_v21 = vsel %vm16091_vm13, %v4160_v23, %v11854_v1  ;;  %v11968_v16 = vpop.permute.xlu0 %3790  ;;  %v1945_v15 = vld [vmem:[#allocation2 + $0xb4] sm:$0xe] }
 0x1c2   : > { %v3101_v2 = vsel %vm10418_vm2, %v3096_v59, %v3100_v8  ;;  %v1888_v28 = vrot.slane %v1886_v34, 5  ;;  %v1894_v3 = vrot.slane %v1892_v40, 5  ;;  %v1898_v45 = vrot.slane %v1896_v54, 4 }
 0x1c3   : > { %v9117_v38 = vcombine.low %v3091_v24, %v3101_v2  ;;  %v1904_v60 = vrot.slane %v1902_v31, 5  ;;  %v2500_v44 = vor.u32 %v2499_v10, %v2496_v27  ;;  %v2503_v61 = vshll.u32 %v11932_v53, 16  ;;  %v11975_v17 = vpop.permute.xlu1 %3456  ;;  %v2555_v27 = vld [vmem:[#allocation2 + $0xb4] sm:$0xe] }
 0x1c4   : > { %v1889_v0 = vor.u32 %v1888_v28, %v1885_v47  ;;  %v2509_v19 = vrot.slane %v2507_v7, 4  ;;  %v1899_v1 = vor.u32 %v1898_v45, %v1894_v3  ;;  %v2513_v26 = vshll.u32 %v11965_v32, 16 }
 0x1c5   : > { %3976 = vrot.lane.b32.xlu1 %v9117_v38, %s9815_s6  ;;  %3642 = vrot.lane.b32.xlu0 %v9054_v43, %s9810_s27  ;;  %v1907_v37 = vshrl.u32 %v11961_v22, 16  ;;  %v1910_v39 = vshll.u32 %v11961_v22, 16  ;;  %v2501_v14 = vrot.slane %v2500_v44, 4  ;;  %v2505_v58 = vrot.slane %v2503_v61, 5  ;;  %v11991_v47 = vpop.permute.xlu0 %3886  ;;  %v2746_v44 = vld [vmem:[#allocation2 + $0xc0] sm:$0xf] }
 0x1c6   : > { %v1890_v9 = vrot.slane %v1889_v0, 4  ;;  %v1916_v63 = vshll.u32 %v11963_v4, 16  ;;  %v1900_v6 = vrot.slane %v1899_v1, 4  ;;  %v2515_v41 = vrot.slane %v2513_v26, 5  ;;  %v12002_v1 = vld [vmem:[#allocation2 + $0xc4] sm:$0xf] }
 0x1c7   : > { %v1909_v23 = vrot.slane %v1907_v37, 4  ;;  %v1912_v55 = vrot.slane %v1910_v39, 5  ;;  %v2506_v11 = vsel %vm10418_vm2, %v2501_v14, %v2505_v58  ;;  %v2510_v8 = vor.u32 %v2509_v19, %v2505_v58  ;;  %v11985_v34 = vpop.permute.xlu1 %3536 }
 0x1c8   : > { %v1895_v20 = vsel %vm10418_vm2, %v1890_v9, %v1894_v3  ;;  %v1918_v24 = vrot.slane %v1916_v63, 5  ;;  %v1905_v7 = vsel %vm10418_vm2, %v1900_v6, %v1904_v60  ;;  %v1920_v59 = vshrl.u32 %v11963_v4, 16  ;;  %v12013_v6 = vld [vmem:[#allocation2 + $0xc0] sm:$0xf] }
 0x1c9   : > { %v1913_v43 = vor.u32 %v1912_v55, %v1909_v23  ;;  %v1926_v10 = vshll.u32 %v1542_v35, 16  ;;  %v9022_v40 = vcombine.low %v1895_v20, %v1905_v7  ;;  %v2511_v54 = vrot.slane %v2510_v8, 4 }
 0x1ca   : > { %v4323_v31 = vsel %vm4309_vm5, %v4290_v30, %v11857_v33  ;;  %v4226_v2 = vsel %vm4210_vm14, %v4193_v21, %v11868_v48  ;;  %v1922_v38 = vrot.slane %v1920_v59, 4  ;;  %v8974_v45 = vrot.slane %v2555_v27, 9 }
 0x1cb   : > { %v1914_v28 = vrot.slane %v1913_v43, 4  ;;  %v1928_v3 = vrot.slane %v1926_v10, 5  ;;  %vm16092_vm13 = vcmask 588800   ;;  %3466 = vrot.lane.b32.xlu1 %v9022_v40, %s9808_s25  ;;  %v2516_v60 = vsel %vm10418_vm2, %v2511_v54, %v2515_v41  ;;  %v12004_v26 = vpop.permute.xlu1 %3632 }
 0x1cc   : > { %9499 = vmatprep.mubr.msk.bf16.mxu0 %vm16092_vm13, %v4323_v31  ;;  %v2705_v0 = vrot.slane %v11932_v53, 5  ;;  %v2708_v33 = vrot.slane %v11965_v32, 5  ;;  %v8959_v30 = vrot.slane %v1945_v15, 9  ;;  %v9070_v48 = vcombine.low %v2506_v11, %v2516_v60  ;;  %v12019_v11 = vld [vmem:[#allocation2 + $0xc4] sm:$0xf] }
 0x1cd   : > { %v1919_v21 = vsel %vm10418_vm2, %v1914_v28, %v1918_v24  ;;  %v1923_v61 = vor.u32 %v1922_v38, %v1918_v24  ;;  %v2104_v19 = vrot.slane %v11963_v4, 5  ;;  %v2107_v53 = vrot.slane %v1542_v35, 5  ;;  %v2764_v28 = vld [vmem:[#allocation2 + $0xc8] sm:$0x1] }
 0x1ce   : > { %v2706_v37 = vsel %vm10431_vm6, %v8974_v45, %v2705_v0  ;;  %v2707_v39 = vrot.slane %v2705_v0, 4  ;;  %v4259_v32 = vsel %vm4243_vm4, %v4226_v2, %v11891_v51  ;;  %3722 = vrot.lane.b32.xlu0 %v9070_v48, %s9814_s5  ;;  %v3103_v63 = vshrl.u32 %v2746_v44, 16  ;;  %v12021_v51 = vpop.permute.xlu0 %3966  ;;  %v12039_v0 = vld [vmem:[#allocation2 + $0xc8] sm:$0x1] }
 0x1cf   : > { %v1924_v9 = vrot.slane %v1923_v61, 4  ;;  %v2105_v14 = vsel %vm10431_vm6, %v8959_v30, %v2104_v19  ;;  %v2106_v58 = vrot.slane %v2104_v19, 4  ;;  %v3106_v23 = vshll.u32 %v2746_v44, 16  ;;  %v12028_v15 = vpop.permute.xlu1 %3712  ;;  %v3164_v61 = vld [vmem:[#allocation2 + $0xc0] sm:$0xe] }
 0x1d0   : > { %v2709_v41 = vsel %vm10431_vm6, %v2707_v39, %v2708_v33  ;;  %v3116_v55 = vshrl.u32 %v12002_v1, 16  ;;  %v9102_v20 = vcombine.low %v2746_v44, %v12002_v1  ;;  %v3105_v27 = vrot.slane %v3103_v63, 4 }
 0x1d1   : > { %v1929_v8 = vsel %vm10418_vm2, %v1924_v9, %v1928_v3  ;;  %v9086_v35 = vcombine.low %v2706_v37, %v2709_v41  ;;  %v2108_v24 = vsel %vm10431_vm6, %v2106_v58, %v2107_v53  ;;  %v3108_v59 = vrot.slane %v3106_v23, 5  ;;  %v9696_v58 = vld [vmem:[#allocation2 + $0x60] sm:$0xf] }
 0x1d2   : > { %v9023_v7 = vcombine.low %v1919_v21, %v1929_v8  ;;  %v9039_v43 = vcombine.low %v2105_v14, %v2108_v24  ;;  %v2518_v10 = vshrl.u32 %v12013_v6, 16  ;;  %v2521_v40 = vshll.u32 %v12013_v6, 16  ;;  %v12041_v33 = vpop.permute.xlu0 %4046  ;;  %v9695_v14 = vld [vmem:[#allocation2 + $0x64] sm:$0xf] }
 0x1d3   : > { %3802 = vrot.lane.b32.xlu0 %v9086_v35, %s9812_s29  ;;  %v2531_v54 = vshrl.u32 %v12019_v11, 16  ;;  %v9055_v31 = vcombine.low %v12013_v6, %v12019_v11  ;;  %v4292_v2 = vsel %vm4276_vm8, %v4259_v32, %v11919_v36  ;;  %v3109_v3 = vor.u32 %v3108_v59, %v3105_v27  ;;  %v2556_v6 = vld [vmem:[#allocation2 + $0xc0] sm:$0xe] }
 0x1d4   : > { %3468 = vrot.lane.b32.xlu1 %v9023_v7, %s9808_s25  ;;  %v2520_v38 = vrot.slane %v2518_v10, 4  ;;  %v3112_v45 = vshll.u32 %v12002_v1, 16  ;;  %v3118_v60 = vrot.slane %v3116_v55, 4  ;;  %v2523_v30 = vrot.slane %v2521_v40, 5 }
 0x1d5   : > { %v3122_v44 = vshll.u32 %v2764_v28, 16  ;;  %v2527_v48 = vshll.u32 %v12019_v11, 16  ;;  %v2533_v21 = vrot.slane %v2531_v54, 4  ;;  %v3110_v19 = vrot.slane %v3109_v3, 4 }
 0x1d6   : > { %v3114_v36 = vrot.slane %v3112_v45, 5  ;;  %v2537_v37 = vshll.u32 %v12039_v0, 16  ;;  %v4325_v39 = vsel %vm4309_vm5, %v4292_v2, %v11872_v57  ;;  %v2524_v32 = vor.u32 %v2523_v30, %v2520_v38  ;;  %v12052_v57 = vpop.permute.xlu1 %3792  ;;  %v12057_v7 = vpop.permute.xlu0 %4048 }
 0x1d7   : > { %3898 = vrot.lane.b32.xlu0 %v9102_v20, %s9811_s28  ;;  %v3124_v53 = vrot.slane %v3122_v44, 5  ;;  %v2529_v9 = vrot.slane %v2527_v48, 5  ;;  %9500 = vmatmul.mubr.msk.bf16.gmra.mxu0 %vm16092_vm13, %v4325_v39  ;;  %v9000_v63 = vcombine.low %v9696_v58, %v9695_v14  ;;  %v8990_v8 = vrot.slane %v3164_v61, 9  ;;  %v338_v44 = vld [vmem:[#allocation2 + $0xd4] sm:$0x1] }
 0x1d8   : > { %3548 = vrot.lane.b32.xlu1 %v9039_v43, %s9809_s26  ;;  %v3115_v41 = vsel %vm10418_vm2, %v3110_v19, %v3114_v36  ;;  %v3119_v23 = vor.u32 %v3118_v60, %v3114_v36  ;;  %v2539_v55 = vrot.slane %v2537_v37, 5  ;;  %v2525_v20 = vrot.slane %v2524_v32, 4  ;;  %v9697_v19 = vld [vmem:[#allocation2 + $0x70] sm:$0xf]  ;;  %v9698_v36 = vld [vmem:[#allocation2 + $0x6c] sm:$0xf] }
 0x1d9   : > { %v2534_v35 = vor.u32 %v2533_v21, %v2529_v9  ;;  %v4089_v24 = vsel %vm15967_vm1, %v9000_v63, %v11946_v12  ;;  %v3314_v27 = vrot.slane %v12002_v1, 5  ;;  %v3317_v10 = vrot.slane %v2764_v28, 5  ;;  %v12070_v28 = vld [vmem:[#allocation2 + $0xd0] sm:$0xf] }
 0x1da   : > { %v3120_v59 = vrot.slane %v3119_v23, 4  ;;  %v4129_v43 = vsel %vm15966_vm15, %v4089_v24, %v11897_v50  ;;  %v8975_v40 = vrot.slane %v2556_v6, 9  ;;  %v2530_v54 = vsel %vm10418_vm2, %v2525_v20, %v2529_v9  ;;  %v282_v50 = vld [vmem:[#allocation2 + $0xcc] sm:$0x1]  ;;  %v12086_v32 = vpop.permute.xlu0 %3538  ;;  %v358_v20 = vld [vmem:[#allocation3 + $0x18] sm:$0x1] }
 0x1db   : > { %v2535_v2 = vrot.slane %v2534_v35, 4  ;;  %v3316_v38 = vrot.slane %v3314_v27, 4  ;;  %v2712_v1 = vrot.slane %v12019_v11, 5  ;;  %v2715_v3 = vrot.slane %v12039_v0, 5  ;;  %v355_v35 = vld [vmem:[#allocation3 + $0xc] sm:$0x1] }
 0x1dc   : > { %3644 = vrot.lane.b32.xlu1 %v9055_v31, %s9810_s27  ;;  %v3125_v12 = vsel %vm10418_vm2, %v3120_v59, %v3124_v53  ;;  %v4162_v45 = vsel %vm15965_vm0, %v4129_v43, %v11921_v46  ;;  %v3315_v31 = vsel %vm10431_vm6, %v8990_v8, %v3314_v27  ;;  %v3889_v46 = vpop.permute.xlu1 %3888  ;;  %vm16093_vm13 = vcmask 261120   ;;  %v413_v24 = vld [vmem:[#allocation3 + $0x20] sm:$0x1]  ;;  %v3165_v43 = vld [vmem:[#allocation2 + $0xcc] sm:$0xe] }
 0x1dd   : > { %v9118_v60 = vcombine.low %v3115_v41, %v3125_v12  ;;  %v2540_v30 = vsel %vm10418_vm2, %v2535_v2, %v2539_v55  ;;  %v3318_v11 = vsel %vm10431_vm6, %v3316_v38, %v3317_v10  ;;  %v2713_v0 = vsel %vm10431_vm6, %v8975_v40, %v2712_v1 }
 0x1de   : > { %v9071_v48 = vcombine.low %v2530_v54, %v2540_v30  ;;  %v2714_v21 = vrot.slane %v2712_v1, 4  ;;  %v4195_v61 = vsel %vm16093_vm13, %v4162_v45, %v11948_v25  ;;  %v9001_v37 = vcombine.low %v9698_v36, %v9697_v19  ;;  %v410_v54 = vld [vmem:[#allocation3 + $0x14] sm:$0x1] }
 0x1df   : > { %3978 = vrot.lane.b32.xlu0 %v9118_v60, %s9815_s6  ;;  %v283_v39 = vsel %vm9856_vm3, 0, %v282_v50  ;;  %v3140_v53 = vshrl.u32 %v12070_v28, 16  ;;  %v4228_v14 = vsel %vm4210_vm14, %v4195_v61, %v11968_v16  ;;  %v339_v25 = vsel %vm10012_vm10, 0, %v338_v44  ;;  %vm16094_vm3 = vmmov %vm16093_vm13 }
 0x1e0   : > { %3724 = vrot.lane.b32.xlu1 %v9071_v48, %s9814_s5  ;;  %v2716_v9 = vsel %vm10431_vm6, %v2714_v21, %v2715_v3  ;;  %284 = vst [vmem:[#allocation2 + $0xcc] sm:$0x1] %v283_v39  ;;  %v3136_v58 = vshll.u32 %v12070_v28, 16  ;;  %v9134_v49 = vcombine.low %v3315_v31, %v3318_v11  ;;  %v4092_v6 = vsel %vm15967_vm1, %v9001_v37, %v11975_v17  ;;  %v364_v3 = vld [vmem:[#allocation3 + $0x30] sm:$0x1] }
 0x1e1   : > { %v9087_v63 = vcombine.low %v2713_v0, %v2716_v9  ;;  %340 = vst [vmem:[#allocation2 + $0xd4] sm:$0x1] %v339_v25  ;;  %v4261_v41 = vsel %vm4243_vm4, %v4228_v14, %v11991_v47  ;;  %v4131_v23 = vsel %vm15966_vm15, %v4092_v6, %v11985_v34  ;;  %v3142_v16 = vrot.slane %v3140_v53, 4  ;;  %v3969_v47 = vpop.permute.xlu1 %3968  ;;  %v419_v39 = vld [vmem:[#allocation3 + $0x38] sm:$0x1] }
 0x1e2   : > { %v12102_v55 = vrot.slane %v3136_v58, 5  ;;  %v4294_v42 = vsel %vm4276_vm8, %v4261_v41, %v12021_v51  ;;  %v4164_v8 = vsel %vm15965_vm0, %v4131_v23, %v12004_v26  ;;  %vm16095_vm10 = vcmask 588800   ;;  %v12118_v26 = vpop.permute.xlu0 %3634  ;;  %v416_v53 = vld [vmem:[#allocation3 + $0x2c] sm:$0x1] }
 0x1e3   : > { %4058 = vrot.lane.b32.xlu0 %v9134_v49, %s9813_s30  ;;  %v4327_v17 = vsel %vm4309_vm5, %v4294_v42, %v12041_v33  ;;  %v4197_v34 = vsel %vm16094_vm3, %v4164_v8, %v12028_v15  ;;  %v3321_v51 = vrot.slane %v12070_v28, 5  ;;  %v9006_v33 = vcombine.low %v11939_v13, %v11902_v62  ;;  %vm16097_vm13 = vmmov %vm16095_vm10  ;;  %v370_v49 = vld [vmem:[#allocation3 + $0x48] sm:$0x1] }
 0x1e4   : > { %3804 = vrot.lane.b32.xlu1 %v9087_v63, %s9812_s29  ;;  %9503 = vmatprep.mubr.msk.bf16.mxu0 %vm16095_vm10, %v4327_v17  ;;  %v4230_v27 = vsel %vm4210_vm14, %v4197_v34, %v12052_v57  ;;  %v3143_v59 = vor.u32 %v3142_v16, %v12102_v55  ;;  %v9007_v10 = vcombine.low %v11961_v22, %v11963_v4  ;;  %v359_v40 = vsel %vm10093_vm12, 0, %v358_v20  ;;  %v391_v22 = vld [vmem:[#allocation3 + $0x9c] sm:$0x1] }
 0x1e5   : > { %v4263_v15 = vsel %vm4243_vm4, %v4230_v27, %v3889_v46  ;;  %360 = vst [vmem:[#allocation3 + $0x18] sm:$0x1] %v359_v40  ;;  %v356_v38 = vsel %vm10093_vm12, 0, %v355_v35  ;;  %v414_v1 = vsel %vm9865_vm7, 0, %v413_v24  ;;  %v8991_v48 = vrot.slane %v3165_v43, 9 }
 0x1e6   : > { %v4296_v57 = vsel %vm4276_vm8, %v4263_v15, %v3969_v47  ;;  %357 = vst [vmem:[#allocation3 + $0xc] sm:$0x1] %v356_v38  ;;  %415 = vst [vmem:[#allocation3 + $0x20] sm:$0x1] %v414_v1  ;;  %v411_v11 = vsel %vm9865_vm7, 0, %v410_v54  ;;  %v3144_v46 = vrot.slane %v3143_v59, 4  ;;  %v3459_v61 = vpop.permute.xlu1 %3458 }
 0x1e7   : > { %v2748_v2 = vld [vmem:[#allocation2 + $0xcc] sm:$0xf]  ;;  %v4329_v31 = vsel %vm4309_vm5, %v4296_v57, %v12057_v7  ;;  %412 = vst [vmem:[#allocation3 + $0x14] sm:$0x1] %v411_v11  ;;  %v361_v7 = vld [vmem:[#allocation3 + $0x24] sm:$0x1]  ;;  %v3322_v42 = vsel %vm10431_vm6, %v8991_v48, %v3321_v51 }
 0x1e8   : > { %v3127_v45 = vshrl.u32 %v2748_v2, 16  ;;  %v3130_v50 = vshll.u32 %v2748_v2, 16  ;;  %v9103_v60 = vcombine.low %v2748_v2, %v12070_v28  ;;  %v2765_v30 = vld [vmem:[#allocation2 + $0xd4] sm:$0x1]  ;;  %9504 = vmatmul.mubr.msk.bf16.gmra.mxu0 %vm16097_vm13, %v4329_v31  ;;  %v365_v28 = vsel %vm10093_vm12, 0, %v364_v3  ;;  %vm16098_vm13 = vmmov %vm16094_vm3 }
 0x1e9   : > { %v3146_v44 = vshll.u32 %v2765_v30, 16  ;;  %v3715_v36 = vpop.permute.xlu0 %3714  ;;  %366 = vst [vmem:[#allocation3 + $0x30] sm:$0x1] %v365_v28  ;;  %v362_v37 = vsel %vm10093_vm12, 0, %v361_v7  ;;  %v3323_v14 = vrot.slane %v3321_v51, 4  ;;  %v3324_v25 = vrot.slane %v2765_v30, 5 }
 0x1ea   : > { %v3129_v0 = vrot.slane %v3127_v45, 4  ;;  %v3132_v21 = vrot.slane %v3130_v50, 5  ;;  %3900 = vrot.lane.b32.xlu1 %v9103_v60, %s9811_s28  ;;  %363 = vst [vmem:[#allocation3 + $0x24] sm:$0x1] %v362_v37  ;;  %v420_v58 = vsel %vm9865_vm7, 0, %v419_v39  ;;  %v417_v63 = vsel %vm9865_vm7, 0, %v416_v53 }
 0x1eb   : > { %v3148_v19 = vrot.slane %v3146_v44, 5  ;;  %421 = vst [vmem:[#allocation3 + $0x38] sm:$0x1] %v420_v58  ;;  %v371_v6 = vsel %vm10093_vm12, 0, %v370_v49  ;;  %418 = vst [vmem:[#allocation3 + $0x2c] sm:$0x1] %v417_v63  ;;  %v3325_v8 = vsel %vm10431_vm6, %v3323_v14, %v3324_v25 }
 0x1ec   : > { %v3133_v9 = vor.u32 %v3132_v21, %v3129_v0  ;;  %372 = vst [vmem:[#allocation3 + $0x48] sm:$0x1] %v371_v6  ;;  %v367_v47 = vld [vmem:[#allocation3 + $0x3c] sm:$0x1]  ;;  %v9135_v24 = vcombine.low %v3322_v42, %v3325_v8  ;;  %v9699_v27 = vld [vmem:[#allocation2 + $0x7c] sm:$0xf] }
 0x1ed   : > { %v3149_v23 = vsel %vm10418_vm2, %v3144_v46, %v3148_v19  ;;  %v368_v35 = vsel %vm10093_vm12, 0, %v367_v47  ;;  %v9700_v59 = vld [vmem:[#allocation2 + $0x78] sm:$0xf]  ;;  %v425_v15 = vld [vmem:[#allocation3 + $0x50] sm:$0x1]  ;;  %v392_v4 = vsel %vm10093_vm12, 0, %v391_v22 }
 0x1ee   : > { %v3134_v41 = vrot.slane %v3133_v9, 4  ;;  %v3461_v17 = vpop.permute.xlu1 %3460  ;;  %v9002_v43 = vcombine.low %v9700_v59, %v9699_v27  ;;  %369 = vst [vmem:[#allocation3 + $0x3c] sm:$0x1] %v368_v35  ;;  %v426_v40 = vsel %vm9865_vm7, 0, %v425_v15  ;;  %v422_v54 = vld [vmem:[#allocation3 + $0x44] sm:$0x1] }
 0x1ef   : > { %v3795_v34 = vpop.permute.xlu0 %3794  ;;  %427 = vst [vmem:[#allocation3 + $0x50] sm:$0x1] %v426_v40  ;;  %v423_v57 = vsel %vm9865_vm7, 0, %v422_v54  ;;  %v376_v3 = vld [vmem:[#allocation3 + $0x60] sm:$0x1]  ;;  %s9404_s28 = sshll.u32 %s16784_s16, 8 }
 0x1f0   : > { %v3139_v16 = vsel %vm10418_vm2, %v3134_v41, %v12102_v55  ;;  %v4095_v51 = vsel %vm15967_vm1, %v9002_v43, %v3459_v61  ;;  %424 = vst [vmem:[#allocation3 + $0x44] sm:$0x1] %v423_v57  ;;  %v377_v50 = vsel %vm10093_vm12, 0, %v376_v3  ;;  %v9701_v46 = vld [vmem:[#allocation2 + $0x84] sm:$0xf] }
 0x1f1   : > { %v9119_v20 = vcombine.low %v3139_v16, %v3149_v23  ;;  %v4133_v38 = vsel %vm15966_vm15, %v4095_v51, %v12086_v32  ;;  %378 = vst [vmem:[#allocation3 + $0x60] sm:$0x1] %v377_v50  ;;  %v9702_v61 = vld [vmem:[#allocation2 + $0x88] sm:$0xf]  ;;  %v373_v23 = vld [vmem:[#allocation3 + $0x54] sm:$0x1] }
 0x1f2   : > { %v3541_v55 = vpop.permute.xlu1 %3540  ;;  %v4166_v45 = vsel %vm15965_vm0, %v4133_v38, %v12118_v26  ;;  %v9003_v28 = vcombine.low %v9701_v46, %v9702_v61  ;;  %v374_v42 = vsel %vm10093_vm12, 0, %v373_v23  ;;  %v431_v47 = vld [vmem:[#allocation3 + $0x68] sm:$0x1]  ;;  %v382_v51 = vld [vmem:[#allocation3 + $0x78] sm:$0x1] }
 0x1f3   : > { %3980 = vrot.lane.b32.xlu1 %v9119_v20, %s9815_s6  ;;  %v3891_v2 = vpop.permute.xlu0 %3890  ;;  %v4199_v30 = vsel %vm16094_vm3, %v4166_v45, %v3715_v36  ;;  %vm16099_vm3 = vmmov %vm16095_vm10  ;;  %375 = vst [vmem:[#allocation3 + $0x54] sm:$0x1] %v374_v42  ;;  %v9704_v20 = vld [vmem:[#allocation2 + $0x90] sm:$0xf]  ;;  %v432_v35 = vsel %vm9865_vm7, 0, %v431_v47  ;;  %v383_v54 = vsel %vm10093_vm12, 0, %v382_v51 }
 0x1f4   : > { %v4232_v31 = vsel %vm4210_vm14, %v4199_v30, %v3795_v34  ;;  %v4098_v19 = vsel %vm15967_vm1, %v9003_v28, %v3461_v17  ;;  %v9703_v17 = vld [vmem:[#allocation2 + $0x94] sm:$0xf]  ;;  %433 = vst [vmem:[#allocation3 + $0x68] sm:$0x1] %v432_v35  ;;  %384 = vst [vmem:[#allocation3 + $0x78] sm:$0x1] %v383_v54 }
 0x1f5   : > { %v4265_v48 = vsel %vm4243_vm4, %v4232_v31, %v3891_v2  ;;  %v4135_v36 = vsel %vm15966_vm15, %v4098_v19, %v3541_v55  ;;  %v9004_v34 = vcombine.low %v9704_v20, %v9703_v17  ;;  %v379_v31 = vld [vmem:[#allocation3 + $0x6c] sm:$0x1]  ;;  %v434_v61 = vld [vmem:[#allocation3 + $0x74] sm:$0x1]  ;;  %v385_v51 = vld [vmem:[#allocation3 + $0x84] sm:$0x1] }
 0x1f6   : > { %v3637_v1 = vpop.permute.xlu1 %3636  ;;  %v443_v54 = vld [vmem:[#allocation3 + $0x98] sm:$0x1]  ;;  %393 = vst [vmem:[#allocation3 + $0x9c] sm:$0x1] %v392_v4  ;;  %v352_v22 = vld [vmem:[#allocation3] sm:$0x1] }
 0x1f7   : > { %4060 = vrot.lane.b32.xlu1 %v9135_v24, %s9813_s30  ;;  %v4168_v37 = vsel %vm15965_vm0, %v4135_v36, %v3637_v1  ;;  %v428_v24 = vld [vmem:[#allocation3 + $0x5c] sm:$0x1]  ;;  %v407_v4 = vld [vmem:[#allocation3 + $0x8] sm:$0x1]  ;;  %v5345_v29 = vld [vmem:[#allocation3 + $0x24] sm:$0xf]  ;;  %s15718_s30 = scalar_lea.vmem %s15947_s4, %s9404_s28 }
 0x1f8   : > { %v429_v59 = vsel %vm9865_vm7, 0, %v428_v24 }
 0x1f9   : > { %430 = vst [vmem:[#allocation3 + $0x5c] sm:$0x1] %v429_v59 }
 0x1fc   : > { %v3971_v60 = vpop.permute.xlu0 %3970 }
 0x1fd   : > { %v4298_v32 = vsel %vm4276_vm8, %v4265_v48, %v3971_v60  ;;  %v380_v48 = vsel %vm10093_vm12, 0, %v379_v31 }
 0x1fe   : > { %v3717_v44 = vpop.permute.xlu1 %3716  ;;  %381 = vst [vmem:[#allocation3 + $0x6c] sm:$0x1] %v380_v48 }
 0x1ff   : > { %v4201_v53 = vsel %vm16098_vm13, %v4168_v37, %v3717_v44 }
 0x200   : > { %v4051_v11 = vpop.permute.xlu0 %4050 }
 0x201   : > { %v4331_v0 = vsel %vm4309_vm5, %v4298_v32, %v4051_v11  ;;  %v437_v11 = vld [vmem:[#allocation3 + $0x80] sm:$0x1] }
 0x202   : > { %v3797_v21 = vpop.permute.xlu1 %3796  ;;  %9507 = vmatprep.mubr.msk.bf16.mxu0 %vm16095_vm10, %v4331_v0  ;;  %vm16100_vm10 = vmmov %vm16098_vm13  ;;  %v9705_v0 = vld [vmem:[#allocation2 + $0x9c] sm:$0xf]  ;;  %v438_v46 = vsel %vm9865_vm7, 0, %v437_v11 }
 0x203   : > { %v4234_v9 = vsel %vm4210_vm14, %v4201_v53, %v3797_v21  ;;  %vm16101_vm13 = vmmov %vm16099_vm3  ;;  %v9706_v21 = vld [vmem:[#allocation2 + $0xa0] sm:$0xf]  ;;  %439 = vst [vmem:[#allocation3 + $0x80] sm:$0x1] %v438_v46 }
 0x204   : > { %v4053_v26 = vpop.permute.xlu0 %4052 }
 0x206   : > { %v3893_v7 = vpop.permute.xlu1 %3892 }
 0x207   : > { %v4267_v14 = vsel %vm4243_vm4, %v4234_v9, %v3893_v7  ;;  %v435_v7 = vsel %vm9865_vm7, 0, %v434_v61  ;;  %v388_v9 = vld [vmem:[#allocation3 + $0x90] sm:$0x1]  ;;  %v446_v61 = vld [vmem:[#allocation3 + $0xa4] sm:$0x1] }
 0x208   : > { %v3543_v39 = vpop.permute.xlu0 %3542  ;;  %436 = vst [vmem:[#allocation3 + $0x74] sm:$0x1] %v435_v7  ;;  %v400_v7 = vld [vmem:[#allocation3 + $0xc0] sm:$0x1] }
 0x20c   : > { %v3639_v63 = vpop.permute.xlu0 %3638 }
 0x20d   : > { %v3973_v25 = vpop.permute.xlu1 %3972 }
 0x20e   : > { %v4300_v58 = vsel %vm4276_vm8, %v4267_v14, %v3973_v25  ;;  %v389_v25 = vsel %vm10093_vm12, 0, %v388_v9  ;;  %v452_v9 = vld [vmem:[#allocation3 + $0xbc] sm:$0x1] }
 0x20f   : > { %v4333_v49 = vsel %vm4309_vm5, %v4300_v58, %v4053_v26  ;;  %v9005_v26 = vcombine.low %v9705_v0, %v9706_v21  ;;  %390 = vst [vmem:[#allocation3 + $0x90] sm:$0x1] %v389_v25 }
 0x210   : > { %9508 = vmatmul.mubr.msk.bf16.gmra.mxu0 %vm16099_vm3, %v4333_v49  ;;  %vm16102_vm3 = vmmov %vm16100_vm10 }
 0x213   : > { %v3463_v6 = vpop.permute.xlu1 %3462 }
 0x214   : > { %v4101_v27 = vsel %vm15967_vm1, %v9004_v34, %v3463_v6 }
 0x215   : > { %v4137_v15 = vsel %vm15966_vm15, %v4101_v27, %v3543_v39 }
 0x216   : > { %v3719_v41 = vpop.permute.xlu0 %3718  ;;  %v4170_v2 = vsel %vm15965_vm0, %v4137_v15, %v3639_v63 }
 0x217   : > { %v4203_v38 = vsel %vm16100_vm10, %v4170_v2, %v3719_v41  ;;  %vm16103_vm10 = vmmov %vm16101_vm13  ;;  %v444_v2 = vsel %vm9865_vm7, 0, %v443_v54 }
 0x218   : > { %445 = vst [vmem:[#allocation3 + $0x98] sm:$0x1] %v444_v2 }
 0x21a   : > { %v3799_v16 = vpop.permute.xlu0 %3798 }
 0x21b   : > { %v3465_v8 = vpop.permute.xlu1 %3464  ;;  %v4236_v1 = vsel %vm4210_vm14, %v4203_v38, %v3799_v16 }
 0x21c   : > { %v4104_v19 = vsel %vm15967_vm1, %v9005_v26, %v3465_v8 }
 0x21e   : > { %v3895_v55 = vpop.permute.xlu0 %3894 }
 0x21f   : > { %v3545_v43 = vpop.permute.xlu1 %3544  ;;  %v4269_v45 = vsel %vm4243_vm4, %v4236_v1, %v3895_v55 }
 0x220   : > { %v4139_v36 = vsel %vm15966_vm15, %v4104_v19, %v3545_v43  ;;  %v401_v19 = vsel %vm10093_vm12, 0, %v400_v7  ;;  %v403_v7 = vld [vmem:[#allocation3 + $0xcc] sm:$0x1] }
 0x221   : > { %402 = vst [vmem:[#allocation3 + $0xc0] sm:$0x1] %v401_v19 }
 0x223   : > { %v3641_v40 = vpop.permute.xlu1 %3640 }
 0x224   : > { %v4172_v37 = vsel %vm15965_vm0, %v4139_v36, %v3641_v40  ;;  %v397_v36 = vld [vmem:[#allocation3 + $0xb4] sm:$0x1] }
 0x227   : > { %v3975_v57 = vpop.permute.xlu0 %3974 }
 0x228   : > { %v3721_v3 = vpop.permute.xlu1 %3720  ;;  %v4302_v50 = vsel %vm4276_vm8, %v4269_v45, %v3975_v57  ;;  %v440_v57 = vld [vmem:[#allocation3 + $0x8c] sm:$0x1] }
 0x229   : > { %v4205_v39 = vsel %vm16102_vm3, %v4172_v37, %v3721_v3  ;;  %v441_v1 = vsel %vm9865_vm7, 0, %v440_v57  ;;  %v394_v3 = vld [vmem:[#allocation3 + $0xa8] sm:$0x1]  ;;  %v398_v37 = vsel %vm10093_vm12, 0, %v397_v36 }
 0x22a   : > { %442 = vst [vmem:[#allocation3 + $0x8c] sm:$0x1] %v441_v1  ;;  %v395_v45 = vsel %vm10093_vm12, 0, %v394_v3  ;;  %399 = vst [vmem:[#allocation3 + $0xb4] sm:$0x1] %v398_v37  ;;  %v12269_v25 = vpop.f32.mrf.mxu0 }
 0x22b   : > { %v4055_v60 = vpop.permute.xlu0 %4054  ;;  %396 = vst [vmem:[#allocation3 + $0xa8] sm:$0x1] %v395_v45 }
 0x22c   : > { %v4335_v30 = vsel %vm4309_vm5, %v4302_v50, %v4055_v60  ;;  %v3801_v44 = vpop.permute.xlu1 %3800 }
 0x22d   : > { %9511 = vmatprep.mubr.msk.bf16.mxu0 %vm16101_vm13, %v4335_v30  ;;  %v4238_v14 = vsel %vm4210_vm14, %v4205_v39, %v3801_v44  ;;  %vm16104_vm13 = vmmov %vm16102_vm3  ;;  %v455_v39 = vld [vmem:[#allocation3 + $0xc8] sm:$0x1] }
 0x22e   : > { %vm16105_vm3 = vmmov %vm16103_vm10 }
 0x22f   : > { %v4057_v32 = vpop.permute.xlu0 %4056 }
 0x230   : > { %v3897_v28 = vpop.permute.xlu1 %3896 }
 0x231   : > { %v4271_v58 = vsel %vm4243_vm4, %v4238_v14, %v3897_v28  ;;  %v447_v28 = vsel %vm9865_vm7, 0, %v446_v61  ;;  %v453_v14 = vsel %vm9865_vm7, 0, %v452_v9  ;;  %v408_v61 = vsel %vm9865_vm7, 0, %v407_v4 }
 0x232   : > { %448 = vst [vmem:[#allocation3 + $0xa4] sm:$0x1] %v447_v28  ;;  %454 = vst [vmem:[#allocation3 + $0xbc] sm:$0x1] %v453_v14  ;;  %v12336_v28 = vld [vmem:[#allocation3 + $0x4] sm:$0xf] }
 0x233   : > { %v3547_v53 = vpop.permute.xlu0 %3546  ;;  %409 = vst [vmem:[#allocation3 + $0x8] sm:$0x1] %v408_v61  ;;  %v5501_v37 = vshll.u32 %v12336_v28, 16 }
 0x237   : > { %v3977_v49 = vpop.permute.xlu1 %3976  ;;  %v3643_v41 = vpop.permute.xlu0 %3642 }
 0x238   : > { %v4304_v63 = vsel %vm4276_vm8, %v4271_v58, %v3977_v49  ;;  %v12271_v58 = vpop.f32.mrf.mxu0 }
 0x239   : > { %v4337_v6 = vsel %vm4309_vm5, %v4304_v63, %v4057_v32 }
 0x23a   : > { %9512 = vmatmul.mubr.msk.bf16.gmra.mxu0 %vm16103_vm10, %v4337_v6  ;;  %vm16106_vm10 = vmmov %vm16104_vm13  ;;  %v12273_v49 = vpop.f32.mrf.mxu0 }
 0x23c   : > { %v12275_v63 = vpop.f32.mrf.mxu0 }
 0x23d   : > { %v3467_v23 = vpop.permute.xlu1 %3466 }
 0x23e   : > { %v4107_v17 = vsel %vm15967_vm1, %v9006_v33, %v3467_v23  ;;  %v386_v33 = vsel %vm10093_vm12, 0, %v385_v51  ;;  %v4650_v51 = vmul.f32 %v12273_v49, %v12273_v49 }
 0x23f   : > { %v4141_v47 = vsel %vm15966_vm15, %v4107_v17, %v3547_v53  ;;  %387 = vst [vmem:[#allocation3 + $0x84] sm:$0x1] %v386_v33  ;;  %v456_v53 = vsel %vm9865_vm7, 0, %v455_v39  ;;  %v5505_v39 = vshrl.u32 %v12336_v28, 16 }
 0x240   : > { %v3723_v16 = vpop.permute.xlu0 %3722  ;;  %v4174_v24 = vsel %vm15965_vm0, %v4141_v47, %v3643_v41  ;;  %457 = vst [vmem:[#allocation3 + $0xc8] sm:$0x1] %v456_v53  ;;  %v4649_v47 = vmul.f32 %v12269_v25, %v12269_v25  ;;  %v404_v53 = vsel %vm10093_vm12, 0, %v403_v7 }
 0x241   : > { %v4207_v59 = vsel %vm16104_vm13, %v4174_v24, %v3723_v16  ;;  %vm16107_vm13 = vmmov %vm16105_vm3  ;;  %v4648_v16 = vmul.f32 %v12275_v63, %v12275_v63  ;;  %405 = vst [vmem:[#allocation3 + $0xcc] sm:$0x1] %v404_v53 }
 0x244   : > { %v12277_v6 = vpop.f32.mrf.mxu0 }
 0x245   : > { %v3803_v42 = vpop.permute.xlu0 %3802 }
 0x246   : > { %v3469_v8 = vpop.permute.xlu1 %3468  ;;  %v4240_v43 = vsel %vm4210_vm14, %v4207_v59, %v3803_v42  ;;  %v12279_v41 = vpop.f32.mrf.mxu0  ;;  %v4647_v42 = vmul.f32 %v12271_v58, %v12271_v58 }
 0x247   : > { %v4110_v60 = vsel %vm15967_vm1, %v9007_v10, %v3469_v8  ;;  %v449_v10 = vld [vmem:[#allocation3 + $0xb0] sm:$0x1] }
 0x248   : > { %v450_v46 = vsel %vm9865_vm7, 0, %v449_v10  ;;  %v12281_v23 = vpop.f32.mrf.mxu0 }
 0x249   : > { %v3899_v34 = vpop.permute.xlu0 %3898  ;;  %451 = vst [vmem:[#allocation3 + $0xb0] sm:$0x1] %v450_v46  ;;  %v4654_v10 = vmul.f32 %v12281_v23, %v12281_v23  ;;  %v353_v46 = vsel %vm10093_vm12, 0, %v352_v22 }
 0x24a   : > { %v3549_v20 = vpop.permute.xlu1 %3548  ;;  %v4273_v15 = vsel %vm4243_vm4, %v4240_v43, %v3899_v34  ;;  %v12287_v8 = vpop.f32.mrf.mxu0  ;;  %354 = vst [vmem:[#allocation3] sm:$0x1] %v353_v46 }
 0x24b   : > { %v4143_v30 = vsel %vm15966_vm15, %v4110_v60, %v3549_v20 }
 0x24e   : > { %v3645_v35 = vpop.permute.xlu1 %3644 }
 0x24f   : > { %v4176_v31 = vsel %vm15965_vm0, %v4143_v30, %v3645_v35 }
 0x251   : > { %v3979_v27 = vpop.permute.xlu0 %3978 }
 0x252   : > { %v3725_v55 = vpop.permute.xlu1 %3724  ;;  %v4306_v62 = vsel %vm4276_vm8, %v4273_v15, %v3979_v27 }
 0x253   : > { %v4209_v48 = vsel %vm16106_vm10, %v4176_v31, %v3725_v55 }
 0x255   : > { %v4059_v13 = vpop.permute.xlu0 %4058 }
 0x256   : > { %v4339_v40 = vsel %vm4309_vm5, %v4306_v62, %v4059_v13  ;;  %v3805_v38 = vpop.permute.xlu1 %3804  ;;  %v4651_v62 = vmul.f32 %v12279_v41, %v12279_v41 }
 0x257   : > { %9515 = vmatprep.mubr.msk.bf16.mxu0 %vm16105_vm3, %v4339_v40  ;;  %v4242_v32 = vsel %vm4210_vm14, %v4209_v48, %v3805_v38  ;;  %v4652_v40 = vmul.f32 %v12287_v8, %v12287_v8 }
 0x25c   : > { %v3901_v50 = vpop.permute.xlu1 %3900 }
 0x25d   : > { %v4275_v11 = vsel %vm4243_vm4, %v4242_v32, %v3901_v50  ;;  %v4653_v50 = vmul.f32 %v12277_v6, %v12277_v6  ;;  %vm16108_vm4 = vcmask 27648  }
 0x265   : > { %v3981_v44 = vpop.permute.xlu1 %3980 }
 0x266   : > { %v4308_v0 = vsel %vm4276_vm8, %v4275_v11, %v3981_v44 }
 0x269   : > { %v4061_v21 = vpop.permute.xlu1 %4060 }
 0x26a   : > { %v4341_v26 = vsel %vm4309_vm5, %v4308_v0, %v4061_v21  ;;  %vm15968_vm5 = vcmask 31744  }
 0x26b   : > { %9516 = vmatmul.mubr.msk.bf16.gmra.mxu0 %vm16107_vm13, %v4341_v26  ;;  %v4578_v17 = vsel %vm15968_vm5, %v12275_v63, 0.0  ;;  %v4680_v20 = vsel %vm15968_vm5, %v4648_v16, 0.0  ;;  %v4577_v35 = vsel %vm15968_vm5, %v12271_v58, 0.0  ;;  %v4679_v24 = vsel %vm15968_vm5, %v4647_v42, 0.0 }
 0x26c   : > { %v4579_v27 = vadd.f32 %v4578_v17, %v4577_v35  ;;  %v4681_v59 = vadd.f32 %v4680_v20, %v4679_v24  ;;  %v4580_v55 = vsel %vm15968_vm5, %v12269_v25, 0.0  ;;  %v4682_v15 = vsel %vm15968_vm5, %v4649_v47, 0.0 }
 0x26d   : > { %v12292_v34 = vpop.f32.mrf.mxu0  ;;  %v4582_v2 = vsel %vm15968_vm5, %v12273_v49, 0.0  ;;  %v4684_v57 = vsel %vm15968_vm5, %v4650_v51, 0.0  ;;  %v4584_v38 = vsel %vm15968_vm5, %v12279_v41, 0.0  ;;  %v4686_v1 = vsel %vm15968_vm5, %v4651_v62, 0.0 }
 0x26e   : > { %v4581_v13 = vadd.f32 %v4580_v55, %v4579_v27  ;;  %v4683_v33 = vadd.f32 %v4682_v15, %v4681_v59  ;;  %v4586_v60 = vsel %vm15968_vm5, %v12287_v8, 0.0  ;;  %v4688_v30 = vsel %vm15968_vm5, %v4652_v40, 0.0  ;;  %v5443_v40 = vld [vmem:[#allocation3] sm:$0xf] }
 0x26f   : > { %v12299_v43 = vpop.f32.mrf.mxu0  ;;  %v4588_v21 = vsel %vm15968_vm5, %v12277_v6, 0.0  ;;  %v4690_v26 = vsel %vm15968_vm5, %v4653_v50, 0.0  ;;  %v5503_v42 = vrot.slane %v5501_v37, 5  ;;  %v5507_v17 = vrot.slane %v5505_v39, 4  ;;  %v6690_v50 = vld [vmem:[#allocation3 + $0xcc] sm:$0xf] }
 0x270   : > { %v4583_v3 = vadd.f32 %v4582_v2, %v4581_v13  ;;  %v4685_v45 = vadd.f32 %v4684_v57, %v4683_v33  ;;  %v4655_v19 = vmul.f32 %v12299_v43, %v12299_v43  ;;  %v4590_v20 = vsel %vm15968_vm5, %v12281_v23, 0.0  ;;  %v5475_v2 = vld [vmem:[#allocation3 + $0x8] sm:$0x1]  ;;  %v6691_v57 = vld [vmem:[#allocation3 + $0xd0] sm:$0xf] }
 0x271   : > { %v12310_v54 = vpop.f32.mrf.mxu0  ;;  %v4692_v47 = vsel %vm15968_vm5, %v4654_v10, 0.0  ;;  %v4592_v35 = vsel %vm15968_vm5, %v12299_v43, 0.0  ;;  %v5508_v62 = vor.u32 %v5507_v17, %v5503_v42  ;;  %v4596_v10 = vsel %vm15968_vm5, %v12292_v34, 0.0 }
 0x272   : > { %v4585_v44 = vadd.f32 %v4584_v38, %v4583_v3  ;;  %v4687_v48 = vadd.f32 %v4686_v1, %v4685_v45  ;;  %v4694_v24 = vsel %vm15968_vm5, %v4655_v19, 0.0  ;;  %v5492_v1 = vshrl.u32 %v5443_v40, 16 }
 0x273   : > { %v12323_v31 = vpop.f32.mrf.mxu0  ;;  %v5495_v3 = vshll.u32 %v5443_v40, 16  ;;  %v5511_v45 = vshll.u32 %v5475_v2, 16  ;;  %v4658_v4 = vmul.f32 %v12310_v54, %v12310_v54  ;;  %v4598_v7 = vsel %vm15968_vm5, %v12310_v54, 0.0 }
 0x274   : > { %v4587_v11 = vadd.f32 %v4586_v60, %v4585_v44  ;;  %v4689_v0 = vadd.f32 %v4688_v30, %v4687_v48  ;;  %v4656_v16 = vmul.f32 %v12323_v31, %v12323_v31  ;;  %v4594_v15 = vsel %vm15968_vm5, %v12323_v31, 0.0 }
 0x275   : > { %v4657_v60 = vmul.f32 %v12292_v34, %v12292_v34  ;;  %v9348_v48 = vcombine.low %v6690_v50, %v6691_v57  ;;  %v5513_v22 = vrot.slane %v5511_v45, 5  ;;  %v4700_v17 = vsel %vm15968_vm5, %v4658_v4, 0.0 }
 0x276   : > { %v4589_v9 = vadd.f32 %v4588_v21, %v4587_v11  ;;  %v4691_v14 = vadd.f32 %v4690_v26, %v4689_v0  ;;  %v4696_v51 = vsel %vm15968_vm5, %v4656_v16, 0.0  ;;  %v5494_v0 = vrot.slane %v5492_v1, 4 }
 0x277   : > { %v5497_v21 = vrot.slane %v5495_v3, 5  ;;  %v5509_v26 = vrot.slane %v5508_v62, 4  ;;  %7842 = vrot.lane.b32.xlu1 %v9348_v48, %s9810_s27  ;;  %v4698_v61 = vsel %vm15968_vm5, %v4657_v60, 0.0  ;;  %v5941_v16 = vrot.slane %v12336_v28, 5 }
 0x278   : > { %v4591_v59 = vadd.f32 %v4590_v20, %v4589_v9  ;;  %v4693_v55 = vadd.f32 %v4692_v47, %v4691_v14  ;;  %v5875_v14 = vld [vmem:[#allocation3] sm:$0xe]  ;;  %v7078_v60 = vshll.u32 %v6691_v57, 16 }
 0x279   : > { %v5498_v46 = vor.u32 %v5497_v21, %v5494_v0  ;;  %v5514_v9 = vsel %vm10418_vm2, %v5509_v26, %v5513_v22  ;;  %v9189_v47 = vrot.slane %v5875_v14, 9 }
 0x27a   : > { %v4593_v13 = vadd.f32 %v4592_v35, %v4591_v59  ;;  %v4695_v33 = vadd.f32 %v4694_v24, %v4693_v55  ;;  %v5944_v35 = vrot.slane %v5475_v2, 5  ;;  %v7069_v55 = vshrl.u32 %v6690_v50, 16 }
 0x27b   : > { %v5499_v53 = vrot.slane %v5498_v46, 4  ;;  %v5942_v28 = vsel %vm10431_vm6, %v9189_v47, %v5941_v16  ;;  %v7082_v2 = vshrl.u32 %v6691_v57, 16  ;;  %v7080_v46 = vrot.slane %v7078_v60, 5 }
 0x27c   : > { %v4595_v30 = vadd.f32 %v4594_v15, %v4593_v13  ;;  %v4697_v44 = vadd.f32 %v4696_v51, %v4695_v33  ;;  %v7072_v15 = vshll.u32 %v6690_v50, 16  ;;  %v5943_v13 = vrot.slane %v5941_v16, 4  ;;  %v458_v50 = vld [vmem:[#allocation3 + $0xd4] sm:$0x1] }
 0x27d   : > { %v5504_v59 = vsel %vm10418_vm2, %v5499_v53, %v5503_v42  ;;  %v459_v26 = vsel %vm9865_vm7, 0, %v458_v50 }
 0x27e   : > { %v4597_v19 = vadd.f32 %v4596_v10, %v4595_v30  ;;  %v4699_v37 = vadd.f32 %v4698_v61, %v4697_v44  ;;  %v9253_v62 = vcombine.low %v5504_v59, %v5514_v9  ;;  %v5945_v45 = vsel %vm10431_vm6, %v5943_v13, %v5944_v35  ;;  %460 = vst [vmem:[#allocation3 + $0xd4] sm:$0x1] %v459_v26 }
 0x27f   : > { %v7071_v44 = vrot.slane %v7069_v55, 4  ;;  %v7074_v48 = vrot.slane %v7072_v15, 5  ;;  %v9269_v0 = vcombine.low %v5942_v28, %v5945_v45  ;;  %v7084_v61 = vrot.slane %v7082_v2, 4 }
 0x280   : > { %v4599_v33 = vadd.f32 %v4598_v7, %v4597_v19  ;;  %v4701_v40 = vadd.f32 %v4700_v17, %v4699_v37  ;;  %7380 = vrot.lane.b32.xlu0 %v9253_v62, %s9807_s21 }
 0x281   : > { %v7075_v37 = vor.u32 %v7074_v48, %v7071_v44  ;;  %v7085_v9 = vor.u32 %v7084_v61, %v7080_v46 }
 0x283   : > { %v7076_v35 = vrot.slane %v7075_v37, 4  ;;  %v7086_v62 = vrot.slane %v7085_v9, 4 }
 0x284   : > { %7460 = vrot.lane.b32.xlu0 %v9269_v0, %s9808_s25 }
 0x285   : > { %v6707_v15 = vld [vmem:[#allocation3 + $0xd4] sm:$0x1]  ;;  %v7081_v45 = vsel %vm10418_vm2, %v7076_v35, %v7080_v46 }
 0x286   : > { %v7088_v28 = vshll.u32 %v6707_v15, 16 }
 0x288   : > { %v7090_v50 = vrot.slane %v7088_v28, 5 }
 0x28a   : > { %v7091_v48 = vsel %vm10418_vm2, %v7086_v62, %v7090_v50 }
 0x297   : > { %v12325_v32 = vpop.f32.mrf.mxu0 }
 0x298   : > { %v4661_v7 = vmul.f32 %v12325_v32, %v12325_v32  ;;  %v4604_v12 = vsel %vm15968_vm5, %v12325_v32, 0.0 }
 0x299   : > { %v12340_v36 = vpop.f32.mrf.mxu0 }
 0x29a   : > { %v4659_v20 = vmul.f32 %v12340_v36, %v12340_v36  ;;  %v4600_v24 = vsel %vm15968_vm5, %v12340_v36, 0.0  ;;  %v4706_v14 = vsel %vm15968_vm5, %v4661_v7, 0.0 }
 0x29b   : > { %v12354_v27 = vpop.f32.mrf.mxu0  ;;  %v4601_v30 = vadd.f32 %v4600_v24, %v4599_v33 }
 0x29c   : > { %v4702_v3 = vsel %vm15968_vm5, %v4659_v20, 0.0  ;;  %v4662_v16 = vmul.f32 %v12354_v27, %v12354_v27  ;;  %v4606_v24 = vsel %vm15968_vm5, %v12354_v27, 0.0 }
 0x29d   : > { %v12359_v38 = vpop.f32.mrf.mxu0  ;;  %v4703_v22 = vadd.f32 %v4702_v3, %v4701_v40 }
 0x29e   : > { %v4660_v51 = vmul.f32 %v12359_v38, %v12359_v38  ;;  %v4602_v42 = vsel %vm15968_vm5, %v12359_v38, 0.0  ;;  %v4708_v13 = vsel %vm15968_vm5, %v4662_v16, 0.0 }
 0x29f   : > { %v4603_v4 = vadd.f32 %v4602_v42, %v4601_v30 }
 0x2a0   : > { %v4704_v21 = vsel %vm15968_vm5, %v4660_v51, 0.0 }
 0x2a1   : > { %v4705_v57 = vadd.f32 %v4704_v21, %v4703_v22  ;;  %v4605_v53 = vadd.f32 %v4604_v12, %v4603_v4  ;;  %v9364_v21 = vcombine.low %v7081_v45, %v7091_v48 }
 0x2a3   : > { %v4707_v20 = vadd.f32 %v4706_v14, %v4705_v57  ;;  %v4607_v51 = vadd.f32 %v4606_v24, %v4605_v53  ;;  %7922 = vrot.lane.b32.xlu1 %v9364_v21, %s9816_s19 }
 0x2a5   : > { %v4709_v3 = vadd.f32 %v4708_v13, %v4707_v20 }
 0x2a8   : > { %v12363_v11 = vpop.f32.mrf.mxu0 }
 0x2a9   : > { %v4665_v0 = vmul.f32 %v12363_v11, %v12363_v11  ;;  %v4612_v4 = vsel %vm15968_vm5, %v12363_v11, 0.0 }
 0x2aa   : > { %v12373_v39 = vpop.f32.mrf.mxu0 }
 0x2ab   : > { %v4663_v17 = vmul.f32 %v12373_v39, %v12373_v39  ;;  %v4608_v59 = vsel %vm15968_vm5, %v12373_v39, 0.0  ;;  %v4714_v7 = vsel %vm15968_vm5, %v4665_v0, 0.0 }
 0x2ac   : > { %v12389_v1 = vpop.f32.mrf.mxu0  ;;  %v4609_v2 = vadd.f32 %v4608_v59, %v4607_v51 }
 0x2ad   : > { %v4710_v33 = vsel %vm15968_vm5, %v4663_v17, 0.0  ;;  %v4666_v57 = vmul.f32 %v12389_v1, %v12389_v1  ;;  %v4614_v53 = vsel %vm15968_vm5, %v12389_v1, 0.0 }
 0x2ae   : > { %v12400_v10 = vpop.f32.mrf.mxu0  ;;  %v4711_v30 = vadd.f32 %v4710_v33, %v4709_v3 }
 0x2af   : > { %v4664_v55 = vmul.f32 %v12400_v10, %v12400_v10  ;;  %v4610_v40 = vsel %vm15968_vm5, %v12400_v10, 0.0  ;;  %v4716_v20 = vsel %vm15968_vm5, %v4666_v57, 0.0 }
 0x2b0   : > { %v4611_v44 = vadd.f32 %v4610_v40, %v4609_v2 }
 0x2b1   : > { %v4712_v60 = vsel %vm15968_vm5, %v4664_v55, 0.0 }
 0x2b2   : > { %v4713_v26 = vadd.f32 %v4712_v60, %v4711_v30  ;;  %v4613_v46 = vadd.f32 %v4612_v4, %v4611_v44 }
 0x2b4   : > { %v4715_v12 = vadd.f32 %v4714_v7, %v4713_v26  ;;  %v4615_v16 = vadd.f32 %v4614_v53, %v4613_v46 }
 0x2b6   : > { %v4717_v55 = vadd.f32 %v4716_v20, %v4715_v12 }
 0x2d0   : > { %v12405_v19 = vpop.f32.mrf.mxu0 }
 0x2d1   : > { %v4669_v13 = vmul.f32 %v12405_v19, %v12405_v19  ;;  %v4620_v40 = vsel %vm15968_vm5, %v12405_v19, 0.0 }
 0x2d2   : > { %v12414_v47 = vpop.f32.mrf.mxu0 }
 0x2d3   : > { %v4667_v37 = vmul.f32 %v12414_v47, %v12414_v47  ;;  %v4616_v9 = vsel %vm15968_vm5, %v12414_v47, 0.0  ;;  %v4722_v45 = vsel %vm15968_vm5, %v4669_v13, 0.0 }
 0x2d4   : > { %v12426_v42 = vpop.f32.mrf.mxu0  ;;  %v4617_v59 = vadd.f32 %v4616_v9, %v4615_v16 }
 0x2d5   : > { %v4718_v35 = vsel %vm15968_vm5, %v4667_v37, 0.0  ;;  %v4670_v50 = vmul.f32 %v12426_v42, %v12426_v42  ;;  %v4622_v44 = vsel %vm15968_vm5, %v12426_v42, 0.0 }
 0x2d6   : > { %v12435_v22 = vpop.f32.mrf.mxu0  ;;  %v4719_v51 = vadd.f32 %v4718_v35, %v4717_v55 }
 0x2d7   : > { %v4668_v14 = vmul.f32 %v12435_v22, %v12435_v22  ;;  %v4618_v24 = vsel %vm15968_vm5, %v12435_v22, 0.0  ;;  %v4724_v26 = vsel %vm15968_vm5, %v4670_v50, 0.0 }
 0x2d8   : > { %v4619_v62 = vadd.f32 %v4618_v24, %v4617_v59 }
 0x2d9   : > { %v4720_v15 = vsel %vm15968_vm5, %v4668_v14, 0.0 }
 0x2da   : > { %v4721_v33 = vadd.f32 %v4720_v15, %v4719_v51  ;;  %v4621_v2 = vadd.f32 %v4620_v40, %v4619_v62 }
 0x2dc   : > { %v4723_v30 = vadd.f32 %v4722_v45, %v4721_v33  ;;  %v4623_v21 = vadd.f32 %v4622_v44, %v4621_v2 }
 0x2de   : > { %v4725_v57 = vadd.f32 %v4724_v26, %v4723_v30 }
 0x2fa   : > { %v12440_v61 = vpop.f32.mrf.mxu0 }
 0x2fb   : > { %v4673_v9 = vmul.f32 %v12440_v61, %v12440_v61  ;;  %v4628_v16 = vsel %vm15968_vm5, %v12440_v61, 0.0 }
 0x2fc   : > { %v12453_v17 = vpop.f32.mrf.mxu0 }
 0x2fd   : > { %v4671_v60 = vmul.f32 %v12453_v17, %v12453_v17  ;;  %v4624_v48 = vsel %vm15968_vm5, %v12453_v17, 0.0  ;;  %v4730_v24 = vsel %vm15968_vm5, %v4673_v9, 0.0 }
 0x2fe   : > { %v12460_v28 = vpop.f32.mrf.mxu0  ;;  %v4625_v7 = vadd.f32 %v4624_v48, %v4623_v21 }
 0x2ff   : > { %v4726_v4 = vsel %vm15968_vm5, %v4671_v60, 0.0  ;;  %v4674_v59 = vmul.f32 %v12460_v28, %v12460_v28  ;;  %v4630_v51 = vsel %vm15968_vm5, %v12460_v28, 0.0 }
 0x300   : > { %v12466_v3 = vpop.f32.mrf.mxu0  ;;  %v4727_v12 = vadd.f32 %v4726_v4, %v4725_v57 }
 0x301   : > { %v4672_v0 = vmul.f32 %v12466_v3, %v12466_v3  ;;  %v4626_v46 = vsel %vm15968_vm5, %v12466_v3, 0.0  ;;  %v4732_v2 = vsel %vm15968_vm5, %v4674_v59, 0.0 }
 0x302   : > { %v4627_v53 = vadd.f32 %v4626_v46, %v4625_v7 }
 0x303   : > { %v4728_v37 = vsel %vm15968_vm5, %v4672_v0, 0.0 }
 0x304   : > { %v4729_v14 = vadd.f32 %v4728_v37, %v4727_v12  ;;  %v4629_v20 = vadd.f32 %v4628_v16, %v4627_v53 }
 0x306   : > { %v4731_v55 = vadd.f32 %v4730_v24, %v4729_v14  ;;  %v4631_v33 = vadd.f32 %v4630_v51, %v4629_v20 }
 0x308   : > { %v4733_v60 = vadd.f32 %v4732_v2, %v4731_v55 }
 0x32b   : > { %v12488_v35 = vpop.f32.mrf.mxu0 }
 0x32c   : > { %v4677_v44 = vmul.f32 %v12488_v35, %v12488_v35  ;;  %v4636_v4 = vsel %vm15968_vm5, %v12488_v35, 0.0 }
 0x32d   : > { %v12493_v15 = vpop.f32.mrf.mxu0 }
 0x32e   : > { %v4632_v62 = vsel %vm15968_vm5, %v12493_v15, 0.0  ;;  %v4675_v13 = vmul.f32 %v12493_v15, %v12493_v15  ;;  %v4738_v12 = vsel %vm15968_vm5, %v4677_v44, 0.0 }
 0x32f   : > { %v12501_v40 = vpop.f32.mrf.mxu0  ;;  %v4633_v50 = vadd.f32 %v4632_v62, %v4631_v33 }
 0x330   : > { %v4734_v45 = vsel %vm15968_vm5, %v4675_v13, 0.0  ;;  %v4678_v46 = vmul.f32 %v12501_v40, %v12501_v40  ;;  %v4638_v53 = vsel %vm15968_vm5, %v12501_v40, 0.0 }
 0x331   : > { %v12505_v30 = vpop.f32.mrf.mxu0  ;;  %v4735_v21 = vadd.f32 %v4734_v45, %v4733_v60 }
 0x332   : > { %v4634_v48 = vsel %vm15968_vm5, %v12505_v30, 0.0  ;;  %v4676_v0 = vmul.f32 %v12505_v30, %v12505_v30  ;;  %v4740_v16 = vsel %vm15968_vm5, %v4678_v46, 0.0 }
 0x333   : > { %v4635_v26 = vadd.f32 %v4634_v48, %v4633_v50 }
 0x334   : > { %v4736_v7 = vsel %vm15968_vm5, %v4676_v0, 0.0 }
 0x335   : > { %v4637_v57 = vadd.f32 %v4636_v4, %v4635_v26  ;;  %v4737_v37 = vadd.f32 %v4736_v7, %v4735_v21 }
 0x337   : > { %v4639_v9 = vadd.f32 %v4638_v53, %v4637_v57  ;;  %v4739_v14 = vadd.f32 %v4738_v12, %v4737_v37 }
 0x339   : > { %v4640_v20 = vrot.slane %v4639_v9, 4  ;;  %v4741_v24 = vadd.f32 %v4740_v16, %v4739_v14 }
 0x33b   : > { %v4641_v59 = vadd.f32 %v4640_v20, %v4639_v9  ;;  %v4742_v55 = vrot.slane %v4741_v24, 4 }
 0x33d   : > { %v4642_v51 = vrot.slane %v4641_v59, 2  ;;  %v4743_v62 = vadd.f32 %v4742_v55, %v4741_v24 }
 0x33f   : > { %v4643_v13 = vadd.f32 %v4642_v51, %v4641_v59  ;;  %v4744_v33 = vrot.slane %v4743_v62, 2 }
 0x341   : > { %v4644_v2 = vrot.slane %v4643_v13, 1  ;;  %v4745_v45 = vadd.f32 %v4744_v33, %v4743_v62 }
 0x343   : > { %v4645_v50 = vadd.f32 %v4644_v2, %v4643_v13  ;;  %v4746_v60 = vrot.slane %v4745_v45, 1 }
 0x345   : > { %v12522_v44 = vmul.f32 0.00390625, %v4645_v50  ;;  %v4747_v48 = vadd.f32 %v4746_v60, %v4745_v45 }
 0x347   : > { %v4748_v0 = vmul.f32 0.00390625, %v4747_v48  ;;  %v4749_v21 = vmul.f32 %v12522_v44, %v12522_v44  ;;  %v4782_v7 = vsub.f32 %v12488_v35, %v12522_v44  ;;  %v4783_v57 = vsub.f32 %v12501_v40, %v12522_v44 }
 0x348   : > { %v4780_v37 = vsub.f32 %v12493_v15, %v12522_v44  ;;  %v4781_v12 = vsub.f32 %v12505_v30, %v12522_v44  ;;  %v4752_v53 = vsub.f32 %v12271_v58, %v12522_v44  ;;  %v4753_v9 = vsub.f32 %v12275_v63, %v12522_v44 }
 0x349   : > { %v4750_v26 = vsub.f32 %v4748_v0, %v4749_v21  ;;  %v4756_v14 = vsub.f32 %v12279_v41, %v12522_v44  ;;  %v4757_v16 = vsub.f32 %v12287_v8, %v12522_v44  ;;  %v4758_v20 = vsub.f32 %v12277_v6, %v12522_v44 }
 0x34a   : > { %v4759_v15 = vsub.f32 %v12281_v23, %v12522_v44  ;;  %v4760_v30 = vsub.f32 %v12299_v43, %v12522_v44  ;;  %v4761_v58 = vsub.f32 %v12323_v31, %v12522_v44  ;;  %v4762_v63 = vsub.f32 %v12292_v34, %v12522_v44 }
 0x34b   : > { %v4751_v4 = vmax.f32 %v4750_v26, 0.0  ;;  %v4763_v41 = vsub.f32 %v12310_v54, %v12522_v44  ;;  %v4764_v8 = vsub.f32 %v12340_v36, %v12522_v44  ;;  %v4765_v6 = vsub.f32 %v12359_v38, %v12522_v44 }
 0x34c   : > { %v4766_v23 = vsub.f32 %v12325_v32, %v12522_v44  ;;  %v4767_v43 = vsub.f32 %v12354_v27, %v12522_v44  ;;  %v4768_v31 = vsub.f32 %v12373_v39, %v12522_v44  ;;  %v4769_v34 = vsub.f32 %v12400_v10, %v12522_v44 }
 0x34d   : > { %v4784_v46 = vadd.f32 1e-05, %v4751_v4  ;;  %v4770_v54 = vsub.f32 %v12363_v11, %v12522_v44  ;;  %v4771_v36 = vsub.f32 %v12389_v1, %v12522_v44  ;;  %v4772_v38 = vsub.f32 %v12414_v47, %v12522_v44 }
 0x34e   : > { %v4773_v32 = vsub.f32 %v12435_v22, %v12522_v44  ;;  %v4774_v27 = vsub.f32 %v12405_v19, %v12522_v44  ;;  %v4775_v39 = vsub.f32 %v12426_v42, %v12522_v44  ;;  %v4776_v11 = vsub.f32 %v12453_v17, %v12522_v44 }
 0x34f   : > { %9675 = vrsqrt.f32 %v4784_v46  ;;  %v4777_v22 = vsub.f32 %v12466_v3, %v12522_v44  ;;  %v4778_v19 = vsub.f32 %v12440_v61, %v12522_v44  ;;  %v4755_v35 = vsub.f32 %v12273_v49, %v12522_v44 }
 0x35c   : > { %v12572_v24 = vpop.eup %9675 }
 0x35d   : > { %v4814_v10 = vmul.f32 %v12572_v24, %v4780_v37  ;;  %v4815_v1 = vmul.f32 %v12572_v24, %v4781_v12  ;;  %v12585_v47 = vmul.f32 %v12572_v24, %v4752_v53  ;;  %v12588_v59 = vmul.f32 %v12572_v24, %v4753_v9 }
 0x35e   : > { %v12595_v42 = vmul.f32 %v12572_v24, %v4756_v14  ;;  %v12598_v17 = vmul.f32 %v12572_v24, %v4757_v16  ;;  %v12601_v62 = vmul.f32 %v12572_v24, %v4758_v20  ;;  %v12604_v13 = vmul.f32 %v12572_v24, %v4759_v15 }
 0x35f   : > { %vm4846_vm7 = vcmp.gt.f32.partialorder %v4814_v10, 0.0  ;;  %vm4847_vm14 = vcmp.gt.f32.partialorder %v4815_v1, 0.0  ;;  %v4878_v55 = vmul.f32 0.01, %v4814_v10  ;;  %v4879_v51 = vmul.f32 0.01, %v4815_v1 }
 0x360   : > { %v12607_v3 = vmul.f32 %v12572_v24, %v4760_v30  ;;  %v12610_v61 = vmul.f32 %v12572_v24, %v4761_v58  ;;  %v12613_v45 = vmul.f32 %v12572_v24, %v4762_v63  ;;  %v12616_v50 = vmul.f32 %v12572_v24, %v4763_v41 }
 0x361   : > { %v4910_v33 = vsel %vm4846_vm7, %v4814_v10, %v4878_v55  ;;  %v4911_v2 = vsel %vm4847_vm14, %v4815_v1, %v4879_v51  ;;  %v12619_v0 = vmul.f32 %v12572_v24, %v4764_v8  ;;  %v12622_v21 = vmul.f32 %v12572_v24, %v4765_v6 }
 0x362   : > { %v9433_v60 = vpack.c.bf16 %v4910_v33, %v4910_v33  ;;  %v9434_v48 = vpack.c.bf16 %v4911_v2, %v4911_v2  ;;  %v12625_v26 = vmul.f32 %v12572_v24, %v4766_v23  ;;  %v12628_v4 = vmul.f32 %v12572_v24, %v4767_v43 }
 0x363   : > { %v12631_v46 = vmul.f32 %v12572_v24, %v4768_v31  ;;  %v12634_v37 = vmul.f32 %v12572_v24, %v4769_v34  ;;  %v4779_v14 = vsub.f32 %v12460_v28, %v12522_v44  ;;  %v12639_v16 = vmul.f32 %v12572_v24, %v4770_v54  ;;  %v5433_v28 = vld [vmem:[#allocation3 + $0xbc] sm:$0x1] }
 0x364   : > { %v5249_v12 = vshrl.u32 %v9433_v60, 16  ;;  %v5257_v53 = vshrl.u32 %v9434_v48, 16  ;;  %v5260_v9 = vshll.u32 %v9434_v48, 16  ;;  %v12642_v20 = vmul.f32 %v12572_v24, %v4771_v36 }
 0x365   : > { %v12645_v15 = vmul.f32 %v12572_v24, %v4772_v38  ;;  %v12648_v30 = vmul.f32 %v12572_v24, %v4773_v32  ;;  %v12651_v41 = vmul.f32 %v12572_v24, %v4774_v27  ;;  %v12654_v8 = vmul.f32 %v12572_v24, %v4775_v39 }
 0x366   : > { %v5251_v58 = vrot.slane %v5249_v12, 7  ;;  %v5259_v63 = vrot.slane %v5257_v53, 7  ;;  %v12657_v6 = vmul.f32 %v12572_v24, %v4776_v11  ;;  %v12660_v23 = vmul.f32 %v12572_v24, %v4777_v22 }
 0x367   : > { %v12663_v43 = vmul.f32 %v12572_v24, %v4778_v19  ;;  %v12666_v31 = vmul.f32 %v12572_v24, %v4779_v14  ;;  %v12672_v38 = vmul.f32 %v12572_v24, %v4782_v7  ;;  %v4754_v32 = vsub.f32 %v12269_v25, %v12522_v44 }
 0x368   : > { %v5255_v34 = vrot.slane %v5251_v58, 4  ;;  %v5262_v54 = vor.u32 %v5260_v9, %v5259_v63  ;;  %v5264_v36 = vrot.slane %v5259_v63, 4  ;;  %v12680_v27 = vmul.f32 %v12572_v24, %v4783_v57  ;;  %v5429_v57 = vld [vmem:[#allocation3 + $0xb4] sm:$0xf] }
 0x369   : > { %v4788_v25 = vmul.f32 %v12572_v24, %v4754_v32  ;;  %v5252_v7 = vshll.u32 %v9433_v60, 16  ;;  %v4789_v40 = vmul.f32 %v12572_v24, %v4755_v35  ;;  %vm4818_vm8 = vcmp.gt.f32.partialorder %v12585_v47, 0.0 }
 0x36a   : > { %v5263_v39 = vsel %vm9898_vm9, %v5255_v34, %v5262_v54  ;;  %v5434_v11 = vsel %vm10093_vm12, %v5264_v36, %v5433_v28  ;;  %vm4823_vm14 = vcmp.gt.f32.partialorder %v12598_v17, 0.0  ;;  %v4850_v49 = vmul.f32 0.01, %v12585_v47 }
 0x36b   : > { %5432 = vst.msk [vmem:[#allocation3 + $0xb8] sm:$0xf] %vm16108_vm4, %v5263_v39  ;;  %5435 = vst [vmem:[#allocation3 + $0xbc] sm:$0x1] %v5434_v11  ;;  %v5254_v10 = vor.u32 %v5252_v7, %v5251_v58  ;;  %vm4820_vm10 = vcmp.gt.f32.partialorder %v4788_v25, 0.0  ;;  %vm4832_vm0 = vcmp.gt.f32.partialorder %v12625_v26, 0.0 }
 0x36c   : > { %v4851_v44 = vmul.f32 0.01, %v12588_v59  ;;  %v4852_v1 = vmul.f32 0.01, %v4788_v25  ;;  %v4853_v22 = vmul.f32 0.01, %v4789_v40  ;;  %v4882_v12 = vsel %vm4818_vm8, %v12585_v47, %v4850_v49 }
 0x36d   : > { %v5430_v24 = vsel %vm10041_vm11, %v5254_v10, %v5429_v57  ;;  %v4854_v19 = vmul.f32 0.01, %v12595_v42  ;;  %vm4837_vm13 = vcmp.gt.f32.partialorder %v12642_v20, 0.0  ;;  %vm4838_vm3 = vcmp.gt.f32.partialorder %v12645_v15, 0.0 }
 0x36e   : > { %5431 = vst [vmem:[#allocation3 + $0xb4] sm:$0xf] %v5430_v24  ;;  %v4855_v55 = vmul.f32 0.01, %v12598_v17  ;;  %v4856_v51 = vmul.f32 0.01, %v12601_v62  ;;  %v4884_v34 = vsel %vm4820_vm10, %v4788_v25, %v4852_v1 }
 0x36f   : > { %v4857_v33 = vmul.f32 0.01, %v12604_v13  ;;  %v4858_v2 = vmul.f32 0.01, %v12607_v3  ;;  %v4859_v60 = vmul.f32 0.01, %v12610_v61 }
 0x370   : > { %v4860_v48 = vmul.f32 0.01, %v12613_v45  ;;  %vm4844_vm5 = vcmp.gt.f32.partialorder %v12663_v43, 0.0  ;;  %vm4845_vm4 = vcmp.gt.f32.partialorder %v12666_v31, 0.0  ;;  %v4861_v53 = vmul.f32 0.01, %v12616_v50 }
 0x371   : > { %v4862_v9 = vmul.f32 0.01, %v12619_v0  ;;  %v4863_v14 = vmul.f32 0.01, %v12622_v21  ;;  %vm16109_vm7 = vcmp.gt.f32.partialorder %v12588_v59, 0.0  ;;  %vm16110_vm8 = vcmp.gt.f32.partialorder %v4789_v40, 0.0 }
 0x372   : > { %v4883_v58 = vsel %vm16109_vm7, %v12588_v59, %v4851_v44  ;;  %v4864_v47 = vmul.f32 0.01, %v12625_v26  ;;  %v4865_v63 = vmul.f32 0.01, %v12628_v4  ;;  %v4866_v28 = vmul.f32 0.01, %v12631_v46 }
 0x373   : > { %v4867_v54 = vmul.f32 0.01, %v12634_v37  ;;  %v4868_v36 = vmul.f32 0.01, %v12639_v16  ;;  %v4869_v32 = vmul.f32 0.01, %v12642_v20  ;;  %v4885_v39 = vsel %vm16110_vm8, %v4789_v40, %v4853_v22 }
 0x374   : > { %v4870_v11 = vmul.f32 0.01, %v12645_v15  ;;  %v4871_v59 = vmul.f32 0.01, %v12648_v30  ;;  %v4872_v35 = vmul.f32 0.01, %v12651_v41  ;;  %v4887_v40 = vsel %vm4823_vm14, %v12598_v17, %v4855_v55 }
 0x375   : > { %vm16111_vm7 = vcmp.gt.f32.partialorder %v12595_v42, 0.0  ;;  %v4873_v25 = vmul.f32 0.01, %v12654_v8  ;;  %v4874_v10 = vmul.f32 0.01, %v12657_v6  ;;  %vm16112_vm10 = vcmp.gt.f32.partialorder %v12601_v62, 0.0 }
 0x376   : > { %v4886_v7 = vsel %vm16111_vm7, %v12595_v42, %v4854_v19  ;;  %v4875_v57 = vmul.f32 0.01, %v12660_v23  ;;  %v4876_v49 = vmul.f32 0.01, %v12663_v43  ;;  %v4877_v44 = vmul.f32 0.01, %v12666_v31 }
 0x377   : > { %v4880_v24 = vmul.f32 0.01, %v12672_v38  ;;  %v4888_v42 = vsel %vm16112_vm10, %v12601_v62, %v4856_v51  ;;  %v4881_v1 = vmul.f32 0.01, %v12680_v27  ;;  %vm16113_vm8 = vcmp.gt.f32.partialorder %v12604_v13, 0.0 }
 0x378   : > { %v4889_v22 = vsel %vm16113_vm8, %v12604_v13, %v4857_v33  ;;  %vm16114_vm7 = vcmp.gt.f32.partialorder %v12607_v3, 0.0  ;;  %vm16115_vm14 = vcmp.gt.f32.partialorder %v12610_v61, 0.0  ;;  %vm16116_vm15 = vcmp.gt.f32.partialorder %v12613_v45, 0.0 }
 0x379   : > { %v4890_v17 = vsel %vm16114_vm7, %v12607_v3, %v4858_v2  ;;  %v4891_v19 = vsel %vm16115_vm14, %v12610_v61, %v4859_v60  ;;  %v4892_v55 = vsel %vm16116_vm15, %v12613_v45, %v4860_v48  ;;  %vm16117_vm10 = vcmp.gt.f32.partialorder %v12616_v50, 0.0 }
 0x37a   : > { %v4893_v62 = vsel %vm16117_vm10, %v12616_v50, %v4861_v53  ;;  %vm16118_vm1 = vcmp.gt.f32.partialorder %v12619_v0, 0.0  ;;  %vm16119_vm8 = vcmp.gt.f32.partialorder %v12622_v21, 0.0  ;;  %v4896_v61 = vsel %vm4832_vm0, %v12625_v26, %v4864_v47 }
 0x37b   : > { %v4894_v13 = vsel %vm16118_vm1, %v12619_v0, %v4862_v9  ;;  %v4895_v3 = vsel %vm16119_vm8, %v12622_v21, %v4863_v14  ;;  %vm16120_vm7 = vcmp.gt.f32.partialorder %v12628_v4, 0.0  ;;  %vm16121_vm15 = vcmp.gt.f32.partialorder %v12631_v46, 0.0 }
 0x37c   : > { %v4897_v45 = vsel %vm16120_vm7, %v12628_v4, %v4865_v63  ;;  %v4898_v50 = vsel %vm16121_vm15, %v12631_v46, %v4866_v28  ;;  %vm16122_vm14 = vcmp.gt.f32.partialorder %v12634_v37, 0.0  ;;  %vm16123_vm1 = vcmp.gt.f32.partialorder %v12639_v16, 0.0 }
 0x37d   : > { %v4899_v0 = vsel %vm16122_vm14, %v12634_v37, %v4867_v54  ;;  %v4900_v21 = vsel %vm16123_vm1, %v12639_v16, %v4868_v36  ;;  %v4901_v26 = vsel %vm4837_vm13, %v12642_v20, %v4869_v32  ;;  %v4902_v4 = vsel %vm4838_vm3, %v12645_v15, %v4870_v11 }
 0x37e   : > { %vm16124_vm0 = vcmp.gt.f32.partialorder %v12648_v30, 0.0  ;;  %vm16125_vm10 = vcmp.gt.f32.partialorder %v12651_v41, 0.0  ;;  %vm16126_vm8 = vcmp.gt.f32.partialorder %v12654_v8, 0.0  ;;  %vm16127_vm7 = vcmp.gt.f32.partialorder %v12657_v6, 0.0 }
 0x37f   : > { %v4903_v46 = vsel %vm16124_vm0, %v12648_v30, %v4871_v59  ;;  %v4904_v37 = vsel %vm16125_vm10, %v12651_v41, %v4872_v35  ;;  %v4905_v16 = vsel %vm16126_vm8, %v12654_v8, %v4873_v25  ;;  %v4906_v20 = vsel %vm16127_vm7, %v12657_v6, %v4874_v10 }
 0x380   : > { %vm16128_vm13 = vcmp.gt.f32.partialorder %v12660_v23, 0.0  ;;  %v4908_v30 = vsel %vm4844_vm5, %v12663_v43, %v4876_v49  ;;  %v4909_v41 = vsel %vm4845_vm4, %v12666_v31, %v4877_v44  ;;  %vm16129_vm3 = vcmp.gt.f32.partialorder %v12672_v38, 0.0 }
 0x381   : > { %v4907_v15 = vsel %vm16128_vm13, %v12660_v23, %v4875_v57  ;;  %v4912_v8 = vsel %vm16129_vm3, %v12672_v38, %v4880_v24  ;;  %vm16130_vm15 = vcmp.gt.f32.partialorder %v12680_v27, 0.0  ;;  %v12837_v51 = vpack.c.bf16 %v4882_v12, %v4882_v12 }
 0x382   : > { %v12835_v6 = vsel %vm16130_vm15, %v12680_v27, %v4881_v1  ;;  %v12839_v23 = vpack.c.bf16 %v4883_v58, %v4883_v58  ;;  %v9407_v33 = vpack.c.bf16 %v4884_v34, %v4884_v34  ;;  %v9408_v2 = vpack.c.bf16 %v4885_v39, %v4885_v39 }
 0x383   : > { %v12841_v43 = vpack.c.bf16 %v4886_v7, %v4886_v7  ;;  %v12843_v60 = vpack.c.bf16 %v4887_v40, %v4887_v40  ;;  %v12845_v31 = vpack.c.bf16 %v4888_v42, %v4888_v42  ;;  %v12847_v48 = vpack.c.bf16 %v4889_v22, %v4889_v22  ;;  %v5338_v22 = vld [vmem:[#allocation3 + $0x18] sm:$0xf] }
 0x384   : > { %v12849_v38 = vpack.c.bf16 %v4890_v17, %v4890_v17  ;;  %v12851_v53 = vpack.c.bf16 %v4891_v19, %v4891_v19  ;;  %v12853_v27 = vpack.c.bf16 %v4892_v55, %v4892_v55  ;;  %v12855_v12 = vpack.c.bf16 %v4893_v62, %v4893_v62 }
 0x385   : > { %v12857_v9 = vpack.c.bf16 %v4894_v13, %v4894_v13  ;;  %v12859_v14 = vpack.c.bf16 %v4895_v3, %v4895_v3  ;;  %v12861_v58 = vpack.c.bf16 %v4896_v61, %v4896_v61  ;;  %v12863_v47 = vpack.c.bf16 %v4897_v45, %v4897_v45 }
 0x386   : > { %v12865_v63 = vpack.c.bf16 %v4898_v50, %v4898_v50  ;;  %v12867_v28 = vpack.c.bf16 %v4899_v0, %v4899_v0  ;;  %v12869_v34 = vpack.c.bf16 %v4900_v21, %v4900_v21  ;;  %v12871_v54 = vpack.c.bf16 %v4901_v26, %v4901_v26 }
 0x387   : > { %v12873_v36 = vpack.c.bf16 %v4902_v4, %v4902_v4  ;;  %v12875_v32 = vpack.c.bf16 %v4903_v46, %v4903_v46  ;;  %v12877_v39 = vpack.c.bf16 %v4904_v37, %v4904_v37  ;;  %v12879_v11 = vpack.c.bf16 %v4905_v16, %v4905_v16 }
 0x388   : > { %v12881_v59 = vpack.c.bf16 %v4906_v20, %v4906_v20  ;;  %v12883_v35 = vpack.c.bf16 %v4907_v15, %v4907_v15  ;;  %v5028_v7 = vshrl.u32 %v9407_v33, 16  ;;  %v5036_v25 = vshrl.u32 %v9408_v2, 16 }
 0x389   : > { %v12885_v10 = vpack.c.bf16 %v4908_v30, %v4908_v30  ;;  %v12887_v57 = vpack.c.bf16 %v4909_v41, %v4909_v41  ;;  %v12889_v40 = vpack.c.bf16 %v4912_v8, %v4912_v8  ;;  %v5031_v49 = vshll.u32 %v9407_v33, 16  ;;  %v5331_v41 = vld [vmem:[#allocation3 + $0xc] sm:$0xf] }
 0x38a   : > { %v5030_v44 = vrot.slane %v5028_v7, 7  ;;  %v5038_v24 = vrot.slane %v5036_v25, 7  ;;  %v5039_v42 = vshll.u32 %v9408_v2, 16  ;;  %v5011_v1 = vshrl.u32 %v12837_v51, 16 }
 0x38b   : > { %16131 = vst [vmem:[#allocation16_spill] sm:$0xff] %v12889_v40  ;;  %v5014_v17 = vshll.u32 %v12837_v51, 16  ;;  %v5019_v19 = vshrl.u32 %v12839_v23, 16  ;;  %v5022_v55 = vshll.u32 %v12839_v23, 16  ;;  %v5045_v62 = vshrl.u32 %v12841_v43, 16 }
 0x38c   : > { %v5033_v13 = vor.u32 %v5031_v49, %v5030_v44  ;;  %v5034_v3 = vrot.slane %v5030_v44, 4  ;;  %v5041_v61 = vor.u32 %v5039_v42, %v5038_v24  ;;  %v5043_v50 = vrot.slane %v5038_v24, 4 }
 0x38d   : > { %v5053_v0 = vshrl.u32 %v12843_v60, 16  ;;  %v5062_v26 = vshrl.u32 %v12845_v31, 16  ;;  %vm16132_vm5 = vcmask 27648   ;;  %v5155_v2 = vshrl.u32 %v12867_v28, 16 }
 0x38e   : > { %v5042_v4 = vsel %vm9898_vm9, %v5034_v3, %v5041_v61  ;;  %v5339_v46 = vsel %vm10041_vm11, %v5033_v13, %v5338_v22  ;;  %v5342_v61 = vld [vmem:[#allocation3 + $0x20] sm:$0x1]  ;;  %v5164_v8 = vshrl.u32 %v12869_v34, 16  ;;  %v5172_v30 = vshrl.u32 %v12871_v54, 16  ;;  %vm16142_vm4 = vmmov %vm16132_vm5 }
 0x38f   : > { %5340 = vst [vmem:[#allocation3 + $0x18] sm:$0xf] %v5339_v46  ;;  %5341 = vst.msk [vmem:[#allocation3 + $0x1c] sm:$0xf] %vm16132_vm5, %v5042_v4  ;;  %v5181_v20 = vshrl.u32 %v12873_v36, 16  ;;  %v5189_v37 = vshrl.u32 %v12875_v32, 16  ;;  %v12937_v25 = vpack.c.bf16 %v12835_v6, %v12835_v6  ;;  %v5343_v13 = vsel %vm10093_vm12, %v5043_v50, %v5342_v61 }
 0x390   : > { %v5198_v42 = vshrl.u32 %v12877_v39, 16  ;;  %5344 = vst [vmem:[#allocation3 + $0x20] sm:$0x1] %v5343_v13  ;;  %v5206_v24 = vshrl.u32 %v12879_v11, 16  ;;  %v5215_v45 = vshrl.u32 %v12881_v59, 16  ;;  %v5223_v61 = vshrl.u32 %v12883_v35, 16  ;;  %vm16158_vm14 = vmmov %vm16142_vm4 }
 0x391   : > { %16133 = vst [vmem:[#allocation17_spill] sm:$0xff] %v12937_v25  ;;  %v5232_v22 = vshrl.u32 %v12885_v10, 16  ;;  %v5240_v49 = vshrl.u32 %v12887_v57, 16  ;;  %v5013_v50 = vrot.slane %v5011_v1, 7  ;;  %v5047_v15 = vrot.slane %v5045_v62, 7  ;;  %vm16199_vm1 = vmmov %vm16142_vm4 }
 0x392   : > { %v12987_v7 = vrot.slane %v5062_v26, 7  ;;  %v16138_v62 = vshrl.u32 %v12847_v48, 16  ;;  %v16139_v51 = vshrl.u32 %v12849_v38, 16  ;;  %v16141_v26 = vshrl.u32 %v12853_v27, 16  ;;  %vm16200_vm0 = vmmov %vm16199_vm1 }
 0x393   : > { %v5016_v33 = vor.u32 %v5014_v17, %v5013_v50  ;;  %v5017_v16 = vrot.slane %v5013_v50, 4  ;;  %v13042_v52 = vrot.slane %v5189_v37, 7  ;;  %v16154_v37 = vshll.u32 %v12843_v60, 16  ;;  %vm16203_vm10 = vmmov %vm16200_vm0 }
 0x394   : > { %v12991_v56 = vrot.slane %v16138_v62, 7  ;;  %v12995_v17 = vrot.slane %v16139_v51, 7  ;;  %v16143_v62 = vshrl.u32 %v12855_v12, 16  ;;  %vm16204_vm8 = vmmov %vm16200_vm0 }
 0x395   : > { %16149 = vst [vmem:[#allocation12_spill] sm:$0xff] %v13042_v52  ;;  %vm16205_vm7 = vmmov %vm16200_vm0 }
 0x396   : > { %v6053_v21 = vld [vmem:[#allocation3 + $0x18] sm:$0xf]  ;;  %v12939_v44 = vld [vmem:[#allocation3 + $0x1c] sm:$0xf]  ;;  %v13012_v51 = vrot.slane %v16143_v62, 7  ;;  %vm16206_vm13 = vmmov %vm16200_vm0 }
 0x397   : > { %16134 = vst [vmem:[#allocation14_spill] sm:$0xff] %v12939_v44  ;;  %v9286_v46 = vcombine.low %v6053_v21, %v12939_v44  ;;  %v6124_v3 = vshrl.u32 %v6053_v21, 16  ;;  %v6127_v4 = vshll.u32 %v6053_v21, 16  ;;  %v12968_v21 = vrot.slane %v5019_v19, 7  ;;  %vm16207_vm3 = vmmov %vm16200_vm0 }
 0x398   : > { %v12982_v19 = vrot.slane %v5053_v0, 7  ;;  %v16140_v0 = vshrl.u32 %v12851_v53, 16  ;;  %v13038_v44 = vrot.slane %v5172_v30, 7  ;;  %v5051_v30 = vrot.slane %v5047_v15, 4  ;;  %vm16208_vm15 = vmmov %vm16200_vm0 }
 0x399   : > { %7558 = vrot.lane.b32.xlu1 %v9286_v46, %s9817_s20  ;;  %v12956_v13 = vrot.slane %v6124_v3, 4  ;;  %v12958_v6 = vrot.slane %v6127_v4, 5  ;;  %v5266_v46 = vshrl.u32 %v12889_v40, 16  ;;  %16137 = vst [vmem:[#allocation8_spill] sm:$0xff] %v12968_v21  ;;  %v5274_v4 = vshrl.u32 %v12937_v25, 16  ;;  %vm16212_vm5 = vmmov %vm16200_vm0 }
 0x39a   : > { %v5024_v1 = vor.u32 %v5022_v55, %v12968_v21  ;;  %v5332_v55 = vsel %vm10041_vm11, %v5016_v33, %v5331_v41  ;;  %v13003_v50 = vrot.slane %v16140_v0, 7  ;;  %v13007_v3 = vrot.slane %v16141_v26, 7 }
 0x39b   : > { %16135 = vst [vmem:[#allocation15_spill] sm:$0xff] %v12956_v13  ;;  %16136 = vst [vmem:[#allocation13_spill] sm:$0xff] %v12958_v6  ;;  %v16145_v41 = vshrl.u32 %v12859_v14, 16  ;;  %v16146_v0 = vshrl.u32 %v12861_v58, 16  ;;  %v13034_v13 = vrot.slane %v5155_v2, 7  ;;  %v13046_v21 = vrot.slane %v5206_v24, 7 }
 0x39c   : > { %v5025_v23 = vsel %vm9898_vm9, %v5017_v16, %v5024_v1  ;;  %5333 = vst [vmem:[#allocation3 + $0xc] sm:$0xf] %v5332_v55  ;;  %v16144_v16 = vshrl.u32 %v12857_v9, 16  ;;  %v16147_v55 = vshrl.u32 %v12863_v47, 16  ;;  %v13050_v25 = vrot.slane %v5223_v61, 7 }
 0x39d   : > { %5334 = vst.msk [vmem:[#allocation3 + $0x10] sm:$0xf] %vm16142_vm4, %v5025_v23  ;;  %v13020_v33 = vrot.slane %v16145_v41, 7  ;;  %v13024_v6 = vrot.slane %v16146_v0, 7  ;;  %v16148_v23 = vshrl.u32 %v12865_v63, 16  ;;  %v13040_v41 = vrot.slane %v5181_v20, 7  ;;  %vm16213_vm4 = vmmov %vm16200_vm0 }
 0x39e   : > { %v13016_v1 = vrot.slane %v16144_v16, 7  ;;  %v13028_v26 = vrot.slane %v16147_v55, 7  ;;  %v13036_v16 = vrot.slane %v5164_v8, 7  ;;  %v13044_v0 = vrot.slane %v5198_v42, 7  ;;  %16150 = vst [vmem:[#allocation4_spill] sm:$0xff] %v13046_v21  ;;  %16151 = vst [vmem:[#allocation7_spill] sm:$0xff] %v13050_v25 }
 0x39f   : > { %v13032_v62 = vrot.slane %v16148_v23, 7  ;;  %v13048_v55 = vrot.slane %v5215_v45, 7  ;;  %v16152_v2 = vshll.u32 %v12841_v43, 16  ;;  %v13054_v8 = vrot.slane %v5232_v22, 7 }
 0x3a0   : > { %v13056_v40 = vrot.slane %v5240_v49, 7  ;;  %v5058_v20 = vor.u32 %v16154_v37, %v12982_v19  ;;  %v13061_v42 = vrot.slane %v5266_v46, 7  ;;  %v13063_v24 = vrot.slane %v5274_v4, 7 }
 0x3a1   : > { %v5050_v23 = vor.u32 %v16152_v2, %v5047_v15  ;;  %v16155_v15 = vshll.u32 %v12845_v31, 16  ;;  %v16156_v22 = vshll.u32 %v12847_v48, 16  ;;  %v16160_v37 = vshll.u32 %v12851_v53, 16 }
 0x3a2   : > { %16153 = vst [vmem:[#allocation6_spill] sm:$0xff] %v13056_v40  ;;  %v5059_v43 = vsel %vm9898_vm9, %v5051_v30, %v5058_v20  ;;  %v16162_v53 = vshll.u32 %v12855_v12, 16  ;;  %v5187_v60 = vrot.slane %v13040_v41, 4 }
 0x3a3   : > { %v5346_v45 = vsel %vm10041_vm11, %v5050_v23, %v5345_v29  ;;  %v13073_v49 = vor.u32 %v16155_v15, %v12987_v7  ;;  %v13079_v46 = vor.u32 %v16156_v22, %v12991_v56  ;;  %v6051_v4 = vld [vmem:[#allocation3 + $0xc] sm:$0xf]  ;;  %5348 = vst.msk [vmem:[#allocation3 + $0x28] sm:$0xf] %vm16158_vm14, %v5059_v43  ;;  %v16159_v23 = vshll.u32 %v12849_v38, 16  ;;  %vm16214_vm14 = vmmov %vm16200_vm0 }
 0x3a4   : > { %5347 = vst [vmem:[#allocation3 + $0x24] sm:$0xf] %v5346_v45  ;;  %v13081_v29 = vld [vmem:[#allocation3 + $0x10] sm:$0xf]  ;;  %v13094_v48 = vor.u32 %v16160_v37, %v13003_v50  ;;  %v6100_v45 = vshrl.u32 %v6051_v4, 16  ;;  %v6103_v15 = vshll.u32 %v6051_v4, 16  ;;  %v13108_v37 = vor.u32 %v16162_v53, %v13012_v51 }
 0x3a5   : > { %16157 = vst [vmem:[#allocation5_spill] sm:$0xff] %v13081_v29  ;;  %v13088_v31 = vor.u32 %v16159_v23, %v12995_v17  ;;  %v9285_v20 = vcombine.low %v6051_v4, %v13081_v29  ;;  %v16161_v38 = vshll.u32 %v12853_v27, 16  ;;  %v16163_v43 = vshll.u32 %v12857_v9, 16 }
 0x3a6   : > { %v13123_v2 = vrot.slane %v6100_v45, 4  ;;  %v13125_v12 = vrot.slane %v6103_v15, 5  ;;  %v16167_v53 = vshll.u32 %v12861_v58, 16  ;;  %v16169_v45 = vshll.u32 %v12865_v63, 16 }
 0x3a7   : > { %v13102_v23 = vor.u32 %v16161_v38, %v13007_v3  ;;  %7556 = vrot.lane.b32.xlu0 %v9285_v20, %s9817_s20  ;;  %v13115_v22 = vor.u32 %v16163_v43, %v13016_v1  ;;  %v16164_v38 = vshll.u32 %v12859_v14, 16  ;;  %v16168_v43 = vshll.u32 %v12863_v47, 16 }
 0x3a8   : > { %16165 = vst [vmem:[#allocation18_spill] sm:$0xff] %v13123_v2  ;;  %16166 = vst [vmem:[#allocation19_spill] sm:$0xff] %v13125_v12  ;;  %v13131_v4 = vor.u32 %v16167_v53, %v13024_v6  ;;  %v13143_v15 = vor.u32 %v16169_v45, %v13032_v62  ;;  %v16171_v53 = vshll.u32 %v12867_v28, 16  ;;  %v16172_v47 = vshll.u32 %v12869_v34, 16  ;;  %v5335_v2 = vld [vmem:[#allocation3 + $0x14] sm:$0x1] }
 0x3a9   : > { %v13121_v61 = vor.u32 %v16164_v38, %v13020_v33  ;;  %v13137_v27 = vor.u32 %v16168_v43, %v13028_v26  ;;  %v5170_v45 = vrot.slane %v13036_v16, 4  ;;  %v16174_v58 = vshll.u32 %v12871_v54, 16  ;;  %v13204_v28 = vld [vmem:[#allocation3 + $0x1c] sm:$0xf] }
 0x3aa   : > { %v5160_v20 = vor.u32 %v16171_v53, %v13034_v13  ;;  %v13155_v43 = vor.u32 %v16172_v47, %v13036_v16  ;;  %v13157_v14 = vld [vmem:[#allocation3 + $0x28] sm:$0xf]  ;;  %v16175_v34 = vshll.u32 %v12873_v36, 16  ;;  %v16176_v54 = vshll.u32 %v12875_v32, 16  ;;  %16184 = vst [vmem:[#allocation25_spill] sm:$0xff] %v13204_v28 }
 0x3ab   : > { %v13145_v38 = vld [vmem:[#allocation3 + $0x24] sm:$0xf]  ;;  %16173 = vst [vmem:[#allocation21_spill] sm:$0xff] %v13157_v14  ;;  %v5177_v30 = vor.u32 %v16174_v58, %v13038_v44  ;;  %v16177_v53 = vshll.u32 %v12877_v39, 16  ;;  %v5204_v36 = vrot.slane %v13044_v0, 4  ;;  %v5221_v39 = vrot.slane %v13048_v55, 4 }
 0x3ac   : > { %16170 = vst [vmem:[#allocation20_spill] sm:$0xff] %v13145_v38  ;;  %v6733_v63 = vshrl.u32 %v13145_v38, 16  ;;  %v9334_v9 = vcombine.low %v13145_v38, %v13157_v14  ;;  %v13171_v47 = vor.u32 %v16175_v34, %v13040_v41  ;;  %v5194_v58 = vor.u32 %v16176_v54, %v13042_v52  ;;  %v5349_v32 = vld [vmem:[#allocation3 + $0x2c] sm:$0x1]  ;;  %v16188_v14 = vld [vmem:[#allocation16_spill] sm:$0xff] }
 0x3ad   : > { %v13182_v12 = vor.u32 %v16177_v53, %v13044_v0  ;;  %v16180_v41 = vshll.u32 %v12879_v11, 16  ;;  %v16181_v54 = vshll.u32 %v12881_v59, 16  ;;  %v13202_v0 = vld [vmem:[#allocation3 + $0x18] sm:$0xf]  ;;  %v16185_v11 = vshll.u32 %v12885_v10, 16 }
 0x3ae   : > { %v13184_v29 = vrot.slane %v6733_v63, 4  ;;  %7814 = vrot.lane.b32.xlu1 %v9334_v9, %s9810_s27  ;;  %v16183_v63 = vshll.u32 %v12883_v35, 16  ;;  %v5238_v59 = vrot.slane %v13054_v8, 4  ;;  %v5356_v9 = vld [vmem:[#allocation3 + $0x38] sm:$0x1]  ;;  %v16189_v38 = vshll.u32 %v16188_v14, 16 }
 0x3af   : > { %16178 = vst [vmem:[#allocation22_spill] sm:$0xff] %v13182_v12  ;;  %v5211_v34 = vor.u32 %v16180_v41, %v13046_v21  ;;  %v13195_v16 = vor.u32 %v16181_v54, %v13048_v55  ;;  %v13209_v41 = vor.u32 %v16185_v11, %v13054_v8  ;;  %v16187_v55 = vshll.u32 %v12887_v57, 16  ;;  %v16190_v8 = vld [vmem:[#allocation17_spill] sm:$0xff]  ;;  %v5370_v21 = vld [vmem:[#allocation3 + $0x50] sm:$0x1] }
 0x3b0   : > { %16179 = vst [vmem:[#allocation23_spill] sm:$0xff] %v13184_v29  ;;  %v5228_v53 = vor.u32 %v16183_v63, %v13050_v25  ;;  %v13216_v63 = vld [vmem:[#allocation3 + $0x30] sm:$0xf]  ;;  %v13218_v29 = vld [vmem:[#allocation3 + $0x3c] sm:$0xf]  ;;  %v13223_v10 = vor.u32 %v16189_v38, %v13061_v42  ;;  %v5272_v11 = vrot.slane %v13061_v42, 4  ;;  %v9333_v14 = vcombine.low %v13202_v0, %v13204_v28 }
 0x3b1   : > { %16182 = vst [vmem:[#allocation24_spill] sm:$0xff] %v13195_v16  ;;  %16186 = vst [vmem:[#allocation26_spill] sm:$0xff] %v13209_v41  ;;  %v5245_v54 = vor.u32 %v16187_v55, %v13056_v40  ;;  %v16191_v41 = vshll.u32 %v16190_v8, 16  ;;  %v16192_v55 = vld [vmem:[#allocation8_spill] sm:$0xff]  ;;  %v13233_v16 = vld [vmem:[#allocation3 + $0x48] sm:$0xf]  ;;  %v5353_v5 = vsel %vm10041_vm11, %v13073_v49, %v13216_v63 }
 0x3b2   : > { %v16193_v25 = vrot.slane %v16192_v55, 4  ;;  %v5363_v12 = vld [vmem:[#allocation3 + $0x44] sm:$0x1]  ;;  %v16195_v42 = vrot.slane %v12987_v7, 4  ;;  %v5373_v8 = vld [vmem:[#allocation3 + $0x54] sm:$0xf]  ;;  %7812 = vrot.lane.b32.xlu0 %v9333_v14, %s9810_s27 }
 0x3b3   : > { %v5279_v57 = vor.u32 %v16191_v41, %v13063_v24  ;;  %v16196_v41 = vrot.slane %v12995_v17, 4  ;;  %v6709_v55 = vshrl.u32 %v13202_v0, 16  ;;  %v6712_v52 = vshll.u32 %v13202_v0, 16  ;;  %v5387_v14 = vld [vmem:[#allocation3 + $0x6c] sm:$0xf] }
 0x3b4   : > { %v5336_v40 = vsel %vm10093_vm12, %v16193_v25, %v5335_v2  ;;  %v5076_v38 = vsel %vm9898_vm9, %v16195_v42, %v13079_v46  ;;  %v13248_v2 = vld [vmem:[#allocation3 + $0x60] sm:$0xf]  ;;  %v16197_v7 = vrot.slane %v13007_v3, 4  ;;  %v16198_v17 = vrot.slane %v13016_v1, 4  ;;  %v5377_v42 = vld [vmem:[#allocation3 + $0x5c] sm:$0x1] }
 0x3b5   : > { %v5093_v25 = vsel %vm9898_vm9, %v16196_v41, %v13094_v48  ;;  %5337 = vst [vmem:[#allocation3 + $0x14] sm:$0x1] %v5336_v40  ;;  %5355 = vst.msk [vmem:[#allocation3 + $0x34] sm:$0xf] %vm16199_vm1, %v5076_v38  ;;  %v5384_v40 = vld [vmem:[#allocation3 + $0x68] sm:$0x1]  ;;  %v5178_v38 = vsel %vm9898_vm9, %v5170_v45, %v5177_v30  ;;  %v5280_v30 = vsel %vm9898_vm9, %v5272_v11, %v5279_v57 }
 0x3b6   : > { %v5110_v46 = vsel %vm9898_vm9, %v16197_v7, %v13108_v37  ;;  %v5127_v48 = vsel %vm9898_vm9, %v16198_v17, %v13121_v61  ;;  %5362 = vst.msk [vmem:[#allocation3 + $0x40] sm:$0xf] %vm16200_vm0, %v5093_v25  ;;  %v13264_v41 = vld [vmem:[#allocation3 + $0x78] sm:$0xf]  ;;  %v16201_v3 = vrot.slane %v13024_v6, 4  ;;  %v16202_v1 = vrot.slane %v13032_v62, 4 }
 0x3b7   : > { %v5195_v25 = vsel %vm9898_vm9, %v5187_v60, %v5194_v58  ;;  %5369 = vst.msk [vmem:[#allocation3 + $0x4c] sm:$0xf] %vm16203_vm10, %v5110_v46  ;;  %v5398_v6 = vld [vmem:[#allocation3 + $0x80] sm:$0x1]  ;;  %v5391_v7 = vld [vmem:[#allocation3 + $0x74] sm:$0x1]  ;;  %v5229_v62 = vsel %vm9898_vm9, %v5221_v39, %v5228_v53  ;;  %v5374_v63 = vsel %vm10041_vm11, %v13115_v22, %v5373_v8 }
 0x3b8   : > { %v5144_v37 = vsel %vm9898_vm9, %v16201_v3, %v13137_v27  ;;  %v5161_v61 = vsel %vm9898_vm9, %v16202_v1, %v5160_v20  ;;  %5376 = vst.msk [vmem:[#allocation3 + $0x58] sm:$0xf] %vm16204_vm8, %v5127_v48  ;;  %v5212_v27 = vsel %vm9898_vm9, %v5204_v36, %v5211_v34  ;;  %v5246_v20 = vsel %vm9898_vm9, %v5238_v59, %v5245_v54  ;;  %v5408_v60 = vld [vmem:[#allocation3 + $0x90] sm:$0xf]  ;;  %v5401_v45 = vld [vmem:[#allocation3 + $0x84] sm:$0xf]  ;;  %vm16211_vm9 = vmmov %vm16200_vm0 }
 0x3b9   : > { %5383 = vst.msk [vmem:[#allocation3 + $0x64] sm:$0xf] %vm16205_vm7, %v5144_v37  ;;  %v5412_v58 = vld [vmem:[#allocation3 + $0x98] sm:$0x1]  ;;  %v16209_v36 = vrot.slane %v12982_v19, 4  ;;  %v16210_v39 = vrot.slane %v12991_v56, 4  ;;  %v5360_v59 = vsel %vm10041_vm11, %v13088_v31, %v13218_v29  ;;  %v5367_v29 = vsel %vm10041_vm11, %v13102_v23, %v13233_v16 }
 0x3ba   : > { %5390 = vst.msk [vmem:[#allocation3 + $0x70] sm:$0xf] %vm16206_vm13, %v5161_v61  ;;  %v5405_v19 = vld [vmem:[#allocation3 + $0x8c] sm:$0x1]  ;;  %v5422_v49 = vld [vmem:[#allocation3 + $0xa8] sm:$0xf]  ;;  %v5388_v16 = vsel %vm10041_vm11, %v13143_v15, %v5387_v14 }
 0x3bb   : > { %5397 = vst.msk [vmem:[#allocation3 + $0x7c] sm:$0xf] %vm16207_vm3, %v5178_v38  ;;  %v5350_v34 = vsel %vm10093_vm12, %v16209_v36, %v5349_v32  ;;  %v5357_v53 = vsel %vm10093_vm12, %v16210_v39, %v5356_v9  ;;  %v5415_v32 = vld [vmem:[#allocation3 + $0x9c] sm:$0xf]  ;;  %v16215_v56 = vrot.slane %v13003_v50, 4  ;;  %v16216_v31 = vrot.slane %v13012_v51, 4 }
 0x3bc   : > { %5404 = vst.msk [vmem:[#allocation3 + $0x88] sm:$0xf] %vm16208_vm15, %v5195_v25  ;;  %5354 = vst [vmem:[#allocation3 + $0x30] sm:$0xf] %v5353_v5  ;;  %v5426_v50 = vld [vmem:[#allocation3 + $0xb0] sm:$0x1] }
 0x3bd   : > { %5411 = vst.msk [vmem:[#allocation3 + $0x94] sm:$0xf] %vm16211_vm9, %v5212_v27  ;;  %v5364_v9 = vsel %vm10093_vm12, %v16215_v56, %v5363_v12  ;;  %v5371_v54 = vsel %vm10093_vm12, %v16216_v31, %v5370_v21  ;;  %5351 = vst [vmem:[#allocation3 + $0x2c] sm:$0x1] %v5350_v34  ;;  %v5419_v12 = vld [vmem:[#allocation3 + $0xa4] sm:$0x1]  ;;  %v5381_v21 = vsel %vm10041_vm11, %v13131_v4, %v13248_v2 }
 0x3be   : > { %5418 = vst.msk [vmem:[#allocation3 + $0xa0] sm:$0xf] %vm16212_vm5, %v5229_v62  ;;  %5358 = vst [vmem:[#allocation3 + $0x38] sm:$0x1] %v5357_v53  ;;  %v5436_v11 = vld [vmem:[#allocation3 + $0xc0] sm:$0xf]  ;;  %v5402_v2 = vsel %vm10041_vm11, %v13171_v47, %v5401_v45 }
 0x3bf   : > { %5425 = vst.msk [vmem:[#allocation3 + $0xac] sm:$0xf] %vm16213_vm4, %v5246_v20  ;;  %5361 = vst [vmem:[#allocation3 + $0x3c] sm:$0xf] %v5360_v59  ;;  %v16217_v57 = vrot.slane %v13020_v33, 4  ;;  %v16218_v51 = vrot.slane %v13028_v26, 4  ;;  %v5395_v26 = vsel %vm10041_vm11, %v13155_v43, %v13264_v41  ;;  %v5437_v20 = vsel %vm10041_vm11, %v13223_v10, %v5436_v11 }
 0x3c0   : > { %5439 = vst.msk [vmem:[#allocation3 + $0xc4] sm:$0xf] %vm16214_vm14, %v5280_v30  ;;  %5365 = vst [vmem:[#allocation3 + $0x44] sm:$0x1] %v5364_v9  ;;  %v5440_v33 = vld [vmem:[#allocation3 + $0xc8] sm:$0x1] }
 0x3c1   : > { %v5378_v23 = vsel %vm10093_vm12, %v16217_v57, %v5377_v42  ;;  %v5385_v22 = vsel %vm10093_vm12, %v16218_v51, %v5384_v40  ;;  %5368 = vst [vmem:[#allocation3 + $0x48] sm:$0xf] %v5367_v29  ;;  %5372 = vst [vmem:[#allocation3 + $0x50] sm:$0x1] %v5371_v54  ;;  %v16219_v8 = vrot.slane %v13034_v13, 4  ;;  %v16220_v4 = vrot.slane %v13038_v44, 4 }
 0x3c2   : > { %5375 = vst [vmem:[#allocation3 + $0x54] sm:$0xf] %v5374_v63  ;;  %5379 = vst [vmem:[#allocation3 + $0x5c] sm:$0x1] %v5378_v23  ;;  %v16221_v13 = vld [vmem:[#allocation12_spill] sm:$0xff]  ;;  %v16223_v40 = vld [vmem:[#allocation22_spill] sm:$0xff] }
 0x3c3   : > { %v5392_v46 = vsel %vm10093_vm12, %v16219_v8, %v5391_v7  ;;  %v5399_v15 = vsel %vm10093_vm12, %v16220_v4, %v5398_v6  ;;  %5382 = vst [vmem:[#allocation3 + $0x60] sm:$0xf] %v5381_v21  ;;  %5386 = vst [vmem:[#allocation3 + $0x68] sm:$0x1] %v5385_v22  ;;  %v16222_v17 = vrot.slane %v16221_v13, 4  ;;  %v5409_v44 = vsel %vm10041_vm11, %v16223_v40, %v5408_v60  ;;  %v16224_v43 = vld [vmem:[#allocation4_spill] sm:$0xff] }
 0x3c4   : > { %5389 = vst [vmem:[#allocation3 + $0x6c] sm:$0xf] %v5388_v16  ;;  %v16225_v42 = vrot.slane %v16224_v43, 4  ;;  %v16226_v3 = vld [vmem:[#allocation24_spill] sm:$0xff]  ;;  %5393 = vst [vmem:[#allocation3 + $0x74] sm:$0x1] %v5392_v46 }
 0x3c5   : > { %v5406_v48 = vsel %vm10093_vm12, %v16222_v17, %v5405_v19  ;;  %v5416_v47 = vsel %vm10041_vm11, %v16226_v3, %v5415_v32  ;;  %5396 = vst [vmem:[#allocation3 + $0x78] sm:$0xf] %v5395_v26  ;;  %5400 = vst [vmem:[#allocation3 + $0x80] sm:$0x1] %v5399_v15  ;;  %v6055_v37 = vld [vmem:[#allocation3 + $0x24] sm:$0xf] }
 0x3c6   : > { %v5413_v41 = vsel %vm10093_vm12, %v16225_v42, %v5412_v58  ;;  %5403 = vst [vmem:[#allocation3 + $0x84] sm:$0xf] %v5402_v2  ;;  %v13373_v1 = vld [vmem:[#allocation3 + $0x28] sm:$0xf]  ;;  %v16228_v61 = vld [vmem:[#allocation7_spill] sm:$0xff]  ;;  %v16235_v58 = vld [vmem:[#allocation20_spill] sm:$0xff] }
 0x3c7   : > { %16227 = vst [vmem:[#allocation16_spill] sm:$0xff] %v13373_v1  ;;  %v16229_v38 = vrot.slane %v16228_v61, 4  ;;  %v16230_v14 = vld [vmem:[#allocation26_spill] sm:$0xff]  ;;  %v13389_v30 = vld [vmem:[#allocation3 + $0x34] sm:$0xf]  ;;  %v16236_v36 = vshll.u32 %v16235_v58, 16 }
 0x3c8   : > { %v5423_v6 = vsel %vm10041_vm11, %v16230_v14, %v5422_v49  ;;  %v16231_v7 = vld [vmem:[#allocation6_spill] sm:$0xff]  ;;  %16233 = vst [vmem:[#allocation17_spill] sm:$0xff] %v13389_v30  ;;  %5407 = vst [vmem:[#allocation3 + $0x8c] sm:$0x1] %v5406_v48  ;;  %v13391_v60 = vld [vmem:[#allocation3 + $0xb4] sm:$0xf] }
 0x3c9   : > { %v5420_v25 = vsel %vm10093_vm12, %v16229_v38, %v5419_v12  ;;  %v16232_v27 = vrot.slane %v16231_v7, 4  ;;  %5410 = vst [vmem:[#allocation3 + $0x90] sm:$0xf] %v5409_v44  ;;  %5414 = vst [vmem:[#allocation3 + $0x98] sm:$0x1] %v5413_v41  ;;  %v13397_v34 = vrot.slane %v16236_v36, 5 }
 0x3ca   : > { %5417 = vst [vmem:[#allocation3 + $0x9c] sm:$0xf] %v5416_v47  ;;  %v13393_v45 = vld [vmem:[#allocation3 + $0xb8] sm:$0xf]  ;;  %v13401_v5 = vrot.slane %v6709_v55, 4  ;;  %v16238_v10 = vrot.slane %v13063_v24, 4  ;;  %v9287_v55 = vcombine.low %v6055_v37, %v13373_v1 }
 0x3cb   : > { %v5427_v62 = vsel %vm10093_vm12, %v16232_v27, %v5426_v50  ;;  %16234 = vst [vmem:[#allocation8_spill] sm:$0xff] %v13393_v45  ;;  %5421 = vst [vmem:[#allocation3 + $0xa4] sm:$0x1] %v5420_v25  ;;  %v13410_v53 = vrot.slane %v6712_v52, 5  ;;  %v6148_v59 = vshrl.u32 %v6055_v37, 16  ;;  %v6151_v9 = vshll.u32 %v6055_v37, 16 }
 0x3cc   : > { %16237 = vst [vmem:[#allocation9_spill] sm:$0xff] %v13401_v5  ;;  %v5441_v39 = vsel %vm10093_vm12, %v16238_v10, %v5440_v33  ;;  %5424 = vst [vmem:[#allocation3 + $0xa8] sm:$0xf] %v5423_v6  ;;  %v13413_v19 = vld [vmem:[#allocation3 + $0x40] sm:$0xf]  ;;  %7560 = vrot.lane.b32.xlu0 %v9287_v55, %s9817_s20  ;;  %vm16538_vm11 = vcmask 31744  }
 0x3cd   : > { %5428 = vst [vmem:[#allocation3 + $0xb0] sm:$0x1] %v5427_v62  ;;  %5438 = vst [vmem:[#allocation3 + $0xc0] sm:$0xf] %v5437_v20  ;;  %v13415_v49 = vld [vmem:[#allocation3 + $0x34] sm:$0xf] }
 0x3ce   : > { %16239 = vst [vmem:[#allocation12_spill] sm:$0xff] %v13410_v53  ;;  %5442 = vst [vmem:[#allocation3 + $0xc8] sm:$0x1] %v5441_v39  ;;  %v13417_v24 = vld [vmem:[#allocation3 + $0xb4] sm:$0xf]  ;;  %v13431_v22 = vrot.slane %v6148_v59, 4 }
 0x3cf   : > { %16240 = vst [vmem:[#allocation22_spill] sm:$0xff] %v13415_v49  ;;  %v13419_v35 = vld [vmem:[#allocation3 + $0xb8] sm:$0xf]  ;;  %v6057_v32 = vld [vmem:[#allocation3 + $0x30] sm:$0xf]  ;;  %v13435_v26 = vrot.slane %v6151_v9, 5  ;;  %vm16541_vm1 = vmmov %vm16538_vm11 }
 0x3d0   : > { %16241 = vst [vmem:[#allocation4_spill] sm:$0xff] %v13419_v35  ;;  %v6666_v29 = vld [vmem:[#allocation3 + $0x3c] sm:$0xf]  ;;  %v6172_v0 = vshrl.u32 %v6057_v32, 16  ;;  %v6175_v31 = vshll.u32 %v6057_v32, 16  ;;  %v9288_v54 = vcombine.low %v6057_v32, %v13389_v30  ;;  %16243 = vst [vmem:[#allocation7_spill] sm:$0xff] %v13431_v22 }
 0x3d1   : > { %v6664_v50 = vld [vmem:[#allocation3 + $0x30] sm:$0xf]  ;;  %v6781_v12 = vshrl.u32 %v6666_v29, 16  ;;  %v6784_v11 = vshll.u32 %v6666_v29, 16  ;;  %v6061_v21 = vld [vmem:[#allocation3 + $0x48] sm:$0xf]  ;;  %v9336_v4 = vcombine.low %v6666_v29, %v13413_v19  ;;  %vm16545_vm13 = vmmov %vm16541_vm1 }
 0x3d2   : > { %v6757_v23 = vshrl.u32 %v6664_v50, 16  ;;  %v13428_v51 = vld [vmem:[#allocation3 + $0x4c] sm:$0xf]  ;;  %7562 = vrot.lane.b32.xlu1 %v9288_v54, %s9817_s20  ;;  %v6760_v16 = vshll.u32 %v6664_v50, 16  ;;  %v9335_v8 = vcombine.low %v6664_v50, %v13415_v49  ;;  %v6059_v46 = vld [vmem:[#allocation3 + $0x3c] sm:$0xf]  ;;  %vm16549_vm14 = vmmov %vm16541_vm1 }
 0x3d3   : > { %16242 = vst [vmem:[#allocation24_spill] sm:$0xff] %v13428_v51  ;;  %16244 = vst [vmem:[#allocation26_spill] sm:$0xff] %v13435_v26  ;;  %v6220_v15 = vshrl.u32 %v6061_v21, 16  ;;  %v13438_v2 = vld [vmem:[#allocation3 + $0x40] sm:$0xf]  ;;  %v13442_v48 = vrot.slane %v6172_v0, 4  ;;  %v9290_v20 = vcombine.low %v6061_v21, %v13428_v51 }
 0x3d4   : > { %16245 = vst [vmem:[#allocation6_spill] sm:$0xff] %v13438_v2  ;;  %v6670_v13 = vld [vmem:[#allocation3 + $0x54] sm:$0xf]  ;;  %v13444_v40 = vrot.slane %v6175_v31, 5  ;;  %7816 = vrot.lane.b32.xlu0 %v9335_v8, %s9810_s27  ;;  %v6223_v44 = vshll.u32 %v6061_v21, 16  ;;  %v6196_v43 = vshrl.u32 %v6059_v46, 16  ;;  %v9289_v6 = vcombine.low %v6059_v46, %v13438_v2 }
 0x3d5   : > { %16246 = vst [vmem:[#allocation20_spill] sm:$0xff] %v13442_v48  ;;  %v13447_v42 = vld [vmem:[#allocation3 + $0x58] sm:$0xf]  ;;  %v6668_v41 = vld [vmem:[#allocation3 + $0x48] sm:$0xf]  ;;  %v13449_v3 = vrot.slane %v6781_v12, 4 }
 0x3d6   : > { %16247 = vst [vmem:[#allocation27_spill] sm:$0xff] %v13444_v40  ;;  %v13451_v47 = vrot.slane %v6784_v11, 5  ;;  %v13453_v37 = vrot.slane %v6757_v23, 4  ;;  %v6199_v61 = vshll.u32 %v6059_v46, 16  ;;  %v13455_v38 = vld [vmem:[#allocation3 + $0x4c] sm:$0xf]  ;;  %7818 = vrot.lane.b32.xlu1 %v9336_v4, %s9810_s27  ;;  %v9338_v11 = vcombine.low %v6670_v13, %v13447_v42 }
 0x3d7   : > { %16248 = vst [vmem:[#allocation28_spill] sm:$0xff] %v13449_v3  ;;  %16251 = vst [vmem:[#allocation31_spill] sm:$0xff] %v13455_v38  ;;  %v13458_v25 = vrot.slane %v6760_v16, 5  ;;  %v6829_v7 = vshrl.u32 %v6670_v13, 16  ;;  %v6065_v27 = vld [vmem:[#allocation3 + $0x60] sm:$0xf]  ;;  %v9337_v23 = vcombine.low %v6668_v41, %v13455_v38 }
 0x3d8   : > { %16249 = vst [vmem:[#allocation29_spill] sm:$0xff] %v13451_v47  ;;  %16250 = vst [vmem:[#allocation30_spill] sm:$0xff] %v13453_v37  ;;  %v13462_v62 = vrot.slane %v6220_v15, 4  ;;  %v6832_v58 = vshll.u32 %v6670_v13, 16  ;;  %v6805_v36 = vshrl.u32 %v6668_v41, 16  ;;  %v13465_v39 = vrot.slane %v6223_v44, 5  ;;  %7564 = vrot.lane.b32.xlu0 %v9289_v6, %s9817_s20 }
 0x3d9   : > { %16252 = vst [vmem:[#allocation32_spill] sm:$0xff] %v13458_v25  ;;  %v6063_v10 = vld [vmem:[#allocation3 + $0x54] sm:$0xf]  ;;  %v13467_v59 = vrot.slane %v6196_v43, 4  ;;  %v6808_v32 = vshll.u32 %v6668_v41, 16  ;;  %v13473_v29 = vrot.slane %v6199_v61, 5 }
 0x3da   : > { %16253 = vst [vmem:[#allocation33_spill] sm:$0xff] %v13462_v62  ;;  %16254 = vst [vmem:[#allocation34_spill] sm:$0xff] %v13465_v39  ;;  %v13471_v9 = vld [vmem:[#allocation3 + $0x64] sm:$0xf]  ;;  %v6268_v31 = vshrl.u32 %v6065_v27, 16  ;;  %v6271_v54 = vshll.u32 %v6065_v27, 16  ;;  %7566 = vrot.lane.b32.xlu1 %v9290_v20, %s9817_s20 }
 0x3db   : > { %16255 = vst [vmem:[#allocation35_spill] sm:$0xff] %v13467_v59  ;;  %16256 = vst [vmem:[#allocation36_spill] sm:$0xff] %v13471_v9  ;;  %v13476_v50 = vld [vmem:[#allocation3 + $0x6c] sm:$0xf]  ;;  %v13479_v12 = vrot.slane %v6829_v7, 4  ;;  %v6244_v16 = vshrl.u32 %v6063_v10, 16 }
 0x3dc   : > { %16257 = vst [vmem:[#allocation37_spill] sm:$0xff] %v13473_v29  ;;  %v13483_v21 = vld [vmem:[#allocation3 + $0x58] sm:$0xf]  ;;  %v6672_v8 = vld [vmem:[#allocation3 + $0x60] sm:$0xf]  ;;  %v13485_v46 = vrot.slane %v6832_v58, 5  ;;  %7820 = vrot.lane.b32.xlu0 %v9337_v23, %s9810_s27  ;;  %v9292_v23 = vcombine.low %v6065_v27, %v13471_v9 }
 0x3dd   : > { %16258 = vst [vmem:[#allocation38_spill] sm:$0xff] %v13479_v12  ;;  %16259 = vst [vmem:[#allocation39_spill] sm:$0xff] %v13483_v21  ;;  %v13487_v4 = vrot.slane %v6805_v36, 4  ;;  %v6247_v44 = vshll.u32 %v6063_v10, 16  ;;  %v13490_v43 = vld [vmem:[#allocation3 + $0x70] sm:$0xf]  ;;  %v9291_v33 = vcombine.low %v6063_v10, %v13483_v21 }
 0x3de   : > { %16260 = vst [vmem:[#allocation40_spill] sm:$0xff] %v13485_v46  ;;  %v13492_v61 = vrot.slane %v6808_v32, 5  ;;  %v6877_v41 = vshrl.u32 %v13476_v50, 16  ;;  %v6880_v6 = vshll.u32 %v13476_v50, 16  ;;  %v13498_v7 = vld [vmem:[#allocation3 + $0x78] sm:$0xf]  ;;  %7822 = vrot.lane.b32.xlu1 %v9338_v11, %s9810_s27 }
 0x3df   : > { %16261 = vst [vmem:[#allocation41_spill] sm:$0xff] %v13487_v4  ;;  %v13500_v20 = vrot.slane %v6268_v31, 4  ;;  %v13502_v58 = vrot.slane %v6271_v54, 5  ;;  %v13505_v15 = vld [vmem:[#allocation3 + $0x64] sm:$0xf]  ;;  %v6853_v32 = vshrl.u32 %v6672_v8, 16 }
 0x3e0   : > { %16262 = vst [vmem:[#allocation42_spill] sm:$0xff] %v13492_v61  ;;  %v13509_v55 = vrot.slane %v6244_v16, 4  ;;  %v6856_v63 = vshll.u32 %v6672_v8, 16  ;;  %v13512_v18 = vld [vmem:[#allocation3 + $0x7c] sm:$0xf]  ;;  %v13514_v13 = vrot.slane %v6247_v44, 5  ;;  %7568 = vrot.lane.b32.xlu0 %v9291_v33, %s9817_s20  ;;  %v9340_v33 = vcombine.low %v13476_v50, %v13490_v43 }
 0x3e1   : > { %16263 = vst [vmem:[#allocation43_spill] sm:$0xff] %v13500_v20  ;;  %16264 = vst [vmem:[#allocation44_spill] sm:$0xff] %v13502_v58  ;;  %v6067_v31 = vld [vmem:[#allocation3 + $0x6c] sm:$0xf]  ;;  %v6316_v36 = vshrl.u32 %v13498_v7, 16  ;;  %v6319_v0 = vshll.u32 %v13498_v7, 16 }
 0x3e2   : > { %16265 = vst [vmem:[#allocation45_spill] sm:$0xff] %v13509_v55  ;;  %16266 = vst [vmem:[#allocation46_spill] sm:$0xff] %v13512_v18  ;;  %v13520_v11 = vrot.slane %v6877_v41, 4  ;;  %v13522_v27 = vrot.slane %v6880_v6, 5  ;;  %v6292_v16 = vshrl.u32 %v6067_v31, 16  ;;  %v13527_v57 = vrot.slane %v6853_v32, 4  ;;  %7570 = vrot.lane.b32.xlu1 %v9292_v23, %s9817_s20 }
 0x3e3   : > { %16267 = vst [vmem:[#allocation47_spill] sm:$0xff] %v13514_v13  ;;  %v13525_v14 = vld [vmem:[#allocation3 + $0x84] sm:$0xf]  ;;  %v13529_v44 = vrot.slane %v6856_v63, 5  ;;  %v13532_v56 = vld [vmem:[#allocation3 + $0x70] sm:$0xf]  ;;  %v9339_v41 = vcombine.low %v6672_v8, %v13505_v15 }
 0x3e4   : > { %16268 = vst [vmem:[#allocation48_spill] sm:$0xff] %v13520_v11  ;;  %16269 = vst [vmem:[#allocation49_spill] sm:$0xff] %v13522_v27  ;;  %v6295_v17 = vshll.u32 %v6067_v31, 16  ;;  %v13538_v6 = vld [vmem:[#allocation3 + $0x88] sm:$0xf]  ;;  %v6925_v10 = vshrl.u32 %v13525_v14, 16 }
 0x3e5   : > { %16270 = vst [vmem:[#allocation50_spill] sm:$0xff] %v13527_v57  ;;  %16271 = vst [vmem:[#allocation51_spill] sm:$0xff] %v13529_v44  ;;  %v6928_v32 = vshll.u32 %v13525_v14, 16  ;;  %v6676_v63 = vld [vmem:[#allocation3 + $0x78] sm:$0xf]  ;;  %v13542_v52 = vrot.slane %v6316_v36, 4  ;;  %v9294_v44 = vcombine.low %v13498_v7, %v13512_v18  ;;  %7824 = vrot.lane.b32.xlu0 %v9339_v41, %s9810_s27  ;;  %v9342_v41 = vcombine.low %v13525_v14, %v13538_v6 }
 0x3e6   : > { %v13544_v54 = vrot.slane %v6319_v0, 5  ;;  %v13548_v23 = vld [vmem:[#allocation3 + $0x7c] sm:$0xf]  ;;  %v6901_v57 = vshrl.u32 %v6676_v63, 16  ;;  %v13551_v50 = vrot.slane %v6292_v16, 4  ;;  %v13553_v8 = vrot.slane %v6295_v17, 5  ;;  %7826 = vrot.lane.b32.xlu1 %v9340_v33, %s9810_s27 }
 0x3e7   : > { %16272 = vst [vmem:[#allocation52_spill] sm:$0xff] %v13542_v52  ;;  %v6904_v55 = vshll.u32 %v6676_v63, 16  ;;  %v13556_v61 = vld [vmem:[#allocation3 + $0x90] sm:$0xf]  ;;  %v13558_v36 = vrot.slane %v6925_v10, 4  ;;  %v9293_v17 = vcombine.low %v6067_v31, %v13532_v56  ;;  %v13567_v16 = vrot.slane %v6928_v32, 5 }
 0x3e8   : > { %16273 = vst [vmem:[#allocation53_spill] sm:$0xff] %v13544_v54  ;;  %16274 = vst [vmem:[#allocation54_spill] sm:$0xff] %v13551_v50  ;;  %v13561_v4 = vld [vmem:[#allocation3 + $0x94] sm:$0xf]  ;;  %v6364_v7 = vshrl.u32 %v13556_v61, 16  ;;  %v6367_v29 = vshll.u32 %v13556_v61, 16  ;;  %v9341_v50 = vcombine.low %v6676_v63, %v13548_v23 }
 0x3e9   : > { %16275 = vst [vmem:[#allocation55_spill] sm:$0xff] %v13553_v8  ;;  %16276 = vst [vmem:[#allocation56_spill] sm:$0xff] %v13558_v36  ;;  %v6071_v13 = vld [vmem:[#allocation3 + $0x84] sm:$0xf]  ;;  %v13572_v8 = vld [vmem:[#allocation3 + $0x88] sm:$0xf]  ;;  %7572 = vrot.lane.b32.xlu0 %v9293_v17, %s9817_s20  ;;  %v9296_v63 = vcombine.low %v13556_v61, %v13561_v4 }
 0x3ea   : > { %16277 = vst [vmem:[#allocation57_spill] sm:$0xff] %v13561_v4  ;;  %16278 = vst [vmem:[#allocation58_spill] sm:$0xff] %v13567_v16  ;;  %v13574_v0 = vrot.slane %v6901_v57, 4  ;;  %v6340_v36 = vshrl.u32 %v6071_v13, 16  ;;  %v6343_v59 = vshll.u32 %v6071_v13, 16  ;;  %v13580_v31 = vrot.slane %v6904_v55, 5  ;;  %7574 = vrot.lane.b32.xlu1 %v9294_v44, %s9817_s20 }
 0x3eb   : > { %16279 = vst [vmem:[#allocation59_spill] sm:$0xff] %v13572_v8  ;;  %v13577_v54 = vld [vmem:[#allocation3 + $0x9c] sm:$0xf]  ;;  %v13583_v14 = vld [vmem:[#allocation3 + $0xa0] sm:$0xf]  ;;  %v13587_v57 = vrot.slane %v6364_v7, 4  ;;  %v9295_v7 = vcombine.low %v6071_v13, %v13572_v8 }
 0x3ec   : > { %16280 = vst [vmem:[#allocation60_spill] sm:$0xff] %v13574_v0  ;;  %16281 = vst [vmem:[#allocation61_spill] sm:$0xff] %v13580_v31  ;;  %v6973_v32 = vshrl.u32 %v13577_v54, 16  ;;  %v6976_v10 = vshll.u32 %v13577_v54, 16  ;;  %v13589_v0 = vrot.slane %v6367_v29, 5  ;;  %v13595_v55 = vrot.slane %v6340_v36, 4 }
 0x3ed   : > { %16282 = vst [vmem:[#allocation62_spill] sm:$0xff] %v13583_v14  ;;  %16283 = vst [vmem:[#allocation63_spill] sm:$0xff] %v13587_v57  ;;  %v6680_v17 = vld [vmem:[#allocation3 + $0x90] sm:$0xf]  ;;  %v13597_v33 = vrot.slane %v6343_v59, 5  ;;  %v9344_v61 = vcombine.low %v13577_v54, %v13583_v14  ;;  %7828 = vrot.lane.b32.xlu0 %v9341_v50, %s9810_s27  ;;  %v7021_v50 = vshrl.u32 %v13391_v60, 16 }
 0x3ee   : > { %16284 = vst [vmem:[#allocation64_spill] sm:$0xff] %v13589_v0  ;;  %16285 = vst [vmem:[#allocation65_spill] sm:$0xff] %v13595_v55  ;;  %v13599_v31 = vld [vmem:[#allocation3 + $0x94] sm:$0xf]  ;;  %v6949_v52 = vshrl.u32 %v6680_v17, 16  ;;  %v6952_v25 = vshll.u32 %v6680_v17, 16  ;;  %7830 = vrot.lane.b32.xlu1 %v9342_v41, %s9810_s27 }
 0x3ef   : > { %16286 = vst [vmem:[#allocation66_spill] sm:$0xff] %v13597_v33  ;;  %16287 = vst [vmem:[#allocation67_spill] sm:$0xff] %v13599_v31  ;;  %v13602_v29 = vrot.slane %v6973_v32, 4  ;;  %v13607_v16 = vld [vmem:[#allocation3 + $0xa8] sm:$0xf]  ;;  %v13612_v59 = vrot.slane %v6976_v10, 5  ;;  %v9343_v0 = vcombine.low %v6680_v17, %v13599_v31 }
 0x3f0   : > { %v13609_v44 = vld [vmem:[#allocation3 + $0xac] sm:$0xf]  ;;  %v6412_v33 = vshrl.u32 %v13607_v16, 16  ;;  %v6415_v13 = vshll.u32 %v13607_v16, 16  ;;  %v13617_v32 = vld [vmem:[#allocation3 + $0x9c] sm:$0xf] }
 0x3f1   : > { %16288 = vst [vmem:[#allocation68_spill] sm:$0xff] %v13602_v29  ;;  %16289 = vst [vmem:[#allocation69_spill] sm:$0xff] %v13609_v44  ;;  %v13620_v8 = vld [vmem:[#allocation3 + $0xa0] sm:$0xf]  ;;  %v6388_v54 = vshrl.u32 %v13617_v32, 16  ;;  %v6391_v55 = vshll.u32 %v13617_v32, 16  ;;  %7576 = vrot.lane.b32.xlu0 %v9295_v7, %s9817_s20 }
 0x3f2   : > { %16290 = vst [vmem:[#allocation70_spill] sm:$0xff] %v13612_v59  ;;  %16291 = vst [vmem:[#allocation71_spill] sm:$0xff] %v13620_v8  ;;  %v13626_v10 = vrot.slane %v6949_v52, 4  ;;  %v13628_v36 = vrot.slane %v6952_v25, 5  ;;  %v13633_v17 = vld [vmem:[#allocation3 + $0xa8] sm:$0xf]  ;;  %v9297_v25 = vcombine.low %v13617_v32, %v13620_v8  ;;  %7578 = vrot.lane.b32.xlu1 %v9296_v63, %s9817_s20 }
 0x3f3   : > { %v13635_v31 = vrot.slane %v6412_v33, 4  ;;  %v13637_v29 = vrot.slane %v6415_v13, 5  ;;  %v7024_v37 = vshll.u32 %v13391_v60, 16  ;;  %v13641_v41 = vld [vmem:[#allocation3 + $0xac] sm:$0xf]  ;;  %v13644_v52 = vrot.slane %v6388_v54, 4 }
 0x3f4   : > { %16292 = vst [vmem:[#allocation72_spill] sm:$0xff] %v13626_v10  ;;  %16293 = vst [vmem:[#allocation73_spill] sm:$0xff] %v13628_v36  ;;  %v6997_v14 = vshrl.u32 %v13633_v17, 16  ;;  %v7000_v33 = vshll.u32 %v13633_v17, 16  ;;  %v13650_v59 = vld [vmem:[#allocation3 + $0xc0] sm:$0xf] }
 0x3f5   : > { %16294 = vst [vmem:[#allocation74_spill] sm:$0xff] %v13635_v31  ;;  %16295 = vst [vmem:[#allocation75_spill] sm:$0xff] %v13637_v29  ;;  %v5876_v13 = vld [vmem:[#allocation3 + $0xc] sm:$0xe]  ;;  %v13652_v29 = vrot.slane %v6391_v55, 5  ;;  %v13654_v57 = vrot.slane %v7021_v50, 4  ;;  %v9345_v55 = vcombine.low %v13633_v17, %v13641_v41  ;;  %7832 = vrot.lane.b32.xlu0 %v9343_v0, %s9810_s27 }
 0x3f6   : > { %16296 = vst [vmem:[#allocation76_spill] sm:$0xff] %v13641_v41  ;;  %16297 = vst [vmem:[#allocation77_spill] sm:$0xff] %v13644_v52  ;;  %v13656_v31 = vld [vmem:[#allocation3 + $0xc4] sm:$0xf]  ;;  %v6460_v7 = vshrl.u32 %v13650_v59, 16  ;;  %v6463_v54 = vshll.u32 %v13650_v59, 16  ;;  %7834 = vrot.lane.b32.xlu1 %v9344_v61, %s9810_s27 }
 0x3f7   : > { %16298 = vst [vmem:[#allocation78_spill] sm:$0xff] %v13652_v29  ;;  %16299 = vst [vmem:[#allocation79_spill] sm:$0xff] %v13654_v57  ;;  %v13660_v52 = vld [vmem:[#allocation3 + $0x10] sm:$0xf]  ;;  %v13663_v32 = vrot.slane %v7024_v37, 5  ;;  %v13671_v10 = vrot.slane %v6997_v14, 4 }
 0x3f8   : > { %v13669_v50 = vld [vmem:[#allocation3 + $0xc0] sm:$0xf]  ;;  %v6483_v57 = vld [vmem:[#allocation3 + $0xc] sm:$0xe]  ;;  %v6484_v29 = vld [vmem:[#allocation3 + $0x18] sm:$0xe] }
 0x3f9   : > { %16300 = vst [vmem:[#allocation80_spill] sm:$0xff] %v13663_v32  ;;  %16301 = vst [vmem:[#allocation81_spill] sm:$0xff] %v13671_v10  ;;  %v13673_v26 = vrot.slane %v7000_v33, 5  ;;  %v6436_v22 = vshrl.u32 %v13417_v24, 16  ;;  %v6439_v37 = vshll.u32 %v13417_v24, 16  ;;  %v13680_v36 = vrot.slane %v6460_v7, 4  ;;  %7580 = vrot.lane.b32.xlu0 %v9297_v25, %s9817_s20 }
 0x3fa   : > { %v13677_v63 = vld [vmem:[#allocation3 + $0xc4] sm:$0xf]  ;;  %v7045_v8 = vshrl.u32 %v13669_v50, 16  ;;  %v7048_v14 = vshll.u32 %v13669_v50, 16  ;;  %v13686_v41 = vld [vmem:[#allocation3 + $0x14] sm:$0x1]  ;;  %v16313_v25 = vcombine.low %v13607_v16, %v13609_v44 }
 0x3fb   : > { %16302 = vst [vmem:[#allocation82_spill] sm:$0xff] %v13673_v26  ;;  %16303 = vst [vmem:[#allocation83_spill] sm:$0xff] %v13680_v36  ;;  %v7092_v33 = vld [vmem:[#allocation3 + $0x18] sm:$0xe]  ;;  %v13688_v26 = vrot.slane %v6463_v54, 5  ;;  %v13690_v10 = vrot.slane %v6436_v22, 4 }
 0x3fc   : > { %v9190_v53 = vrot.slane %v5876_v13, 9  ;;  %v6083_v0 = vld [vmem:[#allocation3 + $0x14] sm:$0x1]  ;;  %v13694_v7 = vrot.slane %v6439_v37, 5  ;;  %v13696_v17 = vrot.slane %v7045_v8, 4  ;;  %v5948_v5 = vrot.slane %v13660_v52, 5  ;;  %7582 = vrot.lane.b32.xlu1 %v16313_v25, %s9817_s20 }
 0x3fd   : > { %16304 = vst [vmem:[#allocation84_spill] sm:$0xff] %v13688_v26  ;;  %16305 = vst [vmem:[#allocation85_spill] sm:$0xff] %v13690_v10  ;;  %v13701_v27 = vld [vmem:[#allocation3 + $0x20] sm:$0x1]  ;;  %v13703_v54 = vrot.slane %v7048_v14, 5  ;;  %v9205_v22 = vrot.slane %v6483_v57, 9  ;;  %7836 = vrot.lane.b32.xlu0 %v9345_v55, %s9810_s27 }
 0x3fe   : > { %16306 = vst [vmem:[#allocation86_spill] sm:$0xff] %v13694_v7  ;;  %16307 = vst [vmem:[#allocation87_spill] sm:$0xff] %v13696_v17  ;;  %v16309_v26 = vld [vmem:[#allocation5_spill] sm:$0xff]  ;;  %v9206_v13 = vrot.slane %v6484_v29, 9  ;;  %v5950_v61 = vrot.slane %v5948_v5, 4  ;;  %v5951_v8 = vrot.slane %v13686_v41, 5  ;;  %v13713_v58 = vsel %vm10431_vm6, %v9190_v53, %v5948_v5 }
 0x3ff   : > { %16308 = vst [vmem:[#allocation88_spill] sm:$0xff] %v13703_v54  ;;  %v6549_v32 = vrot.slane %v16309_v26, 5  ;;  %v6692_v10 = vld [vmem:[#allocation3 + $0x20] sm:$0x1]  ;;  %v6552_v37 = vrot.slane %v6083_v0, 5  ;;  %v16310_v17 = vld [vmem:[#allocation14_spill] sm:$0xff] }
 0x400   : > { %v6556_v7 = vrot.slane %v16310_v17, 5  ;;  %v13709_v36 = vld [vmem:[#allocation3 + $0x28] sm:$0xf]  ;;  %v9221_v57 = vrot.slane %v7092_v33, 9  ;;  %v7158_v54 = vrot.slane %v13204_v28, 5  ;;  %v13722_v0 = vsel %vm10431_vm6, %v5950_v61, %v5951_v8  ;;  %v9665_v11 = vld [vmem:[%s15946_s3 + $0x8] sm:$0xff]  }
 0x401   : > { %16311 = vst [vmem:[#allocation14_spill] sm:$0xff] %v13709_v36  ;;  %v6551_v14 = vrot.slane %v6549_v32, 4  ;;  %v5878_v29 = vld [vmem:[#allocation3 + $0x24] sm:$0xe]  ;;  %v13726_v26 = vsel %vm10431_vm6, %v9205_v22, %v6549_v32  ;;  %v6559_v53 = vrot.slane %v13701_v27, 5  ;;  %v7161_v20 = vrot.slane %v6692_v10, 5 }
 0x402   : > { %v6558_v5 = vrot.slane %v6556_v7, 4  ;;  %v7093_v33 = vld [vmem:[#allocation3 + $0x24] sm:$0xe]  ;;  %v13735_v16 = vsel %vm10431_vm6, %v9206_v13, %v6556_v7  ;;  %v7160_v25 = vrot.slane %v7158_v54, 4  ;;  %v13737_v61 = vld [vmem:[#allocation3 + $0x2c] sm:$0x1]  ;;  %v9270_v32 = vcombine.low %v13713_v58, %v13722_v0 }
 0x403   : > { %v13731_v28 = vsel %vm10431_vm6, %v6551_v14, %v6552_v37  ;;  %16314 = vst [vmem:[#allocation11_spill] sm:$0xff] %v13737_v61  ;;  %v9192_v8 = vrot.slane %v5878_v29, 9  ;;  %v5962_v37 = vrot.slane %v13709_v36, 5  ;;  %v6486_v14 = vld [vmem:[#allocation3 + $0x30] sm:$0xe]  ;;  %v13753_v7 = vsel %vm10431_vm6, %v9221_v57, %v7158_v54  ;;  %v16316_v57 = vld [vmem:[#allocation21_spill] sm:$0xff] }
 0x404   : > { %v13744_v22 = vsel %vm10431_vm6, %v6558_v5, %v6559_v53  ;;  %v13747_v46 = vld [vmem:[#allocation3 + $0x1c] sm:$0xf]  ;;  %v13757_v58 = vsel %vm10431_vm6, %v7160_v25, %v7161_v20  ;;  %v13759_v55 = vld [vmem:[#allocation3 + $0x2c] sm:$0x1]  ;;  %v9222_v13 = vrot.slane %v7093_v33, 9  ;;  %v16315_v0 = vcombine.low %v13391_v60, %v13393_v45 }
 0x405   : > { %v5877_v29 = vld [vmem:[#allocation3 + $0x18] sm:$0xe]  ;;  %v5964_v53 = vrot.slane %v5962_v37, 4  ;;  %v5965_v54 = vrot.slane %v13737_v61, 5  ;;  %v7165_v10 = vrot.slane %v16316_v57, 5  ;;  %v13775_v33 = vsel %vm10431_vm6, %v9192_v8, %v5962_v37 }
 0x406   : > { %7838 = vrot.lane.b32.xlu1 %v16315_v0, %s9810_s27  ;;  %v13769_v12 = vld [vmem:[#allocation3 + $0x38] sm:$0x1]  ;;  %v9208_v25 = vrot.slane %v6486_v14, 9  ;;  %v6570_v60 = vrot.slane %v13389_v30, 5  ;;  %v13778_v0 = vld [vmem:[#allocation3 + $0x40] sm:$0xf]  ;;  %v16319_v45 = vcombine.low %v13417_v24, %v13419_v35 }
 0x407   : > { %16317 = vst [vmem:[#allocation21_spill] sm:$0xff] %v13769_v12  ;;  %16318 = vst [vmem:[#allocation89_spill] sm:$0xff] %v13778_v0  ;;  %v5880_v5 = vld [vmem:[#allocation3 + $0x3c] sm:$0xe]  ;;  %v13786_v39 = vsel %vm10431_vm6, %v5964_v53, %v5965_v54  ;;  %v7167_v20 = vrot.slane %v7165_v10, 4  ;;  %v7168_v62 = vrot.slane %v13759_v55, 5  ;;  %v13793_v14 = vsel %vm10431_vm6, %v9222_v13, %v7165_v10 }
 0x408   : > { %7584 = vrot.lane.b32.xlu0 %v16319_v45, %s9817_s20  ;;  %v13789_v8 = vld [vmem:[#allocation3 + $0x20] sm:$0x1]  ;;  %v9191_v37 = vrot.slane %v5877_v29, 9  ;;  %v6572_v47 = vrot.slane %v6570_v60, 4  ;;  %v6573_v3 = vrot.slane %v13769_v12, 5  ;;  %v5955_v24 = vrot.slane %v13747_v46, 5 }
 0x409   : > { %v13797_v45 = vld [vmem:[#allocation3 + $0x44] sm:$0x1]  ;;  %v16321_v53 = vcombine.low %v13650_v59, %v13656_v31  ;;  %v13807_v29 = vsel %vm10431_vm6, %v7167_v20, %v7168_v62  ;;  %v9194_v10 = vrot.slane %v5880_v5, 9  ;;  %v5976_v13 = vrot.slane %v13778_v0, 5  ;;  %v6485_v35 = vld [vmem:[#allocation3 + $0x24] sm:$0xe] }
 0x40a   : > { %16320 = vst [vmem:[#allocation90_spill] sm:$0xff] %v13797_v45  ;;  %v13812_v12 = vsel %vm10431_vm6, %v9208_v25, %v6570_v60  ;;  %v13816_v30 = vsel %vm10431_vm6, %v6572_v47, %v6573_v3  ;;  %v5957_v59 = vrot.slane %v5955_v24, 4  ;;  %v6488_v54 = vld [vmem:[#allocation3 + $0x48] sm:$0xe]  ;;  %v16322_v62 = vcombine.low %v13669_v50, %v13677_v63  ;;  %v6085_v47 = vld [vmem:[#allocation3 + $0x2c] sm:$0x1] }
 0x40b   : > { %7586 = vrot.lane.b32.xlu1 %v16321_v53, %s9817_s20  ;;  %v5958_v53 = vrot.slane %v13789_v8, 5  ;;  %v13827_v20 = vsel %vm10431_vm6, %v9191_v37, %v5955_v24  ;;  %v5978_v25 = vrot.slane %v5976_v13, 4  ;;  %v5979_v3 = vrot.slane %v13797_v45, 5  ;;  %v7094_v5 = vld [vmem:[#allocation3 + $0x30] sm:$0xe] }
 0x40c   : > { %7840 = vrot.lane.b32.xlu0 %v16322_v62, %s9810_s27  ;;  %v9207_v50 = vrot.slane %v6485_v35, 9  ;;  %v6563_v63 = vrot.slane %v13373_v1, 5  ;;  %v13837_v62 = vld [vmem:[#allocation3 + $0x50] sm:$0x1]  ;;  %v13842_v37 = vsel %vm10431_vm6, %v9194_v10, %v5976_v13  ;;  %v9210_v60 = vrot.slane %v6488_v54, 9 }
 0x40d   : > { %v13834_v0 = vsel %vm10431_vm6, %v5957_v59, %v5958_v53  ;;  %16323 = vst [vmem:[#allocation91_spill] sm:$0xff] %v13837_v62  ;;  %v13846_v24 = vsel %vm10431_vm6, %v5978_v25, %v5979_v3  ;;  %v6584_v59 = vrot.slane %v13428_v51, 5  ;;  %v5458_v53 = vld [vmem:[#allocation3 + $0x58] sm:$0xf]  ;;  %v5882_v35 = vld [vmem:[#allocation3 + $0x54] sm:$0xe]  ;;  %v16324_v10 = vcombine.low %v13726_v26, %v13731_v28 }
 0x40e   : > { %v6566_v40 = vrot.slane %v6085_v47, 5  ;;  %v6694_v48 = vld [vmem:[#allocation3 + $0x38] sm:$0x1]  ;;  %v6587_v13 = vrot.slane %v13837_v62, 5  ;;  %v9223_v25 = vrot.slane %v7094_v5, 9  ;;  %v7172_v3 = vrot.slane %v13415_v49, 5 }
 0x40f   : > { %7462 = vrot.lane.b32.xlu1 %v9270_v32, %s9808_s25  ;;  %v6565_v32 = vrot.slane %v6563_v63, 4  ;;  %v6586_v54 = vrot.slane %v6584_v59, 4  ;;  %v5482_v51 = vld [vmem:[#allocation3 + $0x5c] sm:$0x1]  ;;  %v13861_v1 = vsel %vm10431_vm6, %v9207_v50, %v6563_v63  ;;  %v9196_v45 = vrot.slane %v5882_v35, 9 }
 0x410   : > { %7716 = vrot.lane.b32.xlu0 %v16324_v10, %s9818_s22  ;;  %v5990_v61 = vrot.slane %v5458_v53, 5  ;;  %v7095_v36 = vld [vmem:[#allocation3 + $0x3c] sm:$0xe]  ;;  %v16325_v28 = vcombine.low %v13735_v16, %v13744_v22  ;;  %v13873_v26 = vsel %vm10431_vm6, %v9210_v60, %v6584_v59  ;;  %v7174_v50 = vrot.slane %v7172_v3, 4  ;;  %v6090_v60 = vld [vmem:[#allocation3 + $0x68] sm:$0x1] }
 0x411   : > { %v13865_v47 = vsel %vm10431_vm6, %v6565_v32, %v6566_v40  ;;  %v13877_v5 = vsel %vm10431_vm6, %v6586_v54, %v6587_v13  ;;  %v7175_v63 = vrot.slane %v6694_v48, 5  ;;  %v6490_v40 = vld [vmem:[#allocation3 + $0x60] sm:$0xe]  ;;  %v13883_v35 = vsel %vm10431_vm6, %v9223_v25, %v7172_v3  ;;  %v13885_v32 = vld [vmem:[#allocation3 + $0x44] sm:$0x1] }
 0x412   : > { %v5992_v16 = vrot.slane %v5990_v61, 4  ;;  %v5993_v22 = vrot.slane %v5482_v51, 5  ;;  %v16326_v59 = vcombine.low %v13753_v7, %v13757_v58  ;;  %v9224_v54 = vrot.slane %v7095_v36, 9  ;;  %v13898_v25 = vld [vmem:[#allocation3 + $0x34] sm:$0xf] }
 0x413   : > { %7718 = vrot.lane.b32.xlu1 %v16325_v28, %s9818_s22  ;;  %v13895_v10 = vsel %vm10431_vm6, %v7174_v50, %v7175_v63  ;;  %v7179_v13 = vrot.slane %v13413_v19, 5  ;;  %v5879_v51 = vld [vmem:[#allocation3 + $0x30] sm:$0xe]  ;;  %v13902_v3 = vsel %vm10431_vm6, %v9196_v45, %v5990_v61  ;;  %v9212_v58 = vrot.slane %v6490_v40, 9  ;;  %v5884_v50 = vld [vmem:[#allocation3 + $0x6c] sm:$0xe] }
 0x414   : > { %7972 = vrot.lane.b32.xlu0 %v16326_v59, %s9814_s5  ;;  %v13906_v7 = vsel %vm10431_vm6, %v5992_v16, %v5993_v22  ;;  %v6598_v28 = vrot.slane %v13471_v9, 5  ;;  %v5462_v59 = vld [vmem:[#allocation3 + $0x70] sm:$0xf]  ;;  %v16327_v36 = vcombine.low %v13775_v33, %v13786_v39  ;;  %v7182_v16 = vrot.slane %v13885_v32, 5  ;;  %v13918_v22 = vld [vmem:[#allocation3 + $0x38] sm:$0x1] }
 0x415   : > { %v7181_v45 = vrot.slane %v7179_v13, 4  ;;  %16328 = vst [vmem:[#allocation92_spill] sm:$0xff] %v13918_v22  ;;  %v6601_v48 = vrot.slane %v6090_v60, 5  ;;  %v9193_v53 = vrot.slane %v5879_v51, 9  ;;  %v5969_v49 = vrot.slane %v13898_v25, 5 }
 0x416   : > { %v6600_v40 = vrot.slane %v6598_v28, 4  ;;  %v5484_v9 = vld [vmem:[#allocation3 + $0x74] sm:$0x1]  ;;  %v16329_v39 = vcombine.low %v13793_v14, %v13807_v29  ;;  %v13927_v33 = vsel %vm10431_vm6, %v9224_v54, %v7179_v13  ;;  %v9198_v61 = vrot.slane %v5884_v50, 9  ;;  %v6487_v60 = vld [vmem:[#allocation3 + $0x3c] sm:$0xe] }
 0x417   : > { %7466 = vrot.lane.b32.xlu1 %v16327_v36, %s9808_s25  ;;  %v13931_v36 = vsel %vm10431_vm6, %v7181_v45, %v7182_v16  ;;  %v6004_v63 = vrot.slane %v5462_v59, 5  ;;  %v13935_v51 = vsel %vm10431_vm6, %v9212_v58, %v6598_v28  ;;  %v5971_v14 = vrot.slane %v5969_v49, 4  ;;  %v6492_v54 = vld [vmem:[#allocation3 + $0x78] sm:$0xe]  ;;  %v6696_v59 = vld [vmem:[#allocation3 + $0x50] sm:$0x1] }
 0x418   : > { %7974 = vrot.lane.b32.xlu0 %v16329_v39, %s9814_s5  ;;  %v13939_v62 = vsel %vm10431_vm6, %v6600_v40, %v6601_v48  ;;  %v5972_v29 = vrot.slane %v13918_v22, 5  ;;  %v16330_v13 = vcombine.low %v13812_v12, %v13816_v30  ;;  %v13950_v58 = vsel %vm10431_vm6, %v9193_v53, %v5969_v49  ;;  %v6087_v48 = vld [vmem:[#allocation3 + $0x44] sm:$0x1]  ;;  %v6092_v12 = vld [vmem:[#allocation3 + $0x80] sm:$0x1] }
 0x419   : > { %v6006_v28 = vrot.slane %v6004_v63, 4  ;;  %v6007_v50 = vrot.slane %v5484_v9, 5  ;;  %v9209_v40 = vrot.slane %v6487_v60, 9  ;;  %v6577_v30 = vrot.slane %v13438_v2, 5  ;;  %v7096_v39 = vld [vmem:[#allocation3 + $0x48] sm:$0xe] }
 0x41a   : > { %v13956_v16 = vsel %vm10431_vm6, %v5971_v14, %v5972_v29  ;;  %v16331_v49 = vcombine.low %v13827_v20, %v13834_v0  ;;  %v13965_v9 = vsel %vm10431_vm6, %v9198_v61, %v6004_v63  ;;  %v9214_v14 = vrot.slane %v6492_v54, 9  ;;  %v5466_v29 = vld [vmem:[#allocation3 + $0x88] sm:$0xf]  ;;  %v5486_v2 = vld [vmem:[#allocation3 + $0x8c] sm:$0x1] }
 0x41b   : > { %7722 = vrot.lane.b32.xlu1 %v16330_v13, %s9818_s22  ;;  %v13969_v53 = vsel %vm10431_vm6, %v6006_v28, %v6007_v50  ;;  %v6612_v60 = vrot.slane %v13512_v18, 5  ;;  %v5886_v13 = vld [vmem:[#allocation3 + $0x84] sm:$0xe]  ;;  %v6579_v20 = vrot.slane %v6577_v30, 4  ;;  %v16332_v63 = vcombine.low %v13842_v37, %v13846_v24  ;;  %v7097_v22 = vld [vmem:[#allocation3 + $0x54] sm:$0xe] }
 0x41c   : > { %7464 = vrot.lane.b32.xlu0 %v16331_v49, %s9808_s25  ;;  %v6580_v49 = vrot.slane %v6087_v48, 5  ;;  %v6615_v54 = vrot.slane %v6092_v12, 5  ;;  %v9225_v28 = vrot.slane %v7096_v39, 9  ;;  %v7186_v50 = vrot.slane %v13455_v38, 5  ;;  %v6494_v39 = vld [vmem:[#allocation3 + $0x90] sm:$0xe] }
 0x41d   : > { %v6614_v61 = vrot.slane %v6612_v60, 4  ;;  %v13983_v45 = vsel %vm10431_vm6, %v9209_v40, %v6577_v30  ;;  %v9200_v48 = vrot.slane %v5886_v13, 9  ;;  %v6018_v18 = vrot.slane %v5466_v29, 5 }
 0x41e   : > { %v13987_v0 = vsel %vm10431_vm6, %v6579_v20, %v6580_v49  ;;  %v16333_v37 = vcombine.low %v13861_v1, %v13865_v47  ;;  %v13995_v24 = vsel %vm10431_vm6, %v9214_v14, %v6612_v60  ;;  %v7188_v30 = vrot.slane %v7186_v50, 4  ;;  %v14007_v20 = vld [vmem:[#allocation3 + $0x5c] sm:$0x1]  ;;  %v6094_v14 = vld [vmem:[#allocation3 + $0x98] sm:$0x1] }
 0x41f   : > { %7470 = vrot.lane.b32.xlu1 %v16332_v63, %s9808_s25  ;;  %v13999_v40 = vsel %vm10431_vm6, %v6614_v61, %v6615_v54  ;;  %v7189_v12 = vrot.slane %v6696_v59, 5  ;;  %v14005_v13 = vsel %vm10431_vm6, %v9225_v28, %v7186_v50  ;;  %v6020_v1 = vrot.slane %v6018_v18, 4  ;;  %v14020_v54 = vld [vmem:[#allocation3 + $0x4c] sm:$0xf] }
 0x420   : > { %7720 = vrot.lane.b32.xlu0 %v16333_v37, %s9818_s22  ;;  %v6021_v47 = vrot.slane %v5486_v2, 5  ;;  %v16334_v60 = vcombine.low %v13873_v26, %v13877_v5  ;;  %v9226_v63 = vrot.slane %v7097_v22, 9  ;;  %v7193_v61 = vrot.slane %v13447_v42, 5  ;;  %v5881_v2 = vld [vmem:[#allocation3 + $0x48] sm:$0xe] }
 0x421   : > { %v14017_v49 = vsel %vm10431_vm6, %v7188_v30, %v7189_v12  ;;  %v14024_v28 = vsel %vm10431_vm6, %v9200_v48, %v6018_v18  ;;  %v9216_v5 = vrot.slane %v6494_v39, 9  ;;  %v6626_v50 = vrot.slane %v13561_v4, 5  ;;  %v5470_v37 = vld [vmem:[#allocation3 + $0xa0] sm:$0xf]  ;;  %v5888_v30 = vld [vmem:[#allocation3 + $0x9c] sm:$0xe] }
 0x422   : > { %v14028_v26 = vsel %vm10431_vm6, %v6020_v1, %v6021_v47  ;;  %v16335_v22 = vcombine.low %v13883_v35, %v13895_v10  ;;  %v7195_v48 = vrot.slane %v7193_v61, 4  ;;  %v7196_v1 = vrot.slane %v14007_v20, 5  ;;  %v14040_v47 = vld [vmem:[#allocation3 + $0x50] sm:$0x1]  ;;  %v5488_v4 = vld [vmem:[#allocation3 + $0xa4] sm:$0x1] }
 0x423   : > { %7726 = vrot.lane.b32.xlu1 %v16334_v60, %s9818_s22  ;;  %v6628_v39 = vrot.slane %v6626_v50, 4  ;;  %v6629_v60 = vrot.slane %v6094_v14, 5  ;;  %v9195_v59 = vrot.slane %v5881_v2, 9  ;;  %v5983_v29 = vrot.slane %v14020_v54, 5  ;;  %v6489_v14 = vld [vmem:[#allocation3 + $0x54] sm:$0xe] }
 0x424   : > { %7976 = vrot.lane.b32.xlu0 %v16335_v22, %s9814_s5  ;;  %v16336_v35 = vcombine.low %v13902_v3, %v13906_v7  ;;  %v14049_v10 = vsel %vm10431_vm6, %v9226_v63, %v7193_v61  ;;  %v14053_v22 = vsel %vm10431_vm6, %v7195_v48, %v7196_v1  ;;  %v9202_v18 = vrot.slane %v5888_v30, 9  ;;  %v6496_v63 = vld [vmem:[#allocation3 + $0xa8] sm:$0xe]  ;;  %v6089_v48 = vld [vmem:[#allocation3 + $0x5c] sm:$0x1] }
 0x425   : > { %v6032_v12 = vrot.slane %v5470_v37, 5  ;;  %v14057_v2 = vsel %vm10431_vm6, %v9216_v5, %v6626_v50  ;;  %v14061_v38 = vsel %vm10431_vm6, %v6628_v39, %v6629_v60  ;;  %v5985_v3 = vrot.slane %v5983_v29, 4  ;;  %v6698_v37 = vld [vmem:[#allocation3 + $0x68] sm:$0x1]  ;;  %v7099_v1 = vld [vmem:[#allocation3 + $0x6c] sm:$0xe] }
 0x426   : > { %v5986_v7 = vrot.slane %v14040_v47, 5  ;;  %v16337_v61 = vcombine.low %v13927_v33, %v13931_v36  ;;  %v14072_v5 = vsel %vm10431_vm6, %v9195_v59, %v5983_v29  ;;  %v6035_v30 = vrot.slane %v5488_v4, 5  ;;  %v6096_v36 = vld [vmem:[#allocation3 + $0xb0] sm:$0x1] }
 0x427   : > { %7474 = vrot.lane.b32.xlu1 %v16336_v35, %s9808_s25  ;;  %v6034_v50 = vrot.slane %v6032_v12, 4  ;;  %v9211_v60 = vrot.slane %v6489_v14, 9  ;;  %v6591_v33 = vrot.slane %v13483_v21, 5  ;;  %v7098_v35 = vld [vmem:[#allocation3 + $0x60] sm:$0xe]  ;;  %v16338_v29 = vcombine.low %v13935_v51, %v13939_v62 }
 0x428   : > { %7978 = vrot.lane.b32.xlu0 %v16337_v61, %s9814_s5  ;;  %v14078_v39 = vsel %vm10431_vm6, %v5985_v3, %v5986_v7  ;;  %v14087_v4 = vsel %vm10431_vm6, %v9202_v18, %v6032_v12  ;;  %v9218_v3 = vrot.slane %v6496_v63, 9  ;;  %v6640_v14 = vrot.slane %v13609_v44, 5  ;;  %v5474_v7 = vld [vmem:[#allocation3 + $0xb8] sm:$0xf]  ;;  %v5890_v61 = vld [vmem:[#allocation3 + $0xb4] sm:$0xe] }
 0x429   : > { %v14091_v59 = vsel %vm10431_vm6, %v6034_v50, %v6035_v30  ;;  %v6593_v51 = vrot.slane %v6591_v33, 4  ;;  %v5490_v12 = vld [vmem:[#allocation3 + $0xbc] sm:$0x1]  ;;  %v16339_v18 = vcombine.low %v13950_v58, %v13956_v16  ;;  %v14104_v63 = vsel %vm10431_vm6, %v9211_v60, %v6591_v33 }
 0x42a   : > { %v6642_v50 = vrot.slane %v6640_v14, 4  ;;  %v6643_v30 = vrot.slane %v6096_v36, 5  ;;  %v9227_v44 = vrot.slane %v7098_v35, 9  ;;  %v7200_v21 = vrot.slane %v13505_v15, 5 }
 0x42b   : > { %7730 = vrot.lane.b32.xlu1 %v16338_v29, %s9818_s22  ;;  %v6594_v29 = vrot.slane %v6089_v48, 5  ;;  %v14112_v48 = vsel %vm10431_vm6, %v9218_v3, %v6640_v14  ;;  %v9204_v58 = vrot.slane %v5890_v61, 9  ;;  %v16340_v16 = vcombine.low %v13965_v9, %v13969_v53  ;;  %v6498_v3 = vld [vmem:[#allocation3 + $0xc0] sm:$0xe]  ;;  %v6098_v9 = vld [vmem:[#allocation3 + $0xc8] sm:$0x1] }
 0x42c   : > { %7468 = vrot.lane.b32.xlu0 %v16339_v18, %s9808_s25  ;;  %v14123_v33 = vsel %vm10431_vm6, %v6642_v50, %v6643_v30  ;;  %v7203_v36 = vrot.slane %v6698_v37, 5  ;;  %v6046_v35 = vrot.slane %v5474_v7, 5  ;;  %v7202_v61 = vrot.slane %v7200_v21, 4  ;;  %v5445_v14 = vld [vmem:[#allocation3 + $0xc] sm:$0xf] }
 0x42d   : > { %v14108_v62 = vsel %vm10431_vm6, %v6593_v51, %v6594_v29  ;;  %v14125_v51 = vld [vmem:[#allocation3 + $0x74] sm:$0x1]  ;;  %v6049_v29 = vrot.slane %v5490_v12, 5  ;;  %v9228_v18 = vrot.slane %v7099_v1, 9  ;;  %v16341_v53 = vcombine.low %v13983_v45, %v13987_v0  ;;  %v14144_v1 = vld [vmem:[#allocation3 + $0x68] sm:$0x1] }
 0x42e   : > { %v14135_v50 = vsel %vm10431_vm6, %v9227_v44, %v7200_v21  ;;  %v14139_v37 = vsel %vm10431_vm6, %v9204_v58, %v6046_v35  ;;  %v6048_v7 = vrot.slane %v6046_v35, 4  ;;  %v7207_v30 = vrot.slane %v13490_v43, 5  ;;  %v5883_v44 = vld [vmem:[#allocation3 + $0x60] sm:$0xe] }
 0x42f   : > { %7478 = vrot.lane.b32.xlu1 %v16340_v16, %s9808_s25  ;;  %v14142_v16 = vld [vmem:[#allocation3 + $0x64] sm:$0xf]  ;;  %v14148_v12 = vsel %vm10431_vm6, %v7202_v61, %v7203_v36  ;;  %v7210_v45 = vrot.slane %v14125_v51, 5  ;;  %v9220_v0 = vrot.slane %v6498_v3, 9  ;;  %v6654_v21 = vrot.slane %v13656_v31, 5 }
 0x430   : > { %7724 = vrot.lane.b32.xlu0 %v16341_v53, %s9818_s22  ;;  %v16342_v58 = vcombine.low %v13995_v24, %v13999_v40  ;;  %v14160_v53 = vsel %vm10431_vm6, %v6048_v7, %v6049_v29  ;;  %v7209_v36 = vrot.slane %v7207_v30, 4  ;;  %v6657_v61 = vrot.slane %v6098_v9, 5  ;;  %v14176_v7 = vpop.permute.xlu0 %7380  ;;  %v14178_v9 = vpop.permute.xlu1 %7842  ;;  %v6491_v3 = vld [vmem:[#allocation3 + $0x6c] sm:$0xe] }
 0x431   : > { %v14166_v31 = vsel %vm10431_vm6, %v9228_v18, %v7207_v30  ;;  %v14170_v24 = vsel %vm10431_vm6, %v9220_v0, %v6654_v21  ;;  %v6656_v40 = vrot.slane %v6654_v21, 4  ;;  %v16343_v29 = vcombine.low %v14005_v13, %v14017_v49  ;;  %16344 = vst [vmem:[#allocation93_spill] sm:$0xff] %v14176_v7  ;;  %16345 = vst [vmem:[#allocation94_spill] sm:$0xff] %v14178_v9  ;;  %v6091_v9 = vld [vmem:[#allocation3 + $0x74] sm:$0x1] }
 0x432   : > { %v9197_v18 = vrot.slane %v5883_v44, 9  ;;  %v5997_v30 = vrot.slane %v14142_v16, 5  ;;  %v6000_v0 = vrot.slane %v14144_v1, 5  ;;  %v5516_v49 = vshrl.u32 %v5445_v14, 16  ;;  %v7100_v44 = vld [vmem:[#allocation3 + $0x78] sm:$0xe] }
 0x433   : > { %7734 = vrot.lane.b32.xlu1 %v16342_v58, %s9818_s22  ;;  %v14182_v58 = vsel %vm10431_vm6, %v7209_v36, %v7210_v45  ;;  %v14190_v13 = vsel %vm10431_vm6, %v6656_v40, %v6657_v61  ;;  %v16346_v45 = vcombine.low %v14024_v28, %v14028_v26  ;;  %v5525_v35 = vshll.u32 %v13660_v52, 16 }
 0x434   : > { %7980 = vrot.lane.b32.xlu0 %v16343_v29, %s9814_s5  ;;  %v5519_v29 = vshll.u32 %v5445_v14, 16  ;;  %v14200_v36 = vsel %vm10431_vm6, %v9197_v18, %v5997_v30  ;;  %v5999_v21 = vrot.slane %v5997_v30, 4  ;;  %v5518_v61 = vrot.slane %v5516_v49, 4  ;;  %v9707_v49 = vld [vmem:[#allocation3 + $0x1c] sm:$0xf] }
 0x435   : > { %v5529_v14 = vshrl.u32 %v13660_v52, 16  ;;  %v5535_v60 = vshll.u32 %v13686_v41, 16  ;;  %v16347_v28 = vcombine.low %v14049_v10, %v14053_v22  ;;  %v5527_v18 = vrot.slane %v5525_v35, 5  ;;  %v14220_v22 = vpop.permute.xlu0 %7460 }
 0x436   : > { %v5521_v40 = vrot.slane %v5519_v29, 5  ;;  %v14211_v26 = vsel %vm10431_vm6, %v5999_v21, %v6000_v0  ;;  %v9213_v30 = vrot.slane %v6491_v3, 9  ;;  %v16348_v10 = vcombine.low %v14057_v2, %v14061_v38  ;;  %v14222_v0 = vpop.permute.xlu1 %7922 }
 0x437   : > { %7482 = vrot.lane.b32.xlu1 %v16346_v45, %s9808_s25  ;;  %v6605_v45 = vrot.slane %v13532_v56, 5  ;;  %v5531_v29 = vrot.slane %v5529_v14, 4  ;;  %v5537_v41 = vrot.slane %v5535_v60, 5  ;;  %16349 = vst [vmem:[#allocation95_spill] sm:$0xff] %v14222_v0  ;;  %v6608_v21 = vrot.slane %v6091_v9, 5 }
 0x438   : > { %7982 = vrot.lane.b32.xlu0 %v16347_v28, %s9814_s5  ;;  %v5522_v52 = vor.u32 %v5521_v40, %v5518_v61  ;;  %v16350_v28 = vld [vmem:[#allocation15_spill] sm:$0xff]  ;;  %v16351_v61 = vld [vmem:[#allocation13_spill] sm:$0xff]  ;;  %v6133_v7 = vshll.u32 %v9707_v49, 16  ;;  %v16352_v38 = vshrl.u32 %v16310_v17, 16  ;;  %v16353_v0 = vcombine.low %v14072_v5, %v14078_v39 }
 0x439   : > { %v14226_v35 = vsel %vm10431_vm6, %v9213_v30, %v6605_v45  ;;  %v6607_v3 = vrot.slane %v6605_v45, 4  ;;  %v6130_v40 = vor.u32 %v16351_v61, %v16350_v28  ;;  %v5532_v14 = vor.u32 %v5531_v29, %v5527_v18  ;;  %v14249_v39 = vpop.permute.xlu0 %7556 }
 0x43a   : > { %v5523_v60 = vrot.slane %v5522_v52, 4  ;;  %v6139_v2 = vrot.slane %v16352_v38, 4  ;;  %v6143_v45 = vshll.u32 %v13701_v27, 16  ;;  %v9229_v52 = vrot.slane %v7100_v44, 9  ;;  %v16356_v44 = vld [vmem:[#allocation23_spill] sm:$0xff] }
 0x43b   : > { %7738 = vrot.lane.b32.xlu1 %v16348_v10, %s9818_s22  ;;  %v6700_v10 = vld [vmem:[#allocation3 + $0x80] sm:$0x1]  ;;  %v14238_v30 = vsel %vm10431_vm6, %v6607_v3, %v6608_v21  ;;  %v6131_v9 = vrot.slane %v6130_v40, 4  ;;  %v5533_v28 = vrot.slane %v5532_v14, 4  ;;  %v6135_v61 = vrot.slane %v6133_v7, 5 }
 0x43c   : > { %7472 = vrot.lane.b32.xlu0 %v16353_v0, %s9808_s25  ;;  %v5528_v49 = vsel %vm10418_vm2, %v5523_v60, %v5527_v18  ;;  %v9325_v17 = vcombine.low %v14226_v35, %v14238_v30  ;;  %v16355_v5 = vcombine.low %v14087_v4, %v14091_v59  ;;  %v6145_v0 = vrot.slane %v6143_v45, 5  ;;  %v9708_v60 = vld [vmem:[#allocation3 + $0x28] sm:$0xf]  ;;  %v14258_v4 = vld [vmem:[#allocation3 + $0x8c] sm:$0x1] }
 0x43d   : > { %v7214_v3 = vrot.slane %v13548_v23, 5  ;;  %v7217_v27 = vrot.slane %v6700_v10, 5  ;;  %v6739_v21 = vor.u32 %v13397_v34, %v16356_v44  ;;  %v5538_v18 = vsel %vm10418_vm2, %v5533_v28, %v5537_v41  ;;  %v7101_v59 = vld [vmem:[#allocation3 + $0x84] sm:$0xe]  ;;  %v14264_v10 = vpop.permute.xlu1 %7558 }
 0x43e   : > { %v6136_v7 = vsel %vm10418_vm2, %v6131_v9, %v6135_v61  ;;  %v6140_v40 = vor.u32 %v6139_v2, %v6135_v61  ;;  %v6742_v14 = vshll.u32 %v9708_v60, 16  ;;  %v16357_v38 = vcombine.low %v14104_v63, %v14108_v62 }
 0x43f   : > { %7486 = vrot.lane.b32.xlu1 %v16355_v5, %s9808_s25  ;;  %v14266_v34 = vcombine.low %v5528_v49, %v5538_v18  ;;  %v14270_v41 = vsel %vm10431_vm6, %v9229_v52, %v7214_v3  ;;  %v7216_v9 = vrot.slane %v7214_v3, 4  ;;  %v6740_v2 = vrot.slane %v6739_v21, 4  ;;  %v5447_v21 = vld [vmem:[#allocation3 + $0x18] sm:$0xf] }
 0x440   : > { %7728 = vrot.lane.b32.xlu0 %v16357_v38, %s9818_s22  ;;  %v6141_v45 = vrot.slane %v6140_v40, 4  ;;  %v6744_v28 = vrot.slane %v6742_v14, 5  ;;  %v16358_v61 = vshrl.u32 %v16316_v57, 16  ;;  %v6752_v44 = vshll.u32 %v13759_v55, 16  ;;  %v5885_v18 = vld [vmem:[#allocation3 + $0x78] sm:$0xe]  ;;  %v14295_v40 = vpop.permute.xlu0 %7812 }
 0x441   : > { %v16359_v62 = vcombine.low %v14112_v48, %v14123_v33  ;;  %v14281_v63 = vsel %vm10431_vm6, %v7216_v9, %v7217_v27  ;;  %v9230_v52 = vrot.slane %v7101_v59, 9  ;;  %v7221_v49 = vrot.slane %v13538_v6, 5  ;;  %v5449_v38 = vld [vmem:[#allocation3 + $0x24] sm:$0xf] }
 0x442   : > { %v6748_v5 = vrot.slane %v16358_v61, 4  ;;  %v7224_v3 = vrot.slane %v14258_v4, 5  ;;  %v6146_v57 = vsel %vm10418_vm2, %v6141_v45, %v6145_v0  ;;  %v9373_v55 = vcombine.low %v14270_v41, %v14281_v63  ;;  %v14304_v61 = vld [vmem:[#allocation3 + $0x7c] sm:$0xf]  ;;  %v14410_v63 = vld [vmem:[#allocation3 + $0xa4] sm:$0x1] }
 0x443   : > { %7742 = vrot.lane.b32.xlu1 %v16359_v62, %s9818_s22  ;;  %v6745_v48 = vsel %vm10418_vm2, %v6740_v2, %v6744_v28  ;;  %v16360_v27 = vcombine.low %v14135_v50, %v14148_v12  ;;  %v14297_v60 = vcombine.low %v6136_v7, %v6146_v57  ;;  %v6754_v14 = vrot.slane %v6752_v44, 5  ;;  %v14310_v12 = vpop.permute.xlu1 %7814  ;;  %v14318_v62 = vld [vmem:[#allocation3 + $0x80] sm:$0x1] }
 0x444   : > { %v6749_v33 = vor.u32 %v6748_v5, %v6744_v28  ;;  %v14301_v0 = vsel %vm10431_vm6, %v9230_v52, %v7221_v49  ;;  %v7223_v59 = vrot.slane %v7221_v49, 4  ;;  %v5540_v2 = vshrl.u32 %v5447_v21, 16 }
 0x445   : > { %7984 = vrot.lane.b32.xlu0 %v16360_v27, %s9814_s5  ;;  %v5543_v45 = vshll.u32 %v5447_v21, 16  ;;  %v5549_v28 = vshll.u32 %v13747_v46, 16  ;;  %v16361_v50 = vcombine.low %v14139_v37, %v14160_v53  ;;  %v5553_v5 = vshrl.u32 %v13747_v46, 16 }
 0x446   : > { %v6750_v9 = vrot.slane %v6749_v33, 4  ;;  %v14314_v7 = vsel %vm10431_vm6, %v7223_v59, %v7224_v3  ;;  %v5559_v44 = vshll.u32 %v13789_v8, 16  ;;  %v9199_v52 = vrot.slane %v5885_v18, 9 }
 0x447   : > { %7490 = vrot.lane.b32.xlu1 %v16361_v50, %s9808_s25  ;;  %v5542_v53 = vrot.slane %v5540_v2, 4  ;;  %v5545_v21 = vrot.slane %v5543_v45, 5  ;;  %v16362_v3 = vcombine.low %v14166_v31, %v14182_v58  ;;  %v5551_v46 = vrot.slane %v5549_v28, 5  ;;  %v14336_v2 = vpop.permute.xlu0 %7560  ;;  %v6493_v50 = vld [vmem:[#allocation3 + $0x84] sm:$0xe] }
 0x448   : > { %v6755_v49 = vsel %vm10418_vm2, %v6750_v9, %v6754_v14  ;;  %v5555_v8 = vrot.slane %v5553_v5, 4  ;;  %v5561_v33 = vrot.slane %v5559_v44, 5  ;;  %v6011_v18 = vrot.slane %v14304_v61, 5 }
 0x449   : > { %7986 = vrot.lane.b32.xlu0 %v16362_v3, %s9814_s5  ;;  %v14328_v57 = vcombine.low %v6745_v48, %v6755_v49  ;;  %v5546_v27 = vor.u32 %v5545_v21, %v5542_v53  ;;  %v6014_v14 = vrot.slane %v14318_v62, 5  ;;  %v5564_v59 = vshrl.u32 %v5449_v38, 16  ;;  %v16364_v48 = vld [vmem:[#allocation14_spill] sm:$0xff]  ;;  %v14344_v21 = vpop.permute.xlu1 %7562 }
 0x44a   : > { %v16363_v9 = vcombine.low %v14170_v24, %v14190_v13  ;;  %v5556_v31 = vor.u32 %v5555_v8, %v5551_v46  ;;  %v5567_v58 = vshll.u32 %v5449_v38, 16  ;;  %v5573_v45 = vshll.u32 %v16364_v48, 16 }
 0x44b   : > { %v5577_v28 = vshrl.u32 %v16364_v48, 16  ;;  %v5547_v5 = vrot.slane %v5546_v27, 4  ;;  %v14342_v44 = vsel %vm10431_vm6, %v9199_v52, %v6011_v18  ;;  %v6013_v49 = vrot.slane %v6011_v18, 4  ;;  %v16366_v18 = vld [vmem:[#allocation11_spill] sm:$0xff] }
 0x44c   : > { %7746 = vrot.lane.b32.xlu1 %v16363_v9, %s9818_s22  ;;  %v5566_v53 = vrot.slane %v5564_v59, 4  ;;  %v16365_v24 = vcombine.low %v14200_v36, %v14211_v26  ;;  %v5557_v13 = vrot.slane %v5556_v31, 4  ;;  %v5569_v38 = vrot.slane %v5567_v58, 5  ;;  %v6093_v9 = vld [vmem:[#allocation3 + $0x8c] sm:$0x1]  ;;  %v14359_v36 = vpop.permute.xlu0 %7816  ;;  %v16371_v31 = vld [vmem:[#allocation21_spill] sm:$0xff] }
 0x44d   : > { %v5575_v3 = vrot.slane %v5573_v45, 5  ;;  %v5579_v8 = vrot.slane %v5577_v28, 4  ;;  %v5552_v27 = vsel %vm10418_vm2, %v5547_v5, %v5551_v46  ;;  %v14354_v52 = vsel %vm10431_vm6, %v6013_v49, %v6014_v14  ;;  %v9709_v28 = vld [vmem:[#allocation3 + $0x88] sm:$0xf] }
 0x44e   : > { %7476 = vrot.lane.b32.xlu0 %v16365_v24, %s9808_s25  ;;  %v5583_v59 = vshll.u32 %v16366_v18, 16  ;;  %v9215_v48 = vrot.slane %v6493_v50, 9  ;;  %v5562_v26 = vsel %vm10418_vm2, %v5557_v13, %v5561_v33  ;;  %v5570_v58 = vor.u32 %v5569_v38, %v5566_v53  ;;  %v14367_v50 = vpop.permute.xlu1 %7818  ;;  %v16367_v24 = vld [vmem:[#allocation20_spill] sm:$0xff]  ;;  %v16368_v13 = vld [vmem:[#allocation27_spill] sm:$0xff] }
 0x44f   : > { %v5580_v46 = vor.u32 %v5579_v8, %v5575_v3  ;;  %v14365_v45 = vcombine.low %v5552_v27, %v5562_v26  ;;  %v6619_v5 = vrot.slane %v9709_v28, 5  ;;  %v6622_v49 = vrot.slane %v6093_v9, 5  ;;  %v9710_v53 = vld [vmem:[#allocation3 + $0x34] sm:$0xf]  ;;  %v7102_v8 = vld [vmem:[#allocation3 + $0x90] sm:$0xe] }
 0x450   : > { %7382 = vrot.lane.b32.xlu1 %v14266_v34, %s9807_s21  ;;  %v5585_v14 = vrot.slane %v5583_v59, 5  ;;  %v5571_v34 = vrot.slane %v5570_v58, 4  ;;  %v6178_v18 = vor.u32 %v16368_v13, %v16367_v24  ;;  %v6181_v38 = vshll.u32 %v9710_v53, 16  ;;  %v16369_v59 = vld [vmem:[#allocation17_spill] sm:$0xff]  ;;  %v14384_v35 = vpop.permute.xlu0 %7564 }
 0x451   : > { %v5581_v33 = vrot.slane %v5580_v46, 4  ;;  %v14377_v27 = vsel %vm10431_vm6, %v9215_v48, %v6619_v5  ;;  %v6621_v9 = vrot.slane %v6619_v5, 4  ;;  %v16370_v26 = vshrl.u32 %v16369_v59, 16  ;;  %16372 = vst [vmem:[#allocation15_spill] sm:$0xff] %v14384_v35  ;;  %v6702_v46 = vld [vmem:[#allocation3 + $0x98] sm:$0x1] }
 0x452   : > { %7732 = vrot.lane.b32.xlu0 %v9325_v17, %s9818_s22  ;;  %v6191_v37 = vshll.u32 %v16371_v31, 16  ;;  %v5576_v30 = vsel %vm10418_vm2, %v5571_v34, %v5575_v3  ;;  %v6179_v58 = vrot.slane %v6178_v18, 4  ;;  %v6183_v48 = vrot.slane %v6181_v38, 5  ;;  %v16374_v38 = vld [vmem:[#allocation29_spill] sm:$0xff]  ;;  %v9735_v35 = vld [vmem:[#allocation3 + $0x7c] sm:$0xf] }
 0x453   : > { %v6187_v28 = vrot.slane %v16370_v26, 4  ;;  %v5586_v17 = vsel %vm10418_vm2, %v5581_v33, %v5585_v14  ;;  %v14394_v24 = vsel %vm10431_vm6, %v6621_v9, %v6622_v49  ;;  %v9231_v13 = vrot.slane %v7102_v8, 9  ;;  %v9711_v33 = vld [vmem:[#allocation3 + $0x94] sm:$0xf]  ;;  %v7103_v49 = vld [vmem:[#allocation3 + $0x9c] sm:$0xe] }
 0x454   : > { %7638 = vrot.lane.b32.xlu1 %v14297_v60, %s9809_s26  ;;  %v14390_v5 = vcombine.low %v5576_v30, %v5586_v17  ;;  %v6193_v31 = vrot.slane %v6191_v37, 5  ;;  %v14396_v60 = vpop.permute.xlu1 %7566  ;;  %v6184_v14 = vsel %vm10418_vm2, %v6179_v58, %v6183_v48  ;;  %v7228_v18 = vrot.slane %v9711_v33, 5  ;;  %v16373_v37 = vld [vmem:[#allocation28_spill] sm:$0xff]  ;;  %v9712_v9 = vld [vmem:[#allocation3 + $0x40] sm:$0xf] }
 0x455   : > { %v6188_v34 = vor.u32 %v6187_v28, %v6183_v48  ;;  %v7231_v53 = vrot.slane %v6702_v46, 5  ;;  %v6787_v8 = vor.u32 %v16374_v38, %v16373_v37  ;;  %v6790_v59 = vshll.u32 %v9712_v9, 16  ;;  %v5451_v38 = vld [vmem:[#allocation3 + $0x30] sm:$0xf] }
 0x456   : > { %7988 = vrot.lane.b32.xlu0 %v9373_v55, %s9814_s5  ;;  %v16375_v26 = vshrl.u32 %v13413_v19, 16  ;;  %v14414_v55 = vpop.permute.xlu0 %7820  ;;  %v14418_v30 = vsel %vm10431_vm6, %v9231_v13, %v7228_v18  ;;  %v7230_v17 = vrot.slane %v7228_v18, 4  ;;  %v6800_v58 = vshll.u32 %v13885_v32, 16  ;;  %v14421_v19 = vld [vmem:[#allocation3 + $0xa0] sm:$0xf] }
 0x457   : > { %16376 = vst [vmem:[#allocation13_spill] sm:$0xff] %v14414_v55  ;;  %v6189_v28 = vrot.slane %v6188_v34, 4  ;;  %v6788_v48 = vrot.slane %v6787_v8, 4  ;;  %v6792_v46 = vrot.slane %v6790_v59, 5  ;;  %v9232_v33 = vrot.slane %v7103_v49, 9 }
 0x458   : > { %v6796_v41 = vrot.slane %v16375_v26, 4  ;;  %7894 = vrot.lane.b32.xlu1 %v14328_v57, %s9816_s19  ;;  %v7235_v37 = vrot.slane %v14421_v19, 5  ;;  %v14424_v9 = vpop.permute.xlu1 %7822  ;;  %v16378_v57 = vcombine.low %v14301_v0, %v14314_v7  ;;  %v14434_v32 = vsel %vm10431_vm6, %v7230_v17, %v7231_v53  ;;  %v5887_v0 = vld [vmem:[#allocation3 + $0x90] sm:$0xe]  ;;  %v14449_v17 = vld [vmem:[#allocation3 + $0x94] sm:$0xf] }
 0x459   : > { %16377 = vst [vmem:[#allocation10_spill] sm:$0xff] %v14424_v9  ;;  %v6194_v13 = vsel %vm10418_vm2, %v6189_v28, %v6193_v31  ;;  %v6802_v34 = vrot.slane %v6800_v58, 5  ;;  %v7238_v18 = vrot.slane %v14410_v63, 5  ;;  %v9375_v8 = vcombine.low %v14418_v30, %v14434_v32 }
 0x45a   : > { %7990 = vrot.lane.b32.xlu0 %v16378_v57, %s9814_s5  ;;  %v9304_v49 = vcombine.low %v6184_v14, %v6194_v13  ;;  %v6793_v59 = vsel %vm10418_vm2, %v6788_v48, %v6792_v46  ;;  %v6797_v26 = vor.u32 %v6796_v41, %v6792_v46  ;;  %v14443_v7 = vpop.permute.xlu0 %7568  ;;  %v14447_v31 = vsel %vm10431_vm6, %v9232_v33, %v7235_v37  ;;  %v16380_v48 = vld [vmem:[#allocation92_spill] sm:$0xff] }
 0x45b   : > { %16379 = vst [vmem:[#allocation23_spill] sm:$0xff] %v14443_v7  ;;  %v7237_v53 = vrot.slane %v7235_v37, 4  ;;  %v5588_v28 = vshrl.u32 %v5451_v38, 16  ;;  %v5591_v14 = vshll.u32 %v5451_v38, 16  ;;  %v5597_v58 = vshll.u32 %v13898_v25, 16 }
 0x45c   : > { %7384 = vrot.lane.b32.xlu1 %v14365_v45, %s9807_s21  ;;  %v6798_v30 = vrot.slane %v6797_v26, 4  ;;  %v5601_v41 = vshrl.u32 %v13898_v25, 16  ;;  %v5607_v46 = vshll.u32 %v16380_v48, 16  ;;  %v14454_v57 = vld [vmem:[#allocation3 + $0x98] sm:$0x1]  ;;  %v14456_v45 = vpop.permute.xlu1 %7570  ;;  %v16382_v33 = vcombine.low %v14342_v44, %v14354_v52 }
 0x45d   : > { %16381 = vst [vmem:[#allocation14_spill] sm:$0xff] %v14456_v45  ;;  %v14464_v37 = vsel %vm10431_vm6, %v7237_v53, %v7238_v18  ;;  %v5590_v38 = vrot.slane %v5588_v28, 4  ;;  %v5593_v13 = vrot.slane %v5591_v14, 5  ;;  %v9201_v32 = vrot.slane %v5887_v0, 9  ;;  %v5453_v26 = vld [vmem:[#allocation3 + $0x3c] sm:$0xf] }
 0x45e   : > { %7480 = vrot.lane.b32.xlu0 %v16382_v33, %s9808_s25  ;;  %v6803_v25 = vsel %vm10418_vm2, %v6798_v30, %v6802_v34  ;;  %v9376_v48 = vcombine.low %v14447_v31, %v14464_v37  ;;  %v5599_v3 = vrot.slane %v5597_v58, 5  ;;  %v5603_v7 = vrot.slane %v5601_v41, 4  ;;  %v14472_v44 = vpop.permute.xlu0 %7824  ;;  %v16386_v41 = vld [vmem:[#allocation89_spill] sm:$0xff]  ;;  %v16391_v45 = vld [vmem:[#allocation34_spill] sm:$0xff] }
 0x45f   : > { %16383 = vst [vmem:[#allocation11_spill] sm:$0xff] %v14472_v44  ;;  %v9352_v52 = vcombine.low %v6793_v59, %v6803_v25  ;;  %v5594_v18 = vor.u32 %v5593_v13, %v5590_v38  ;;  %v5609_v53 = vrot.slane %v5607_v46, 5  ;;  %v6025_v28 = vrot.slane %v14449_v17, 5  ;;  %v9714_v44 = vld [vmem:[#allocation3 + $0xa0] sm:$0xf] }
 0x460   : > { %7386 = vrot.lane.b32.xlu1 %v14390_v5, %s9807_s21  ;;  %v5604_v0 = vor.u32 %v5603_v7, %v5599_v3  ;;  %v6028_v14 = vrot.slane %v14454_v57, 5  ;;  %v5612_v33 = vshrl.u32 %v5453_v26, 16  ;;  %v5615_v34 = vshll.u32 %v5453_v26, 16  ;;  %v14476_v30 = vpop.permute.xlu1 %7826  ;;  %v6495_v26 = vld [vmem:[#allocation3 + $0x9c] sm:$0xe] }
 0x461   : > { %16384 = vst [vmem:[#allocation20_spill] sm:$0xff] %v14476_v30  ;;  %v16385_v31 = vcombine.low %v14377_v27, %v14394_v24  ;;  %v5595_v5 = vrot.slane %v5594_v18, 4  ;;  %v14484_v59 = vsel %vm10431_vm6, %v9201_v32, %v6025_v28  ;;  %v6027_v58 = vrot.slane %v6025_v28, 4  ;;  %v16388_v18 = vld [vmem:[#allocation90_spill] sm:$0xff]  ;;  %v16390_v30 = vld [vmem:[#allocation33_spill] sm:$0xff] }
 0x462   : > { %v5621_v46 = vshll.u32 %v16386_v41, 16  ;;  %v5605_v7 = vrot.slane %v5604_v0, 4  ;;  %v5614_v37 = vrot.slane %v5612_v33, 4  ;;  %v5617_v38 = vrot.slane %v5615_v34, 5  ;;  %v14489_v25 = vpop.permute.xlu0 %7572 }
 0x463   : > { %7736 = vrot.lane.b32.xlu0 %v16385_v31, %s9818_s22  ;;  %v5625_v13 = vshrl.u32 %v16386_v41, 16  ;;  %16387 = vst [vmem:[#allocation27_spill] sm:$0xff] %v14489_v25  ;;  %v5600_v27 = vsel %vm10418_vm2, %v5595_v5, %v5599_v3  ;;  %v6029_v24 = vsel %vm10431_vm6, %v6027_v58, %v6028_v14  ;;  %v5631_v28 = vshll.u32 %v16388_v18, 16  ;;  %v6095_v31 = vld [vmem:[#allocation3 + $0xa4] sm:$0x1] }
 0x464   : > { %7642 = vrot.lane.b32.xlu1 %v9304_v49, %s9809_s26  ;;  %v5623_v32 = vrot.slane %v5621_v46, 5  ;;  %v5610_v0 = vsel %vm10418_vm2, %v5605_v7, %v5609_v53  ;;  %v9281_v33 = vcombine.low %v14484_v59, %v6029_v24  ;;  %v5618_v34 = vor.u32 %v5617_v38, %v5614_v37  ;;  %v14499_v49 = vpop.permute.xlu1 %7574  ;;  %v7104_v53 = vld [vmem:[#allocation3 + $0xa8] sm:$0xe]  ;;  %v9715_v37 = vld [vmem:[#allocation3 + $0x4c] sm:$0xf] }
 0x465   : > { %v5627_v41 = vrot.slane %v5625_v13, 4  ;;  %16389 = vst [vmem:[#allocation17_spill] sm:$0xff] %v14499_v49  ;;  %v9257_v25 = vcombine.low %v5600_v27, %v5610_v0  ;;  %v5633_v3 = vrot.slane %v5631_v28, 5  ;;  %v9217_v5 = vrot.slane %v6495_v26, 9  ;;  %v16393_v13 = vld [vmem:[#allocation24_spill] sm:$0xff] }
 0x466   : > { %v6633_v14 = vrot.slane %v9714_v44, 5  ;;  %v5619_v58 = vrot.slane %v5618_v34, 4  ;;  %v6636_v18 = vrot.slane %v6095_v31, 5  ;;  %v6226_v55 = vor.u32 %v16391_v45, %v16390_v30  ;;  %v14505_v59 = vpop.permute.xlu0 %7828  ;;  %v6704_v27 = vld [vmem:[#allocation3 + $0xb0] sm:$0x1]  ;;  %v16431_v49 = vld [vmem:[#allocation32_spill] sm:$0xff] }
 0x467   : > { %7992 = vrot.lane.b32.xlu0 %v9375_v8, %s9814_s5  ;;  %v5628_v46 = vor.u32 %v5627_v41, %v5623_v32  ;;  %16392 = vst [vmem:[#allocation21_spill] sm:$0xff] %v14505_v59  ;;  %v6229_v38 = vshll.u32 %v9715_v37, 16  ;;  %v16394_v26 = vshrl.u32 %v16393_v13, 16  ;;  %v16395_v30 = vld [vmem:[#allocation91_spill] sm:$0xff]  ;;  %v9233_v41 = vrot.slane %v7104_v53, 9 }
 0x468   : > { %7898 = vrot.lane.b32.xlu1 %v9352_v52, %s9816_s19  ;;  %v6634_v7 = vsel %vm10431_vm6, %v9217_v5, %v6633_v14  ;;  %v6635_v8 = vrot.slane %v6633_v14, 4  ;;  %v5624_v24 = vsel %vm10418_vm2, %v5619_v58, %v5623_v32  ;;  %v6227_v45 = vrot.slane %v6226_v55, 4  ;;  %v14514_v52 = vpop.permute.xlu1 %7830  ;;  %v9716_v5 = vld [vmem:[#allocation3 + $0xac] sm:$0xf]  ;;  %v7105_v55 = vld [vmem:[#allocation3 + $0xb4] sm:$0xe] }
 0x469   : > { %v6235_v44 = vrot.slane %v16394_v26, 4  ;;  %v5629_v28 = vrot.slane %v5628_v46, 4  ;;  %v6239_v31 = vshll.u32 %v16395_v30, 16  ;;  %16396 = vst [vmem:[#allocation28_spill] sm:$0xff] %v14514_v52  ;;  %v6231_v34 = vrot.slane %v6229_v38, 5  ;;  %v16398_v30 = vld [vmem:[#allocation38_spill] sm:$0xff] }
 0x46a   : > { %v6637_v0 = vsel %vm10431_vm6, %v6635_v8, %v6636_v18  ;;  %v7242_v14 = vrot.slane %v9716_v5, 5  ;;  %v7245_v58 = vrot.slane %v6704_v27, 5  ;;  %v14522_v46 = vpop.permute.xlu0 %7576  ;;  %v6705_v8 = vld [vmem:[#allocation3 + $0xbc] sm:$0x1]  ;;  %vm16539_vm12 = vcmask 64512  }
 0x46b   : > { %7994 = vrot.lane.b32.xlu0 %v9376_v48, %s9814_s5  ;;  %v5634_v37 = vsel %vm10418_vm2, %v5629_v28, %v5633_v3  ;;  %v9329_v13 = vcombine.low %v6634_v7, %v6637_v0  ;;  %v6241_v32 = vrot.slane %v6239_v31, 5  ;;  %16397 = vst [vmem:[#allocation29_spill] sm:$0xff] %v14522_v46  ;;  %v6232_v48 = vsel %vm10418_vm2, %v6227_v45, %v6231_v34  ;;  %v16399_v3 = vld [vmem:[#allocation40_spill] sm:$0xff]  ;;  %vm16543_vm8 = vmmov %vm16539_vm12 }
 0x46c   : > { %7388 = vrot.lane.b32.xlu1 %v9257_v25, %s9807_s21  ;;  %v9258_v26 = vcombine.low %v5624_v24, %v5634_v37  ;;  %v6236_v18 = vor.u32 %v6235_v44, %v6231_v34  ;;  %v7243_v53 = vsel %vm10431_vm6, %v9233_v41, %v7242_v14  ;;  %v7244_v38 = vrot.slane %v7242_v14, 4  ;;  %v9717_v28 = vld [vmem:[#allocation3 + $0x58] sm:$0xf]  ;;  %v14532_v0 = vpop.permute.xlu1 %7578  ;;  %vm16548_vm5 = vmmov %vm16543_vm8 }
 0x46d   : > { %v6835_v7 = vor.u32 %v16399_v3, %v16398_v30  ;;  %v6838_v27 = vshll.u32 %v9717_v28, 16  ;;  %v16400_v31 = vshrl.u32 %v13447_v42, 16  ;;  %16401 = vst [vmem:[#allocation92_spill] sm:$0xff] %v14532_v0  ;;  %v6848_v44 = vshll.u32 %v14007_v20, 16  ;;  %v14536_v34 = vld [vmem:[#allocation3 + $0xb8] sm:$0xf] }
 0x46e   : > { %v6237_v24 = vrot.slane %v6236_v18, 4  ;;  %v9234_v45 = vrot.slane %v7105_v55, 9  ;;  %v7249_v41 = vrot.slane %v14536_v34, 5  ;;  %v7246_v5 = vsel %vm10431_vm6, %v7244_v38, %v7245_v58  ;;  %v5455_v42 = vld [vmem:[#allocation3 + $0x48] sm:$0xf]  ;;  %v14542_v3 = vpop.permute.xlu0 %7832  ;;  %v16428_v0 = vld [vmem:[#allocation16_spill] sm:$0xff] }
 0x46f   : > { %v6844_v25 = vrot.slane %v16400_v31, 4  ;;  %7484 = vrot.lane.b32.xlu0 %v9281_v33, %s9808_s25  ;;  %v6836_v14 = vrot.slane %v6835_v7, 4  ;;  %v6840_v37 = vrot.slane %v6838_v27, 5  ;;  %v7252_v30 = vrot.slane %v6705_v8, 5  ;;  %16402 = vst [vmem:[#allocation89_spill] sm:$0xff] %v14542_v3 }
 0x470   : > { %7390 = vrot.lane.b32.xlu1 %v9258_v26, %s9807_s21  ;;  %v6242_v33 = vsel %vm10418_vm2, %v6237_v24, %v6241_v32  ;;  %v9377_v20 = vcombine.low %v7243_v53, %v7246_v5  ;;  %v6850_v55 = vrot.slane %v6848_v44, 5  ;;  %v7250_v18 = vsel %vm10431_vm6, %v9234_v45, %v7249_v41  ;;  %v5889_v28 = vld [vmem:[#allocation3 + $0xa8] sm:$0xe]  ;;  %v5472_v7 = vld [vmem:[#allocation3 + $0xac] sm:$0xf]  ;;  %v14550_v27 = vpop.permute.xlu1 %7834 }
 0x471   : > { %v9306_v31 = vcombine.low %v6232_v48, %v6242_v33  ;;  %v6841_v58 = vsel %vm10418_vm2, %v6836_v14, %v6840_v37  ;;  %v6845_v38 = vor.u32 %v6844_v25, %v6840_v37  ;;  %v7251_v8 = vrot.slane %v7249_v41, 4  ;;  %16403 = vst [vmem:[#allocation90_spill] sm:$0xff] %v14550_v27  ;;  %v14555_v24 = vld [vmem:[#allocation3 + $0xb0] sm:$0x1]  ;;  %v5457_v41 = vld [vmem:[#allocation3 + $0x54] sm:$0xf] }
 0x472   : > { %v5636_v26 = vshrl.u32 %v5455_v42, 16  ;;  %v5639_v3 = vshll.u32 %v5455_v42, 16  ;;  %v5645_v32 = vshll.u32 %v14020_v54, 16  ;;  %v5649_v53 = vshrl.u32 %v14020_v54, 16  ;;  %v14561_v5 = vpop.permute.xlu0 %7580 }
 0x473   : > { %7740 = vrot.lane.b32.xlu0 %v9329_v13, %s9818_s22  ;;  %v6846_v44 = vrot.slane %v6845_v38, 4  ;;  %v7253_v48 = vsel %vm10431_vm6, %v7251_v8, %v7252_v30  ;;  %v5655_v25 = vshll.u32 %v14040_v47, 16  ;;  %v9203_v45 = vrot.slane %v5889_v28, 9  ;;  %16404 = vst [vmem:[#allocation33_spill] sm:$0xff] %v14561_v5 }
 0x474   : > { %7646 = vrot.lane.b32.xlu1 %v9306_v31, %s9809_s26  ;;  %v9378_v13 = vcombine.low %v7250_v18, %v7253_v48  ;;  %v5638_v14 = vrot.slane %v5636_v26, 4  ;;  %v5641_v37 = vrot.slane %v5639_v3, 5  ;;  %v5647_v42 = vrot.slane %v5645_v32, 5  ;;  %v14565_v46 = vpop.permute.xlu1 %7582 }
 0x475   : > { %v6851_v54 = vsel %vm10418_vm2, %v6846_v44, %v6850_v55  ;;  %v5651_v33 = vrot.slane %v5649_v53, 4  ;;  %v5657_v38 = vrot.slane %v5655_v25, 5  ;;  %v6039_v27 = vrot.slane %v5472_v7, 5  ;;  %16405 = vst [vmem:[#allocation34_spill] sm:$0xff] %v14565_v46  ;;  %v9719_v53 = vld [vmem:[#allocation3 + $0x58] sm:$0xf] }
 0x476   : > { %v9354_v47 = vcombine.low %v6841_v58, %v6851_v54  ;;  %v5642_v30 = vor.u32 %v5641_v37, %v5638_v14  ;;  %v6042_v28 = vrot.slane %v14555_v24, 5  ;;  %v5660_v31 = vshrl.u32 %v5457_v41, 16  ;;  %v14572_v55 = vpop.permute.xlu0 %7836  ;;  %v6497_v58 = vld [vmem:[#allocation3 + $0xb4] sm:$0xe]  ;;  %v9720_v37 = vld [vmem:[#allocation3 + $0x5c] sm:$0x1] }
 0x477   : > { %7996 = vrot.lane.b32.xlu0 %v9377_v20, %s9814_s5  ;;  %v5652_v8 = vor.u32 %v5651_v33, %v5647_v42  ;;  %v6040_v3 = vsel %vm10431_vm6, %v9203_v45, %v6039_v27  ;;  %v6041_v18 = vrot.slane %v6039_v27, 4  ;;  %v5663_v26 = vshll.u32 %v5457_v41, 16  ;;  %16406 = vst [vmem:[#allocation24_spill] sm:$0xff] %v14572_v55  ;;  %v14576_v45 = vld [vmem:[#allocation3 + $0xbc] sm:$0x1] }
 0x478   : > { %7902 = vrot.lane.b32.xlu1 %v9354_v47, %s9816_s19  ;;  %v5643_v7 = vrot.slane %v5642_v30, 4  ;;  %v5662_v32 = vrot.slane %v5660_v31, 4  ;;  %v5669_v44 = vshll.u32 %v9719_v53, 16  ;;  %v5673_v20 = vshrl.u32 %v9719_v53, 16  ;;  %v14578_v27 = vpop.permute.xlu1 %7838  ;;  %v14587_v55 = vld [vmem:[#allocation3 + $0xb8] sm:$0xf] }
 0x479   : > { %v5653_v48 = vrot.slane %v5652_v8, 4  ;;  %v6043_v25 = vsel %vm10431_vm6, %v6041_v18, %v6042_v28  ;;  %v5665_v14 = vrot.slane %v5663_v26, 5  ;;  %v5679_v54 = vshll.u32 %v9720_v37, 16  ;;  %16407 = vst [vmem:[#allocation91_spill] sm:$0xff] %v14578_v27  ;;  %v9727_v46 = vld [vmem:[#allocation3 + $0x1c] sm:$0xf] }
 0x47a   : > { %v5648_v41 = vsel %vm10418_vm2, %v5643_v7, %v5647_v42  ;;  %v9283_v33 = vcombine.low %v6040_v3, %v6043_v25  ;;  %v5671_v47 = vrot.slane %v5669_v44, 5  ;;  %v5675_v30 = vrot.slane %v5673_v20, 4  ;;  %v14585_v53 = vpop.permute.xlu0 %7584  ;;  %v16409_v3 = vld [vmem:[#allocation43_spill] sm:$0xff]  ;;  %v16410_v7 = vld [vmem:[#allocation44_spill] sm:$0xff]  ;;  %v9722_v20 = vld [vmem:[#allocation3 + $0x64] sm:$0xf] }
 0x47b   : > { %7998 = vrot.lane.b32.xlu0 %v9378_v13, %s9814_s5  ;;  %v5658_v31 = vsel %vm10418_vm2, %v5653_v48, %v5657_v38  ;;  %v5666_v8 = vor.u32 %v5665_v14, %v5662_v32  ;;  %v5681_v28 = vrot.slane %v5679_v54, 5  ;;  %v9219_v18 = vrot.slane %v6497_v58, 9  ;;  %16408 = vst [vmem:[#allocation38_spill] sm:$0xff] %v14585_v53  ;;  %v16411_v38 = vld [vmem:[#allocation36_spill] sm:$0xff] }
 0x47c   : > { %v9259_v26 = vcombine.low %v5648_v41, %v5658_v31  ;;  %v5676_v37 = vor.u32 %v5675_v30, %v5671_v47  ;;  %v6647_v13 = vrot.slane %v14587_v55, 5  ;;  %v6650_v27 = vrot.slane %v14576_v45, 5  ;;  %v9723_v30 = vld [vmem:[#allocation3 + $0x68] sm:$0x1] }
 0x47d   : > { %v5667_v42 = vrot.slane %v5666_v8, 4  ;;  %v6274_v44 = vor.u32 %v16410_v7, %v16409_v3  ;;  %v6277_v25 = vshll.u32 %v9722_v20, 16  ;;  %v16412_v32 = vshrl.u32 %v16411_v38, 16  ;;  %v14596_v58 = vpop.permute.xlu1 %7586  ;;  %v16414_v20 = vld [vmem:[#allocation18_spill] sm:$0xff]  ;;  %v16415_v38 = vld [vmem:[#allocation19_spill] sm:$0xff] }
 0x47e   : > { %7392 = vrot.lane.b32.xlu1 %v9259_v26, %s9807_s21  ;;  %16413 = vst [vmem:[#allocation40_spill] sm:$0xff] %v14596_v58  ;;  %v5677_v14 = vrot.slane %v5676_v37, 4  ;;  %v6648_v54 = vsel %vm10431_vm6, %v9219_v18, %v6647_v13  ;;  %v6649_v41 = vrot.slane %v6647_v13, 4  ;;  %v6287_v31 = vshll.u32 %v9723_v30, 16  ;;  %v14607_v58 = vpop.permute.xlu0 %7840  ;;  %v9724_v37 = vld [vmem:[#allocation3 + $0x10] sm:$0xf] }
 0x47f   : > { %v6283_v48 = vrot.slane %v16412_v32, 4  ;;  %7488 = vrot.lane.b32.xlu0 %v9283_v33, %s9808_s25  ;;  %v5672_v8 = vsel %vm10418_vm2, %v5667_v42, %v5671_v47  ;;  %v6275_v3 = vrot.slane %v6274_v44, 4  ;;  %v6279_v7 = vrot.slane %v6277_v25, 5  ;;  %16416 = vst [vmem:[#allocation43_spill] sm:$0xff] %v14607_v58  ;;  %v9725_v58 = vld [vmem:[#allocation3 + $0x14] sm:$0x1] }
 0x480   : > { %v6106_v32 = vor.u32 %v16415_v38, %v16414_v20  ;;  %v5682_v26 = vsel %vm10418_vm2, %v5677_v14, %v5681_v28  ;;  %v6651_v33 = vsel %vm10431_vm6, %v6649_v41, %v6650_v27  ;;  %v6289_v18 = vrot.slane %v6287_v31, 5  ;;  %v16417_v38 = vld [vmem:[#allocation5_spill] sm:$0xff]  ;;  %v16419_v41 = vld [vmem:[#allocation48_spill] sm:$0xff] }
 0x481   : > { %v6109_v13 = vshll.u32 %v9724_v37, 16  ;;  %v9260_v30 = vcombine.low %v5672_v8, %v5682_v26  ;;  %v9331_v53 = vcombine.low %v6648_v54, %v6651_v33  ;;  %v6280_v47 = vsel %vm10418_vm2, %v6275_v3, %v6279_v7  ;;  %v14613_v44 = vpop.permute.xlu1 %7462  ;;  %v16420_v54 = vld [vmem:[#allocation49_spill] sm:$0xff]  ;;  %v9726_v8 = vld [vmem:[#allocation3 + $0x70] sm:$0xf] }
 0x482   : > { %v6284_v42 = vor.u32 %v6283_v48, %v6279_v7  ;;  %v6107_v25 = vrot.slane %v6106_v32, 4  ;;  %v16418_v28 = vshrl.u32 %v16417_v38, 16  ;;  %v6119_v5 = vshll.u32 %v9725_v58, 16  ;;  %v14623_v32 = vpop.permute.xlu0 %7716  ;;  %v16423_v38 = vld [vmem:[#allocation12_spill] sm:$0xff] }
 0x483   : > { %v6111_v20 = vrot.slane %v6109_v13, 5  ;;  %7394 = vrot.lane.b32.xlu1 %v9260_v30, %s9807_s21  ;;  %7744 = vrot.lane.b32.xlu0 %v9331_v53, %s9818_s22  ;;  %v6883_v31 = vor.u32 %v16420_v54, %v16419_v41  ;;  %v6886_v3 = vshll.u32 %v9726_v8, 16  ;;  %v16421_v48 = vshrl.u32 %v13490_v43, 16  ;;  %v5459_v41 = vld [vmem:[#allocation3 + $0x60] sm:$0xf] }
 0x484   : > { %v6115_v14 = vrot.slane %v16418_v28, 4  ;;  %v6285_v27 = vrot.slane %v6284_v42, 4  ;;  %v6121_v58 = vrot.slane %v6119_v5, 5  ;;  %v6896_v37 = vshll.u32 %v14125_v51, 16  ;;  %v16422_v42 = vld [vmem:[#allocation9_spill] sm:$0xff] }
 0x485   : > { %v6892_v7 = vrot.slane %v16421_v48, 4  ;;  %v6112_v26 = vsel %vm10418_vm2, %v6107_v25, %v6111_v20  ;;  %v6884_v13 = vrot.slane %v6883_v31, 4  ;;  %v6888_v30 = vrot.slane %v6886_v3, 5  ;;  %v14632_v54 = vpop.permute.xlu1 %7718 }
 0x486   : > { %v6116_v33 = vor.u32 %v6115_v14, %v6111_v20  ;;  %v6290_v53 = vsel %vm10418_vm2, %v6285_v27, %v6289_v18  ;;  %v6715_v28 = vor.u32 %v16423_v38, %v16422_v42  ;;  %v6898_v48 = vrot.slane %v6896_v37, 5  ;;  %v16424_v14 = vld [vmem:[#allocation25_spill] sm:$0xff] }
 0x487   : > { %v9308_v43 = vcombine.low %v6280_v47, %v6290_v53  ;;  %v6718_v25 = vshll.u32 %v9727_v46, 16  ;;  %v6889_v5 = vsel %vm10418_vm2, %v6884_v13, %v6888_v30  ;;  %v6893_v51 = vor.u32 %v6892_v7, %v6888_v30  ;;  %v14641_v47 = vpop.permute.xlu0 %7972 }
 0x488   : > { %v6117_v8 = vrot.slane %v6116_v33, 4  ;;  %v6716_v20 = vrot.slane %v6715_v28, 4  ;;  %v16425_v18 = vshrl.u32 %v16424_v14, 16  ;;  %v9728_v33 = vld [vmem:[#allocation3 + $0x20] sm:$0x1]  ;;  %v5684_v53 = vshrl.u32 %v5459_v41, 16 }
 0x489   : > { %7650 = vrot.lane.b32.xlu1 %v9308_v43, %s9809_s26  ;;  %v6720_v3 = vrot.slane %v6718_v25, 5  ;;  %v6728_v37 = vshll.u32 %v9728_v33, 16  ;;  %v6894_v42 = vrot.slane %v6893_v51, 4  ;;  %v5687_v38 = vshll.u32 %v5459_v41, 16  ;;  %v14644_v13 = vpop.permute.xlu1 %7466  ;;  %v16426_v33 = vld [vmem:[#allocation7_spill] sm:$0xff] }
 0x48a   : > { %v6724_v27 = vrot.slane %v16425_v18, 4  ;;  %v6122_v31 = vsel %vm10418_vm2, %v6117_v8, %v6121_v58  ;;  %v5693_v7 = vshll.u32 %v14142_v16, 16  ;;  %v5686_v14 = vrot.slane %v5684_v53, 4  ;;  %v9729_v53 = vld [vmem:[#allocation3 + $0x28] sm:$0xf] }
 0x48b   : > { %v9301_v46 = vcombine.low %v6112_v26, %v6122_v31  ;;  %v6721_v30 = vsel %vm10418_vm2, %v6716_v20, %v6720_v3  ;;  %v6730_v43 = vrot.slane %v6728_v37, 5  ;;  %v6899_v58 = vsel %vm10418_vm2, %v6894_v42, %v6898_v48  ;;  %v14653_v31 = vpop.permute.xlu0 %7974  ;;  %v16427_v20 = vld [vmem:[#allocation26_spill] sm:$0xff] }
 0x48c   : > { %v6725_v28 = vor.u32 %v6724_v27, %v6720_v3  ;;  %v5689_v8 = vrot.slane %v5687_v38, 5  ;;  %v5695_v25 = vrot.slane %v5693_v7, 5  ;;  %v5697_v26 = vshrl.u32 %v14142_v16, 16  ;;  %v5461_v42 = vld [vmem:[#allocation3 + $0x6c] sm:$0xf] }
 0x48d   : > { %7636 = vrot.lane.b32.xlu0 %v9301_v46, %s9809_s26  ;;  %v9356_v41 = vcombine.low %v6889_v5, %v6899_v58  ;;  %v5703_v18 = vshll.u32 %v14144_v1, 16  ;;  %v6154_v27 = vor.u32 %v16427_v20, %v16426_v33  ;;  %v6157_v46 = vshll.u32 %v9729_v53, 16  ;;  %v14662_v1 = vpop.permute.xlu1 %7722  ;;  %v9730_v7 = vld [vmem:[#allocation3 + $0x2c] sm:$0x1] }
 0x48e   : > { %v6726_v51 = vrot.slane %v6725_v28, 4  ;;  %v5690_v3 = vor.u32 %v5689_v8, %v5686_v14  ;;  %v5699_v37 = vrot.slane %v5697_v26, 4  ;;  %v16429_v59 = vshrl.u32 %v16428_v0, 16 }
 0x48f   : > { %7906 = vrot.lane.b32.xlu1 %v9356_v41, %s9816_s19  ;;  %v5705_v5 = vrot.slane %v5703_v18, 5  ;;  %v6155_v38 = vrot.slane %v6154_v27, 4  ;;  %v6167_v28 = vshll.u32 %v9730_v7, 16  ;;  %v6159_v26 = vrot.slane %v6157_v46, 5  ;;  %v14664_v52 = vpop.permute.xlu0 %7464  ;;  %v9732_v7 = vld [vmem:[#allocation3 + $0x74] sm:$0x1] }
 0x490   : > { %v6163_v48 = vrot.slane %v16429_v59, 4  ;;  %v6731_v16 = vsel %vm10418_vm2, %v6726_v51, %v6730_v43  ;;  %v5691_v14 = vrot.slane %v5690_v3, 4  ;;  %v5700_v8 = vor.u32 %v5699_v37, %v5695_v25  ;;  %v9731_v59 = vld [vmem:[#allocation3 + $0x70] sm:$0xf] }
 0x491   : > { %v9349_v58 = vcombine.low %v6721_v30, %v6731_v16  ;;  %v6169_v33 = vrot.slane %v6167_v28, 5  ;;  %v5708_v20 = vshrl.u32 %v5461_v42, 16  ;;  %v5711_v0 = vshll.u32 %v5461_v42, 16  ;;  %v14671_v46 = vpop.permute.xlu1 %7470 }
 0x492   : > { %v5717_v53 = vshll.u32 %v9731_v59, 16  ;;  %v5696_v43 = vsel %vm10418_vm2, %v5691_v14, %v5695_v25  ;;  %v5701_v41 = vrot.slane %v5700_v8, 4  ;;  %v6160_v51 = vsel %vm10418_vm2, %v6155_v38, %v6159_v26  ;;  %v9733_v38 = vld [vmem:[#allocation3 + $0x34] sm:$0xf] }
 0x493   : > { %7892 = vrot.lane.b32.xlu0 %v9349_v58, %s9816_s19  ;;  %v6164_v30 = vor.u32 %v6163_v48, %v6159_v26  ;;  %v5710_v18 = vrot.slane %v5708_v20, 4  ;;  %v5713_v27 = vrot.slane %v5711_v0, 5  ;;  %v5721_v37 = vshrl.u32 %v9731_v59, 16  ;;  %v16430_v58 = vld [vmem:[#allocation30_spill] sm:$0xff]  ;;  %v14677_v26 = vpop.permute.xlu0 %7720 }
 0x494   : > { %v5719_v3 = vrot.slane %v5717_v53, 5  ;;  %v5706_v42 = vsel %vm10418_vm2, %v5701_v41, %v5705_v5  ;;  %v5727_v28 = vshll.u32 %v9732_v7, 16  ;;  %v6763_v25 = vor.u32 %v16431_v49, %v16430_v58  ;;  %v16432_v53 = vld [vmem:[#allocation22_spill] sm:$0xff]  ;;  %v16436_v58 = vld [vmem:[#allocation53_spill] sm:$0xff] }
 0x495   : > { %v6165_v16 = vrot.slane %v6164_v30, 4  ;;  %v9261_v14 = vcombine.low %v5696_v43, %v5706_v42  ;;  %v5714_v8 = vor.u32 %v5713_v27, %v5710_v18  ;;  %v5723_v9 = vrot.slane %v5721_v37, 4  ;;  %v14684_v18 = vpop.permute.xlu1 %7726  ;;  %v9734_v27 = vld [vmem:[#allocation3 + $0x38] sm:$0x1] }
 0x496   : > { %v6766_v48 = vshll.u32 %v9733_v38, 16  ;;  %v5729_v0 = vrot.slane %v5727_v28, 5  ;;  %v6764_v59 = vrot.slane %v6763_v25, 4  ;;  %v16433_v5 = vshrl.u32 %v16432_v53, 16  ;;  %16434 = vst [vmem:[#allocation44_spill] sm:$0xff] %v14684_v18  ;;  %v16435_v42 = vld [vmem:[#allocation52_spill] sm:$0xff] }
 0x497   : > { %v6170_v20 = vsel %vm10418_vm2, %v6165_v16, %v6169_v33  ;;  %7396 = vrot.lane.b32.xlu1 %v9261_v14, %s9807_s21  ;;  %v5715_v7 = vrot.slane %v5714_v8, 4  ;;  %v5724_v49 = vor.u32 %v5723_v9, %v5719_v3  ;;  %v6776_v37 = vshll.u32 %v9734_v27, 16  ;;  %v16437_v16 = vld [vmem:[#allocation46_spill] sm:$0xff]  ;;  %v9736_v27 = vld [vmem:[#allocation3 + $0x80] sm:$0x1] }
 0x498   : > { %v6772_v41 = vrot.slane %v16433_v5, 4  ;;  %v9303_v30 = vcombine.low %v6160_v51, %v6170_v20  ;;  %v6768_v43 = vrot.slane %v6766_v48, 5  ;;  %v6322_v38 = vor.u32 %v16436_v58, %v16435_v42  ;;  %v14695_v48 = vpop.permute.xlu0 %7976 }
 0x499   : > { %v6325_v33 = vshll.u32 %v9735_v35, 16  ;;  %v16438_v28 = vshrl.u32 %v16437_v16, 16  ;;  %v5720_v51 = vsel %vm10418_vm2, %v5715_v7, %v5719_v3  ;;  %v5725_v14 = vrot.slane %v5724_v49, 4  ;;  %v16440_v16 = vld [vmem:[#allocation37_spill] sm:$0xff]  ;;  %v14701_v49 = vpop.permute.xlu1 %7474 }
 0x49a   : > { %7640 = vrot.lane.b32.xlu0 %v9303_v30, %s9809_s26  ;;  %v6769_v9 = vsel %vm10418_vm2, %v6764_v59, %v6768_v43  ;;  %v6773_v8 = vor.u32 %v6772_v41, %v6768_v43  ;;  %v6778_v20 = vrot.slane %v6776_v37, 5  ;;  %v6323_v53 = vrot.slane %v6322_v38, 4  ;;  %v16439_v30 = vld [vmem:[#allocation35_spill] sm:$0xff]  ;;  %v9737_v3 = vld [vmem:[#allocation3 + $0x40] sm:$0xf]  ;;  %16441 = vst [vmem:[#allocation36_spill] sm:$0xff] %v14701_v49 }
 0x49b   : > { %v6331_v25 = vrot.slane %v16438_v28, 4  ;;  %v6327_v5 = vrot.slane %v6325_v33, 5  ;;  %v6335_v35 = vshll.u32 %v9736_v27, 16  ;;  %v5730_v42 = vsel %vm10418_vm2, %v5725_v14, %v5729_v0  ;;  %v16442_v0 = vld [vmem:[#allocation6_spill] sm:$0xff] }
 0x49c   : > { %v6774_v58 = vrot.slane %v6773_v8, 4  ;;  %v6202_v28 = vor.u32 %v16440_v16, %v16439_v30  ;;  %v6205_v7 = vshll.u32 %v9737_v3, 16  ;;  %v9262_v59 = vcombine.low %v5720_v51, %v5730_v42  ;;  %v14709_v18 = vpop.permute.xlu0 %7978  ;;  %v9738_v51 = vld [vmem:[#allocation3 + $0x44] sm:$0x1]  ;;  %v16445_v3 = vld [vmem:[#allocation56_spill] sm:$0xff] }
 0x49d   : > { %v6328_v41 = vsel %vm10418_vm2, %v6323_v53, %v6327_v5  ;;  %v6332_v43 = vor.u32 %v6331_v25, %v6327_v5  ;;  %v6337_v37 = vrot.slane %v6335_v35, 5  ;;  %v16443_v14 = vshrl.u32 %v16442_v0, 16  ;;  %16444 = vst [vmem:[#allocation18_spill] sm:$0xff] %v14709_v18  ;;  %v16446_v53 = vld [vmem:[#allocation58_spill] sm:$0xff]  ;;  %v14718_v0 = vpop.permute.xlu1 %7730 }
 0x49e   : > { %v6779_v38 = vsel %vm10418_vm2, %v6774_v58, %v6778_v20  ;;  %v6203_v33 = vrot.slane %v6202_v28, 4  ;;  %v6207_v27 = vrot.slane %v6205_v7, 5  ;;  %7398 = vrot.lane.b32.xlu1 %v9262_v59, %s9807_s21  ;;  %v6215_v42 = vshll.u32 %v9738_v51, 16  ;;  %v9739_v35 = vld [vmem:[#allocation3 + $0x88] sm:$0xf]  ;;  %16448 = vst [vmem:[#allocation19_spill] sm:$0xff] %v14718_v0 }
 0x49f   : > { %v6211_v8 = vrot.slane %v16443_v14, 4  ;;  %v9351_v30 = vcombine.low %v6769_v9, %v6779_v38  ;;  %v6333_v16 = vrot.slane %v6332_v43, 4  ;;  %v6931_v25 = vor.u32 %v16446_v53, %v16445_v3  ;;  %v5463_v53 = vld [vmem:[#allocation3 + $0x78] sm:$0xf] }
 0x4a0   : > { %v6208_v5 = vsel %vm10418_vm2, %v6203_v33, %v6207_v27  ;;  %v6934_v58 = vshll.u32 %v9739_v35, 16  ;;  %v16447_v28 = vshrl.u32 %v13538_v6, 16  ;;  %v6217_v59 = vrot.slane %v6215_v42, 5  ;;  %v14726_v6 = vpop.permute.xlu0 %7468 }
 0x4a1   : > { %v6212_v20 = vor.u32 %v6211_v8, %v6207_v27  ;;  %7896 = vrot.lane.b32.xlu0 %v9351_v30, %s9816_s19  ;;  %v6338_v9 = vsel %vm10418_vm2, %v6333_v16, %v6337_v37  ;;  %v6932_v43 = vrot.slane %v6931_v25, 4  ;;  %v6944_v38 = vshll.u32 %v14258_v4, 16  ;;  %v16449_v27 = vld [vmem:[#allocation41_spill] sm:$0xff]  ;;  %v16450_v8 = vld [vmem:[#allocation42_spill] sm:$0xff]  ;;  %v16451_v30 = vld [vmem:[#allocation31_spill] sm:$0xff] }
 0x4a2   : > { %v6940_v7 = vrot.slane %v16447_v28, 4  ;;  %v9310_v14 = vcombine.low %v6328_v41, %v6338_v9  ;;  %v6936_v33 = vrot.slane %v6934_v58, 5  ;;  %v6811_v3 = vor.u32 %v16450_v8, %v16449_v27  ;;  %v9740_v28 = vld [vmem:[#allocation3 + $0x4c] sm:$0xf]  ;;  %v9741_v37 = vld [vmem:[#allocation3 + $0x50] sm:$0x1] }
 0x4a3   : > { %v6213_v51 = vrot.slane %v6212_v20, 4  ;;  %v6946_v35 = vrot.slane %v6944_v38, 5  ;;  %v6814_v0 = vshll.u32 %v9740_v28, 16  ;;  %v16452_v49 = vshrl.u32 %v16451_v30, 16  ;;  %v14735_v20 = vpop.permute.xlu1 %7478 }
 0x4a4   : > { %v6824_v16 = vshll.u32 %v9741_v37, 16  ;;  %7654 = vrot.lane.b32.xlu1 %v9310_v14, %s9809_s26  ;;  %v6937_v41 = vsel %vm10418_vm2, %v6932_v43, %v6936_v33  ;;  %v6941_v42 = vor.u32 %v6940_v7, %v6936_v33  ;;  %v6812_v25 = vrot.slane %v6811_v3, 4  ;;  %16453 = vst [vmem:[#allocation5_spill] sm:$0xff] %v14735_v20  ;;  %v14739_v30 = vpop.permute.xlu0 %7724  ;;  %v16459_v20 = vld [vmem:[#allocation39_spill] sm:$0xff] }
 0x4a5   : > { %v6820_v18 = vrot.slane %v16452_v49, 4  ;;  %v6218_v4 = vsel %vm10418_vm2, %v6213_v51, %v6217_v59  ;;  %v6816_v9 = vrot.slane %v6814_v0, 5  ;;  %v5732_v27 = vshrl.u32 %v5463_v53, 16  ;;  %16454 = vst [vmem:[#allocation48_spill] sm:$0xff] %v14739_v30 }
 0x4a6   : > { %v9305_v58 = vcombine.low %v6208_v5, %v6218_v4  ;;  %v6826_v38 = vrot.slane %v6824_v16, 5  ;;  %v6942_v8 = vrot.slane %v6941_v42, 4  ;;  %v5735_v49 = vshll.u32 %v5463_v53, 16  ;;  %v14747_v53 = vld [vmem:[#allocation3 + $0x84] sm:$0xf] }
 0x4a7   : > { %v5741_v28 = vshll.u32 %v14304_v61, 16  ;;  %v5745_v14 = vshrl.u32 %v14304_v61, 16  ;;  %v6817_v7 = vsel %vm10418_vm2, %v6812_v25, %v6816_v9  ;;  %v6821_v59 = vor.u32 %v6820_v18, %v6816_v9  ;;  %16455 = vst [vmem:[#allocation49_spill] sm:$0xff] %v14747_v53  ;;  %v14749_v61 = vpop.permute.xlu1 %7734  ;;  %v16457_v42 = vld [vmem:[#allocation45_spill] sm:$0xff] }
 0x4a8   : > { %7644 = vrot.lane.b32.xlu0 %v9305_v58, %s9809_s26  ;;  %v5734_v43 = vrot.slane %v5732_v27, 4  ;;  %v5751_v5 = vshll.u32 %v14318_v62, 16  ;;  %v6947_v0 = vsel %vm10418_vm2, %v6942_v8, %v6946_v35  ;;  %v5737_v51 = vrot.slane %v5735_v49, 5  ;;  %16456 = vst [vmem:[#allocation9_spill] sm:$0xff] %v14749_v61  ;;  %v16458_v58 = vld [vmem:[#allocation47_spill] sm:$0xff]  ;;  %v14755_v8 = vpop.permute.xlu0 %7980 }
 0x4a9   : > { %v5743_v33 = vrot.slane %v5741_v28, 5  ;;  %v5747_v3 = vrot.slane %v5745_v14, 4  ;;  %v9358_v37 = vcombine.low %v6937_v41, %v6947_v0  ;;  %v6822_v16 = vrot.slane %v6821_v59, 4  ;;  %v9742_v27 = vld [vmem:[#allocation3 + $0x58] sm:$0xf] }
 0x4aa   : > { %v5753_v4 = vrot.slane %v5751_v5, 5  ;;  %v6250_v25 = vor.u32 %v16458_v58, %v16457_v42  ;;  %v5738_v18 = vor.u32 %v5737_v51, %v5734_v43  ;;  %v6253_v62 = vshll.u32 %v9742_v27, 16  ;;  %v9743_v28 = vld [vmem:[#allocation3 + $0x5c] sm:$0x1]  ;;  %v14764_v58 = vld [vmem:[#allocation3 + $0x88] sm:$0xf] }
 0x4ab   : > { %v5748_v9 = vor.u32 %v5747_v3, %v5743_v33  ;;  %v16460_v30 = vshrl.u32 %v16459_v20, 16  ;;  %7910 = vrot.lane.b32.xlu1 %v9358_v37, %s9816_s19  ;;  %v6827_v49 = vsel %vm10418_vm2, %v6822_v16, %v6826_v38  ;;  %v6263_v14 = vshll.u32 %v9743_v28, 16  ;;  %v14761_v3 = vpop.permute.xlu1 %7482  ;;  %16462 = vst [vmem:[#allocation25_spill] sm:$0xff] %v14764_v58 }
 0x4ac   : > { %v6251_v41 = vrot.slane %v6250_v25, 4  ;;  %v5756_v59 = vshrl.u32 %v14747_v53, 16  ;;  %v9353_v5 = vcombine.low %v6817_v7, %v6827_v49  ;;  %v5739_v43 = vrot.slane %v5738_v18, 4  ;;  %16461 = vst [vmem:[#allocation12_spill] sm:$0xff] %v14761_v3  ;;  %v14774_v18 = vpop.permute.xlu0 %7982  ;;  %v16464_v3 = vld [vmem:[#allocation51_spill] sm:$0xff] }
 0x4ad   : > { %v6259_v35 = vrot.slane %v16460_v30, 4  ;;  %v5749_v0 = vrot.slane %v5748_v9, 4  ;;  %v6255_v51 = vrot.slane %v6253_v62, 5  ;;  %v6265_v20 = vrot.slane %v6263_v14, 5  ;;  %v9745_v14 = vld [vmem:[#allocation3 + $0x8c] sm:$0x1] }
 0x4ae   : > { %v5758_v30 = vrot.slane %v5756_v59, 4  ;;  %v5759_v42 = vshll.u32 %v14747_v53, 16  ;;  %v5765_v37 = vshll.u32 %v14764_v58, 16  ;;  %7900 = vrot.lane.b32.xlu0 %v9353_v5, %s9816_s19  ;;  %v5744_v38 = vsel %vm10418_vm2, %v5739_v43, %v5743_v33  ;;  %v16463_v5 = vld [vmem:[#allocation50_spill] sm:$0xff]  ;;  %v9746_v43 = vld [vmem:[#allocation3 + $0x64] sm:$0xf] }
 0x4af   : > { %v5754_v7 = vsel %vm10418_vm2, %v5749_v0, %v5753_v4  ;;  %v6256_v16 = vsel %vm10418_vm2, %v6251_v41, %v6255_v51  ;;  %v6260_v25 = vor.u32 %v6259_v35, %v6255_v51  ;;  %v5769_v49 = vshrl.u32 %v14764_v58, 16  ;;  %v14779_v4 = vpop.permute.xlu1 %7738 }
 0x4b0   : > { %v9263_v9 = vcombine.low %v5744_v38, %v5754_v7  ;;  %v5761_v27 = vrot.slane %v5759_v42, 5  ;;  %v5767_v62 = vrot.slane %v5765_v37, 5  ;;  %v5775_v59 = vshll.u32 %v9745_v14, 16  ;;  %16465 = vst [vmem:[#allocation7_spill] sm:$0xff] %v14779_v4  ;;  %v9747_v42 = vld [vmem:[#allocation3 + $0x68] sm:$0x1] }
 0x4b1   : > { %v6261_v28 = vrot.slane %v6260_v25, 4  ;;  %v6859_v33 = vor.u32 %v16464_v3, %v16463_v5  ;;  %v6862_v53 = vshll.u32 %v9746_v43, 16  ;;  %v5771_v41 = vrot.slane %v5769_v49, 4  ;;  %v14786_v3 = vpop.permute.xlu0 %7472 }
 0x4b2   : > { %7400 = vrot.lane.b32.xlu1 %v9263_v9, %s9807_s21  ;;  %v5762_v35 = vor.u32 %v5761_v27, %v5758_v30  ;;  %v16466_v0 = vshrl.u32 %v13505_v15, 16  ;;  %v6872_v37 = vshll.u32 %v9747_v42, 16  ;;  %v5777_v7 = vrot.slane %v5775_v59, 5  ;;  %16467 = vst [vmem:[#allocation26_spill] sm:$0xff] %v14786_v3  ;;  %v16468_v15 = vld [vmem:[#allocation63_spill] sm:$0xff]  ;;  %v16469_v27 = vld [vmem:[#allocation64_spill] sm:$0xff] }
 0x4b3   : > { %v6266_v38 = vsel %vm10418_vm2, %v6261_v28, %v6265_v20  ;;  %v6860_v25 = vrot.slane %v6859_v33, 4  ;;  %v6864_v14 = vrot.slane %v6862_v53, 5  ;;  %v5772_v4 = vor.u32 %v5771_v41, %v5767_v62  ;;  %v14792_v61 = vpop.permute.xlu1 %7486  ;;  %v9749_v33 = vld [vmem:[#allocation3 + $0x98] sm:$0x1] }
 0x4b4   : > { %v6868_v51 = vrot.slane %v16466_v0, 4  ;;  %v9307_v5 = vcombine.low %v6256_v16, %v6266_v38  ;;  %v5763_v43 = vrot.slane %v5762_v35, 4  ;;  %v6874_v58 = vrot.slane %v6872_v37, 5  ;;  %v9748_v0 = vld [vmem:[#allocation3 + $0x94] sm:$0xf]  ;;  %16470 = vst [vmem:[#allocation16_spill] sm:$0xff] %v14792_v61 }
 0x4b5   : > { %v6865_v30 = vsel %vm10418_vm2, %v6860_v25, %v6864_v14  ;;  %v6370_v49 = vor.u32 %v16469_v27, %v16468_v15  ;;  %v6373_v42 = vshll.u32 %v9748_v0, 16  ;;  %v5773_v20 = vrot.slane %v5772_v4, 4  ;;  %v16471_v16 = vld [vmem:[#allocation57_spill] sm:$0xff]  ;;  %v16473_v38 = vld [vmem:[#allocation54_spill] sm:$0xff]  ;;  %v16474_v25 = vld [vmem:[#allocation55_spill] sm:$0xff]  ;;  %v14801_v15 = vpop.permute.xlu0 %7728 }
 0x4b6   : > { %v6869_v9 = vor.u32 %v6868_v51, %v6864_v14  ;;  %7648 = vrot.lane.b32.xlu0 %v9307_v5, %s9809_s26  ;;  %v5768_v53 = vsel %vm10418_vm2, %v5763_v43, %v5767_v62  ;;  %v16472_v28 = vshrl.u32 %v16471_v16, 16  ;;  %v6383_v35 = vshll.u32 %v9749_v33, 16  ;;  %16475 = vst [vmem:[#allocation30_spill] sm:$0xff] %v14801_v15  ;;  %v9750_v0 = vld [vmem:[#allocation3 + $0x70] sm:$0xf] }
 0x4b7   : > { %v6371_v51 = vrot.slane %v6370_v49, 4  ;;  %v6375_v37 = vrot.slane %v6373_v42, 5  ;;  %v6298_v14 = vor.u32 %v16474_v25, %v16473_v38  ;;  %v5778_v5 = vsel %vm10418_vm2, %v5773_v20, %v5777_v7  ;;  %v9751_v7 = vld [vmem:[#allocation3 + $0x74] sm:$0x1] }
 0x4b8   : > { %v6379_v59 = vrot.slane %v16472_v28, 4  ;;  %v6870_v41 = vrot.slane %v6869_v9, 4  ;;  %v6385_v27 = vrot.slane %v6383_v35, 5  ;;  %v6301_v62 = vshll.u32 %v9750_v0, 16  ;;  %v14811_v28 = vpop.permute.xlu1 %7742  ;;  %v16479_v0 = vld [vmem:[#allocation70_spill] sm:$0xff] }
 0x4b9   : > { %v16476_v4 = vshrl.u32 %v13532_v56, 16  ;;  %v9264_v16 = vcombine.low %v5768_v53, %v5778_v5  ;;  %v6376_v49 = vsel %vm10418_vm2, %v6371_v51, %v6375_v37  ;;  %16477 = vst [vmem:[#allocation32_spill] sm:$0xff] %v14811_v28  ;;  %v6299_v38 = vrot.slane %v6298_v14, 4  ;;  %v16478_v56 = vld [vmem:[#allocation68_spill] sm:$0xff]  ;;  %v14819_v51 = vpop.permute.xlu0 %7984 }
 0x4ba   : > { %v6875_v9 = vsel %vm10418_vm2, %v6870_v41, %v6874_v58  ;;  %v6380_v42 = vor.u32 %v6379_v59, %v6375_v37  ;;  %v6303_v25 = vrot.slane %v6301_v62, 5  ;;  %v6311_v20 = vshll.u32 %v9751_v7, 16  ;;  %v16480_v58 = vld [vmem:[#allocation62_spill] sm:$0xff]  ;;  %16482 = vst [vmem:[#allocation22_spill] sm:$0xff] %v14819_v51  ;;  %v16529_v51 = vld [vmem:[#allocation4_spill] sm:$0xff] }
 0x4bb   : > { %v6307_v43 = vrot.slane %v16476_v4, 4  ;;  %v9355_v33 = vcombine.low %v6865_v30, %v6875_v9  ;;  %7402 = vrot.lane.b32.xlu1 %v9264_v16, %s9807_s21  ;;  %v6979_v53 = vor.u32 %v16479_v0, %v16478_v56  ;;  %v6982_v5 = vshll.u32 %v14421_v19, 16  ;;  %v16483_v19 = vld [vmem:[#allocation60_spill] sm:$0xff]  ;;  %v14829_v56 = vld [vmem:[#allocation3 + $0x90] sm:$0xf] }
 0x4bc   : > { %v6381_v35 = vrot.slane %v6380_v42, 4  ;;  %v16481_v41 = vshrl.u32 %v16480_v58, 16  ;;  %v6304_v30 = vsel %vm10418_vm2, %v6299_v38, %v6303_v25  ;;  %v6313_v37 = vrot.slane %v6311_v20, 5  ;;  %v16484_v42 = vld [vmem:[#allocation61_spill] sm:$0xff]  ;;  %16485 = vst [vmem:[#allocation52_spill] sm:$0xff] %v14829_v56  ;;  %v14831_v0 = vpop.permute.xlu1 %7490 }
 0x4bd   : > { %7904 = vrot.lane.b32.xlu0 %v9355_v33, %s9816_s19  ;;  %v6308_v59 = vor.u32 %v6307_v43, %v6303_v25  ;;  %v6992_v14 = vshll.u32 %v14410_v63, 16  ;;  %v6980_v16 = vrot.slane %v6979_v53, 4  ;;  %v6984_v9 = vrot.slane %v6982_v5, 5  ;;  %16486 = vst [vmem:[#allocation53_spill] sm:$0xff] %v14831_v0  ;;  %v9752_v38 = vld [vmem:[#allocation3 + $0x7c] sm:$0xf]  ;;  %v14837_v53 = vpop.permute.xlu0 %7986 }
 0x4be   : > { %v6988_v4 = vrot.slane %v16481_v41, 4  ;;  %v6386_v62 = vsel %vm10418_vm2, %v6381_v35, %v6385_v27  ;;  %v6907_v7 = vor.u32 %v16484_v42, %v16483_v19  ;;  %v6910_v43 = vshll.u32 %v9752_v38, 16  ;;  %16488 = vst [vmem:[#allocation46_spill] sm:$0xff] %v14837_v53  ;;  %v16493_v0 = vld [vmem:[#allocation59_spill] sm:$0xff] }
 0x4bf   : > { %v9312_v33 = vcombine.low %v6376_v49, %v6386_v62  ;;  %v6309_v58 = vrot.slane %v6308_v59, 4  ;;  %v6994_v41 = vrot.slane %v6992_v14, 5  ;;  %v6985_v63 = vsel %vm10418_vm2, %v6980_v16, %v6984_v9  ;;  %v9753_v59 = vld [vmem:[#allocation3 + $0x80] sm:$0x1] }
 0x4c0   : > { %v6989_v25 = vor.u32 %v6988_v4, %v6984_v9  ;;  %v6908_v20 = vrot.slane %v6907_v7, 4  ;;  %v16487_v27 = vshrl.u32 %v13548_v23, 16  ;;  %v6912_v49 = vrot.slane %v6910_v43, 5  ;;  %v14845_v23 = vpop.permute.xlu1 %7746 }
 0x4c1   : > { %7658 = vrot.lane.b32.xlu1 %v9312_v33, %s9809_s26  ;;  %v6314_v5 = vsel %vm10418_vm2, %v6309_v58, %v6313_v37  ;;  %v6920_v14 = vshll.u32 %v9753_v59, 16  ;;  %v5780_v62 = vshrl.u32 %v14829_v56, 16  ;;  %v5783_v4 = vshll.u32 %v14829_v56, 16  ;;  %16489 = vst [vmem:[#allocation35_spill] sm:$0xff] %v14845_v23  ;;  %v16491_v23 = vld [vmem:[#allocation65_spill] sm:$0xff]  ;;  %v16498_v56 = vld [vmem:[#allocation72_spill] sm:$0xff] }
 0x4c2   : > { %v6916_v35 = vrot.slane %v16487_v27, 4  ;;  %v9309_v19 = vcombine.low %v6304_v30, %v6314_v5  ;;  %v6990_v42 = vrot.slane %v6989_v25, 4  ;;  %v5789_v16 = vshll.u32 %v14449_v17, 16  ;;  %v14853_v25 = vpop.permute.xlu0 %7476 }
 0x4c3   : > { %v6913_v9 = vsel %vm10418_vm2, %v6908_v20, %v6912_v49  ;;  %v6922_v33 = vrot.slane %v6920_v14, 5  ;;  %v5782_v38 = vrot.slane %v5780_v62, 4  ;;  %v5785_v58 = vrot.slane %v5783_v4, 5  ;;  %16490 = vst [vmem:[#allocation37_spill] sm:$0xff] %v14853_v25  ;;  %v16492_v20 = vld [vmem:[#allocation66_spill] sm:$0xff]  ;;  %v16521_v25 = vld [vmem:[#allocation76_spill] sm:$0xff] }
 0x4c4   : > { %v6917_v7 = vor.u32 %v6916_v35, %v6912_v49  ;;  %7652 = vrot.lane.b32.xlu0 %v9309_v19, %s9809_s26  ;;  %v6995_v37 = vsel %vm10418_vm2, %v6990_v42, %v6994_v41  ;;  %v5791_v30 = vrot.slane %v5789_v16, 5  ;;  %v5793_v43 = vshrl.u32 %v14449_v17, 16  ;;  %v9754_v62 = vld [vmem:[#allocation3 + $0x88] sm:$0xf]  ;;  %v14860_v42 = vld [vmem:[#allocation3 + $0x9c] sm:$0xf]  ;;  %v14862_v4 = vpop.permute.xlu1 %7382 }
 0x4c5   : > { %v9360_v27 = vcombine.low %v6985_v63, %v6995_v37  ;;  %v5799_v59 = vshll.u32 %v14454_v57, 16  ;;  %v6346_v35 = vor.u32 %v16492_v20, %v16491_v23  ;;  %v5786_v49 = vor.u32 %v5785_v58, %v5782_v38  ;;  %16495 = vst [vmem:[#allocation6_spill] sm:$0xff] %v14860_v42  ;;  %v9755_v16 = vld [vmem:[#allocation3 + $0x8c] sm:$0x1] }
 0x4c6   : > { %v6918_v5 = vrot.slane %v6917_v7, 4  ;;  %v5795_v14 = vrot.slane %v5793_v43, 4  ;;  %v6349_v19 = vshll.u32 %v9754_v62, 16  ;;  %v16494_v28 = vshrl.u32 %v16493_v0, 16  ;;  %v14867_v43 = vpop.permute.xlu0 %7732  ;;  %v14871_v62 = vld [vmem:[#allocation3 + $0xa0] sm:$0xf] }
 0x4c7   : > { %7914 = vrot.lane.b32.xlu1 %v9360_v27, %s9816_s19  ;;  %v5801_v57 = vrot.slane %v5799_v59, 5  ;;  %v6347_v63 = vrot.slane %v6346_v35, 4  ;;  %v6359_v23 = vshll.u32 %v9755_v16, 16  ;;  %v5787_v38 = vrot.slane %v5786_v49, 4  ;;  %16496 = vst [vmem:[#allocation56_spill] sm:$0xff] %v14867_v43  ;;  %16497 = vst [vmem:[#allocation58_spill] sm:$0xff] %v14871_v62 }
 0x4c8   : > { %v6355_v41 = vrot.slane %v16494_v28, 4  ;;  %v6923_v17 = vsel %vm10418_vm2, %v6918_v5, %v6922_v33  ;;  %v5796_v37 = vor.u32 %v5795_v14, %v5791_v30  ;;  %v6351_v58 = vrot.slane %v6349_v19, 5  ;;  %v14879_v35 = vpop.permute.xlu1 %7638  ;;  %v16501_v43 = vld [vmem:[#allocation67_spill] sm:$0xff] }
 0x4c9   : > { %v9357_v7 = vcombine.low %v6913_v9, %v6923_v17  ;;  %v6361_v28 = vrot.slane %v6359_v23, 5  ;;  %v5804_v0 = vshrl.u32 %v14860_v42, 16  ;;  %v5807_v20 = vshll.u32 %v14860_v42, 16  ;;  %v9758_v42 = vld [vmem:[#allocation3 + $0x94] sm:$0xf] }
 0x4ca   : > { %v5813_v27 = vshll.u32 %v14871_v62, 16  ;;  %v5792_v33 = vsel %vm10418_vm2, %v5787_v38, %v5791_v30  ;;  %v5797_v9 = vrot.slane %v5796_v37, 4  ;;  %v6352_v5 = vsel %vm10418_vm2, %v6347_v63, %v6351_v58  ;;  %v16499_v30 = vld [vmem:[#allocation73_spill] sm:$0xff]  ;;  %v14886_v37 = vpop.permute.xlu0 %7988 }
 0x4cb   : > { %7908 = vrot.lane.b32.xlu0 %v9357_v7, %s9816_s19  ;;  %v6356_v59 = vor.u32 %v6355_v41, %v6351_v58  ;;  %v5806_v49 = vrot.slane %v5804_v0, 4  ;;  %v5809_v14 = vrot.slane %v5807_v20, 5  ;;  %v5817_v17 = vshrl.u32 %v14871_v62, 16  ;;  %v9757_v7 = vld [vmem:[#allocation3 + $0xa4] sm:$0x1]  ;;  %16500 = vst [vmem:[#allocation41_spill] sm:$0xff] %v14886_v37 }
 0x4cc   : > { %v5815_v19 = vrot.slane %v5813_v27, 5  ;;  %v5802_v16 = vsel %vm10418_vm2, %v5797_v9, %v5801_v57  ;;  %v5823_v61 = vshll.u32 %v9757_v7, 16  ;;  %v6955_v38 = vor.u32 %v16499_v30, %v16498_v56  ;;  %v9760_v37 = vld [vmem:[#allocation3 + $0xac] sm:$0xf] }
 0x4cd   : > { %v6357_v23 = vrot.slane %v6356_v59, 4  ;;  %v9265_v63 = vcombine.low %v5792_v33, %v5802_v16  ;;  %v5810_v41 = vor.u32 %v5809_v14, %v5806_v49  ;;  %v5819_v58 = vrot.slane %v5817_v17, 4  ;;  %v14892_v59 = vpop.permute.xlu1 %7894  ;;  %v9759_v49 = vld [vmem:[#allocation3 + $0x98] sm:$0x1]  ;;  %v16503_v17 = vld [vmem:[#allocation74_spill] sm:$0xff] }
 0x4ce   : > { %v6958_v0 = vshll.u32 %v9758_v42, 16  ;;  %v5825_v27 = vrot.slane %v5823_v61, 5  ;;  %v6956_v62 = vrot.slane %v6955_v38, 4  ;;  %v16502_v57 = vshrl.u32 %v16501_v43, 16  ;;  %v16504_v42 = vld [vmem:[#allocation75_spill] sm:$0xff]  ;;  %v16505_v61 = vld [vmem:[#allocation69_spill] sm:$0xff]  ;;  %v14899_v43 = vpop.permute.xlu0 %7990 }
 0x4cf   : > { %v6362_v20 = vsel %vm10418_vm2, %v6357_v23, %v6361_v28  ;;  %7404 = vrot.lane.b32.xlu1 %v9265_v63, %s9807_s21  ;;  %v5811_v7 = vrot.slane %v5810_v41, 4  ;;  %v5820_v30 = vor.u32 %v5819_v58, %v5815_v19  ;;  %v6968_v14 = vshll.u32 %v9759_v49, 16  ;;  %16507 = vst [vmem:[#allocation42_spill] sm:$0xff] %v14899_v43  ;;  %v9761_v49 = vld [vmem:[#allocation3 + $0xb0] sm:$0x1] }
 0x4d0   : > { %v6964_v9 = vrot.slane %v16502_v57, 4  ;;  %v9311_v56 = vcombine.low %v6352_v5, %v6362_v20  ;;  %v6960_v33 = vrot.slane %v6958_v0, 5  ;;  %v6418_v16 = vor.u32 %v16504_v42, %v16503_v17 }
 0x4d1   : > { %v6421_v28 = vshll.u32 %v9760_v37, 16  ;;  %v16506_v23 = vshrl.u32 %v16505_v61, 16  ;;  %v5816_v5 = vsel %vm10418_vm2, %v5811_v7, %v5815_v19  ;;  %v5821_v63 = vrot.slane %v5820_v30, 4  ;;  %v14906_v17 = vpop.permute.xlu1 %7384  ;;  %v9762_v19 = vld [vmem:[#allocation3 + $0xa0] sm:$0xf] }
 0x4d2   : > { %7656 = vrot.lane.b32.xlu0 %v9311_v56, %s9809_s26  ;;  %v6961_v41 = vsel %vm10418_vm2, %v6956_v62, %v6960_v33  ;;  %v6965_v58 = vor.u32 %v6964_v9, %v6960_v33  ;;  %v6970_v0 = vrot.slane %v6968_v14, 5  ;;  %v6419_v20 = vrot.slane %v6418_v16, 4  ;;  %v16508_v56 = vld [vmem:[#allocation77_spill] sm:$0xff]  ;;  %v14914_v14 = vpop.permute.xlu0 %7480 }
 0x4d3   : > { %v6427_v38 = vrot.slane %v16506_v23, 4  ;;  %v6423_v57 = vrot.slane %v6421_v28, 5  ;;  %v6431_v37 = vshll.u32 %v9761_v49, 16  ;;  %v5826_v42 = vsel %vm10418_vm2, %v5821_v63, %v5825_v27  ;;  %v16509_v23 = vld [vmem:[#allocation78_spill] sm:$0xff]  ;;  %16510 = vst [vmem:[#allocation31_spill] sm:$0xff] %v14914_v14  ;;  %v16511_v27 = vld [vmem:[#allocation71_spill] sm:$0xff] }
 0x4d4   : > { %v6966_v61 = vrot.slane %v6965_v58, 4  ;;  %v6394_v43 = vor.u32 %v16509_v23, %v16508_v56  ;;  %v6397_v7 = vshll.u32 %v9762_v19, 16  ;;  %v9266_v30 = vcombine.low %v5816_v5, %v5826_v42  ;;  %v9763_v5 = vld [vmem:[#allocation3 + $0xa4] sm:$0x1]  ;;  %v16513_v19 = vld [vmem:[#allocation79_spill] sm:$0xff] }
 0x4d5   : > { %v6424_v62 = vsel %vm10418_vm2, %v6419_v20, %v6423_v57  ;;  %v6428_v9 = vor.u32 %v6427_v38, %v6423_v57  ;;  %v6433_v33 = vrot.slane %v6431_v37, 5  ;;  %v16512_v63 = vshrl.u32 %v16511_v27, 16  ;;  %v16514_v20 = vld [vmem:[#allocation80_spill] sm:$0xff]  ;;  %v14923_v57 = vpop.permute.xlu1 %7386  ;;  %v14937_v14 = vld [vmem:[#allocation3 + $0xa8] sm:$0xf] }
 0x4d6   : > { %v6971_v16 = vsel %vm10418_vm2, %v6966_v61, %v6970_v0  ;;  %v6395_v28 = vrot.slane %v6394_v43, 4  ;;  %v6399_v49 = vrot.slane %v6397_v7, 5  ;;  %7406 = vrot.lane.b32.xlu1 %v9266_v30, %s9807_s21  ;;  %v6407_v42 = vshll.u32 %v9763_v5, 16  ;;  %v16515_v61 = vld [vmem:[#allocation8_spill] sm:$0xff]  ;;  %v14933_v5 = vpop.permute.xlu0 %7736  ;;  %16520 = vst [vmem:[#allocation47_spill] sm:$0xff] %v14937_v14 }
 0x4d7   : > { %v6403_v58 = vrot.slane %v16512_v63, 4  ;;  %v9359_v56 = vcombine.low %v6961_v41, %v6971_v16  ;;  %v6429_v23 = vrot.slane %v6428_v9, 4  ;;  %v7027_v38 = vor.u32 %v16514_v20, %v16513_v19  ;;  %v9764_v16 = vld [vmem:[#allocation3 + $0xbc] sm:$0x1]  ;;  %16517 = vst [vmem:[#allocation45_spill] sm:$0xff] %v14933_v5  ;;  %v16527_v5 = vld [vmem:[#allocation86_spill] sm:$0xff] }
 0x4d8   : > { %v6400_v37 = vsel %vm10418_vm2, %v6395_v28, %v6399_v49  ;;  %v7030_v43 = vshll.u32 %v14536_v34, 16  ;;  %v16516_v7 = vshrl.u32 %v16515_v61, 16  ;;  %v6409_v30 = vrot.slane %v6407_v42, 5 }
 0x4d9   : > { %v6404_v0 = vor.u32 %v6403_v58, %v6399_v49  ;;  %7912 = vrot.lane.b32.xlu0 %v9359_v56, %s9816_s19  ;;  %v6434_v41 = vsel %vm10418_vm2, %v6429_v23, %v6433_v33  ;;  %v7028_v9 = vrot.slane %v7027_v38, 4  ;;  %v7040_v63 = vshll.u32 %v9764_v16, 16  ;;  %v16518_v49 = vld [vmem:[#allocation81_spill] sm:$0xff]  ;;  %v16519_v58 = vld [vmem:[#allocation82_spill] sm:$0xff]  ;;  %v9766_v23 = vld [vmem:[#allocation3 + $0xb0] sm:$0x1]  ;;  %v14941_v38 = vpop.permute.xlu1 %7642 }
 0x4da   : > { %v7036_v27 = vrot.slane %v16516_v7, 4  ;;  %v9314_v19 = vcombine.low %v6424_v62, %v6434_v41  ;;  %v7032_v28 = vrot.slane %v7030_v43, 5  ;;  %v7003_v34 = vor.u32 %v16519_v58, %v16518_v49  ;;  %v9765_v7 = vld [vmem:[#allocation3 + $0xac] sm:$0xf] }
 0x4db   : > { %v6405_v20 = vrot.slane %v6404_v0, 4  ;;  %v7042_v61 = vrot.slane %v7040_v63, 5  ;;  %v7006_v56 = vshll.u32 %v9765_v7, 16  ;;  %v16522_v53 = vshrl.u32 %v16521_v25, 16 }
 0x4dc   : > { %v7016_v42 = vshll.u32 %v9766_v23, 16  ;;  %7662 = vrot.lane.b32.xlu1 %v9314_v19, %s9809_s26  ;;  %v7033_v0 = vsel %vm10418_vm2, %v7028_v9, %v7032_v28  ;;  %v7037_v43 = vor.u32 %v7036_v27, %v7032_v28  ;;  %v7004_v41 = vrot.slane %v7003_v34, 4  ;;  %v14952_v23 = vld [vmem:[#allocation3 + $0xac] sm:$0xf] }
 0x4dd   : > { %v7012_v33 = vrot.slane %v16522_v53, 4  ;;  %v6410_v62 = vsel %vm10418_vm2, %v6405_v20, %v6409_v30  ;;  %v7008_v63 = vrot.slane %v7006_v56, 5  ;;  %v5828_v25 = vshrl.u32 %v14937_v14, 16  ;;  %v14949_v53 = vpop.permute.xlu0 %7992  ;;  %16524 = vst [vmem:[#allocation50_spill] sm:$0xff] %v14952_v23  ;;  %v14960_v28 = vpop.permute.xlu1 %7898 }
 0x4de   : > { %v9313_v16 = vcombine.low %v6400_v37, %v6410_v62  ;;  %v7018_v49 = vrot.slane %v7016_v42, 5  ;;  %16523 = vst [vmem:[#allocation39_spill] sm:$0xff] %v14949_v53  ;;  %v7038_v58 = vrot.slane %v7037_v43, 4  ;;  %v5831_v7 = vshll.u32 %v14937_v14, 16  ;;  %v14964_v43 = vld [vmem:[#allocation3 + $0xb4] sm:$0xf] }
 0x4df   : > { %v5837_v19 = vshll.u32 %v14952_v23, 16  ;;  %v5841_v30 = vshrl.u32 %v14952_v23, 16  ;;  %v7009_v37 = vsel %vm10418_vm2, %v7004_v41, %v7008_v63  ;;  %v7013_v27 = vor.u32 %v7012_v33, %v7008_v63  ;;  %16525 = vst [vmem:[#allocation51_spill] sm:$0xff] %v14964_v43  ;;  %v16526_v53 = vld [vmem:[#allocation85_spill] sm:$0xff] }
 0x4e0   : > { %7660 = vrot.lane.b32.xlu0 %v9313_v16, %s9809_s26  ;;  %v5830_v9 = vrot.slane %v5828_v25, 4  ;;  %v5847_v20 = vshll.u32 %v14555_v24, 16  ;;  %v7043_v34 = vsel %vm10418_vm2, %v7038_v58, %v7042_v61  ;;  %v5833_v56 = vrot.slane %v5831_v7, 5 }
 0x4e1   : > { %v5839_v42 = vrot.slane %v5837_v19, 5  ;;  %v5843_v62 = vrot.slane %v5841_v30, 4  ;;  %v9362_v14 = vcombine.low %v7033_v0, %v7043_v34  ;;  %v7014_v23 = vrot.slane %v7013_v27, 4  ;;  %v14968_v33 = vpop.permute.xlu0 %7994 }
 0x4e2   : > { %v5849_v16 = vrot.slane %v5847_v20, 5  ;;  %v6442_v41 = vor.u32 %v16527_v5, %v16526_v53  ;;  %16528 = vst [vmem:[#allocation63_spill] sm:$0xff] %v14968_v33  ;;  %v5834_v63 = vor.u32 %v5833_v56, %v5830_v9  ;;  %v6445_v25 = vshll.u32 %v14587_v55, 16  ;;  %v14978_v5 = vpop.permute.xlu1 %7388  ;;  %v14980_v55 = vld [vmem:[#allocation3 + $0xc4] sm:$0xf]  ;;  %v16534_v33 = vld [vmem:[#allocation88_spill] sm:$0xff] }
 0x4e3   : > { %v5844_v24 = vor.u32 %v5843_v62, %v5839_v42  ;;  %v16530_v15 = vshrl.u32 %v16529_v51, 16  ;;  %7918 = vrot.lane.b32.xlu1 %v9362_v14, %s9816_s19  ;;  %v7019_v58 = vsel %vm10418_vm2, %v7014_v23, %v7018_v49  ;;  %v6455_v7 = vshll.u32 %v14576_v45, 16  ;;  %v14984_v20 = vld [vmem:[#allocation3 + $0xb8] sm:$0xf] }
 0x4e4   : > { %v6443_v0 = vrot.slane %v6442_v41, 4  ;;  %v5852_v19 = vshrl.u32 %v14964_v43, 16  ;;  %v9361_v53 = vcombine.low %v7009_v37, %v7019_v58  ;;  %v5835_v30 = vrot.slane %v5834_v63, 4  ;;  %16531 = vst [vmem:[#allocation64_spill] sm:$0xff] %v14984_v20 }
 0x4e5   : > { %v6451_v61 = vrot.slane %v16530_v15, 4  ;;  %v5845_v27 = vrot.slane %v5844_v24, 4  ;;  %v6447_v9 = vrot.slane %v6445_v25, 5  ;;  %v7058_v15 = vshrl.u32 %v14980_v55, 16  ;;  %v14987_v45 = vpop.permute.xlu0 %7484 }
 0x4e6   : > { %v5854_v51 = vrot.slane %v5852_v19, 4  ;;  %v5855_v14 = vshll.u32 %v14964_v43, 16  ;;  %v5861_v49 = vshll.u32 %v14984_v20, 16  ;;  %16532 = vst [vmem:[#allocation57_spill] sm:$0xff] %v14987_v45  ;;  %7916 = vrot.lane.b32.xlu0 %v9361_v53, %s9816_s19  ;;  %v5840_v23 = vsel %vm10418_vm2, %v5835_v30, %v5839_v42  ;;  %v9770_v19 = vld [vmem:[#allocation3 + $0xbc] sm:$0x1] }
 0x4e7   : > { %v5850_v37 = vsel %vm10418_vm2, %v5845_v27, %v5849_v16  ;;  %v6452_v34 = vor.u32 %v6451_v61, %v6447_v9  ;;  %v6457_v56 = vrot.slane %v6455_v7, 5  ;;  %v5865_v24 = vshrl.u32 %v14984_v20, 16  ;;  %v16533_v53 = vld [vmem:[#allocation87_spill] sm:$0xff]  ;;  %v9771_v42 = vld [vmem:[#allocation3 + $0xc4] sm:$0xf] }
 0x4e8   : > { %v9267_v62 = vcombine.low %v5840_v23, %v5850_v37  ;;  %v5857_v41 = vrot.slane %v5855_v14, 5  ;;  %v5863_v63 = vrot.slane %v5861_v49, 5  ;;  %v6448_v25 = vsel %vm10418_vm2, %v6443_v0, %v6447_v9  ;;  %v15000_v7 = vld [vmem:[#allocation3 + $0xc8] sm:$0x1]  ;;  %v15003_v14 = vpop.permute.xlu1 %7390 }
 0x4e9   : > { %v6453_v58 = vrot.slane %v6452_v34, 4  ;;  %v5871_v43 = vshll.u32 %v9770_v19, 16  ;;  %v7051_v45 = vor.u32 %v16534_v33, %v16533_v53  ;;  %v6473_v30 = vshrl.u32 %v9771_v42, 16  ;;  %v15005_v49 = vpop.permute.xlu0 %7740 }
 0x4ea   : > { %7408 = vrot.lane.b32.xlu1 %v9267_v62, %s9807_s21  ;;  %v5858_v16 = vor.u32 %v5857_v41, %v5854_v51  ;;  %v5867_v61 = vrot.slane %v5865_v24, 4  ;;  %v7054_v27 = vshll.u32 %v14980_v55, 16  ;;  %16535 = vst [vmem:[#allocation54_spill] sm:$0xff] %v15005_v49  ;;  %v7060_v23 = vrot.slane %v7058_v15, 4  ;;  %v16536_v41 = vld [vmem:[#allocation83_spill] sm:$0xff]  ;;  %v16537_v24 = vld [vmem:[#allocation84_spill] sm:$0xff] }
 0x4eb   : > { %v6458_v0 = vsel %vm10418_vm2, %v6453_v58, %v6457_v56  ;;  %v5873_v9 = vrot.slane %v5871_v43, 5  ;;  %v7052_v19 = vrot.slane %v7051_v45, 4  ;;  %v7064_v51 = vshll.u32 %v15000_v7, 16  ;;  %v9772_v43 = vld [vmem:[#allocation3 + $0xc8] sm:$0x1] }
 0x4ec   : > { %v9315_v33 = vcombine.low %v6448_v25, %v6458_v0  ;;  %v5859_v37 = vrot.slane %v5858_v16, 4  ;;  %v5868_v34 = vor.u32 %v5867_v61, %v5863_v63  ;;  %v7056_v62 = vrot.slane %v7054_v27, 5  ;;  %v7106_v27 = vld [vmem:[#allocation3 + $0xc0] sm:$0xe]  ;;  %v7107_v0 = vld [vmem:[#allocation3 + $0xcc] sm:$0xe] }
 0x4ed   : > { %v6466_v53 = vor.u32 %v16537_v24, %v16536_v41  ;;  %v6469_v20 = vshll.u32 %v9771_v42, 16  ;;  %v6475_v56 = vrot.slane %v6473_v30, 4  ;;  %v6479_v15 = vshll.u32 %v9772_v43, 16  ;;  %v15015_v25 = vpop.permute.xlu0 %7996  ;;  %v15019_v42 = vpop.permute.xlu1 %7646  ;;  %v9774_v43 = vld [vmem:[#allocation3 + $0xd4] sm:$0x1] }
 0x4ee   : > { %7664 = vrot.lane.b32.xlu0 %v9315_v33, %s9809_s26  ;;  %v5864_v49 = vsel %vm10418_vm2, %v5859_v37, %v5863_v63  ;;  %v5869_v3 = vrot.slane %v5868_v34, 4  ;;  %v7061_v58 = vor.u32 %v7060_v23, %v7056_v62  ;;  %v7057_v63 = vsel %vm10418_vm2, %v7052_v19, %v7056_v62  ;;  %v9773_v62 = vld [vmem:[#allocation3 + $0xd0] sm:$0xf] }
 0x4ef   : > { %v6467_v45 = vrot.slane %v6466_v53, 4  ;;  %v6471_v61 = vrot.slane %v6469_v20, 5  ;;  %v7066_v30 = vrot.slane %v7064_v51, 5  ;;  %v6481_v23 = vrot.slane %v6479_v15, 5 }
 0x4f0   : > { %v5874_v16 = vsel %vm10418_vm2, %v5869_v3, %v5873_v9  ;;  %v7062_v37 = vrot.slane %v7061_v58, 4  ;;  %v9235_v20 = vrot.slane %v7106_v27, 9  ;;  %v9236_v9 = vrot.slane %v7107_v0, 9 }
 0x4f1   : > { %v9268_v33 = vcombine.low %v5864_v49, %v5874_v16  ;;  %v6472_v34 = vsel %vm10418_vm2, %v6467_v45, %v6471_v61  ;;  %v6476_v41 = vor.u32 %v6475_v56, %v6471_v61  ;;  %v15025_v24 = vpop.permute.xlu0 %7998  ;;  %v7256_v49 = vrot.slane %v14980_v55, 5  ;;  %v9775_v45 = vld [vmem:[#allocation3 + $0x10] sm:$0xf]  ;;  %v9776_v56 = vld [vmem:[#allocation3 + $0xc] sm:$0xf] }
 0x4f2   : > { %v7067_v3 = vsel %vm10418_vm2, %v7062_v37, %v7066_v30  ;;  %v7263_v51 = vrot.slane %v9773_v62, 5  ;;  %v7266_v58 = vrot.slane %v9774_v43, 5  ;;  %v9238_v15 = vcombine.low %v9776_v56, %v9775_v45 }
 0x4f3   : > { %7410 = vrot.lane.b32.xlu1 %v9268_v33, %s9807_s21  ;;  %v9363_v53 = vcombine.low %v7057_v63, %v7067_v3  ;;  %v6477_v19 = vrot.slane %v6476_v41, 4  ;;  %v7258_v16 = vrot.slane %v7256_v49, 4  ;;  %v7259_v61 = vrot.slane %v15000_v7, 5  ;;  %v15037_v33 = vpop.permute.xlu1 %7902 }
 0x4f4   : > { %v7264_v55 = vsel %vm10431_vm6, %v9236_v9, %v7263_v51  ;;  %v7265_v0 = vrot.slane %v7263_v51, 4  ;;  %v8009_v63 = vsel %vm16538_vm11, %v9238_v15, %v14862_v4  ;;  %v7257_v30 = vsel %vm10431_vm6, %v9235_v20, %v7256_v49  ;;  %v9664_v4 = vld [vmem:[%s15946_s3 + $0x10] ss:$0 sps:$4 sm:$0x33]   ;;  %v9778_v20 = vld [vmem:[#allocation3] sm:$0xf] }
 0x4f5   : > { %7920 = vrot.lane.b32.xlu0 %v9363_v53, %s9816_s19  ;;  %v6482_v27 = vsel %vm10418_vm2, %v6477_v19, %v6481_v23  ;;  %v7260_v7 = vsel %vm10431_vm6, %v7258_v16, %v7259_v61  ;;  %v15045_v41 = vpop.permute.xlu0 %7488  ;;  %v8055_v9 = vsel %vm16539_vm12, %v8009_v63, %v14613_v44  ;;  %vm8084_vm2 = vcmask 97280   ;;  %v16540_v51 = vld [vmem:[#allocation93_spill] sm:$0xff]  ;;  %v9779_v61 = vld [vmem:[#allocation3 + $0x28] sm:$0xf] }
 0x4f6   : > { %v9316_v37 = vcombine.low %v6472_v34, %v6482_v27  ;;  %v9379_v29 = vcombine.low %v7257_v30, %v7260_v7  ;;  %v7267_v23 = vsel %vm10431_vm6, %v7265_v0, %v7266_v58  ;;  %v9777_v34 = vld [vmem:[#allocation3 + $0x4] sm:$0xf]  ;;  %v8088_v19 = vsel %vm8084_vm2, %v8055_v9, %v14264_v10  ;;  %v9666_v10 = vld [vmem:[%s15946_s3] sm:$0xff]   ;;  %v9782_v30 = vld [vmem:[#allocation3 + $0x18] sm:$0xf] }
 0x4f7   : > { %v9380_v3 = vcombine.low %v7264_v55, %v7267_v23  ;;  %v9237_v49 = vcombine.low %v9778_v20, %v9777_v34  ;;  %v15056_v53 = vpop.permute.xlu1 %7392  ;;  %vm8332_vm6 = vcmask 1041408   ;;  %vm8149_vm0 = vcmask 162816   ;;  %v9780_v27 = vld [vmem:[#allocation3 + $0x24] sm:$0xf]  ;;  %v9783_v34 = vld [vmem:[#allocation3 + $0x40] sm:$0xf] }
 0x4f8   : > { %7666 = vrot.lane.b32.xlu1 %v9316_v37, %s9809_s26  ;;  %9558 = vmatprep.subr.msk.bf16.mxu1 %vm8332_vm6, %v9664_v4  ;;  %v8334_v62 = vsel %vm8332_vm6, %v9664_v4, 0  ;;  %vm16542_vm10 = vcmask 130048   ;;  %v9240_v55 = vcombine.low %v9780_v27, %v9779_v61  ;;  %vm16546_vm3 = vcmask 195584   ;;  %v9781_v37 = vld [vmem:[#allocation3 + $0x1c] sm:$0xf]  ;;  %vm16552_vm6 = vmmov %vm16548_vm5 }
 0x4f9   : > { %8000 = vrot.lane.b32.xlu0 %v9379_v29, %s9814_s5  ;;  %v15064_v44 = vpop.permute.xlu0 %7744  ;;  %v8006_v43 = vsel %vm16541_vm1, %v9237_v49, %v16540_v51  ;;  %9520 = vmatpush3.bf16.msra.mxu1 %v8334_v62  ;;  %v8120_v58 = vsel %vm16542_vm10, %v8088_v19, %v14879_v35  ;;  %vm16544_vm7 = vmmov %vm16542_vm10  ;;  %vm8214_vm15 = vcmask 228352   ;;  %v9239_v7 = vcombine.low %v9782_v30, %v9781_v37  ;;  %v9785_v51 = vld [vmem:[#allocation3 + $0x34] sm:$0xf]  ;;  %v16569_v37 = vld [vmem:[#allocation10_spill] sm:$0xff] }
 0x4fa   : > { %9521 = vmatprep.subr.bf16.mxu1 %v9665_v11  ;;  %v8053_v45 = vsel %vm16543_vm8, %v8006_v43, %v14220_v22  ;;  %v8153_v16 = vsel %vm8149_vm0, %v8120_v58, %v14632_v54  ;;  %v8015_v63 = vsel %vm16545_vm13, %v9240_v55, %v14923_v57  ;;  %vm16547_vm9 = vmmov %vm16546_vm3  ;;  %vm8299_vm4 = vcmask 293888   ;;  %v9786_v43 = vld [vmem:[#allocation3 + $0x30] sm:$0xf]  ;;  %v9788_v61 = vld [vmem:[#allocation3 + $0x54] sm:$0xf] }
 0x4fb   : > { %v15075_v56 = vpop.permute.xlu1 %7394  ;;  %v8086_v15 = vsel %vm8084_vm2, %v8053_v45, %v14249_v39  ;;  %v8185_v39 = vsel %vm16546_vm3, %v8153_v16, %v14310_v12  ;;  %v8059_v29 = vsel %vm16548_vm5, %v8015_v63, %v14644_v13  ;;  %v8012_v12 = vsel %vm16549_vm14, %v9239_v7, %v14906_v17  ;;  %vm16553_vm1 = vmmov %vm16544_vm7  ;;  %v16571_v7 = vld [vmem:[#allocation36_spill] sm:$0xff] }
 0x4fc   : > { %8002 = vrot.lane.b32.xlu1 %v9380_v3, %s9814_s5  ;;  %v8218_v57 = vsel %vm8214_vm15, %v8185_v39, %v14892_v59  ;;  %vm16550_vm11 = vcmask 261120   ;;  %v8057_v59 = vsel %vm16552_vm6, %v8012_v12, %v14664_v52  ;;  %vm16554_vm10 = vmmov %vm16553_vm1  ;;  %v9241_v58 = vcombine.low %v9786_v43, %v9785_v51  ;;  %v16568_v39 = vld [vmem:[#allocation48_spill] sm:$0xff]  ;;  %v9789_v12 = vld [vmem:[#allocation3 + $0x4c] sm:$0xf] }
 0x4fd   : > { %9522 = vmatpush3.bf16.msra.mxu1 %v9665_v11  ;;  %vm16551_vm12 = vmmov %vm16550_vm11  ;;  %v16583_v51 = vld [vmem:[#allocation23_spill] sm:$0xff] }
 0x4fe   : > { %9523 = vmatprep.subr.bf16.mxu1 %v9666_v10  ;;  %v8250_v13 = vsel %vm16551_vm12, %v8218_v57, %v14653_v31  ;;  %vm16555_vm8 = vmmov %vm16545_vm13  ;;  %v16573_v57 = vld [vmem:[#allocation13_spill] sm:$0xff] }
 0x4ff   : > { %v7637_v35 = vpop.permute.xlu0 %7636  ;;  %v15092_v23 = vpop.permute.xlu1 %7650  ;;  %vm16557_vm13 = vmmov %vm16548_vm5 }
 0x500   : > { %v8118_v0 = vsel %vm16544_vm7, %v8086_v15, %v7637_v35  ;;  %vm16556_vm7 = vmmov %vm16546_vm3  ;;  %v16564_v35 = vld [vmem:[#allocation15_spill] sm:$0xff] }
 0x501   : > { %v8151_v22 = vsel %vm8149_vm0, %v8118_v0, %v14623_v32  ;;  %9524 = vmatpush3.bf16.msra.mxu1 %v9666_v10  ;;  %vm16559_vm5 = vmmov %vm16550_vm11  ;;  %v16565_v0 = vld [vmem:[#allocation44_spill] sm:$0xff] }
 0x502   : > { %v8183_v54 = vsel %vm16547_vm9, %v8151_v22, %v14295_v40  ;;  %v8092_v40 = vsel %vm8084_vm2, %v8059_v29, %v14344_v21  ;;  %v9784_v21 = vld [vmem:[#allocation3 + $0x3c] sm:$0xf]  ;;  %vm16558_vm9 = vmmov %vm16555_vm8 }
 0x503   : > { %v8124_v17 = vsel %vm16553_vm1, %v8092_v40, %v14941_v38  ;;  %v15111_v4 = vpop.permute.xlu1 %7906  ;;  %v9242_v20 = vcombine.low %v9784_v21, %v9783_v34  ;;  %vm16560_vm14 = vmmov %vm16552_vm6 }
 0x504   : > { %v8157_v31 = vsel %vm8149_vm0, %v8124_v17, %v14662_v1  ;;  %vm16563_vm12 = vmmov %vm16553_vm1 }
 0x505   : > { %v7893_v32 = vpop.permute.xlu0 %7892  ;;  %v8021_v52 = vsel %vm16555_vm8, %v9242_v20, %v15003_v14  ;;  %v8189_v19 = vsel %vm16556_vm7, %v8157_v31, %v14367_v50  ;;  %vm16566_vm6 = vmmov %vm16553_vm1  ;;  %v9791_v31 = vld [vmem:[#allocation3 + $0x70] sm:$0xf] }
 0x506   : > { %v8216_v3 = vsel %vm8214_vm15, %v8183_v54, %v7893_v32  ;;  %v8222_v14 = vsel %vm8214_vm15, %v8189_v19, %v14960_v28  ;;  %vm16567_vm1 = vmmov %vm16555_vm8 }
 0x507   : > { %v8248_v9 = vsel %vm16550_vm11, %v8216_v3, %v14641_v47  ;;  %v8090_v47 = vsel %vm8084_vm2, %v8057_v59, %v14336_v2  ;;  %v8063_v2 = vsel %vm16557_vm13, %v8021_v52, %v14671_v46  ;;  %vm16562_vm11 = vmmov %vm16559_vm5  ;;  %v9790_v3 = vld [vmem:[#allocation3 + $0x48] sm:$0xf] }
 0x508   : > { %9525 = vmatprep.mubr.msk.bf16.mxu1 %vm8299_vm4, %v8248_v9  ;;  %v8096_v50 = vsel %vm8084_vm2, %v8063_v2, %v14396_v60  ;;  %v9787_v60 = vld [vmem:[#allocation3 + $0x58] sm:$0xf]  ;;  %vm16572_vm8 = vmmov %vm16557_vm13  ;;  %v9243_v40 = vcombine.low %v9790_v3, %v9789_v12  ;;  %v16576_v59 = vld [vmem:[#allocation14_spill] sm:$0xff] }
 0x509   : > { %9526 = vmatmul.mubr.msk.bf16.vlgmr.msra.gmra.mxu1 %vm8299_vm4, %v8250_v13  ;;  %v15124_v62 = vpop.permute.xlu1 %7396  ;;  %v9244_v27 = vcombine.low %v9788_v61, %v9787_v60  ;;  %vm16574_vm7 = vmmov %vm16546_vm3  ;;  %v16594_v61 = vld [vmem:[#allocation17_spill] sm:$0xff] }
 0x50a   : > { %vm16575_vm13 = vmmov %vm16567_vm1 }
 0x50b   : > { %v8027_v22 = vsel %vm16567_vm1, %v9244_v27, %v15075_v56  ;;  %v8024_v13 = vsel %vm16575_vm13, %v9243_v40, %v15056_v53 }
 0x50c   : > { %v7641_v49 = vpop.permute.xlu0 %7640  ;;  %v8067_v29 = vsel %vm16572_vm8, %v8027_v22, %v16571_v7  ;;  %v16599_v22 = vld [vmem:[#allocation37_spill] sm:$0xff] }
 0x50d   : > { %v8122_v11 = vsel %vm16554_vm10, %v8090_v47, %v7641_v49  ;;  %vm16570_vm10 = vmmov %vm16546_vm3  ;;  %v8100_v17 = vsel %vm8084_vm2, %v8067_v29, %v16576_v59  ;;  %v16579_v47 = vld [vmem:[#allocation26_spill] sm:$0xff]  ;;  %v16611_v59 = vld [vmem:[#allocation21_spill] sm:$0xff] }
 0x50e   : > { %v8155_v38 = vsel %vm8149_vm0, %v8122_v11, %v14677_v26  ;;  %v8018_v26 = vsel %vm16558_vm9, %v9241_v58, %v14978_v5  ;;  %v8128_v5 = vsel %vm16563_vm12, %v8096_v50, %v15019_v42  ;;  %v9792_v11 = vld [vmem:[#allocation3 + $0x6c] sm:$0xf]  ;;  %vm16585_vm12 = vmmov %vm16566_vm6 }
 0x50f   : > { %v8187_v1 = vsel %vm16546_vm3, %v8155_v38, %v14359_v36  ;;  %v8061_v46 = vsel %vm16560_vm14, %v8018_v26, %v14726_v6  ;;  %v16561_v36 = vld [vmem:[#allocation18_spill] sm:$0xff]  ;;  %v8161_v6 = vsel %vm8149_vm0, %v8128_v5, %v16565_v0  ;;  %vm16577_vm3 = vmmov %vm16559_vm5  ;;  %v9246_v52 = vcombine.low %v9792_v11, %v9791_v31  ;;  %v16582_v38 = vld [vmem:[#allocation19_spill] sm:$0xff] }
 0x510   : > { %v7399_v16 = vpop.permute.xlu1 %7398  ;;  %v8254_v28 = vsel %vm16562_vm11, %v8222_v14, %v16561_v36  ;;  %v8193_v30 = vsel %vm16570_vm10, %v8161_v6, %v16569_v37  ;;  %vm16578_vm9 = vmmov %vm16577_vm3  ;;  %v16587_v14 = vld [vmem:[#allocation20_spill] sm:$0xff]  ;;  %v9794_v36 = vld [vmem:[#allocation3 + $0x60] sm:$0xf] }
 0x511   : > { %v8226_v9 = vsel %vm8214_vm15, %v8193_v30, %v15037_v33  ;;  %vm16581_vm14 = vmmov %vm16566_vm6  ;;  %v16597_v6 = vld [vmem:[#allocation46_spill] sm:$0xff]  ;;  %v16603_v37 = vld [vmem:[#allocation25_spill] sm:$0xff] }
 0x512   : > { %v8258_v49 = vsel %vm16578_vm9, %v8226_v9, %v14774_v18  ;;  %v8132_v53 = vsel %vm16581_vm14, %v8100_v17, %v15092_v23  ;;  %vm16584_vm11 = vmmov %vm16567_vm1  ;;  %v16604_v30 = vld [vmem:[#allocation49_spill] sm:$0xff]  ;;  %v16608_v9 = vld [vmem:[#allocation56_spill] sm:$0xff] }
 0x513   : > { %v7897_v10 = vpop.permute.xlu0 %7896  ;;  %v8165_v19 = vsel %vm8149_vm0, %v8132_v53, %v16582_v38  ;;  %v8033_v18 = vsel %vm16584_vm11, %v9246_v52, %v7399_v16  ;;  %vm16598_vm13 = vmmov %vm16577_vm3  ;;  %v9248_v7 = vcombine.low %v16604_v30, %v16603_v37  ;;  %v16639_v30 = vld [vmem:[#allocation34_spill] sm:$0xff] }
 0x514   : > { %v8220_v45 = vsel %vm8214_vm15, %v8187_v1, %v7897_v10  ;;  %v16586_v1 = vld [vmem:[#allocation30_spill] sm:$0xff]  ;;  %v16589_v10 = vld [vmem:[#allocation5_spill] sm:$0xff]  ;;  %vm16601_vm9 = vmmov %vm16585_vm12 }
 0x515   : > { %v8252_v15 = vsel %vm16559_vm5, %v8220_v45, %v14695_v48  ;;  %v8094_v48 = vsel %vm8084_vm2, %v8061_v46, %v16564_v35  ;;  %vm16580_vm5 = vmmov %vm16572_vm8  ;;  %v16591_v45 = vld [vmem:[#allocation11_spill] sm:$0xff]  ;;  %v9793_v46 = vld [vmem:[#allocation3 + $0x64] sm:$0xf] }
 0x516   : > { %9529 = vmatprep.mubr.msk.bf16.mxu1 %vm8299_vm4, %v8252_v15  ;;  %v7655_v54 = vpop.permute.xlu1 %7654  ;;  %v8065_v33 = vsel %vm16580_vm5, %v8024_v13, %v16579_v47  ;;  %vm16590_vm1 = vmmov %vm16580_vm5  ;;  %v16613_v47 = vld [vmem:[#allocation12_spill] sm:$0xff] }
 0x517   : > { %9530 = vmatmul.mubr.msk.bf16.gmra.mxu1 %vm8299_vm4, %v8254_v28  ;;  %v8098_v43 = vsel %vm8084_vm2, %v8065_v33, %v16583_v51  ;;  %v8071_v50 = vsel %vm16590_vm1, %v8033_v18, %v16589_v10  ;;  %v9245_v28 = vcombine.low %v9794_v36, %v9793_v46  ;;  %vm16593_vm8 = vmmov %vm16584_vm11  ;;  %v16617_v51 = vld [vmem:[#allocation41_spill] sm:$0xff]  ;;  %v16619_v18 = vld [vmem:[#allocation42_spill] sm:$0xff] }
 0x518   : > { %v8104_v27 = vsel %vm8084_vm2, %v8071_v50, %v16594_v61  ;;  %vm16606_vm5 = vmmov %vm16601_vm9  ;;  %v16625_v50 = vld [vmem:[#allocation7_spill] sm:$0xff]  ;;  %v16627_v46 = vld [vmem:[#allocation45_spill] sm:$0xff] }
 0x519   : > { %v8030_v60 = vsel %vm16593_vm8, %v9245_v28, %v15124_v62  ;;  %v16602_v62 = vld [vmem:[#allocation9_spill] sm:$0xff]  ;;  %vm16607_vm14 = vmmov %vm16593_vm8  ;;  %v16628_v28 = vld [vmem:[#allocation90_spill] sm:$0xff] }
 0x51a   : > { %v7645_v55 = vpop.permute.xlu0 %7644 }
 0x51b   : > { %v8126_v63 = vsel %vm16566_vm6, %v8094_v48, %v7645_v55  ;;  %vm16588_vm6 = vmmov %vm16574_vm7  ;;  %v16595_v48 = vld [vmem:[#allocation22_spill] sm:$0xff] }
 0x51c   : > { %v8159_v42 = vsel %vm8149_vm0, %v8126_v63, %v16568_v39  ;;  %v8197_v26 = vsel %vm16588_vm6, %v8165_v19, %v16587_v14  ;;  %vm16592_vm10 = vmmov %vm16588_vm6  ;;  %v8136_v39 = vsel %vm16601_vm9, %v8104_v27, %v7655_v54  ;;  %v16616_v19 = vld [vmem:[#allocation92_spill] sm:$0xff]  ;;  %v9797_v27 = vld [vmem:[#allocation3 + $0x94] sm:$0xf] }
 0x51d   : > { %v8191_v32 = vsel %vm16574_vm7, %v8159_v42, %v16573_v57  ;;  %v7911_v21 = vpop.permute.xlu1 %7910  ;;  %v8230_v16 = vsel %vm8214_vm15, %v8197_v26, %v15111_v4  ;;  %vm16596_vm7 = vmmov %vm16577_vm3  ;;  %v8169_v42 = vsel %vm8149_vm0, %v8136_v39, %v16602_v62  ;;  %v16624_v26 = vld [vmem:[#allocation29_spill] sm:$0xff]  ;;  %v16637_v39 = vld [vmem:[#allocation16_spill] sm:$0xff] }
 0x51e   : > { %v8262_v63 = vsel %vm16598_vm13, %v8230_v16, %v16597_v6  ;;  %vm16610_vm11 = vmmov %vm16588_vm6 }
 0x51f   : > { %vm16623_vm13 = vmmov %vm16606_vm5 }
 0x520   : > { %v7901_v56 = vpop.permute.xlu0 %7900  ;;  %vm16629_vm9 = vmmov %vm16610_vm11 }
 0x521   : > { %v8224_v34 = vsel %vm8214_vm15, %v8191_v32, %v7901_v56  ;;  %v16605_v32 = vld [vmem:[#allocation27_spill] sm:$0xff]  ;;  %v16609_v56 = vld [vmem:[#allocation28_spill] sm:$0xff] }
 0x522   : > { %v8256_v20 = vsel %vm16577_vm3, %v8224_v34, %v14755_v8  ;;  %vm16600_vm3 = vmmov %vm16590_vm1  ;;  %v8201_v13 = vsel %vm16610_vm11, %v8169_v42, %v16609_v56  ;;  %v9795_v34 = vld [vmem:[#allocation3 + $0x7c] sm:$0xf] }
 0x523   : > { %9533 = vmatprep.mubr.msk.bf16.mxu1 %vm8299_vm4, %v8256_v20  ;;  %v8069_v4 = vsel %vm16600_vm3, %v8030_v60, %v16599_v22  ;;  %v9796_v20 = vld [vmem:[#allocation3 + $0x78] sm:$0xf]  ;;  %v8234_v53 = vsel %vm8214_vm15, %v8201_v13, %v7911_v21  ;;  %v16631_v60 = vld [vmem:[#allocation6_spill] sm:$0xff]  ;;  %v16647_v13 = vld [vmem:[#allocation33_spill] sm:$0xff] }
 0x524   : > { %9534 = vmatmul.mubr.msk.bf16.gmra.mxu1 %vm8299_vm4, %v8258_v49  ;;  %v7401_v58 = vpop.permute.xlu1 %7400  ;;  %v8102_v12 = vsel %vm8084_vm2, %v8069_v4, %v16605_v32  ;;  %v9247_v49 = vcombine.low %v9796_v20, %v9795_v34  ;;  %v16642_v32 = vld [vmem:[#allocation57_spill] sm:$0xff] }
 0x528   : > { %v7649_v8 = vpop.permute.xlu0 %7648 }
 0x529   : > { %v8130_v2 = vsel %vm16585_vm12, %v8098_v43, %v7649_v8  ;;  %vm16612_vm12 = vmmov %vm16588_vm6 }
 0x52a   : > { %v8163_v23 = vsel %vm8149_vm0, %v8130_v2, %v16586_v1  ;;  %vm16614_vm6 = vmmov %vm16590_vm1  ;;  %v16621_v1 = vld [vmem:[#allocation31_spill] sm:$0xff] }
 0x52b   : > { %v8195_v15 = vsel %vm16592_vm10, %v8163_v23, %v16591_v45  ;;  %vm16615_vm1 = vmmov %vm16593_vm8 }
 0x52c   : > { %v8036_v52 = vsel %vm16615_vm1, %v9247_v49, %v7401_v58  ;;  %vm16618_vm10 = vmmov %vm16596_vm7  ;;  %v16650_v49 = vld [vmem:[#allocation54_spill] sm:$0xff] }
 0x52d   : > { %v7403_v55 = vpop.permute.xlu1 %7402  ;;  %vm16620_vm8 = vmmov %vm16596_vm7 }
 0x52e   : > { %v8039_v40 = vsel %vm16607_vm14, %v9248_v7, %v7403_v55  ;;  %v8266_v2 = vsel %vm16620_vm8, %v8234_v53, %v16619_v18  ;;  %v16632_v55 = vld [vmem:[#allocation52_spill] sm:$0xff]  ;;  %vm16635_vm14 = vmmov %vm16615_vm1 }
 0x52f   : > { %v7905_v5 = vpop.permute.xlu0 %7904  ;;  %v8075_v33 = vsel %vm16614_vm6, %v8039_v40, %v16613_v47  ;;  %vm16636_vm11 = vmmov %vm16615_vm1  ;;  %v16644_v40 = vld [vmem:[#allocation63_spill] sm:$0xff] }
 0x530   : > { %v8228_v35 = vsel %vm8214_vm15, %v8195_v15, %v7905_v5  ;;  %v8108_v8 = vsel %vm8084_vm2, %v8075_v33, %v16616_v19  ;;  %v16630_v5 = vld [vmem:[#allocation58_spill] sm:$0xff]  ;;  %v16651_v33 = vld [vmem:[#allocation91_spill] sm:$0xff] }
 0x531   : > { %v8260_v0 = vsel %vm16596_vm7, %v8228_v35, %v16595_v48  ;;  %vm16622_vm7 = vmmov %vm16600_vm3  ;;  %v9250_v61 = vcombine.low %v16631_v60, %v16630_v5  ;;  %v9249_v35 = vcombine.low %v16632_v55, %v9797_v27 }
 0x532   : > { %9537 = vmatprep.mubr.msk.bf16.mxu1 %vm8299_vm4, %v8260_v0  ;;  %v8073_v21 = vsel %vm16622_vm7, %v8036_v52, %v16621_v1  ;;  %vm16626_vm3 = vmmov %vm16606_vm5  ;;  %v16633_v0 = vld [vmem:[#allocation89_spill] sm:$0xff] }
 0x533   : > { %9538 = vmatmul.mubr.msk.bf16.gmra.mxu1 %vm8299_vm4, %v8262_v63  ;;  %v7659_v29 = vpop.permute.xlu1 %7658  ;;  %v8106_v10 = vsel %vm8084_vm2, %v8073_v21, %v16624_v26  ;;  %vm16643_vm1 = vmmov %vm16622_vm7  ;;  %v16661_v26 = vld [vmem:[#allocation38_spill] sm:$0xff] }
 0x534   : > { %v8140_v58 = vsel %vm16623_vm13, %v8108_v8, %v7659_v29  ;;  %v16640_v29 = vld [vmem:[#allocation39_spill] sm:$0xff]  ;;  %vm16649_vm7 = vmmov %vm16626_vm3 }
 0x535   : > { %v8173_v45 = vsel %vm8149_vm0, %v8140_v58, %v16625_v50 }
 0x536   : > { %v7653_v57 = vpop.permute.xlu0 %7652  ;;  %v8205_v16 = vsel %vm16629_vm9, %v8173_v45, %v16628_v28  ;;  %v16664_v45 = vld [vmem:[#allocation51_spill] sm:$0xff]  ;;  %v16666_v28 = vld [vmem:[#allocation53_spill] sm:$0xff] }
 0x537   : > { %v8134_v3 = vsel %vm16606_vm5, %v8102_v12, %v7653_v57  ;;  %vm16634_vm5 = vmmov %vm16629_vm9 }
 0x538   : > { %v8167_v54 = vsel %vm8149_vm0, %v8134_v3, %v16608_v9  ;;  %vm16652_vm13 = vmmov %vm16634_vm5 }
 0x539   : > { %v8199_v17 = vsel %vm16612_vm12, %v8167_v54, %v16611_v59  ;;  %v7915_v31 = vpop.permute.xlu1 %7914  ;;  %vm16638_vm12 = vmmov %vm16614_vm6 }
 0x53a   : > { %v8238_v22 = vsel %vm8214_vm15, %v8205_v16, %v7915_v31  ;;  %vm16641_vm6 = vmmov %vm16620_vm8 }
 0x53b   : > { %vm16646_vm8 = vmmov %vm16626_vm3 }
 0x53c   : > { %vm16657_vm9 = vmmov %vm16641_vm6 }
 0x53d   : > { %v7909_v11 = vpop.permute.xlu0 %7908 }
 0x53e   : > { %v8232_v38 = vsel %vm8214_vm15, %v8199_v17, %v7909_v11  ;;  %v16648_v17 = vld [vmem:[#allocation32_spill] sm:$0xff] }
 0x53f   : > { %v8264_v43 = vsel %vm16618_vm10, %v8232_v38, %v16617_v51  ;;  %vm16645_vm10 = vmmov %vm16641_vm6  ;;  %v16653_v11 = vld [vmem:[#allocation24_spill] sm:$0xff]  ;;  %v16655_v51 = vld [vmem:[#allocation50_spill] sm:$0xff] }
 0x540   : > { %9541 = vmatprep.mubr.msk.bf16.mxu1 %vm8299_vm4, %v8264_v43  ;;  %v8270_v9 = vsel %vm16645_vm10, %v8238_v22, %v16644_v40  ;;  %v16656_v43 = vld [vmem:[#allocation47_spill] sm:$0xff]  ;;  %v16673_v22 = vld [vmem:[#allocation94_spill] sm:$0xff] }
 0x541   : > { %9542 = vmatmul.mubr.msk.bf16.gmra.mxu1 %vm8299_vm4, %v8266_v2  ;;  %v7405_v23 = vpop.permute.xlu1 %7404  ;;  %v9251_v18 = vcombine.low %v16656_v43, %v16655_v51 }
 0x542   : > { %v8042_v4 = vsel %vm16636_vm11, %v9249_v35, %v7405_v23 }
 0x543   : > { %v8077_v12 = vsel %vm16643_vm1, %v8042_v4, %v16642_v32 }
 0x544   : > { %v7657_v14 = vpop.permute.xlu0 %7656  ;;  %v8110_v59 = vsel %vm8084_vm2, %v8077_v12, %v16647_v13 }
 0x545   : > { %v8138_v15 = vsel %vm16626_vm3, %v8106_v10, %v7657_v14  ;;  %vm16654_vm3 = vmmov %vm16634_vm5 }
 0x546   : > { %v8171_v36 = vsel %vm8149_vm0, %v8138_v15, %v16627_v46  ;;  %vm16668_vm10 = vmmov %vm16654_vm3 }
 0x547   : > { %v8203_v6 = vsel %vm16634_vm5, %v8171_v36, %v16633_v0  ;;  %vm16658_vm5 = vmmov %vm16641_vm6 }
 0x548   : > { %v7407_v48 = vpop.permute.xlu1 %7406 }
 0x549   : > { %v8045_v63 = vsel %vm16635_vm14, %v9250_v61, %v7407_v48  ;;  %vm16659_vm14 = vmmov %vm16636_vm11  ;;  %v16669_v61 = vld [vmem:[#allocation40_spill] sm:$0xff] }
 0x54a   : > { %v8079_v62 = vsel %vm16638_vm12, %v8045_v63, %v16637_v39  ;;  %vm16660_vm11 = vmmov %vm16643_vm1  ;;  %v16675_v39 = vld [vmem:[#allocation95_spill] sm:$0xff] }
 0x54b   : > { %v7913_v42 = vpop.permute.xlu0 %7912  ;;  %v8112_v7 = vsel %vm8084_vm2, %v8079_v62, %v16639_v30  ;;  %vm16662_vm12 = vmmov %vm16649_vm7 }
 0x54c   : > { %v8236_v37 = vsel %vm8214_vm15, %v8203_v6, %v7913_v42  ;;  %v16671_v6 = vld [vmem:[#allocation35_spill] sm:$0xff] }
 0x54d   : > { %v8268_v57 = vsel %vm16641_vm6, %v8236_v37, %v16640_v29  ;;  %vm16665_vm6 = vmmov %vm16659_vm14 }
 0x54e   : > { %v7663_v3 = vpop.permute.xlu1 %7662  ;;  %9545 = vmatprep.mubr.msk.bf16.mxu1 %vm8299_vm4, %v8268_v57 }
 0x54f   : > { %v8144_v54 = vsel %vm16646_vm8, %v8112_v7, %v7663_v3  ;;  %9546 = vmatmul.mubr.msk.bf16.gmra.mxu1 %vm8299_vm4, %v8270_v9  ;;  %vm16670_vm8 = vmmov %vm16649_vm7 }
 0x550   : > { %v8177_v34 = vsel %vm8149_vm0, %v8144_v54, %v16648_v17 }
 0x551   : > { %v8209_v53 = vsel %vm16652_vm13, %v8177_v34, %v16651_v33  ;;  %vm16674_vm13 = vmmov %vm16654_vm3 }
 0x552   : > { %v7661_v56 = vpop.permute.xlu0 %7660 }
 0x553   : > { %v8142_v20 = vsel %vm16649_vm7, %v8110_v59, %v7661_v56  ;;  %vm16672_vm7 = vmmov %vm16658_vm5 }
 0x554   : > { %v8175_v47 = vsel %vm8149_vm0, %v8142_v20, %v16650_v49 }
 0x555   : > { %v7919_v31 = vpop.permute.xlu1 %7918  ;;  %v8207_v52 = vsel %vm16654_vm3, %v8175_v47, %v16653_v11 }
 0x556   : > { %v8242_v38 = vsel %vm8214_vm15, %v8209_v53, %v7919_v31 }
 0x557   : > { %v8274_v21 = vsel %vm16658_vm5, %v8242_v38, %v15025_v24 }
 0x558   : > { %v7917_v19 = vpop.permute.xlu0 %7916 }
 0x559   : > { %v8240_v8 = vsel %vm8214_vm15, %v8207_v52, %v7917_v19 }
 0x55a   : > { %v8272_v2 = vsel %vm16657_vm9, %v8240_v8, %v15015_v25  ;;  %v16663_v25 = vld [vmem:[#allocation64_spill] sm:$0xff] }
 0x55b   : > { %9549 = vmatprep.mubr.msk.bf16.mxu1 %vm8299_vm4, %v8272_v2  ;;  %v9252_v15 = vcombine.low %v16664_v45, %v16663_v25 }
 0x55c   : > { %v7409_v1 = vpop.permute.xlu1 %7408  ;;  %9550 = vmatmul.mubr.msk.bf16.gmra.mxu1 %vm8299_vm4, %v8274_v21 }
 0x55d   : > { %v8048_v58 = vsel %vm16659_vm14, %v9251_v18, %v7409_v1 }
 0x55e   : > { %v8081_v23 = vsel %vm16660_vm11, %v8048_v58, %v15045_v41  ;;  %v16667_v41 = vld [vmem:[#allocation43_spill] sm:$0xff] }
 0x55f   : > { %v8114_v10 = vsel %vm8084_vm2, %v8081_v23, %v16661_v26 }
 0x560   : > { %v7665_v14 = vpop.permute.xlu0 %7664 }
 0x561   : > { %v8146_v50 = vsel %vm16662_vm12, %v8114_v10, %v7665_v14 }
 0x562   : > { %v8179_v24 = vsel %vm8149_vm0, %v8146_v50, %v15064_v44 }
 0x563   : > { %v8211_v60 = vsel %vm16668_vm10, %v8179_v24, %v16667_v41 }
 0x565   : > { %v7411_v46 = vpop.permute.xlu1 %7410 }
 0x566   : > { %v8051_v36 = vsel %vm16665_vm6, %v9252_v15, %v7411_v46 }
 0x567   : > { %v8083_v16 = vsel %vm16643_vm1, %v8051_v36, %v16666_v28  ;;  %v7921_v5 = vpop.permute.xlu0 %7920 }
 0x568   : > { %v8116_v27 = vsel %vm8084_vm2, %v8083_v16, %v16669_v61  ;;  %v8244_v35 = vsel %vm8214_vm15, %v8211_v60, %v7921_v5  ;;  %vm16676_vm2 = vmmov %vm16658_vm5 }
 0x56a   : > { %v7667_v55 = vpop.permute.xlu1 %7666 }
 0x56b   : > { %v8148_v48 = vsel %vm16670_vm8, %v8116_v27, %v7667_v55  ;;  %v8001_v0 = vpop.permute.xlu0 %8000 }
 0x56c   : > { %v8181_v44 = vsel %vm8149_vm0, %v8148_v48, %v16671_v6  ;;  %v8276_v63 = vsel %vm16672_vm7, %v8244_v35, %v8001_v0  ;;  %vm16677_vm0 = vmmov %vm16665_vm6 }
 0x56d   : > { %v8213_v4 = vsel %vm16674_vm13, %v8181_v44, %v16673_v22  ;;  %9553 = vmatprep.mubr.msk.bf16.mxu1 %vm8299_vm4, %v8276_v63  ;;  %vm16680_vm3 = vmmov %vm16677_vm0 }
 0x56e   : > { %v8246_v62 = vsel %vm8214_vm15, %v8213_v4, %v16675_v39  ;;  %v8003_v42 = vpop.permute.xlu1 %8002  ;;  %vm16678_vm15 = vmmov %vm16677_vm0 }
 0x56f   : > { %v8278_v37 = vsel %vm16676_vm2, %v8246_v62, %v8003_v42  ;;  %vm16681_vm9 = vmmov %vm16677_vm0 }
 0x570   : > { %9554 = vmatmul.mubr.msk.bf16.gmra.mxu1 %vm8299_vm4, %v8278_v37  ;;  %vm16679_vm4 = vmmov %vm16677_vm0 }
 0x571   : > { %vm16682_vm5 = vmmov %vm16677_vm0 }
 0x572   : > { %vm16683_vm14 = vmmov %vm16677_vm0 }
 0x573   : > { %vm16684_vm11 = vmmov %vm16677_vm0 }
 0x574   : > { %vm16685_vm12 = vmmov %vm16677_vm0 }
 0x575   : > { %vm16686_vm6 = vmmov %vm16677_vm0 }
 0x576   : > { %vm16687_vm1 = vmmov %vm16677_vm0 }
 0x577   : > { %vm16688_vm10 = vmmov %vm16677_vm0 }
 0x578   : > { %vm16689_vm8 = vmmov %vm16677_vm0 }
 0x579   : > { %vm16690_vm7 = vmmov %vm16677_vm0 }
 0x57a   : > { %vm16691_vm13 = vmmov %vm16677_vm0 }
 0x57b   : > { %vm16692_vm2 = vmmov %vm16677_vm0 }
 0x5c9   : > { %v15320_v30 = vpop.f32.mrf.mxu1 }
 0x5ca   : > { %v8569_v12 = vmul.f32 %v15320_v30, %v15320_v30  ;;  %v8500_v56 = vsel %vm16679_vm4, %v15320_v30, 0.0  ;;  %vm16694_vm4 = vmmov %vm16677_vm0 }
 0x5cb   : > { %v15322_v7 = vpop.f32.mrf.mxu1 }
 0x5cc   : > { %v8567_v57 = vmul.f32 %v15322_v7, %v15322_v7  ;;  %v8497_v3 = vsel %vm16677_vm0, %v15322_v7, 0.0  ;;  %v8602_v20 = vsel %vm16682_vm5, %v8569_v12, 0.0  ;;  %vm16697_vm5 = vmmov %vm16677_vm0 }
 0x5cd   : > { %v15324_v29 = vpop.f32.mrf.mxu1 }
 0x5ce   : > { %v8599_v13 = vsel %vm16680_vm3, %v8567_v57, 0.0  ;;  %v8570_v49 = vmul.f32 %v15324_v29, %v15324_v29  ;;  %v8502_v33 = vsel %vm16683_vm14, %v15324_v29, 0.0  ;;  %vm16695_vm3 = vmmov %vm16677_vm0 }
 0x5cf   : > { %v15328_v32 = vpop.f32.mrf.mxu1  ;;  %vm16698_vm14 = vmmov %vm16677_vm0 }
 0x5d0   : > { %v8498_v40 = vsel %vm16678_vm15, %v15328_v32, 0.0  ;;  %v8568_v9 = vmul.f32 %v15328_v32, %v15328_v32  ;;  %v8604_v11 = vsel %vm16684_vm11, %v8570_v49, 0.0  ;;  %vm16693_vm15 = vmmov %vm16677_vm0 }
 0x5d1   : > { %v8499_v54 = vadd.f32 %v8498_v40, %v8497_v3  ;;  %vm16699_vm11 = vmmov %vm16677_vm0 }
 0x5d2   : > { %v8600_v59 = vsel %vm16681_vm9, %v8568_v9, 0.0  ;;  %vm16696_vm9 = vmmov %vm16677_vm0 }
 0x5d3   : > { %v8501_v17 = vadd.f32 %v8500_v56, %v8499_v54  ;;  %v8601_v34 = vadd.f32 %v8600_v59, %v8599_v13 }
 0x5d5   : > { %v8603_v47 = vadd.f32 %v8602_v20, %v8601_v34  ;;  %v8503_v31 = vadd.f32 %v8502_v33, %v8501_v17 }
 0x5d7   : > { %v15347_v53 = vpop.f32.mrf.mxu1  ;;  %v8605_v38 = vadd.f32 %v8604_v11, %v8603_v47 }
 0x5d8   : > { %v8573_v21 = vmul.f32 %v15347_v53, %v15347_v53  ;;  %v8508_v26 = vsel %vm16688_vm10, %v15347_v53, 0.0  ;;  %vm16703_vm10 = vmmov %vm16677_vm0 }
 0x5d9   : > { %v15350_v52 = vpop.f32.mrf.mxu1 }
 0x5da   : > { %v8504_v19 = vsel %vm16685_vm12, %v15350_v52, 0.0  ;;  %v8571_v8 = vmul.f32 %v15350_v52, %v15350_v52  ;;  %v8610_v15 = vsel %vm16690_vm7, %v8573_v21, 0.0  ;;  %vm16700_vm12 = vmmov %vm16677_vm0 }
 0x5db   : > { %v8505_v51 = vadd.f32 %v8504_v19, %v8503_v31  ;;  %v15356_v43 = vpop.f32.mrf.mxu1  ;;  %vm16705_vm7 = vmmov %vm16677_vm0 }
 0x5dc   : > { %v8606_v18 = vsel %vm16686_vm6, %v8571_v8, 0.0  ;;  %v8574_v50 = vmul.f32 %v15356_v43, %v15356_v43  ;;  %v8510_v46 = vsel %vm16691_vm13, %v15356_v43, 0.0  ;;  %vm16701_vm6 = vmmov %vm16677_vm0 }
 0x5dd   : > { %v8607_v2 = vadd.f32 %v8606_v18, %v8605_v38  ;;  %v15359_v1 = vpop.f32.mrf.mxu1  ;;  %vm16706_vm13 = vmmov %vm16677_vm0 }
 0x5de   : > { %v8506_v58 = vsel %vm16687_vm1, %v15359_v1, 0.0  ;;  %v8572_v23 = vmul.f32 %v15359_v1, %v15359_v1  ;;  %v8612_v16 = vsel %vm16692_vm2, %v8574_v50, 0.0  ;;  %vm16702_vm1 = vmmov %vm16677_vm0 }
 0x5df   : > { %v8507_v14 = vadd.f32 %v8506_v58, %v8505_v51  ;;  %vm16707_vm2 = vmmov %vm16677_vm0 }
 0x5e0   : > { %v8608_v10 = vsel %vm16689_vm8, %v8572_v23, 0.0  ;;  %vm16704_vm8 = vmmov %vm16677_vm0 }
 0x5e1   : > { %v8509_v25 = vadd.f32 %v8508_v26, %v8507_v14  ;;  %v8609_v45 = vadd.f32 %v8608_v10, %v8607_v2 }
 0x5e3   : > { %v8611_v24 = vadd.f32 %v8610_v15, %v8609_v45  ;;  %v8511_v28 = vadd.f32 %v8510_v46, %v8509_v25 }
 0x5e4   : > { %v15375_v36 = vpop.f32.mrf.mxu1 }
 0x5e5   : > { %v8613_v41 = vadd.f32 %v8612_v16, %v8611_v24  ;;  %v8577_v6 = vmul.f32 %v15375_v36, %v15375_v36  ;;  %v8516_v4 = vsel %vm16695_vm3, %v15375_v36, 0.0  ;;  %vm16710_vm3 = vmmov %vm16677_vm0 }
 0x5e6   : > { %v15378_v5 = vpop.f32.mrf.mxu1 }
 0x5e7   : > { %v8512_v60 = vsel %vm16677_vm0, %v15378_v5, 0.0  ;;  %v8575_v61 = vmul.f32 %v15378_v5, %v15378_v5  ;;  %v8618_v57 = vsel %vm16697_vm5, %v8577_v6, 0.0  ;;  %vm16712_vm5 = vmmov %vm16677_vm0 }
 0x5e8   : > { %v8513_v27 = vadd.f32 %v8512_v60, %v8511_v28  ;;  %v15384_v55 = vpop.f32.mrf.mxu1 }
 0x5e9   : > { %v8614_v35 = vsel %vm16693_vm15, %v8575_v61, 0.0  ;;  %v8578_v62 = vmul.f32 %v15384_v55, %v15384_v55  ;;  %v8518_v12 = vsel %vm16698_vm14, %v15384_v55, 0.0  ;;  %vm16708_vm15 = vmmov %vm16677_vm0 }
 0x5ea   : > { %v8615_v48 = vadd.f32 %v8614_v35, %v8613_v41  ;;  %v15387_v0 = vpop.f32.mrf.mxu1  ;;  %vm16713_vm14 = vmmov %vm16677_vm0 }
 0x5eb   : > { %v8514_v44 = vsel %vm16694_vm4, %v15387_v0, 0.0  ;;  %v8576_v63 = vmul.f32 %v15387_v0, %v15387_v0  ;;  %v8620_v54 = vsel %vm16699_vm11, %v8578_v62, 0.0  ;;  %vm16709_vm4 = vmmov %vm16677_vm0 }
 0x5ec   : > { %v8515_v22 = vadd.f32 %v8514_v44, %v8513_v27  ;;  %vm16714_vm11 = vmmov %vm16677_vm0 }
 0x5ed   : > { %v8616_v39 = vsel %vm16696_vm9, %v8576_v63, 0.0  ;;  %vm16711_vm9 = vmmov %vm16677_vm0 }
 0x5ee   : > { %v8517_v42 = vadd.f32 %v8516_v4, %v8515_v22  ;;  %v8617_v37 = vadd.f32 %v8616_v39, %v8615_v48 }
 0x5f0   : > { %v8619_v3 = vadd.f32 %v8618_v57, %v8617_v37  ;;  %v8519_v9 = vadd.f32 %v8518_v12, %v8517_v42 }
 0x5f2   : > { %v8621_v13 = vadd.f32 %v8620_v54, %v8619_v3 }
 0x5f3   : > { %v15403_v40 = vpop.f32.mrf.mxu1 }
 0x5f4   : > { %v8581_v31 = vmul.f32 %v15403_v40, %v15403_v40  ;;  %v8524_v8 = vsel %vm16703_vm10, %v15403_v40, 0.0  ;;  %vm16718_vm10 = vmmov %vm16677_vm0 }
 0x5f5   : > { %v15406_v56 = vpop.f32.mrf.mxu1 }
 0x5f6   : > { %v8520_v59 = vsel %vm16700_vm12, %v15406_v56, 0.0  ;;  %v8579_v17 = vmul.f32 %v15406_v56, %v15406_v56  ;;  %v8626_v21 = vsel %vm16705_vm7, %v8581_v31, 0.0  ;;  %vm16715_vm12 = vmmov %vm16677_vm0 }
 0x5f7   : > { %v8521_v34 = vadd.f32 %v8520_v59, %v8519_v9  ;;  %v15412_v20 = vpop.f32.mrf.mxu1  ;;  %vm16720_vm7 = vmmov %vm16677_vm0 }
 0x5f8   : > { %v8622_v49 = vsel %vm16701_vm6, %v8579_v17, 0.0  ;;  %v8582_v58 = vmul.f32 %v15412_v20, %v15412_v20  ;;  %v8526_v14 = vsel %vm16706_vm13, %v15412_v20, 0.0  ;;  %vm16716_vm6 = vmmov %vm16677_vm0 }
 0x5f9   : > { %v8623_v47 = vadd.f32 %v8622_v49, %v8621_v13  ;;  %v15415_v33 = vpop.f32.mrf.mxu1  ;;  %vm16721_vm13 = vmmov %vm16677_vm0 }
 0x5fa   : > { %v8522_v11 = vsel %vm16702_vm1, %v15415_v33, 0.0  ;;  %v8580_v38 = vmul.f32 %v15415_v33, %v15415_v33  ;;  %v8628_v50 = vsel %vm16707_vm2, %v8582_v58, 0.0  ;;  %vm16717_vm1 = vmmov %vm16677_vm0 }
 0x5fb   : > { %v8523_v19 = vadd.f32 %v8522_v11, %v8521_v34  ;;  %vm16722_vm2 = vmmov %vm16677_vm0 }
 0x5fc   : > { %v8624_v51 = vsel %vm16704_vm8, %v8580_v38, 0.0  ;;  %vm16719_vm8 = vmmov %vm16677_vm0 }
 0x5fd   : > { %v8525_v18 = vadd.f32 %v8524_v8, %v8523_v19  ;;  %v8625_v2 = vadd.f32 %v8624_v51, %v8623_v47 }
 0x5ff   : > { %v8627_v23 = vadd.f32 %v8626_v21, %v8625_v2  ;;  %v8527_v10 = vadd.f32 %v8526_v14, %v8525_v18 }
 0x601   : > { %v15431_v26 = vpop.f32.mrf.mxu1  ;;  %v8629_v15 = vadd.f32 %v8628_v50, %v8627_v23 }
 0x602   : > { %v8585_v6 = vmul.f32 %v15431_v26, %v15431_v26  ;;  %v8532_v63 = vsel %vm16711_vm9, %v15431_v26, 0.0  ;;  %vm16726_vm9 = vmmov %vm16677_vm0 }
 0x603   : > { %v15434_v25 = vpop.f32.mrf.mxu1 }
 0x604   : > { %v8583_v45 = vmul.f32 %v15434_v25, %v15434_v25  ;;  %v8528_v46 = vsel %vm16677_vm0, %v15434_v25, 0.0  ;;  %v8634_v4 = vsel %vm16712_vm5, %v8585_v6, 0.0  ;;  %vm16727_vm5 = vmmov %vm16677_vm0 }
 0x605   : > { %v15440_v24 = vpop.f32.mrf.mxu1  ;;  %v8529_v28 = vadd.f32 %v8528_v46, %v8527_v10 }
 0x606   : > { %v8630_v16 = vsel %vm16708_vm15, %v8583_v45, 0.0  ;;  %v8586_v39 = vmul.f32 %v15440_v24, %v15440_v24  ;;  %v8534_v37 = vsel %vm16713_vm14, %v15440_v24, 0.0  ;;  %vm16723_vm15 = vmmov %vm16677_vm0 }
 0x607   : > { %v15443_v41 = vpop.f32.mrf.mxu1  ;;  %v8631_v60 = vadd.f32 %v8630_v16, %v8629_v15  ;;  %vm16728_vm14 = vmmov %vm16677_vm0 }
 0x608   : > { %v8530_v61 = vsel %vm16709_vm4, %v15443_v41, 0.0  ;;  %v8584_v27 = vmul.f32 %v15443_v41, %v15443_v41  ;;  %v8636_v3 = vsel %vm16714_vm11, %v8586_v39, 0.0  ;;  %vm16724_vm4 = vmmov %vm16677_vm0 }
 0x609   : > { %v8531_v35 = vadd.f32 %v8530_v61, %v8529_v28  ;;  %vm16729_vm11 = vmmov %vm16677_vm0 }
 0x60a   : > { %v8632_v48 = vsel %vm16710_vm3, %v8584_v27, 0.0  ;;  %vm16725_vm3 = vmmov %vm16677_vm0 }
 0x60b   : > { %v8633_v44 = vadd.f32 %v8632_v48, %v8631_v60  ;;  %v8533_v22 = vadd.f32 %v8532_v63, %v8531_v35 }
 0x60d   : > { %v8635_v42 = vadd.f32 %v8634_v4, %v8633_v44  ;;  %v8535_v12 = vadd.f32 %v8534_v37, %v8533_v22 }
 0x60f   : > { %v15457_v62 = vpop.f32.mrf.mxu1  ;;  %v8637_v13 = vadd.f32 %v8636_v3, %v8635_v42 }
 0x610   : > { %v8589_v8 = vmul.f32 %v15457_v62, %v15457_v62  ;;  %v8540_v2 = vsel %vm16719_vm8, %v15457_v62, 0.0  ;;  %vm16734_vm8 = vmmov %vm16677_vm0 }
 0x611   : > { %v15461_v57 = vpop.f32.mrf.mxu1 }
 0x612   : > { %v8587_v9 = vmul.f32 %v15461_v57, %v15461_v57  ;;  %v8536_v59 = vsel %vm16715_vm12, %v15461_v57, 0.0  ;;  %v8642_v23 = vsel %vm16720_vm7, %v8589_v8, 0.0  ;;  %vm16730_vm12 = vmmov %vm16677_vm0 }
 0x613   : > { %v15466_v54 = vpop.f32.mrf.mxu1  ;;  %v8537_v34 = vadd.f32 %v8536_v59, %v8535_v12  ;;  %vm16735_vm7 = vmmov %vm16677_vm0 }
 0x614   : > { %v8638_v47 = vsel %vm16716_vm6, %v8587_v9, 0.0  ;;  %v8590_v14 = vmul.f32 %v15466_v54, %v15466_v54  ;;  %v8542_v45 = vsel %vm16721_vm13, %v15466_v54, 0.0  ;;  %vm16731_vm6 = vmmov %vm16677_vm0 }
 0x615   : > { %v15470_v17 = vpop.f32.mrf.mxu1  ;;  %v8639_v11 = vadd.f32 %v8638_v47, %v8637_v13  ;;  %vm16736_vm13 = vmmov %vm16677_vm0 }
 0x616   : > { %v8588_v49 = vmul.f32 %v15470_v17, %v15470_v17  ;;  %v8538_v31 = vsel %vm16717_vm1, %v15470_v17, 0.0  ;;  %v8644_v28 = vsel %vm16722_vm2, %v8590_v14, 0.0  ;;  %vm16732_vm1 = vmmov %vm16677_vm0 }
 0x617   : > { %v8539_v19 = vadd.f32 %v8538_v31, %v8537_v34  ;;  %vm16737_vm2 = vmmov %vm16677_vm0 }
 0x618   : > { %v8640_v38 = vsel %vm16718_vm10, %v8588_v49, 0.0  ;;  %vm16733_vm10 = vmmov %vm16677_vm0 }
 0x619   : > { %v8641_v51 = vadd.f32 %v8640_v38, %v8639_v11  ;;  %v8541_v21 = vadd.f32 %v8540_v2, %v8539_v19 }
 0x61b   : > { %v8643_v10 = vadd.f32 %v8642_v23, %v8641_v51  ;;  %v8543_v15 = vadd.f32 %v8542_v45, %v8541_v21 }
 0x61c   : > { %v15480_v18 = vpop.f32.mrf.mxu1 }
 0x61d   : > { %v8645_v60 = vadd.f32 %v8644_v28, %v8643_v10  ;;  %v8593_v4 = vmul.f32 %v15480_v18, %v15480_v18  ;;  %v8548_v42 = vsel %vm16726_vm9, %v15480_v18, 0.0 }
 0x61e   : > { %v15484_v58 = vpop.f32.mrf.mxu1 }
 0x61f   : > { %v8591_v16 = vmul.f32 %v15484_v58, %v15484_v58  ;;  %v8544_v61 = vsel %vm16677_vm0, %v15484_v58, 0.0  ;;  %v8650_v12 = vsel %vm16727_vm5, %v8593_v4, 0.0 }
 0x620   : > { %v15489_v50 = vpop.f32.mrf.mxu1  ;;  %v8545_v35 = vadd.f32 %v8544_v61, %v8543_v15 }
 0x621   : > { %v8646_v48 = vsel %vm16723_vm15, %v8591_v16, 0.0  ;;  %v8594_v3 = vmul.f32 %v15489_v50, %v15489_v50  ;;  %v8550_v59 = vsel %vm16728_vm14, %v15489_v50, 0.0 }
 0x622   : > { %v15493_v46 = vpop.f32.mrf.mxu1  ;;  %v8647_v44 = vadd.f32 %v8646_v48, %v8645_v60 }
 0x623   : > { %v8592_v27 = vmul.f32 %v15493_v46, %v15493_v46  ;;  %v8546_v6 = vsel %vm16724_vm4, %v15493_v46, 0.0  ;;  %v8652_v47 = vsel %vm16729_vm11, %v8594_v3, 0.0 }
 0x624   : > { %v8547_v22 = vadd.f32 %v8546_v6, %v8545_v35 }
 0x625   : > { %v8648_v63 = vsel %vm16725_vm3, %v8592_v27, 0.0 }
 0x626   : > { %v8649_v39 = vadd.f32 %v8648_v63, %v8647_v44  ;;  %v8549_v37 = vadd.f32 %v8548_v42, %v8547_v22 }
 0x628   : > { %v8651_v9 = vadd.f32 %v8650_v12, %v8649_v39  ;;  %v8551_v49 = vadd.f32 %v8550_v59, %v8549_v37 }
 0x62a   : > { %v8653_v38 = vadd.f32 %v8652_v47, %v8651_v9 }
 0x630   : > { %v15513_v13 = vpop.f32.mrf.mxu1 }
 0x631   : > { %v8597_v21 = vmul.f32 %v15513_v13, %v15513_v13  ;;  %v8556_v15 = vsel %vm16733_vm10, %v15513_v13, 0.0 }
 0x632   : > { %v15517_v34 = vpop.f32.mrf.mxu1 }
 0x633   : > { %v8552_v31 = vsel %vm16730_vm12, %v15517_v34, 0.0  ;;  %v8595_v11 = vmul.f32 %v15517_v34, %v15517_v34  ;;  %v8658_v27 = vsel %vm16735_vm7, %v8597_v21, 0.0 }
 0x634   : > { %v15524_v19 = vpop.f32.mrf.mxu1  ;;  %v8553_v51 = vadd.f32 %v8552_v31, %v8551_v49 }
 0x635   : > { %v8654_v8 = vsel %vm16731_vm6, %v8595_v11, 0.0  ;;  %v8598_v28 = vmul.f32 %v15524_v19, %v15524_v19  ;;  %v8558_v35 = vsel %vm16736_vm13, %v15524_v19, 0.0 }
 0x636   : > { %v15527_v2 = vpop.f32.mrf.mxu1  ;;  %v8655_v10 = vadd.f32 %v8654_v8, %v8653_v38 }
 0x637   : > { %v8554_v23 = vsel %vm16732_vm1, %v15527_v2, 0.0  ;;  %v8596_v14 = vmul.f32 %v15527_v2, %v15527_v2  ;;  %v8660_v44 = vsel %vm16737_vm2, %v8598_v28, 0.0 }
 0x638   : > { %v8555_v45 = vadd.f32 %v8554_v23, %v8553_v51 }
 0x639   : > { %v8656_v16 = vsel %vm16734_vm8, %v8596_v14, 0.0 }
 0x63a   : > { %v8557_v60 = vadd.f32 %v8556_v15, %v8555_v45  ;;  %v8657_v61 = vadd.f32 %v8656_v16, %v8655_v10 }
 0x63c   : > { %v8559_v48 = vadd.f32 %v8558_v35, %v8557_v60  ;;  %v8659_v6 = vadd.f32 %v8658_v27, %v8657_v61 }
 0x63e   : > { %v8560_v63 = vrot.slane %v8559_v48, 4  ;;  %v8661_v22 = vadd.f32 %v8660_v44, %v8659_v6 }
 0x640   : > { %v8561_v4 = vadd.f32 %v8560_v63, %v8559_v48  ;;  %v8662_v39 = vrot.slane %v8661_v22, 4 }
 0x642   : > { %v8562_v42 = vrot.slane %v8561_v4, 2  ;;  %v8663_v37 = vadd.f32 %v8662_v39, %v8661_v22 }
 0x644   : > { %v8563_v12 = vadd.f32 %v8562_v42, %v8561_v4  ;;  %v8664_v3 = vrot.slane %v8663_v37, 2 }
 0x646   : > { %v8564_v9 = vrot.slane %v8563_v12, 1  ;;  %v8665_v59 = vadd.f32 %v8664_v3, %v8663_v37 }
 0x648   : > { %v8565_v49 = vadd.f32 %v8564_v9, %v8563_v12  ;;  %v8666_v47 = vrot.slane %v8665_v59, 1 }
 0x64a   : > { %v15544_v31 = vmul.f32 0.00390625, %v8565_v49  ;;  %v8667_v11 = vadd.f32 %v8666_v47, %v8665_v59 }
 0x64c   : > { %v8668_v38 = vmul.f32 0.00390625, %v8667_v11  ;;  %v8669_v8 = vmul.f32 %v15544_v31, %v15544_v31  ;;  %v8672_v14 = vsub.f32 %v15322_v7, %v15544_v31  ;;  %v8673_v10 = vsub.f32 %v15328_v32, %v15544_v31 }
 0x64d   : > { %v8674_v45 = vsub.f32 %v15320_v30, %v15544_v31  ;;  %v8675_v15 = vsub.f32 %v15324_v29, %v15544_v31  ;;  %v8676_v28 = vsub.f32 %v15350_v52, %v15544_v31  ;;  %v8677_v16 = vsub.f32 %v15359_v1, %v15544_v31 }
 0x64e   : > { %v8670_v51 = vsub.f32 %v8668_v38, %v8669_v8  ;;  %v8678_v60 = vsub.f32 %v15347_v53, %v15544_v31  ;;  %v8679_v7 = vsub.f32 %v15356_v43, %v15544_v31  ;;  %v8680_v32 = vsub.f32 %v15378_v5, %v15544_v31 }
 0x64f   : > { %v8681_v30 = vsub.f32 %v15387_v0, %v15544_v31  ;;  %v8682_v29 = vsub.f32 %v15375_v36, %v15544_v31  ;;  %v8683_v52 = vsub.f32 %v15384_v55, %v15544_v31  ;;  %v8684_v1 = vsub.f32 %v15406_v56, %v15544_v31 }
 0x650   : > { %v8671_v21 = vmax.f32 %v8670_v51, 0.0  ;;  %v8685_v53 = vsub.f32 %v15415_v33, %v15544_v31  ;;  %v8686_v43 = vsub.f32 %v15403_v40, %v15544_v31  ;;  %v8687_v5 = vsub.f32 %v15412_v20, %v15544_v31 }
 0x651   : > { %v8688_v0 = vsub.f32 %v15434_v25, %v15544_v31  ;;  %v8689_v36 = vsub.f32 %v15443_v41, %v15544_v31  ;;  %v8690_v55 = vsub.f32 %v15431_v26, %v15544_v31  ;;  %v8691_v56 = vsub.f32 %v15440_v24, %v15544_v31 }
 0x652   : > { %v8704_v23 = vadd.f32 1e-05, %v8671_v21  ;;  %v8692_v40 = vsub.f32 %v15461_v57, %v15544_v31  ;;  %v8693_v20 = vsub.f32 %v15470_v17, %v15544_v31  ;;  %v8694_v33 = vsub.f32 %v15457_v62, %v15544_v31 }
 0x653   : > { %v8695_v25 = vsub.f32 %v15466_v54, %v15544_v31  ;;  %v8696_v26 = vsub.f32 %v15484_v58, %v15544_v31  ;;  %v8697_v24 = vsub.f32 %v15493_v46, %v15544_v31  ;;  %v8698_v41 = vsub.f32 %v15480_v18, %v15544_v31 }
 0x654   : > { %9677 = vrsqrt.f32 %v8704_v23  ;;  %v8699_v57 = vsub.f32 %v15489_v50, %v15544_v31  ;;  %v8700_v17 = vsub.f32 %v15517_v34, %v15544_v31  ;;  %v8701_v62 = vsub.f32 %v15527_v2, %v15544_v31 }
 0x655   : > { %v8702_v54 = vsub.f32 %v15513_v13, %v15544_v31  ;;  %v8703_v58 = vsub.f32 %v15524_v19, %v15544_v31 }
 0x661   : > { %v15588_v61 = vpop.eup %9677 }
 0x662   : > { %v15615_v46 = vmul.f32 %v15588_v61, %v8672_v14  ;;  %v15618_v18 = vmul.f32 %v15588_v61, %v8673_v10  ;;  %v15621_v50 = vmul.f32 %v15588_v61, %v8674_v45  ;;  %v15624_v34 = vmul.f32 %v15588_v61, %v8675_v15 }
 0x663   : > { %v15627_v2 = vmul.f32 %v15588_v61, %v8676_v28  ;;  %v15630_v13 = vmul.f32 %v15588_v61, %v8677_v16  ;;  %v15633_v19 = vmul.f32 %v15588_v61, %v8678_v60  ;;  %v15636_v27 = vmul.f32 %v15588_v61, %v8679_v7 }
 0x664   : > { %v15639_v35 = vmul.f32 %v15588_v61, %v8680_v32  ;;  %v15642_v48 = vmul.f32 %v15588_v61, %v8681_v30  ;;  %v15645_v6 = vmul.f32 %v15588_v61, %v8682_v29  ;;  %v15648_v44 = vmul.f32 %v15588_v61, %v8683_v52 }
 0x665   : > { %v15651_v63 = vmul.f32 %v15588_v61, %v8684_v1  ;;  %v15654_v22 = vmul.f32 %v15588_v61, %v8685_v53  ;;  %v15657_v4 = vmul.f32 %v15588_v61, %v8686_v43  ;;  %v15660_v39 = vmul.f32 %v15588_v61, %v8687_v5 }
 0x666   : > { %v15663_v42 = vmul.f32 %v15588_v61, %v8688_v0  ;;  %v15666_v37 = vmul.f32 %v15588_v61, %v8689_v36  ;;  %v15669_v12 = vmul.f32 %v15588_v61, %v8690_v55  ;;  %v15672_v3 = vmul.f32 %v15588_v61, %v8691_v56 }
 0x667   : > { %v15675_v9 = vmul.f32 %v15588_v61, %v8692_v40  ;;  %v15678_v59 = vmul.f32 %v15588_v61, %v8693_v20  ;;  %v15681_v49 = vmul.f32 %v15588_v61, %v8694_v33  ;;  %v15684_v47 = vmul.f32 %v15588_v61, %v8695_v25 }
 0x668   : > { %v15687_v31 = vmul.f32 %v15588_v61, %v8696_v26  ;;  %v15690_v11 = vmul.f32 %v15588_v61, %v8697_v24  ;;  %v15693_v38 = vmul.f32 %v15588_v61, %v8698_v41  ;;  %v15696_v8 = vmul.f32 %v15588_v61, %v8699_v57 }
 0x669   : > { %v15700_v51 = vmul.f32 %v15588_v61, %v8700_v17  ;;  %v15703_v21 = vmul.f32 %v15588_v61, %v8701_v62  ;;  %vm8738_vm0 = vcmp.gt.f32.partialorder %v15615_v46, 0.0  ;;  %vm8739_vm15 = vcmp.gt.f32.partialorder %v15618_v18, 0.0 }
 0x66a   : > { %vm8740_vm4 = vcmp.gt.f32.partialorder %v15621_v50, 0.0  ;;  %vm8741_vm3 = vcmp.gt.f32.partialorder %v15624_v34, 0.0  ;;  %vm8742_vm9 = vcmp.gt.f32.partialorder %v15627_v2, 0.0  ;;  %vm8743_vm5 = vcmp.gt.f32.partialorder %v15630_v13, 0.0 }
 0x66b   : > { %vm8744_vm14 = vcmp.gt.f32.partialorder %v15633_v19, 0.0  ;;  %vm8745_vm11 = vcmp.gt.f32.partialorder %v15636_v27, 0.0  ;;  %vm8746_vm12 = vcmp.gt.f32.partialorder %v15639_v35, 0.0  ;;  %v15721_v23 = vmul.f32 %v15588_v61, %v8702_v54 }
 0x66c   : > { %v8770_v14 = vmul.f32 0.01, %v15615_v46  ;;  %v8771_v10 = vmul.f32 0.01, %v15618_v18  ;;  %v8772_v45 = vmul.f32 0.01, %v15621_v50  ;;  %v15731_v15 = vmul.f32 %v15588_v61, %v8703_v58 }
 0x66d   : > { %vm8753_vm2 = vcmp.gt.f32.partialorder %v15660_v39, 0.0  ;;  %vm8754_vm1 = vcmp.gt.f32.partialorder %v15663_v42, 0.0  ;;  %v8773_v28 = vmul.f32 0.01, %v15624_v34  ;;  %v8774_v16 = vmul.f32 0.01, %v15627_v2 }
 0x66e   : > { %v8775_v60 = vmul.f32 0.01, %v15630_v13  ;;  %vm8759_vm13 = vcmp.gt.f32.partialorder %v15678_v59, 0.0  ;;  %v8776_v7 = vmul.f32 0.01, %v15633_v19  ;;  %v8802_v29 = vsel %vm8738_vm0, %v15615_v46, %v8770_v14  ;;  %vm16738_vm0 = vmmov %vm16731_vm6 }
 0x66f   : > { %v8777_v32 = vmul.f32 0.01, %v15636_v27  ;;  %v8778_v30 = vmul.f32 0.01, %v15639_v35  ;;  %v8779_v52 = vmul.f32 0.01, %v15642_v48  ;;  %v8803_v43 = vsel %vm8739_vm15, %v15618_v18, %v8771_v10  ;;  %vm16739_vm15 = vmmov %vm16738_vm0 }
 0x670   : > { %v8780_v1 = vmul.f32 0.01, %v15645_v6  ;;  %v8781_v53 = vmul.f32 0.01, %v15648_v44  ;;  %8834 = vst.msk [vmem:[%s15718_s30] sm:$0xff] %vm16738_vm0, %v8802_v29  ;;  %vm8764_vm7 = vcmp.gt.f32.partialorder %v15693_v38, 0.0  ;;  %v8804_v55 = vsel %vm8740_vm4, %v15621_v50, %v8772_v45  ;;  %vm16740_vm4 = vmmov %vm16731_vm6 }
 0x671   : > { %vm8765_vm10 = vcmp.gt.f32.partialorder %v15696_v8, 0.0  ;;  %v8782_v5 = vmul.f32 0.01, %v15651_v63  ;;  %v8783_v0 = vmul.f32 0.01, %v15654_v22  ;;  %8835 = vst.msk [vmem:[%s15718_s30 + $0x8] sm:$0xff] %vm16739_vm15, %v8803_v43  ;;  %v8805_v20 = vsel %vm8741_vm3, %v15624_v34, %v8773_v28  ;;  %vm16741_vm3 = vmmov %vm16740_vm4 }
 0x672   : > { %v8784_v36 = vmul.f32 0.01, %v15657_v4  ;;  %vm8768_vm0 = vcmp.gt.f32.partialorder %v15721_v23, 0.0  ;;  %vm8769_vm8 = vcmp.gt.f32.partialorder %v15731_v15, 0.0  ;;  %v8785_v56 = vmul.f32 0.01, %v15660_v39 }
 0x673   : > { %v8786_v61 = vmul.f32 0.01, %v15663_v42  ;;  %v8787_v40 = vmul.f32 0.01, %v15666_v37  ;;  %8836 = vst.msk [vmem:[%s15718_s30 + $0x10] sm:$0xff] %vm16731_vm6, %v8804_v55  ;;  %v8806_v24 = vsel %vm8742_vm9, %v15627_v2, %v8774_v16  ;;  %v8807_v62 = vsel %vm8743_vm5, %v15630_v13, %v8775_v60  ;;  %vm16742_vm9 = vmmov %vm16741_vm3 }
 0x674   : > { %v8788_v33 = vmul.f32 0.01, %v15669_v12  ;;  %v8789_v25 = vmul.f32 0.01, %v15672_v3  ;;  %v8790_v26 = vmul.f32 0.01, %v15675_v9  ;;  %v8808_v18 = vsel %vm8744_vm14, %v15633_v19, %v8776_v7  ;;  %vm16743_vm5 = vmmov %vm16741_vm3 }
 0x675   : > { %8837 = vst.msk [vmem:[%s15718_s30 + $0x18] sm:$0xff] %vm16740_vm4, %v8805_v20  ;;  %v8791_v41 = vmul.f32 0.01, %v15678_v59  ;;  %v8792_v57 = vmul.f32 0.01, %v15681_v49  ;;  %v8809_v13 = vsel %vm8745_vm11, %v15636_v27, %v8777_v32  ;;  %v8810_v10 = vsel %vm8746_vm12, %v15639_v35, %v8778_v30  ;;  %vm16745_vm6 = vmmov %vm16741_vm3 }
 0x676   : > { %v8793_v17 = vmul.f32 0.01, %v15684_v47  ;;  %8838 = vst.msk [vmem:[%s15718_s30 + $0x20] sm:$0xff] %vm16741_vm3, %v8806_v24  ;;  %v8794_v54 = vmul.f32 0.01, %v15687_v31  ;;  %vm16744_vm14 = vcmp.gt.f32.partialorder %v15642_v48, 0.0 }
 0x677   : > { %v8795_v58 = vmul.f32 0.01, %v15690_v11  ;;  %v8796_v46 = vmul.f32 0.01, %v15693_v38  ;;  %8839 = vst.msk [vmem:[%s15718_s30 + $0x28] sm:$0xff] %vm16742_vm9, %v8807_v62  ;;  %v8811_v45 = vsel %vm16744_vm14, %v15642_v48, %v8779_v52  ;;  %vm16746_vm11 = vcmp.gt.f32.partialorder %v15645_v6, 0.0  ;;  %vm16750_vm9 = vmmov %vm16741_vm3 }
 0x678   : > { %v8797_v50 = vmul.f32 0.01, %v15696_v8  ;;  %v8798_v34 = vmul.f32 0.01, %v15700_v51  ;;  %v8799_v2 = vmul.f32 0.01, %v15703_v21  ;;  %v8812_v27 = vsel %vm16746_vm11, %v15645_v6, %v8780_v1  ;;  %vm16754_vm11 = vmmov %vm16741_vm3 }
 0x679   : > { %8840 = vst.msk [vmem:[%s15718_s30 + $0x30] sm:$0xff] %vm16743_vm5, %v8808_v18  ;;  %v8800_v14 = vmul.f32 0.01, %v15721_v23  ;;  %v8801_v19 = vmul.f32 0.01, %v15731_v15  ;;  %vm16747_vm15 = vcmp.gt.f32.partialorder %v15648_v44, 0.0  ;;  %v8817_v6 = vsel %vm8753_vm2, %v15660_v39, %v8785_v56 }
 0x67a   : > { %8841 = vst.msk [vmem:[%s15718_s30 + $0x38] sm:$0xff] %vm16745_vm6, %v8809_v13  ;;  %v8813_v28 = vsel %vm16747_vm15, %v15648_v44, %v8781_v53  ;;  %vm16748_vm4 = vcmp.gt.f32.partialorder %v15651_v63, 0.0  ;;  %vm16749_vm12 = vcmp.gt.f32.partialorder %v15654_v22, 0.0  ;;  %vm16751_vm5 = vcmp.gt.f32.partialorder %v15657_v4, 0.0  ;;  %vm16753_vm6 = vmmov %vm16741_vm3 }
 0x67b   : > { %v8814_v16 = vsel %vm16748_vm4, %v15651_v63, %v8782_v5  ;;  %v8815_v35 = vsel %vm16749_vm12, %v15654_v22, %v8783_v0  ;;  %8842 = vst.msk [vmem:[%s15718_s30 + $0x40] sm:$0xff] %vm16741_vm3, %v8810_v10  ;;  %v8816_v48 = vsel %vm16751_vm5, %v15657_v4, %v8784_v36  ;;  %v8818_v44 = vsel %vm8754_vm1, %v15663_v42, %v8786_v61  ;;  %vm16755_vm15 = vmmov %vm16741_vm3 }
 0x67c   : > { %8843 = vst.msk [vmem:[%s15718_s30 + $0x48] sm:$0xff] %vm16750_vm9, %v8811_v45  ;;  %vm16752_vm14 = vcmp.gt.f32.partialorder %v15666_v37, 0.0  ;;  %vm16756_vm4 = vmmov %vm16741_vm3  ;;  %vm16757_vm2 = vcmp.gt.f32.partialorder %v15669_v12, 0.0  ;;  %vm16758_vm1 = vcmp.gt.f32.partialorder %v15672_v3, 0.0  ;;  %vm16759_vm12 = vcmp.gt.f32.partialorder %v15675_v9, 0.0 }
 0x67d   : > { %v8819_v63 = vsel %vm16752_vm14, %v15666_v37, %v8787_v40  ;;  %8844 = vst.msk [vmem:[%s15718_s30 + $0x50] sm:$0xff] %vm16753_vm6, %v8812_v27  ;;  %v8820_v22 = vsel %vm16757_vm2, %v15669_v12, %v8788_v33  ;;  %v8821_v4 = vsel %vm16758_vm1, %v15672_v3, %v8789_v25  ;;  %v8822_v39 = vsel %vm16759_vm12, %v15675_v9, %v8790_v26  ;;  %vm16760_vm9 = vmmov %vm16741_vm3 }
 0x67e   : > { %8845 = vst.msk [vmem:[%s15718_s30 + $0x58] sm:$0xff] %vm16754_vm11, %v8813_v28  ;;  %v8823_v42 = vsel %vm8759_vm13, %v15678_v59, %v8791_v41  ;;  %vm16761_vm5 = vmmov %vm16741_vm3  ;;  %vm16763_vm6 = vcmp.gt.f32.partialorder %v15681_v49, 0.0  ;;  %vm16764_vm11 = vcmp.gt.f32.partialorder %v15684_v47, 0.0  ;;  %vm16765_vm13 = vcmp.gt.f32.partialorder %v15687_v31, 0.0 }
 0x67f   : > { %8846 = vst.msk [vmem:[%s15718_s30 + $0x60] sm:$0xff] %vm16755_vm15, %v8814_v16  ;;  %vm16762_vm14 = vmmov %vm16741_vm3  ;;  %v8824_v37 = vsel %vm16763_vm6, %v15681_v49, %v8792_v57  ;;  %v8825_v12 = vsel %vm16764_vm11, %v15684_v47, %v8793_v17  ;;  %v8826_v3 = vsel %vm16765_vm13, %v15687_v31, %v8794_v54  ;;  %vm16766_vm15 = vcmp.gt.f32.partialorder %v15690_v11, 0.0 }
 0x680   : > { %8847 = vst.msk [vmem:[%s15718_s30 + $0x68] sm:$0xff] %vm16756_vm4, %v8815_v35  ;;  %v8827_v9 = vsel %vm16766_vm15, %v15690_v11, %v8795_v58  ;;  %vm16767_vm4 = vmmov %vm16741_vm3  ;;  %v8828_v59 = vsel %vm8764_vm7, %v15693_v38, %v8796_v46  ;;  %v8829_v49 = vsel %vm8765_vm10, %v15696_v8, %v8797_v50  ;;  %v8832_v11 = vsel %vm8768_vm0, %v15721_v23, %v8800_v14 }
 0x681   : > { %8848 = vst.msk [vmem:[%s15718_s30 + $0x70] sm:$0xff] %vm16741_vm3, %v8816_v48  ;;  %vm16768_vm2 = vmmov %vm16741_vm3  ;;  %vm16771_vm3 = vcmp.gt.f32.partialorder %v15700_v51, 0.0  ;;  %v8833_v38 = vsel %vm8769_vm8, %v15731_v15, %v8801_v19 }
 0x682   : > { %8849 = vst.msk [vmem:[%s15718_s30 + $0x78] sm:$0xff] %vm16760_vm9, %v8817_v6  ;;  %vm16769_vm1 = vmmov %vm16768_vm2  ;;  %v8830_v47 = vsel %vm16771_vm3, %v15700_v51, %v8798_v34  ;;  %vm16772_vm9 = vcmp.gt.f32.partialorder %v15703_v21, 0.0 }
 0x683   : > { %8850 = vst.msk [vmem:[%s15718_s30 + $0x80] sm:$0xff] %vm16761_vm5, %v8818_v44  ;;  %vm16770_vm12 = vmmov %vm16769_vm1  ;;  %v8831_v31 = vsel %vm16772_vm9, %v15703_v21, %v8799_v2 }
 0x684   : > { %8851 = vst.msk [vmem:[%s15718_s30 + $0x88] sm:$0xff] %vm16762_vm14, %v8819_v63  ;;  %vm16773_vm5 = vmmov %vm16769_vm1 }
 0x685   : > { %8852 = vst.msk [vmem:[%s15718_s30 + $0x90] sm:$0xff] %vm16767_vm4, %v8820_v22  ;;  %vm16774_vm14 = vmmov %vm16769_vm1 }
 0x686   : > { %8853 = vst.msk [vmem:[%s15718_s30 + $0x98] sm:$0xff] %vm16768_vm2, %v8821_v4  ;;  %vm16775_vm6 = vmmov %vm16769_vm1 }
 0x687   : > { %8854 = vst.msk [vmem:[%s15718_s30 + $0xa0] sm:$0xff] %vm16769_vm1, %v8822_v39  ;;  %vm16776_vm11 = vmmov %vm16769_vm1 }
 0x688   : > { %8855 = vst.msk [vmem:[%s15718_s30 + $0xa8] sm:$0xff] %vm16770_vm12, %v8823_v42  ;;  %vm16777_vm10 = vmmov %vm16769_vm1 }
 0x689   : > { %8856 = vst.msk [vmem:[%s15718_s30 + $0xb0] sm:$0xff] %vm16773_vm5, %v8824_v37  ;;  %vm16778_vm7 = vmmov %vm16769_vm1 }
 0x68a   : > { %8857 = vst.msk [vmem:[%s15718_s30 + $0xb8] sm:$0xff] %vm16774_vm14, %v8825_v12  ;;  %vm16779_vm13 = vmmov %vm16769_vm1 }
 0x68b   : > { %8858 = vst.msk [vmem:[%s15718_s30 + $0xc0] sm:$0xff] %vm16775_vm6, %v8826_v3  ;;  %vm16780_vm15 = vmmov %vm16769_vm1 }
 0x68c   : > { %8859 = vst.msk [vmem:[%s15718_s30 + $0xc8] sm:$0xff] %vm16776_vm11, %v8827_v9  ;;  %vm16781_vm4 = vmmov %vm16769_vm1 }
 0x68d   : > { %8860 = vst.msk [vmem:[%s15718_s30 + $0xd0] sm:$0xff] %vm16777_vm10, %v8828_v59  ;;  %vm16782_vm2 = vmmov %vm16769_vm1 }
 0x68e   : > { %8861 = vst.msk [vmem:[%s15718_s30 + $0xd8] sm:$0xff] %vm16778_vm7, %v8829_v49 }
 0x68f   : > { %8862 = vst.msk [vmem:[%s15718_s30 + $0xe0] sm:$0xff] %vm16779_vm13, %v8830_v47 }
 0x690   : > { %8863 = vst.msk [vmem:[%s15718_s30 + $0xe8] sm:$0xff] %vm16780_vm15, %v8831_v31 }
 0x691   : > { %8864 = vst.msk [vmem:[%s15718_s30 + $0xf0] sm:$0xff] %vm16781_vm4, %v8832_v11 }
 0x692   : > { %8865 = vst.msk [vmem:[%s15718_s30 + $0xf8] sm:$0xff] %vm16782_vm2, %v8833_v38 }
 0x693 PF: > { %s14_s15 = sadd.s32 1, %s9804_s15  }
 0x694   : > { %p11_p4 = scmp.ge.s32.totalorder %s14_s15, 4  }
 0x696   :  { %13 = sbr.rel (!%p11_p4) target bundleno = 1 (0x1), region = 75 }

</bundles_post_ra>
